<compile_context>
chip_gen: v7x
topology: tpu7x:2x2x1
jax: 0.10.0
libtpu: 0.0.40
codegen_flags: <defaults>
</compile_context>

<pallas_src>
import numpy as np
import jax
import jax.numpy as jnp
from jax.experimental import pallas as pl
from jax.experimental.pallas import tpu as pltpu

EPS = 1e-5
_VMEM_LIMIT = 64 * 1024 * 1024  # cap only; actual usage is far below on v5e/v6e/v7x


# ----------------------------- Pallas kernels -------------------------------

def _ln_kernel(x_ref, g_ref, b_ref, o_ref):
    x = x_ref[...].astype(jnp.float32)
    mu = jnp.mean(x, axis=-1, keepdims=True)
    var = jnp.mean((x - mu) ** 2, axis=-1, keepdims=True)
    y = (x - mu) * jax.lax.rsqrt(var + EPS) * g_ref[...] + b_ref[...]
    o_ref[...] = y.astype(o_ref.dtype)


def layernorm_pallas(x_tok, gamma_1c, beta_1c, tn):
    Np, C = x_tok.shape
    return pl.pallas_call(
        _ln_kernel,
        out_shape=jax.ShapeDtypeStruct((Np, C), jnp.bfloat16),
        grid=(Np // tn,),
        in_specs=[
            pl.BlockSpec((tn, C), lambda i: (i, 0)),
            pl.BlockSpec((1, C), lambda i: (0, 0)),
            pl.BlockSpec((1, C), lambda i: (0, 0)),
        ],
        out_specs=pl.BlockSpec((tn, C), lambda i: (i, 0)),
        compiler_params=pltpu.CompilerParams(
            dimension_semantics=("parallel",),
            vmem_limit_bytes=_VMEM_LIMIT),
    )(x_tok, gamma_1c, beta_1c)


def _block_kernel(x_in_ref, xs_ref, wcomb_ref, bcomb_ref,
                  g2_ref, be2_ref, wm1_ref, bm1_ref, wm2_ref, bm2_ref, o_ref):
    f32, bf16 = jnp.float32, jnp.bfloat16
    # Three CycleFC layers + Spatial_Proj.fc_1 collapse (exactly, all linear) into one
    # stacked matmul against the precomposed (3C, C) weight; add the Cycle_Block residual.
    u = (jnp.dot(xs_ref[...], wcomb_ref[...], preferred_element_type=f32)
         + bcomb_ref[...] + x_in_ref[...].astype(f32))
    # MLP_Block: LayerNorm (f32 stats) -> fc1 -> GELU -> fc2 -> residual.
    mu = jnp.mean(u, axis=-1, keepdims=True)
    var = jnp.mean((u - mu) ** 2, axis=-1, keepdims=True)
    v = (u - mu) * jax.lax.rsqrt(var + EPS) * g2_ref[...] + be2_ref[...]
    h = jnp.dot(v.astype(bf16), wm1_ref[...], preferred_element_type=f32) + bm1_ref[...]
    # tanh-GELU keeps v5e's single (no-bf16) EUP off the critical slot; error << tolerance.
    h = jax.nn.gelu(h, approximate=True)
    o_ref[...] = (jnp.dot(h.astype(bf16), wm2_ref[...], preferred_element_type=f32)
                  + bm2_ref[...] + u).astype(o_ref.dtype)


def block_pallas(x_tok_bf16, xs_cat_bf16, prep, tn):
    Np, C = x_tok_bf16.shape
    C3 = xs_cat_bf16.shape[1]
    Hd = prep["wm1"].shape[1]

    tok = lambda shape: pl.BlockSpec(shape, lambda i: (i, 0))
    # Constant index_map -> the pipeline fetches these weight blocks only once.
    # NOTE(v7x): at production channel counts add pipeline_mode=pl.Buffered(1) to these
    # specs to single-buffer the weight set against the 64 MiB/TC VMEM budget.
    rep = lambda shape: pl.BlockSpec(shape, lambda i: (0, 0))

    return pl.pallas_call(
        _block_kernel,
        out_shape=jax.ShapeDtypeStruct((Np, C), jnp.bfloat16),
        grid=(Np // tn,),
        in_specs=[
            tok((tn, C)),                 # residual stream, bf16
            tok((tn, C3)),                # concatenated shifted activations, bf16
            rep((C3, C)), rep((1, C)),    # precomposed CycleFC∘fc_1 weight / bias
            rep((1, C)), rep((1, C)),     # ln2 gamma / beta
            rep((C, Hd)), rep((1, Hd)),   # wm1, bm1
            rep((Hd, C)), rep((1, C)),    # wm2, bm2
        ],
        out_specs=pl.BlockSpec((tn, C), lambda i: (i, 0)),
        compiler_params=pltpu.CompilerParams(
            dimension_semantics=("parallel",),
            vmem_limit_bytes=_VMEM_LIMIT),
    )(x_tok_bf16, xs_cat_bf16,
      prep["wcomb"], prep["bcomb"], prep["ln2_g"], prep["ln2_b"],
      prep["wm1"], prep["bm1"], prep["wm2"], prep["bm2"])


# ------------------------------ weight prep ----------------------------------

def prepare_params(p):
    """One-time weight preprocessing (hoisted out of the per-call path).

    * A static channel permutation grouping the c%7 offset classes contiguously is
      folded into the CycleFC weight rows, so the activation-side shifts become plain
      uniform rolls of contiguous channel slabs (zero runtime cost on the weight side).
    * The stacked (3C, C) CycleFC weight is composed with Spatial_Proj.fc_1 in f32
      (exact: no nonlinearity in between), removing one matmul from the hot kernel.
    """
    f32, bf16 = jnp.float32, jnp.bfloat16
    C = p["w1"].shape[0]
    Hd = p["wm1"].shape[1]
    perm = np.concatenate([np.arange(g, C, 7) for g in range(min(7, C))])

    wstack = jnp.concatenate([p["w1"][perm], p["w2"], p["w3"][perm]], axis=0).astype(f32)
    wfc = p["wfc"].astype(f32)
    bsum = (p["b1"] + p["b2"] + p["b3"]).astype(f32)

    return {
        "ln1_g": p["ln1_g"].astype(f32).reshape(1, C),
        "ln1_b": p["ln1_b"].astype(f32).reshape(1, C),
        "wcomb": (wstack @ wfc).astype(bf16),                         # (3C, C)
        "bcomb": (bsum @ wfc + p["bfc"].astype(f32)).reshape(1, C),
        "ln2_g": p["ln2_g"].astype(f32).reshape(1, C),
        "ln2_b": p["ln2_b"].astype(f32).reshape(1, C),
        "wm1": p["wm1"].astype(bf16),
        "bm1": p["bm1"].astype(f32).reshape(1, Hd),
        "wm2": p["wm2"].astype(bf16),
        "bm2": p["bm2"].astype(f32).reshape(1, C),
    }


# ------------------------------ JAX glue --------------------------------------

def _pick_tn(n_tok, max_tn=512):
    """Largest tile (multiple of 8) <= max_tn that divides n_tok (=> zero padded-token
    work); fall back to 256-row tiles with padding only if no usable divisor exists."""
    hi = min(n_tok, max_tn)
    hi -= hi % 8
    for t in range(hi, 7, -8):
        if n_tok % t == 0:
            return t
    return min(256, max_tn)


def cyclemlp_block_forward(x_nchw, prep, max_tn=512):
    B, C, H, W = x_nchw.shape
    N = B * H * W
    bf16 = jnp.bfloat16

    # Tokens-major bf16 activation stream: single f32->bf16 cast at the top.
    x_tok = jnp.transpose(x_nchw.astype(bf16), (0, 2, 3, 1)).reshape(N, C)

    tn = _pick_tn(N, max_tn)
    n_pad = pl.cdiv(N, tn) * tn          # == N whenever a dividing tile exists (it does here)

    def pad(a):
        return a if n_pad == N else jnp.pad(a, ((0, n_pad - N), (0, 0)))

    # Kernel 1: Cycle_Block pre-norm.
    xn = layernorm_pallas(pad(x_tok), prep["ln1_g"], prep["ln1_b"], tn)[:N]
    xn = xn.reshape(B, H, W, C)

    # Glue: the three CycleFC shift patterns as 15 uniform rolls of contiguous c%7
    # channel groups (channel permutation is folded into prep["wcomb"] row order).
    # Offsets: di = c % sh - 1, dj = (c // sh) % sw - 1  ->  roll shift = (-di, -dj).
    ngrp = min(7, C)
    xs1 = jnp.concatenate(
        [jnp.roll(xn[..., g::7], shift=(1, 1 - g), axis=(1, 2)) for g in range(ngrp)],
        axis=-1)                                           # (sh, sw) = (1, 7)
    xs2 = jnp.roll(xn, shift=(1, 1), axis=(1, 2))          # (sh, sw) = (1, 1)
    xs3 = jnp.concatenate(
        [jnp.roll(xn[..., g::7], shift=(1 - g, 1), axis=(1, 2)) for g in range(ngrp)],
        axis=-1)                                           # (sh, sw) = (7, 1)
    xs_cat = jnp.concatenate([xs1, xs2, xs3], axis=-1).reshape(N, 3 * C)

    # Kernel 2: fused (stacked CycleFC ∘ fc_1) + residual + LN + MLP + residual.
    out = block_pallas(pad(x_tok), pad(xs_cat), prep, tn)[:N]
    # Follow-up (not required for correctness): fuse LN + shifts + block into one kernel
    # with halo'd token windows and in-VMEM pltpu.roll so xs_cat never touches HBM.
    return jnp.transpose(out.reshape(B, H, W, C), (0, 3, 1, 2)).astype(jnp.float32)


# --------------------------- Pure-JAX reference -------------------------------

def _cycle_shift_ref(x_nhwc, sh, sw):
    """Slow per-channel roll reference (independent of the fused perm/roll trick)."""
    B, H, W, C = x_nhwc.shape
    chans = []
    for c in range(C):
        di = c % sh - 1
        dj = (c // sh) % sw - 1
        chans.append(jnp.roll(x_nhwc[..., c], shift=(-di, -dj), axis=(1, 2)))
    return jnp.stack(chans, axis=-1)


def ref_forward(x_nchw, p):
    f32, bf16 = jnp.float32, jnp.bfloat16
    x = jnp.transpose(x_nchw, (0, 2, 3, 1)).astype(f32)

    def ln(t, g, b):
        mu = jnp.mean(t, -1, keepdims=True)
        var = jnp.mean((t - mu) ** 2, -1, keepdims=True)
        return (t - mu) * jax.lax.rsqrt(var + EPS) * g + b

    def mm(a, w):  # bf16-in / f32-accumulate, un-composed (independent of kernel tricks)
        return jnp.dot(a.astype(bf16), w.astype(bf16), preferred_element_type=f32)

    xn = ln(x, p["ln1_g"], p["ln1_b"]).astype(bf16).astype(f32)
    xs1 = _cycle_shift_ref(xn, 1, 7)
    xs2 = _cycle_shift_ref(xn, 1, 1)
    xs3 = _cycle_shift_ref(xn, 7, 1)
    s = (mm(xs1, p["w1"]) + mm(xs2, p["w2"]) + mm(xs3, p["w3"])
         + p["b1"] + p["b2"] + p["b3"])
    u = mm(s, p["wfc"]) + p["bfc"] + x
    v = ln(u, p["ln2_g"], p["ln2_b"])
    h = jax.nn.gelu(mm(v, p["wm1"]) + p["bm1"], approximate=False)
    out = mm(h, p["wm2"]) + p["bm2"] + u
    return jnp.transpose(out, (0, 3, 1, 2))


# --------------------------------- main ---------------------------------------

if __name__ == "__main__":
    # Lane-dense channel dim (C multiple of 128); N = 4*14*14 = 784 -> tn = 392, grid=(2,)
    # (no padded tokens, even split across v7x TensorCores).
    B, C, H, W = 4, 128, 14, 14
    Hd = 4 * C

    key = jax.random.PRNGKey(0)
    ks = jax.random.split(key, 17)
    p = {
        "ln1_g": jax.random.normal(ks[0], (C,), jnp.float32),
        "ln1_b": jax.random.normal(ks[1], (C,), jnp.float32),
        "w1":    jax.random.normal(ks[2], (C, C), jnp.float32),
        "b1":    jax.random.normal(ks[3], (C,), jnp.float32),
        "w2":    jax.random.normal(ks[4], (C, C), jnp.float32),
        "b2":    jax.random.normal(ks[5], (C,), jnp.float32),
        "w3":    jax.random.normal(ks[6], (C, C), jnp.float32),
        "b3":    jax.random.normal(ks[7], (C,), jnp.float32),
        "wfc":   jax.random.normal(ks[8], (C, C), jnp.float32) * 0.1,
        "bfc":   jax.random.normal(ks[9], (C,), jnp.float32),
        "ln2_g": jax.random.normal(ks[10], (C,), jnp.float32),
        "ln2_b": jax.random.normal(ks[11], (C,), jnp.float32),
        "wm1":   jax.random.normal(ks[12], (C, Hd), jnp.float32) * 0.1,
        "bm1":   jax.random.normal(ks[13], (Hd,), jnp.float32),
        "wm2":   jax.random.normal(ks[14], (Hd, C), jnp.float32) * 0.1,
        "bm2":   jax.random.normal(ks[15], (C,), jnp.float32),
    }

    x = jax.random.normal(ks[16], (B, C, H, W), jnp.float32)

    prep = prepare_params(p)   # one-time weight prep, hoisted out of the per-call path
    fwd = jax.jit(lambda xx: cyclemlp_block_forward(xx, prep))
    out = jax.block_until_ready(fwd(x))
    ref = jax.block_until_ready(ref_forward(x, p))

    assert out.shape == (B, C, H, W)
    err = float(jnp.max(jnp.abs(out - ref)) / (jnp.max(jnp.abs(ref)) + 1e-6))
    assert err < 3e-2, err
    print("KERNEL_OK")
</pallas_src>

<mosaic_0001>
module attributes {stable_mosaic.version = 11 : i64} {
  func.func @_ln_kernel(%arg0: i32, %arg1: memref<392x128xbf16, #tpu.memory_space<vmem>>, %arg2: memref<1x128xf32, #tpu.memory_space<vmem>>, %arg3: memref<1x128xf32, #tpu.memory_space<vmem>>, %arg4: memref<392x128xbf16, #tpu.memory_space<vmem>>) attributes {dimension_semantics = [#tpu.dimension_semantics<parallel>], iteration_bounds = array<i64: 2>, scalar_prefetch = 0 : i64, scratch_operands = 0 : i64, tpu.core_type = #tpu.core_type<tc>, window_params = [{transform_indices = @transform_0, window_bounds = array<i64: 392, 128>}, {pipeline_mode = #tpu.pipeline_mode<synchronous>, transform_indices = @transform_1, window_bounds = array<i64: 1, 128>}, {pipeline_mode = #tpu.pipeline_mode<synchronous>, transform_indices = @transform_2, window_bounds = array<i64: 1, 128>}, {transform_indices = @transform_3, window_bounds = array<i64: 392, 128>}]} {
    %c0 = arith.constant 0 : index
    %c0_0 = arith.constant 0 : index
    %0 = vector.load %arg1[%c0, %c0_0] : memref<392x128xbf16, #tpu.memory_space<vmem>>, vector<392x128xbf16>
    %1 = arith.extf %0 : vector<392x128xbf16> to vector<392x128xf32>
    %cst = arith.constant dense<0.000000e+00> : vector<392xf32>
    %2 = vector.multi_reduction <add>, %1, %cst [1] : vector<392x128xf32> to vector<392xf32>
    %3 = vector.shape_cast %2 : vector<392xf32> to vector<392x1xf32>
    %cst_1 = arith.constant 1.280000e+02 : f32
    %4 = vector.broadcast %cst_1 : f32 to vector<392x1xf32>
    %5 = arith.divf %3, %4 : vector<392x1xf32>
    %6 = vector.broadcast %5 : vector<392x1xf32> to vector<392x128xf32>
    %7 = arith.subf %1, %6 : vector<392x128xf32>
    %8 = arith.mulf %7, %7 : vector<392x128xf32>
    %cst_2 = arith.constant dense<0.000000e+00> : vector<392xf32>
    %9 = vector.multi_reduction <add>, %8, %cst_2 [1] : vector<392x128xf32> to vector<392xf32>
    %10 = vector.shape_cast %9 : vector<392xf32> to vector<392x1xf32>
    %cst_3 = arith.constant 1.280000e+02 : f32
    %11 = vector.broadcast %cst_3 : f32 to vector<392x1xf32>
    %12 = arith.divf %10, %11 : vector<392x1xf32>
    %13 = vector.broadcast %5 : vector<392x1xf32> to vector<392x128xf32>
    %14 = arith.subf %1, %13 : vector<392x128xf32>
    %cst_4 = arith.constant 9.99999974E-6 : f32
    %15 = vector.broadcast %cst_4 : f32 to vector<392x1xf32>
    %16 = arith.addf %12, %15 : vector<392x1xf32>
    %17 = math.rsqrt %16 : vector<392x1xf32>
    %18 = vector.broadcast %17 : vector<392x1xf32> to vector<392x128xf32>
    %19 = arith.mulf %14, %18 : vector<392x128xf32>
    %c0_5 = arith.constant 0 : index
    %c0_6 = arith.constant 0 : index
    %20 = vector.load %arg2[%c0_5, %c0_6] : memref<1x128xf32, #tpu.memory_space<vmem>>, vector<1x128xf32>
    %21 = vector.broadcast %20 : vector<1x128xf32> to vector<392x128xf32>
    %22 = arith.mulf %19, %21 : vector<392x128xf32>
    %c0_7 = arith.constant 0 : index
    %c0_8 = arith.constant 0 : index
    %23 = vector.load %arg3[%c0_7, %c0_8] : memref<1x128xf32, #tpu.memory_space<vmem>>, vector<1x128xf32>
    %24 = vector.broadcast %23 : vector<1x128xf32> to vector<392x128xf32>
    %25 = arith.addf %22, %24 : vector<392x128xf32>
    %26 = arith.truncf %25 : vector<392x128xf32> to vector<392x128xbf16>
    %c0_9 = arith.constant 0 : index
    %c0_10 = arith.constant 0 : index
    %27 = vector.load %arg4[%c0_9, %c0_10] : memref<392x128xbf16, #tpu.memory_space<vmem>>, vector<392x128xbf16>
    tpu.vector_store %arg4[%c0_9, %c0_10], %26 {strides = array<i32>} : memref<392x128xbf16, #tpu.memory_space<vmem>>, vector<392x128xbf16>,
    return
  }
  func.func @transform_0(%arg0: i32) -> (i32, i32) {
    %c0_i32 = arith.constant 0 : i32
    %c0_i32_0 = arith.constant 0 : i32
    return %arg0, %c0_i32 : i32, i32
  }
  func.func @transform_1(%arg0: i32) -> (i32, i32) {
    %c0_i32 = arith.constant 0 : i32
    %c0_i32_0 = arith.constant 0 : i32
    %c0_i32_1 = arith.constant 0 : i32
    return %c0_i32, %c0_i32_0 : i32, i32
  }
  func.func @transform_2(%arg0: i32) -> (i32, i32) {
    %c0_i32 = arith.constant 0 : i32
    %c0_i32_0 = arith.constant 0 : i32
    %c0_i32_1 = arith.constant 0 : i32
    return %c0_i32, %c0_i32_0 : i32, i32
  }
  func.func @transform_3(%arg0: i32) -> (i32, i32) {
    %c0_i32 = arith.constant 0 : i32
    %c0_i32_0 = arith.constant 0 : i32
    return %arg0, %c0_i32 : i32, i32
  }
}

module attributes {stable_mosaic.version = 11 : i64} {
  func.func @_block_kernel(%arg0: i32, %arg1: memref<392x128xbf16, #tpu.memory_space<vmem>>, %arg2: memref<392x384xbf16, #tpu.memory_space<vmem>>, %arg3: memref<384x128xbf16, #tpu.memory_space<vmem>>, %arg4: memref<1x128xf32, #tpu.memory_space<vmem>>, %arg5: memref<1x128xf32, #tpu.memory_space<vmem>>, %arg6: memref<1x128xf32, #tpu.memory_space<vmem>>, %arg7: memref<128x512xbf16, #tpu.memory_space<vmem>>, %arg8: memref<1x512xf32, #tpu.memory_space<vmem>>, %arg9: memref<512x128xbf16, #tpu.memory_space<vmem>>, %arg10: memref<1x128xf32, #tpu.memory_space<vmem>>, %arg11: memref<392x128xbf16, #tpu.memory_space<vmem>>) attributes {dimension_semantics = [#tpu.dimension_semantics<parallel>], iteration_bounds = array<i64: 2>, scalar_prefetch = 0 : i64, scratch_operands = 0 : i64, tpu.core_type = #tpu.core_type<tc>, window_params = [{transform_indices = @transform_0, window_bounds = array<i64: 392, 128>}, {transform_indices = @transform_1, window_bounds = array<i64: 392, 384>}, {pipeline_mode = #tpu.pipeline_mode<synchronous>, transform_indices = @transform_2, window_bounds = array<i64: 384, 128>}, {pipeline_mode = #tpu.pipeline_mode<synchronous>, transform_indices = @transform_3, window_bounds = array<i64: 1, 128>}, {pipeline_mode = #tpu.pipeline_mode<synchronous>, transform_indices = @transform_4, window_bounds = array<i64: 1, 128>}, {pipeline_mode = #tpu.pipeline_mode<synchronous>, transform_indices = @transform_5, window_bounds = array<i64: 1, 128>}, {pipeline_mode = #tpu.pipeline_mode<synchronous>, transform_indices = @transform_6, window_bounds = array<i64: 128, 512>}, {pipeline_mode = #tpu.pipeline_mode<synchronous>, transform_indices = @transform_7, window_bounds = array<i64: 1, 512>}, {pipeline_mode = #tpu.pipeline_mode<synchronous>, transform_indices = @transform_8, window_bounds = array<i64: 512, 128>}, {pipeline_mode = #tpu.pipeline_mode<synchronous>, transform_indices = @transform_9, window_bounds = array<i64: 1, 128>}, {transform_indices = @transform_10, window_bounds = array<i64: 392, 128>}]} {
    %c0 = arith.constant 0 : index
    %c0_0 = arith.constant 0 : index
    %0 = vector.load %arg2[%c0, %c0_0] : memref<392x384xbf16, #tpu.memory_space<vmem>>, vector<392x384xbf16>
    %c0_1 = arith.constant 0 : index
    %c0_2 = arith.constant 0 : index
    %1 = vector.load %arg3[%c0_1, %c0_2] : memref<384x128xbf16, #tpu.memory_space<vmem>>, vector<384x128xbf16>
    %cst = arith.constant dense<0.000000e+00> : vector<392x128xf32>
    %2 = tpu.matmul %0, %1, %cst {dimension_numbers = #tpu.dot_dimension_numbers<[1], [0], [0], [1], [0, 0, 1, 1], [], []>} : vector<392x384xbf16>, vector<384x128xbf16>, vector<392x128xf32> -> vector<392x128xf32>
    %c0_3 = arith.constant 0 : index
    %c0_4 = arith.constant 0 : index
    %3 = vector.load %arg4[%c0_3, %c0_4] : memref<1x128xf32, #tpu.memory_space<vmem>>, vector<1x128xf32>
    %4 = vector.broadcast %3 : vector<1x128xf32> to vector<392x128xf32>
    %5 = arith.addf %2, %4 : vector<392x128xf32>
    %c0_5 = arith.constant 0 : index
    %c0_6 = arith.constant 0 : index
    %6 = vector.load %arg1[%c0_5, %c0_6] : memref<392x128xbf16, #tpu.memory_space<vmem>>, vector<392x128xbf16>
    %7 = arith.extf %6 : vector<392x128xbf16> to vector<392x128xf32>
    %8 = arith.addf %5, %7 : vector<392x128xf32>
    %cst_7 = arith.constant dense<0.000000e+00> : vector<392xf32>
    %9 = vector.multi_reduction <add>, %8, %cst_7 [1] : vector<392x128xf32> to vector<392xf32>
    %10 = vector.shape_cast %9 : vector<392xf32> to vector<392x1xf32>
    %cst_8 = arith.constant 1.280000e+02 : f32
    %11 = vector.broadcast %cst_8 : f32 to vector<392x1xf32>
    %12 = arith.divf %10, %11 : vector<392x1xf32>
    %13 = vector.broadcast %12 : vector<392x1xf32> to vector<392x128xf32>
    %14 = arith.subf %8, %13 : vector<392x128xf32>
    %15 = arith.mulf %14, %14 : vector<392x128xf32>
    %cst_9 = arith.constant dense<0.000000e+00> : vector<392xf32>
    %16 = vector.multi_reduction <add>, %15, %cst_9 [1] : vector<392x128xf32> to vector<392xf32>
    %17 = vector.shape_cast %16 : vector<392xf32> to vector<392x1xf32>
    %cst_10 = arith.constant 1.280000e+02 : f32
    %18 = vector.broadcast %cst_10 : f32 to vector<392x1xf32>
    %19 = arith.divf %17, %18 : vector<392x1xf32>
    %20 = vector.broadcast %12 : vector<392x1xf32> to vector<392x128xf32>
    %21 = arith.subf %8, %20 : vector<392x128xf32>
    %cst_11 = arith.constant 9.99999974E-6 : f32
    %22 = vector.broadcast %cst_11 : f32 to vector<392x1xf32>
    %23 = arith.addf %19, %22 : vector<392x1xf32>
    %24 = math.rsqrt %23 : vector<392x1xf32>
    %25 = vector.broadcast %24 : vector<392x1xf32> to vector<392x128xf32>
    %26 = arith.mulf %21, %25 : vector<392x128xf32>
    %c0_12 = arith.constant 0 : index
    %c0_13 = arith.constant 0 : index
    %27 = vector.load %arg5[%c0_12, %c0_13] : memref<1x128xf32, #tpu.memory_space<vmem>>, vector<1x128xf32>
    %28 = vector.broadcast %27 : vector<1x128xf32> to vector<392x128xf32>
    %29 = arith.mulf %26, %28 : vector<392x128xf32>
    %c0_14 = arith.constant 0 : index
    %c0_15 = arith.constant 0 : index
    %30 = vector.load %arg6[%c0_14, %c0_15] : memref<1x128xf32, #tpu.memory_space<vmem>>, vector<1x128xf32>
    %31 = vector.broadcast %30 : vector<1x128xf32> to vector<392x128xf32>
    %32 = arith.addf %29, %31 : vector<392x128xf32>
    %33 = arith.truncf %32 : vector<392x128xf32> to vector<392x128xbf16>
    %c0_16 = arith.constant 0 : index
    %c0_17 = arith.constant 0 : index
    %34 = vector.load %arg7[%c0_16, %c0_17] : memref<128x512xbf16, #tpu.memory_space<vmem>>, vector<128x512xbf16>
    %cst_18 = arith.constant dense<0.000000e+00> : vector<392x512xf32>
    %35 = tpu.matmul %33, %34, %cst_18 {dimension_numbers = #tpu.dot_dimension_numbers<[1], [0], [0], [1], [0, 0, 1, 1], [], []>} : vector<392x128xbf16>, vector<128x512xbf16>, vector<392x512xf32> -> vector<392x512xf32>
    %c0_19 = arith.constant 0 : index
    %c0_20 = arith.constant 0 : index
    %36 = vector.load %arg8[%c0_19, %c0_20] : memref<1x512xf32, #tpu.memory_space<vmem>>, vector<1x512xf32>
    %37 = vector.broadcast %36 : vector<1x512xf32> to vector<392x512xf32>
    %38 = arith.addf %35, %37 : vector<392x512xf32>
    %39 = arith.mulf %38, %38 : vector<392x512xf32>
    %40 = arith.mulf %38, %39 : vector<392x512xf32>
    %cst_21 = arith.constant 4.471500e-02 : f32
    %41 = vector.broadcast %cst_21 : f32 to vector<392x512xf32>
    %42 = arith.mulf %41, %40 : vector<392x512xf32>
    %43 = arith.addf %38, %42 : vector<392x512xf32>
    %cst_22 = arith.constant 0.797884583 : f32
    %44 = vector.broadcast %cst_22 : f32 to vector<392x512xf32>
    %45 = arith.mulf %44, %43 : vector<392x512xf32>
    %46 = math.tanh %45 : vector<392x512xf32>
    %cst_23 = arith.constant 1.000000e+00 : f32
    %47 = vector.broadcast %cst_23 : f32 to vector<392x512xf32>
    %48 = arith.addf %47, %46 : vector<392x512xf32>
    %cst_24 = arith.constant 5.000000e-01 : f32
    %49 = vector.broadcast %cst_24 : f32 to vector<392x512xf32>
    %50 = arith.mulf %49, %48 : vector<392x512xf32>
    %51 = arith.mulf %38, %50 : vector<392x512xf32>
    %52 = arith.truncf %51 : vector<392x512xf32> to vector<392x512xbf16>
    %c0_25 = arith.constant 0 : index
    %c0_26 = arith.constant 0 : index
    %53 = vector.load %arg9[%c0_25, %c0_26] : memref<512x128xbf16, #tpu.memory_space<vmem>>, vector<512x128xbf16>
    %cst_27 = arith.constant dense<0.000000e+00> : vector<392x128xf32>
    %54 = tpu.matmul %52, %53, %cst_27 {dimension_numbers = #tpu.dot_dimension_numbers<[1], [0], [0], [1], [0, 0, 1, 1], [], []>} : vector<392x512xbf16>, vector<512x128xbf16>, vector<392x128xf32> -> vector<392x128xf32>
    %c0_28 = arith.constant 0 : index
    %c0_29 = arith.constant 0 : index
    %55 = vector.load %arg10[%c0_28, %c0_29] : memref<1x128xf32, #tpu.memory_space<vmem>>, vector<1x128xf32>
    %56 = vector.broadcast %55 : vector<1x128xf32> to vector<392x128xf32>
    %57 = arith.addf %54, %56 : vector<392x128xf32>
    %58 = arith.addf %57, %8 : vector<392x128xf32>
    %59 = arith.truncf %58 : vector<392x128xf32> to vector<392x128xbf16>
    %c0_30 = arith.constant 0 : index
    %c0_31 = arith.constant 0 : index
    %60 = vector.load %arg11[%c0_30, %c0_31] : memref<392x128xbf16, #tpu.memory_space<vmem>>, vector<392x128xbf16>
    tpu.vector_store %arg11[%c0_30, %c0_31], %59 {strides = array<i32>} : memref<392x128xbf16, #tpu.memory_space<vmem>>, vector<392x128xbf16>,
    return
  }
  func.func @transform_0(%arg0: i32) -> (i32, i32) {
    %c0_i32 = arith.constant 0 : i32
    %c0_i32_0 = arith.constant 0 : i32
    return %arg0, %c0_i32 : i32, i32
  }
  func.func @transform_1(%arg0: i32) -> (i32, i32) {
    %c0_i32 = arith.constant 0 : i32
    %c0_i32_0 = arith.constant 0 : i32
    return %arg0, %c0_i32 : i32, i32
  }
  func.func @transform_2(%arg0: i32) -> (i32, i32) {
    %c0_i32 = arith.constant 0 : i32
    %c0_i32_0 = arith.constant 0 : i32
    %c0_i32_1 = arith.constant 0 : i32
    return %c0_i32, %c0_i32_0 : i32, i32
  }
  func.func @transform_3(%arg0: i32) -> (i32, i32) {
    %c0_i32 = arith.constant 0 : i32
    %c0_i32_0 = arith.constant 0 : i32
    %c0_i32_1 = arith.constant 0 : i32
    return %c0_i32, %c0_i32_0 : i32, i32
  }
  func.func @transform_4(%arg0: i32) -> (i32, i32) {
    %c0_i32 = arith.constant 0 : i32
    %c0_i32_0 = arith.constant 0 : i32
    %c0_i32_1 = arith.constant 0 : i32
    return %c0_i32, %c0_i32_0 : i32, i32
  }
  func.func @transform_5(%arg0: i32) -> (i32, i32) {
    %c0_i32 = arith.constant 0 : i32
    %c0_i32_0 = arith.constant 0 : i32
    %c0_i32_1 = arith.constant 0 : i32
    return %c0_i32, %c0_i32_0 : i32, i32
  }
  func.func @transform_6(%arg0: i32) -> (i32, i32) {
    %c0_i32 = arith.constant 0 : i32
    %c0_i32_0 = arith.constant 0 : i32
    %c0_i32_1 = arith.constant 0 : i32
    return %c0_i32, %c0_i32_0 : i32, i32
  }
  func.func @transform_7(%arg0: i32) -> (i32, i32) {
    %c0_i32 = arith.constant 0 : i32
    %c0_i32_0 = arith.constant 0 : i32
    %c0_i32_1 = arith.constant 0 : i32
    return %c0_i32, %c0_i32_0 : i32, i32
  }
  func.func @transform_8(%arg0: i32) -> (i32, i32) {
    %c0_i32 = arith.constant 0 : i32
    %c0_i32_0 = arith.constant 0 : i32
    %c0_i32_1 = arith.constant 0 : i32
    return %c0_i32, %c0_i32_0 : i32, i32
  }
  func.func @transform_9(%arg0: i32) -> (i32, i32) {
    %c0_i32 = arith.constant 0 : i32
    %c0_i32_0 = arith.constant 0 : i32
    %c0_i32_1 = arith.constant 0 : i32
    return %c0_i32, %c0_i32_0 : i32, i32
  }
  func.func @transform_10(%arg0: i32) -> (i32, i32) {
    %c0_i32 = arith.constant 0 : i32
    %c0_i32_0 = arith.constant 0 : i32
    return %arg0, %c0_i32 : i32, i32
  }
}

</mosaic_0001>

<bundles_post_ra>
// kernel: _lambda_.2
= control target key start
LH: loop header
LB: loop body
LE: loop exit
PB: predicated region body
PF: predicated region fallthrough
CT: control target
= control target key end

     0   :  { %8 = vsyncpa [#allocation3], 0  ;;  %s2984_s0 = inlined_call_operand.hbm [shape: bf16[784,128], index: 0, kind: input, shape index: {}]   ;;  %s2985_s1 = inlined_call_operand.hbm [shape: f32[1,128], index: 1, kind: input, shape index: {}]   ;;  %s2986_s2 = inlined_call_operand.hbm [shape: f32[1,128], index: 2, kind: input, shape index: {}]   ;;  %s2987_s3 = inlined_call_operand.hbm [shape: bf16[784,128], index: 3, kind: output, shape index: {}]  }
   0x1   :  { %10 = vsyncpa [#allocation3 + $0x1], 0 }
   0x2   :  { %11 = vsyncpa [#allocation6], 0 }
   0x3   :  { %12 = vsyncpa [#allocation4], 0 }
   0x4   :  { %14 = vsyncpa [#allocation4 + $0x1], 0  ;;  %s2051_s12 = smov 0   ;;  %s2053_s13 = smov 0  }
   0x5   :  { %s2055_s14 = smov 0   ;;  %s2057_s15 = smov 0  }
   0x6 LB: > { %s2072_s16 = sadd.s32 4294967295, %s2021_s15   ;;  %s1318_s17 = sadd.s32 4294967294, %s2021_s15   ;;  %s2021_s15 = sphi %s2057_s15, %s3071_s15   ;;  %s2017_s14 = sphi %s2055_s14, %s3070_s14   ;;  %s2013_s13 = sphi %s2053_s13, %s3069_s13   ;;  %s2009_s12 = sphi %s2051_s12, %s3068_s12  }
   0x7   : > { %s2076_s18 = sadd.s32 1, %s2021_s15   ;;  %s27_s19 = sadd.s32 1, %s2017_s14 }
   0x8   : > { %s24_s20 = ssub.s32 %s2021_s15, %s2076_s18  ;;  %p34_p0 = scmp.ne.s32.totalorder %s2017_s14, %s2013_s13 }
   0x9   : > { %p25_p1 = scmp.eq.s32.totalorder %s24_s20, 0  ;;  %p35_p2 = scmp.eq.s32.totalorder %s2021_s15, 0 }
   0xa   : > { %p40_p3 = scmp.ne.s32.totalorder %s2013_s13, %s2009_s12  ;;  %p2988_p4 = scmp.eq.s32.totalorder %s2072_s16, 0 }
   0xb   : > { %s2088_s21 = scalar_select %p25_p1, %s2017_s14, %s27_s19  }
   0xc   : > { %p2090_p5 = por %p35_p2, %p34_p0  ;;  %p2096_p6 = por %p2988_p4, %p40_p3 }
   0xd   : > { %p106_p7 = scmp.eq.s32.totalorder %s2072_s16, 1  ;;  %p112_p8 = scmp.eq.s32.totalorder %s1318_s17, 1 }
   0xe   : > { %s3021_s23 = scalar_select %p2096_p6, 1, 0 }
   0xf   : > { %p1319_p9 = scmp.ge.s32.totalorder %s2021_s15, 1  ;;  %p119_p10 = scmp.lt.s32.totalorder %s2021_s15, 3 }
  0x10   : > { %p2103_p11 = por %p106_p7, %p34_p0  ;;  %p2107_p12 = por %p112_p8, %p40_p3 }
  0x11   : > { %p2111_p13 = pnand %p1319_p9, %p119_p10  ;;  %s2023_s27 = smov [#allocation5]  }
  0x12   : > { %s3022_s24 = scalar_select %p2103_p11, 1, 0 }
  0x13   : > { %s3023_s25 = scalar_select %p2107_p12, 1, 0 }
  0x14   : > { %s3024_s26 = scalar_select %p2111_p13, 1, 0 }
  0x15   : > { %p1708_p2 = pneg %p2111_p13  ;;  %s132_s28 = sshll.u32 %s2023_s27, 4  ;;  %s133_s28 = int_to_ptr.vmem [resolvable:$true] %s132_s28 }
  0x16   : > { %p1725_p4 = scmp.lt.s32.totalorder %s2021_s15, 2  ;;  %p3025_p0 = scmp.eq.s32.totalorder %s2072_s16, 0 }
  0x17   : > { %s2024_s4 = smov [#allocation7]   ;;  %s1865_s8 = scalar_lea.hbm %s2985_s1, 16 }
  0x18   : > { %p2121_p7 = pnand %p1708_p2, %p3025_p0  ;;  %p2127_p3 = pnand %p1725_p4, %p2090_p5 }
  0x19   : > { %s143_s5 = sshll.u32 %s2024_s4, 4  ;;  %p1866_p8 = scmp.ne.s32.totalorder %s2985_s1, %s1865_s8  ;;  %s2131_s5 = int_to_ptr.vmem [resolvable:$true] %s143_s5 }
  0x1a   : > { %s3027_s30 = scalar_select %p2127_p3, 1, 0 }
  0x1b   : > { %p1867_p9 = pneg %p2121_p7  ;;  %p1872_p10 = scmp.lt.u32.totalorder %s1865_s8, %s2985_s1 }
  0x1d   : > { %p1868_p4 = pnand %p1867_p9, %p1866_p8 }
  0x1f   : > { %p1869_p5 = pneg %p1868_p4 }
  0x21   : > { %p1874_p2 = pnand %p1872_p10, %p1869_p5 }
  0x23   : > { %1877 = shalt.err (!%p1874_p2)
}
  0x24   : > { %s1878_s19 = scalar_lea.vmem %s133_s28, 16  ;;  %s1885_s20 = scalar_lea.vmem %s133_s28, 32 }
  0x25   : > { %p1879_p0 = scmp.ne.s32.totalorder %s133_s28, %s1878_s19  ;;  %p1886_p11 = scmp.lt.s32.totalorder %s133_s28, %s133_s28 }
  0x26   : > { %p1887_p6 = scmp.lt.s32.totalorder %s1885_s20, %s1878_s19 }
  0x27   : > { %p1881_p1 = pnand %p1879_p0, %p1867_p9 }
  0x28   : > { %p1888_p13 = por %p1887_p6, %p1886_p11 }
  0x29   : > { %p1882_p12 = pneg %p1881_p1 }
  0x2b   : > { %p1889_p3 = pnand %p1888_p13, %p1882_p12 }
  0x2d   : > { %1892 = shalt.err (!%p1889_p3)
}
  0x2e   : > { %1711 = dma.hbm_to_vmem [thread:$0]  (!%p2121_p7), %s2985_s1, 16, %s133_s28, [#allocation6]  }
  0x2f   : > { %s154_s4 = sand.u32 1, %s2017_s14   ;;  %s1893_s8 = scalar_lea.hbm %s2986_s2, 16 }
  0x30   : > { %p1894_p1 = scmp.ne.s32.totalorder %s2986_s2, %s1893_s8  ;;  %p1900_p12 = scmp.lt.u32.totalorder %s1893_s8, %s2986_s2 }
  0x32   : > { %p1896_p6 = pnand %p1894_p1, %p1867_p9 }
  0x34   : > { %p1897_p11 = pneg %p1896_p6 }
  0x36   : > { %p1902_p13 = pnand %p1900_p12, %p1897_p11 }
  0x38   : > { %1905 = shalt.err (!%p1902_p13)
}
  0x39   : > { %s1906_s28 = scalar_lea.vmem %s2131_s5, 16  ;;  %s1913_s19 = scalar_lea.vmem %s2131_s5, 32 }
  0x3a   : > { %p1907_p3 = scmp.ne.s32.totalorder %s2131_s5, %s1906_s28  ;;  %p1914_p5 = scmp.lt.s32.totalorder %s2131_s5, %s2131_s5 }
  0x3b   : > { %p1915_p10 = scmp.lt.s32.totalorder %s1913_s19, %s1906_s28 }
  0x3c   : > { %p1909_p8 = pnand %p1907_p3, %p1867_p9 }
  0x3d   : > { %p1916_p2 = por %p1915_p10, %p1914_p5 }
  0x3e   : > { %p1910_p4 = pneg %p1909_p8 }
  0x40   : > { %p1917_p0 = pnand %p1916_p2, %p1910_p4 }
  0x42   : > { %1920 = shalt.err (!%p1917_p0)
}
  0x43   : > { %1714 = dma.hbm_to_vmem [thread:$0]  (!%p2121_p7), %s2986_s2, 16, %s2131_s5, [#allocation6]  }
  0x44   : > { %s1694_s27 = smul.u32 196, %s154_s4  ;;  %s2190_s11 = scalar_lea.sflag [#allocation3], %s154_s4 }
  0x45   : > { %s1381_s6 = smul.u32 3136, %s2021_s15  ;;  %p3028_p7 = scmp.ne.s32.totalorder %s3027_s30, 0 }
  0x46   : > { %s158_s29 = scalar_lea.vmem [#allocation2], %s1694_s27  ;;  %s1926_s19 = scalar_lea.hbm %s2984_s0, 6272 }
  0x47   : > { %s2186_s9 = scalar_lea.hbm %s2984_s0, %s1381_s6  ;;  %s165_s10 = sshll.u32 %s158_s29, 4  ;;  %s2188_s10 = int_to_ptr.vmem [resolvable:$true] %s165_s10 }
  0x48   : > { %s1921_s17 = scalar_lea.hbm %s2186_s9, 3136  ;;  %p1923_p1 = pneg %p3028_p7 }
  0x49   : > { %p1922_p9 = scmp.ne.s32.totalorder %s2186_s9, %s1921_s17  ;;  %p1927_p12 = scmp.lt.u32.totalorder %s2186_s9, %s2984_s0 }
  0x4a   : > { %p1928_p13 = scmp.lt.u32.totalorder %s1926_s19, %s1921_s17  ;;  %p1930_p8 = scmp.lt.u32.totalorder %s1921_s17, %s2186_s9 }
  0x4b   : > { %p1924_p6 = pnand %p1923_p1, %p1922_p9 }
  0x4c   : > { %p1929_p3 = por %p1928_p13, %p1927_p12 }
  0x4d   : > { %p1925_p11 = pneg %p1924_p6 }
  0x4e   : > { %p1931_p4 = por %p1930_p8, %p1929_p3 }
  0x50   : > { %p1932_p5 = pnand %p1931_p4, %p1925_p11 }
  0x52   : > { %1935 = shalt.err (!%p1932_p5)
}
  0x53   : > { %s1936_s4 = scalar_lea.vmem %s2188_s10, 3136  ;;  %s2025_s27 = smov [#allocation2]  }
  0x54   : > { %p1937_p10 = scmp.ne.s32.totalorder %s2188_s10, %s1936_s4  ;;  %s1941_s6 = sshll.u32 %s2025_s27, 4  ;;  %s1942_s6 = int_to_ptr.vmem [resolvable:$false] %s1941_s6 }
  0x55   : > { %s1943_s7 = scalar_lea.vmem %s1942_s6, 6272  ;;  %p1944_p9 = scmp.lt.s32.totalorder %s2188_s10, %s1942_s6 }
  0x56   : > { %p1939_p2 = pnand %p1937_p10, %p1923_p1  ;;  %p1945_p6 = scmp.lt.s32.totalorder %s1943_s7, %s1936_s4 }
  0x58   : > { %p1940_p0 = pneg %p1939_p2  ;;  %p1946_p12 = por %p1945_p6, %p1944_p9 }
  0x5a   : > { %p1947_p13 = pnand %p1946_p12, %p1940_p0 }
  0x5c   : > { %1950 = shalt.err (!%p1947_p13)
}
  0x5d   : > { %s2026_s8 = smov 64   ;;  %s2027_s29 = smov 4  }
  0x5e   : > { %1718 = dma.hbm_to_vmem [thread:$0]  (!%p3028_p7), %s2186_s9, 3136, %s2188_s10, %s2190_s11, %s2026_s8, %s2026_s8, %s2027_s29  }
  0x5f   : > { %p3029_p1 = scmp.ne.s32.totalorder %s3024_s26, 0 }
  0x61   : > { %177 = sbr.rel (%p3029_p1) target bundleno = 540 (0x21c), region = 32 }
  0x68   : > { %s2221_s17 = sand.u32 1, %s2013_s13   ;;  %p3030_p11 = scmp.ne.s32.totalorder %s3021_s23, 0 }
  0x69   : > { %s1695_s5 = smul.u32 196, %s2221_s17  ;;  %s180_s28 = scalar_lea.sflag [#allocation3], %s2221_s17 }
  0x6b   : > { %s2227_s19 = scalar_lea.vmem [#allocation2], %s1695_s5 }
  0x6c   : > { %1996 = dma.done.wait (%p3030_p11), %s180_s28, 3136  }
  0x6d   : > { %1998 = vsyncadd (%p3030_p11), %s180_s28, 4294964160  ;;  %p3031_p7 = scmp.eq.s32.totalorder %s2072_s16, 0 }
  0x6f   : > { %2000 = dma.done.wait (%p3031_p7), [#allocation6], 32   ;;  %p3032_p3 = pmov %p3031_p7 }
  0x70   : > { %v2238_v0 = vld [vmem:[%s2227_s19] sm:$0xff]   ;;  %v2241_v1 = vld [vmem:[%s2227_s19 + $0x8] sm:$0xff]   ;;  %v2252_v6 = vld [vmem:[%s2227_s19 + $0x10] sm:$0xff]   ;;  %s2773_s23 = scalar_lea.vmem [#allocation8], %s1695_s5  ;;  %s1431_s26 = smul.u32 3136, %s2072_s16 }
  0x71   : > { %2002 = vsyncadd (%p3032_p3), [#allocation6], 4294967264  ;;  %v1434_v2 = vunpack.c.l.bf16 %v2238_v0  ;;  %v1438_v3 = vunpack.c.l.bf16 %v2241_v1  ;;  %v1435_v4 = vunpack.c.h.bf16 %v2238_v0  ;;  %v1439_v5 = vunpack.c.h.bf16 %v2241_v1  ;;  %v2261_v9 = vld [vmem:[%s2227_s19 + $0x18] sm:$0xff]   ;;  %v2270_v12 = vld [vmem:[%s2227_s19 + $0x20] sm:$0xff]   ;;  %s1226_s30 = sshll.u32 %s2773_s23, 4  ;;  %s1213_s16 = scalar_lea.sflag [#allocation4], %s2221_s17  ;;  %s2938_s30 = int_to_ptr.vmem [resolvable:$true] %s1226_s30 }
  0x72   : > { %v1442_v7 = vunpack.c.l.bf16 %v2252_v6  ;;  %v1443_v8 = vunpack.c.h.bf16 %v2252_v6  ;;  %v1446_v10 = vunpack.c.l.bf16 %v2261_v9  ;;  %v1447_v11 = vunpack.c.h.bf16 %v2261_v9  ;;  %v2279_v15 = vld [vmem:[%s2227_s19 + $0x28] sm:$0xff]   ;;  %v2288_v18 = vld [vmem:[%s2227_s19 + $0x30] sm:$0xff]   ;;  %v2297_v21 = vld [vmem:[%s2227_s19 + $0x38] sm:$0xff]   ;;  %s2936_s11 = scalar_lea.hbm %s2987_s3, %s1431_s26  ;;  %s1951_s20 = scalar_lea.vmem %s2938_s30, 3136 }
  0x73   : > { %314 = vadd.xlane.f32.xlu0 %v1434_v2  ;;  %318 = vadd.xlane.f32.xlu1 %v1438_v3  ;;  %v1450_v13 = vunpack.c.l.bf16 %v2270_v12  ;;  %v1451_v14 = vunpack.c.h.bf16 %v2270_v12  ;;  %v1454_v16 = vunpack.c.l.bf16 %v2279_v15  ;;  %v1455_v17 = vunpack.c.h.bf16 %v2279_v15  ;;  %v2306_v24 = vld [vmem:[%s2227_s19 + $0x40] sm:$0xff]   ;;  %v2315_v27 = vld [vmem:[%s2227_s19 + $0x48] sm:$0xff]   ;;  %v2324_v30 = vld [vmem:[%s2227_s19 + $0x50] sm:$0xff]   ;;  %p1952_p8 = scmp.ne.s32.totalorder %s2938_s30, %s1951_s20  ;;  %p3065_p4 = scmp.ne.s32.totalorder %s3022_s24, 0 }
  0x74   : > { %v1458_v19 = vunpack.c.l.bf16 %v2288_v18  ;;  %v1459_v20 = vunpack.c.h.bf16 %v2288_v18  ;;  %v1462_v22 = vunpack.c.l.bf16 %v2297_v21  ;;  %v1463_v23 = vunpack.c.h.bf16 %v2297_v21  ;;  %v2333_v33 = vld [vmem:[%s2227_s19 + $0x58] sm:$0xff]   ;;  %v2342_v36 = vld [vmem:[%s2227_s19 + $0x60] sm:$0xff]   ;;  %v2351_v39 = vld [vmem:[%s2227_s19 + $0x68] sm:$0xff]   ;;  %s2028_s22 = smov [#allocation8]  }
  0x75   : > { %v1466_v25 = vunpack.c.l.bf16 %v2306_v24  ;;  %v1467_v26 = vunpack.c.h.bf16 %v2306_v24  ;;  %v1470_v28 = vunpack.c.l.bf16 %v2315_v27  ;;  %v1471_v29 = vunpack.c.h.bf16 %v2315_v27  ;;  %v2360_v42 = vld [vmem:[%s2227_s19 + $0x70] sm:$0xff]   ;;  %v2369_v45 = vld [vmem:[%s2227_s19 + $0x78] sm:$0xff]   ;;  %v2378_v48 = vld [vmem:[%s2227_s19 + $0x80] sm:$0xff]   ;;  %p1953_p5 = pnand %p1952_p8, %p3065_p4  ;;  %s1955_s4 = sshll.u32 %s2028_s22, 4  ;;  %s1956_s4 = int_to_ptr.vmem [resolvable:$false] %s1955_s4 }
  0x76   : > { %v1474_v31 = vunpack.c.l.bf16 %v2324_v30  ;;  %v1475_v32 = vunpack.c.h.bf16 %v2324_v30  ;;  %v1478_v34 = vunpack.c.l.bf16 %v2333_v33  ;;  %v1479_v35 = vunpack.c.h.bf16 %v2333_v33  ;;  %v2387_v51 = vld [vmem:[%s2227_s19 + $0x88] sm:$0xff]   ;;  %v2396_v54 = vld [vmem:[%s2227_s19 + $0x90] sm:$0xff]   ;;  %v2405_v57 = vld [vmem:[%s2227_s19 + $0x98] sm:$0xff]   ;;  %s1957_s27 = scalar_lea.vmem %s1956_s4, 6272  ;;  %p1958_p2 = scmp.lt.s32.totalorder %s2938_s30, %s1956_s4 }
  0x77   : > { %316 = vadd.xlane.f32.xlu0 %v1435_v4  ;;  %320 = vadd.xlane.f32.xlu1 %v1439_v5  ;;  %v1482_v37 = vunpack.c.l.bf16 %v2342_v36  ;;  %v1483_v38 = vunpack.c.h.bf16 %v2342_v36  ;;  %v1486_v40 = vunpack.c.l.bf16 %v2351_v39  ;;  %v3013_v41 = vunpack.c.h.bf16 %v2351_v39  ;;  %v2414_v60 = vld [vmem:[%s2227_s19 + $0xa0] sm:$0xff]   ;;  %v2423_v63 = vld [vmem:[%s2227_s19 + $0xa8] sm:$0xff]   ;;  %p1954_p10 = pneg %p1953_p5  ;;  %p1959_p0 = scmp.lt.s32.totalorder %s1957_s27, %s1951_s20 }
  0x78   : > { %v3012_v43 = vunpack.c.l.bf16 %v2360_v42  ;;  %v3010_v44 = vunpack.c.h.bf16 %v2360_v42  ;;  %v3008_v46 = vunpack.c.l.bf16 %v2369_v45  ;;  %v3007_v47 = vunpack.c.h.bf16 %v2369_v45 }
  0x79   : > { %v3006_v49 = vunpack.c.l.bf16 %v2378_v48  ;;  %v3004_v50 = vunpack.c.h.bf16 %v2378_v48  ;;  %v3000_v52 = vunpack.c.l.bf16 %v2387_v51  ;;  %v2997_v53 = vunpack.c.h.bf16 %v2387_v51  ;;  %p1960_p9 = por %p1959_p0, %p1958_p2 }
  0x7a   : > { %v2995_v55 = vunpack.c.l.bf16 %v2396_v54  ;;  %v2993_v56 = vunpack.c.h.bf16 %v2396_v54  ;;  %v2994_v58 = vunpack.c.l.bf16 %v2405_v57  ;;  %v2996_v59 = vunpack.c.h.bf16 %v2405_v57 }
  0x7b   : > { %322 = vadd.xlane.f32.xlu0 %v1442_v7  ;;  %324 = vadd.xlane.f32.xlu1 %v1443_v8  ;;  %v2998_v61 = vunpack.c.l.bf16 %v2414_v60  ;;  %v2999_v62 = vunpack.c.h.bf16 %v2414_v60  ;;  %v3033_v36 = vunpack.c.h.bf16 %v2351_v39  ;;  %v3035_v39 = vunpack.c.h.bf16 %v2360_v42  ;;  %p1961_p6 = pnand %p1960_p9, %p1954_p10 }
  0x7f   : > { %326 = vadd.xlane.f32.xlu0 %v1446_v10  ;;  %328 = vadd.xlane.f32.xlu1 %v1447_v11 }
  0x83   : > { %330 = vadd.xlane.f32.xlu0 %v1450_v13  ;;  %332 = vadd.xlane.f32.xlu1 %v1451_v14 }
  0x87   : > { %334 = vadd.xlane.f32.xlu0 %v1454_v16  ;;  %336 = vadd.xlane.f32.xlu1 %v1455_v17 }
  0x8b   : > { %338 = vadd.xlane.f32.xlu0 %v1458_v19  ;;  %340 = vadd.xlane.f32.xlu1 %v1459_v20 }
  0x8f   : > { %342 = vadd.xlane.f32.xlu0 %v1462_v22  ;;  %344 = vadd.xlane.f32.xlu1 %v1463_v23 }
  0x93   : > { %346 = vadd.xlane.f32.xlu0 %v1466_v25  ;;  %348 = vadd.xlane.f32.xlu1 %v1467_v26 }
  0x97   : > { %350 = vadd.xlane.f32.xlu0 %v1470_v28  ;;  %352 = vadd.xlane.f32.xlu1 %v1471_v29 }
  0x9b   : > { %354 = vadd.xlane.f32.xlu0 %v1474_v31  ;;  %356 = vadd.xlane.f32.xlu1 %v1475_v32 }
  0x9f   : > { %358 = vadd.xlane.f32.xlu0 %v1478_v34  ;;  %360 = vadd.xlane.f32.xlu1 %v1479_v35 }
  0xa3   : > { %362 = vadd.xlane.f32.xlu0 %v1482_v37  ;;  %364 = vadd.xlane.f32.xlu1 %v1483_v38 }
  0xa7   : > { %366 = vadd.xlane.f32.xlu0 %v1486_v40  ;;  %368 = vadd.xlane.f32.xlu1 %v3013_v41 }
  0xab   : > { %370 = vadd.xlane.f32.xlu0 %v3012_v43  ;;  %372 = vadd.xlane.f32.xlu1 %v3010_v44 }
  0xaf   : > { %374 = vadd.xlane.f32.xlu0 %v3008_v46  ;;  %376 = vadd.xlane.f32.xlu1 %v3007_v47 }
  0xb3   : > { %378 = vadd.xlane.f32.xlu0 %v3006_v49  ;;  %380 = vadd.xlane.f32.xlu1 %v3004_v50 }
  0xb7   : > { %382 = vadd.xlane.f32.xlu0 %v3000_v52  ;;  %384 = vadd.xlane.f32.xlu1 %v2997_v53 }
  0xbb   : > { %386 = vadd.xlane.f32.xlu0 %v2995_v55  ;;  %388 = vadd.xlane.f32.xlu1 %v2993_v56  ;;  %v3001_v56 = vunpack.c.l.bf16 %v2423_v63  ;;  %v2432_v55 = vld [vmem:[%s2227_s19 + $0xb0] sm:$0xff]  }
  0xbc   : > { %v3005_v53 = vunpack.c.h.bf16 %v2432_v55 }
  0xbf   : > { %390 = vadd.xlane.f32.xlu0 %v2994_v58  ;;  %392 = vadd.xlane.f32.xlu1 %v2996_v59  ;;  %v3002_v58 = vunpack.c.h.bf16 %v2423_v63  ;;  %v3003_v59 = vunpack.c.l.bf16 %v2432_v55 }
  0xc3   : > { %394 = vadd.xlane.f32.xlu0 %v2998_v61  ;;  %396 = vadd.xlane.f32.xlu1 %v2999_v62  ;;  %v2441_v61 = vld [vmem:[%s2227_s19 + $0xb8] sm:$0xff]  }
  0xc4   : > { %v3009_v62 = vunpack.c.l.bf16 %v2441_v61  ;;  %v3011_v52 = vunpack.c.h.bf16 %v2441_v61 }
  0xc7   : > { %398 = vadd.xlane.f32.xlu0 %v3001_v56  ;;  %400 = vadd.xlane.f32.xlu1 %v3002_v58  ;;  %v2450_v56 = vld [vmem:[%s2227_s19 + $0xc0] sm:$0xf] }
  0xc8   : > { %v3014_v58 = vunpack.c.l.bf16 %v2450_v56 }
  0xcb   : > { %402 = vadd.xlane.f32.xlu0 %v3003_v59  ;;  %404 = vadd.xlane.f32.xlu1 %v3005_v53 }
  0xcf   : > { %406 = vadd.xlane.f32.xlu0 %v3009_v62  ;;  %408 = vadd.xlane.f32.xlu1 %v3011_v52 }
  0xd3   : > { %410 = vadd.xlane.f32.xlu0 %v3014_v58 }
 0x100   : > { %v315_v59 = vpop.xlane.xlu0 %314  ;;  %v319_v50 = vpop.xlane.xlu1 %318 }
 0x101   : > { %v413_v53 = vmul.f32 0.0078125, %v315_v59  ;;  %v415_v49 = vmul.f32 0.0078125, %v319_v50 }
 0x103   : > { %v2461_v47 = vsub.f32 %v1434_v2, %v413_v53  ;;  %v2465_v46 = vsub.f32 %v1438_v3, %v415_v49 }
 0x104   : > { %v317_v62 = vpop.xlane.xlu0 %316  ;;  %v321_v44 = vpop.xlane.xlu1 %320 }
 0x105   : > { %v414_v52 = vmul.f32 0.0078125, %v317_v62  ;;  %v511_v43 = vmul.f32 %v2461_v47, %v2461_v47  ;;  %v416_v41 = vmul.f32 0.0078125, %v321_v44  ;;  %v513_v3 = vmul.f32 %v2465_v46, %v2465_v46 }
 0x107   : > { %v2471_v58 = vsub.f32 %v1435_v4, %v414_v52  ;;  %560 = vadd.xlane.f32.xlu1 %v511_v43  ;;  %v2475_v2 = vsub.f32 %v1439_v5, %v416_v41 }
 0x108   : > { %v323_v49 = vpop.xlane.xlu0 %322  ;;  %v325_v50 = vpop.xlane.xlu1 %324 }
 0x109   : > { %v417_v53 = vmul.f32 0.0078125, %v323_v49  ;;  %v512_v59 = vmul.f32 %v2471_v58, %v2471_v58  ;;  %v418_v62 = vmul.f32 0.0078125, %v325_v50  ;;  %v514_v4 = vmul.f32 %v2475_v2, %v2475_v2 }
 0x10b   : > { %v2483_v0 = vsub.f32 %v1442_v7, %v417_v53  ;;  %564 = vadd.xlane.f32.xlu1 %v513_v3  ;;  %562 = vadd.xlane.f32.xlu0 %v512_v59  ;;  %v2487_v1 = vsub.f32 %v1443_v8, %v418_v62 }
 0x10c   : > { %v327_v5 = vpop.xlane.xlu0 %326  ;;  %v329_v41 = vpop.xlane.xlu1 %328 }
 0x10d   : > { %v419_v43 = vmul.f32 0.0078125, %v327_v5  ;;  %v515_v44 = vmul.f32 %v2483_v0, %v2483_v0  ;;  %v420_v52 = vmul.f32 0.0078125, %v329_v41  ;;  %v516_v8 = vmul.f32 %v2487_v1, %v2487_v1 }
 0x10f   : > { %v2495_v7 = vsub.f32 %v1446_v10, %v419_v43  ;;  %566 = vadd.xlane.f32.xlu0 %v514_v4  ;;  %568 = vadd.xlane.f32.xlu1 %v515_v44  ;;  %v2499_v6 = vsub.f32 %v1447_v11, %v420_v52 }
 0x110   : > { %v331_v3 = vpop.xlane.xlu0 %330  ;;  %v333_v49 = vpop.xlane.xlu1 %332 }
 0x111   : > { %v421_v50 = vmul.f32 0.0078125, %v331_v3  ;;  %v517_v53 = vmul.f32 %v2495_v7, %v2495_v7  ;;  %v422_v59 = vmul.f32 0.0078125, %v333_v49  ;;  %v518_v11 = vmul.f32 %v2499_v6, %v2499_v6 }
 0x113   : > { %v2507_v10 = vsub.f32 %v1450_v13, %v421_v50  ;;  %570 = vadd.xlane.f32.xlu0 %v516_v8  ;;  %572 = vadd.xlane.f32.xlu1 %v517_v53  ;;  %v2511_v9 = vsub.f32 %v1451_v14, %v422_v59 }
 0x114   : > { %v335_v62 = vpop.xlane.xlu0 %334  ;;  %v337_v4 = vpop.xlane.xlu1 %336 }
 0x115   : > { %v423_v5 = vmul.f32 0.0078125, %v335_v62  ;;  %v519_v41 = vmul.f32 %v2507_v10, %v2507_v10  ;;  %v424_v43 = vmul.f32 0.0078125, %v337_v4  ;;  %v520_v14 = vmul.f32 %v2511_v9, %v2511_v9 }
 0x117   : > { %v2519_v13 = vsub.f32 %v1454_v16, %v423_v5  ;;  %574 = vadd.xlane.f32.xlu0 %v518_v11  ;;  %576 = vadd.xlane.f32.xlu1 %v519_v41  ;;  %v2523_v12 = vsub.f32 %v1455_v17, %v424_v43 }
 0x118   : > { %v339_v44 = vpop.xlane.xlu0 %338  ;;  %v341_v52 = vpop.xlane.xlu1 %340 }
 0x119   : > { %v425_v8 = vmul.f32 0.0078125, %v339_v44  ;;  %v521_v3 = vmul.f32 %v2519_v13, %v2519_v13  ;;  %v426_v49 = vmul.f32 0.0078125, %v341_v52  ;;  %v522_v17 = vmul.f32 %v2523_v12, %v2523_v12 }
 0x11b   : > { %v2531_v16 = vsub.f32 %v1458_v19, %v425_v8  ;;  %578 = vadd.xlane.f32.xlu0 %v520_v14  ;;  %580 = vadd.xlane.f32.xlu1 %v521_v3  ;;  %v2535_v15 = vsub.f32 %v1459_v20, %v426_v49 }
 0x11c   : > { %v343_v50 = vpop.xlane.xlu0 %342  ;;  %v345_v53 = vpop.xlane.xlu1 %344 }
 0x11d   : > { %v427_v59 = vmul.f32 0.0078125, %v343_v50  ;;  %v523_v11 = vmul.f32 %v2531_v16, %v2531_v16  ;;  %v428_v62 = vmul.f32 0.0078125, %v345_v53  ;;  %v524_v20 = vmul.f32 %v2535_v15, %v2535_v15 }
 0x11f   : > { %v2543_v19 = vsub.f32 %v1462_v22, %v427_v59  ;;  %582 = vadd.xlane.f32.xlu0 %v522_v17  ;;  %584 = vadd.xlane.f32.xlu1 %v523_v11  ;;  %v2547_v18 = vsub.f32 %v1463_v23, %v428_v62 }
 0x120   : > { %v347_v4 = vpop.xlane.xlu0 %346  ;;  %v349_v5 = vpop.xlane.xlu1 %348 }
 0x121   : > { %v429_v41 = vmul.f32 0.0078125, %v347_v4  ;;  %v525_v43 = vmul.f32 %v2543_v19, %v2543_v19  ;;  %v430_v14 = vmul.f32 0.0078125, %v349_v5  ;;  %v526_v23 = vmul.f32 %v2547_v18, %v2547_v18 }
 0x123   : > { %v2555_v22 = vsub.f32 %v1466_v25, %v429_v41  ;;  %586 = vadd.xlane.f32.xlu0 %v524_v20  ;;  %588 = vadd.xlane.f32.xlu1 %v525_v43  ;;  %v2559_v21 = vsub.f32 %v1467_v26, %v430_v14 }
 0x124   : > { %v351_v44 = vpop.xlane.xlu0 %350  ;;  %v353_v52 = vpop.xlane.xlu1 %352 }
 0x125   : > { %v431_v8 = vmul.f32 0.0078125, %v351_v44  ;;  %v527_v3 = vmul.f32 %v2555_v22, %v2555_v22  ;;  %v432_v49 = vmul.f32 0.0078125, %v353_v52  ;;  %v528_v26 = vmul.f32 %v2559_v21, %v2559_v21 }
 0x127   : > { %v2567_v25 = vsub.f32 %v1470_v28, %v431_v8  ;;  %590 = vadd.xlane.f32.xlu0 %v526_v23  ;;  %592 = vadd.xlane.f32.xlu1 %v527_v3  ;;  %v2571_v24 = vsub.f32 %v1471_v29, %v432_v49 }
 0x128   : > { %v355_v17 = vpop.xlane.xlu0 %354  ;;  %v357_v50 = vpop.xlane.xlu1 %356 }
 0x129   : > { %v433_v53 = vmul.f32 0.0078125, %v355_v17  ;;  %v529_v59 = vmul.f32 %v2567_v25, %v2567_v25  ;;  %v434_v11 = vmul.f32 0.0078125, %v357_v50  ;;  %v530_v29 = vmul.f32 %v2571_v24, %v2571_v24 }
 0x12b   : > { %v2579_v28 = vsub.f32 %v1474_v31, %v433_v53  ;;  %594 = vadd.xlane.f32.xlu0 %v528_v26  ;;  %596 = vadd.xlane.f32.xlu1 %v529_v59  ;;  %v2583_v27 = vsub.f32 %v1475_v32, %v434_v11 }
 0x12c   : > { %v359_v62 = vpop.xlane.xlu0 %358  ;;  %v361_v20 = vpop.xlane.xlu1 %360 }
 0x12d   : > { %v435_v4 = vmul.f32 0.0078125, %v359_v62  ;;  %v531_v5 = vmul.f32 %v2579_v28, %v2579_v28  ;;  %v436_v41 = vmul.f32 0.0078125, %v361_v20  ;;  %v532_v32 = vmul.f32 %v2583_v27, %v2583_v27 }
 0x12e   : > { %v3034_v20 = vunpack.c.l.bf16 %v2360_v42  ;;  %v3037_v42 = vunpack.c.h.bf16 %v2369_v45 }
 0x12f   : > { %v2591_v31 = vsub.f32 %v1478_v34, %v435_v4  ;;  %598 = vadd.xlane.f32.xlu0 %v530_v29  ;;  %600 = vadd.xlane.f32.xlu1 %v531_v5  ;;  %v2595_v30 = vsub.f32 %v1479_v35, %v436_v41 }
 0x130   : > { %v363_v43 = vpop.xlane.xlu0 %362  ;;  %v365_v14 = vpop.xlane.xlu1 %364 }
 0x131   : > { %v437_v23 = vmul.f32 0.0078125, %v363_v43  ;;  %v533_v44 = vmul.f32 %v2591_v31, %v2591_v31  ;;  %v438_v52 = vmul.f32 0.0078125, %v365_v14  ;;  %v534_v35 = vmul.f32 %v2595_v30, %v2595_v30 }
 0x133   : > { %v2603_v34 = vsub.f32 %v1482_v37, %v437_v23  ;;  %602 = vadd.xlane.f32.xlu0 %v532_v32  ;;  %604 = vadd.xlane.f32.xlu1 %v533_v44  ;;  %v2607_v33 = vsub.f32 %v1483_v38, %v438_v52  ;;  %v3036_v44 = vunpack.c.l.bf16 %v2369_v45  ;;  %v3039_v45 = vunpack.c.h.bf16 %v2378_v48 }
 0x134   : > { %v367_v8 = vpop.xlane.xlu0 %366  ;;  %v369_v3 = vpop.xlane.xlu1 %368 }
 0x135   : > { %v439_v49 = vmul.f32 0.0078125, %v367_v8  ;;  %v535_v26 = vmul.f32 %v2603_v34, %v2603_v34  ;;  %v440_v17 = vmul.f32 0.0078125, %v369_v3  ;;  %v536_v50 = vmul.f32 %v2607_v33, %v2607_v33 }
 0x137   : > { %v2615_v37 = vsub.f32 %v1486_v40, %v439_v49  ;;  %606 = vadd.xlane.f32.xlu0 %v534_v35  ;;  %608 = vadd.xlane.f32.xlu1 %v535_v26  ;;  %v2619_v38 = vsub.f32 %v3033_v36, %v440_v17 }
 0x138   : > { %v371_v53 = vpop.xlane.xlu0 %370  ;;  %v373_v59 = vpop.xlane.xlu1 %372 }
 0x139   : > { %v441_v11 = vmul.f32 0.0078125, %v371_v53  ;;  %v537_v29 = vmul.f32 %v2615_v37, %v2615_v37  ;;  %v442_v62 = vmul.f32 0.0078125, %v373_v59  ;;  %v538_v5 = vmul.f32 %v2619_v38, %v2619_v38 }
 0x13b   : > { %v2627_v40 = vsub.f32 %v3034_v20, %v441_v11  ;;  %610 = vadd.xlane.f32.xlu0 %v536_v50  ;;  %612 = vadd.xlane.f32.xlu1 %v537_v29  ;;  %v2631_v4 = vsub.f32 %v3035_v39, %v442_v62  ;;  %v3038_v50 = vunpack.c.l.bf16 %v2378_v48  ;;  %v3041_v48 = vunpack.c.h.bf16 %v2387_v51 }
 0x13c   : > { %v375_v41 = vpop.xlane.xlu0 %374  ;;  %v377_v32 = vpop.xlane.xlu1 %376 }
 0x13d   : > { %v443_v43 = vmul.f32 0.0078125, %v375_v41  ;;  %v539_v14 = vmul.f32 %v2627_v40, %v2627_v40  ;;  %v444_v23 = vmul.f32 0.0078125, %v377_v32  ;;  %v540_v8 = vmul.f32 %v2631_v4, %v2631_v4 }
 0x13e   : > { %v3040_v41 = vunpack.c.l.bf16 %v2387_v51  ;;  %v3043_v51 = vunpack.c.h.bf16 %v2396_v54 }
 0x13f   : > { %v2639_v52 = vsub.f32 %v3036_v44, %v443_v43  ;;  %614 = vadd.xlane.f32.xlu0 %v538_v5  ;;  %616 = vadd.xlane.f32.xlu1 %v539_v14  ;;  %v2643_v35 = vsub.f32 %v3037_v42, %v444_v23 }
 0x140   : > { %v379_v3 = vpop.xlane.xlu0 %378  ;;  %v381_v49 = vpop.xlane.xlu1 %380 }
 0x141   : > { %v445_v26 = vmul.f32 0.0078125, %v379_v3  ;;  %v541_v17 = vmul.f32 %v2639_v52, %v2639_v52  ;;  %v446_v36 = vmul.f32 0.0078125, %v381_v49  ;;  %v542_v11 = vmul.f32 %v2643_v35, %v2643_v35 }
 0x142   : > { %v3042_v49 = vunpack.c.l.bf16 %v2396_v54  ;;  %v3045_v54 = vunpack.c.h.bf16 %v2405_v57 }
 0x143   : > { %v2651_v53 = vsub.f32 %v3038_v50, %v445_v26  ;;  %618 = vadd.xlane.f32.xlu0 %v540_v8  ;;  %620 = vadd.xlane.f32.xlu1 %v541_v17  ;;  %v2655_v59 = vsub.f32 %v3039_v45, %v446_v36 }
 0x144   : > { %v383_v29 = vpop.xlane.xlu0 %382  ;;  %v385_v62 = vpop.xlane.xlu1 %384 }
 0x145   : > { %v447_v20 = vmul.f32 0.0078125, %v383_v29  ;;  %v543_v39 = vmul.f32 %v2651_v53, %v2651_v53  ;;  %v448_v5 = vmul.f32 0.0078125, %v385_v62  ;;  %v544_v14 = vmul.f32 %v2655_v59, %v2655_v59 }
 0x147   : > { %v2663_v32 = vsub.f32 %v3040_v41, %v447_v20  ;;  %622 = vadd.xlane.f32.xlu0 %v542_v11  ;;  %624 = vadd.xlane.f32.xlu1 %v543_v39  ;;  %v2667_v43 = vsub.f32 %v3041_v48, %v448_v5  ;;  %v3044_v20 = vunpack.c.l.bf16 %v2405_v57  ;;  %v3047_v57 = vunpack.c.h.bf16 %v2414_v60 }
 0x148   : > { %v387_v23 = vpop.xlane.xlu0 %386  ;;  %v389_v44 = vpop.xlane.xlu1 %388 }
 0x149   : > { %v449_v42 = vmul.f32 0.0078125, %v387_v23  ;;  %v545_v8 = vmul.f32 %v2663_v32, %v2663_v32  ;;  %v450_v3 = vmul.f32 0.0078125, %v389_v44  ;;  %v546_v36 = vmul.f32 %v2667_v43, %v2667_v43 }
 0x14b   : > { %v2675_v26 = vsub.f32 %v3042_v49, %v449_v42  ;;  %626 = vadd.xlane.f32.xlu0 %v544_v14  ;;  %628 = vadd.xlane.f32.xlu1 %v545_v8  ;;  %v2679_v17 = vsub.f32 %v3043_v51, %v450_v3  ;;  %v3046_v8 = vunpack.c.l.bf16 %v2414_v60  ;;  %v3049_v60 = vunpack.c.h.bf16 %v2423_v63 }
 0x14c   : > { %v391_v50 = vpop.xlane.xlu0 %390  ;;  %v393_v45 = vpop.xlane.xlu1 %392 }
 0x14d   : > { %v451_v11 = vmul.f32 0.0078125, %v391_v50  ;;  %v547_v29 = vmul.f32 %v2675_v26, %v2675_v26  ;;  %v452_v62 = vmul.f32 0.0078125, %v393_v45  ;;  %v548_v41 = vmul.f32 %v2679_v17, %v2679_v17 }
 0x14f   : > { %v2687_v39 = vsub.f32 %v3044_v20, %v451_v11  ;;  %630 = vadd.xlane.f32.xlu0 %v546_v36  ;;  %632 = vadd.xlane.f32.xlu1 %v547_v29  ;;  %v2691_v5 = vsub.f32 %v3045_v54, %v452_v62  ;;  %v3048_v62 = vunpack.c.l.bf16 %v2423_v63  ;;  %v3052_v63 = vunpack.c.h.bf16 %v2432_v55 }
 0x150   : > { %v395_v48 = vpop.xlane.xlu0 %394  ;;  %v397_v14 = vpop.xlane.xlu1 %396 }
 0x151   : > { %v453_v23 = vmul.f32 0.0078125, %v395_v48  ;;  %v549_v44 = vmul.f32 %v2687_v39, %v2687_v39  ;;  %v454_v42 = vmul.f32 0.0078125, %v397_v14  ;;  %v550_v51 = vmul.f32 %v2691_v5, %v2691_v5 }
 0x153   : > { %v2699_v3 = vsub.f32 %v3046_v8, %v453_v23  ;;  %634 = vadd.xlane.f32.xlu0 %v548_v41  ;;  %636 = vadd.xlane.f32.xlu1 %v549_v44  ;;  %v2703_v49 = vsub.f32 %v3047_v57, %v454_v42  ;;  %v3051_v8 = vunpack.c.l.bf16 %v2432_v55  ;;  %v3056_v55 = vunpack.c.h.bf16 %v2441_v61 }
 0x154   : > { %v399_v36 = vpop.xlane.xlu0 %398  ;;  %v401_v50 = vpop.xlane.xlu1 %400 }
 0x155   : > { %v455_v45 = vmul.f32 0.0078125, %v399_v36  ;;  %v551_v11 = vmul.f32 %v2699_v3, %v2699_v3  ;;  %v456_v29 = vmul.f32 0.0078125, %v401_v50  ;;  %v552_v41 = vmul.f32 %v2703_v49, %v2703_v49 }
 0x157   : > { %v2711_v20 = vsub.f32 %v3048_v62, %v455_v45  ;;  %638 = vadd.xlane.f32.xlu0 %v550_v51  ;;  %640 = vadd.xlane.f32.xlu1 %v551_v11  ;;  %v2715_v54 = vsub.f32 %v3049_v60, %v456_v29  ;;  %v3054_v60 = vunpack.c.l.bf16 %v2441_v61 }
 0x158   : > { %v403_v48 = vpop.xlane.xlu0 %402  ;;  %v405_v14 = vpop.xlane.xlu1 %404 }
 0x159   : > { %3050 = vst [vmem:[#allocation12_spill] sm:$0xff] %v2715_v54  ;;  %v457_v23 = vmul.f32 0.0078125, %v403_v48  ;;  %v553_v44 = vmul.f32 %v2711_v20, %v2711_v20  ;;  %v458_v42 = vmul.f32 0.0078125, %v405_v14  ;;  %v554_v36 = vmul.f32 %v2715_v54, %v2715_v54 }
 0x15b   : > { %v2723_v57 = vsub.f32 %v3051_v8, %v457_v23  ;;  %642 = vadd.xlane.f32.xlu0 %v552_v41  ;;  %644 = vadd.xlane.f32.xlu1 %v553_v44  ;;  %v2727_v51 = vsub.f32 %v3052_v63, %v458_v42  ;;  %v3058_v8 = vunpack.c.l.bf16 %v2450_v56 }
 0x15c   : > { %v407_v50 = vpop.xlane.xlu0 %406  ;;  %v409_v45 = vpop.xlane.xlu1 %408 }
 0x15d   : > { %3053 = vst [vmem:[#allocation13_spill] sm:$0xff] %v2727_v51  ;;  %v459_v11 = vmul.f32 0.0078125, %v407_v50  ;;  %v555_v29 = vmul.f32 %v2723_v57, %v2723_v57  ;;  %v460_v62 = vmul.f32 0.0078125, %v409_v45  ;;  %v556_v14 = vmul.f32 %v2727_v51, %v2727_v51 }
 0x15f   : > { %v2735_v48 = vsub.f32 %v3054_v60, %v459_v11  ;;  %646 = vadd.xlane.f32.xlu0 %v554_v36  ;;  %648 = vadd.xlane.f32.xlu1 %v555_v29  ;;  %v2739_v41 = vsub.f32 %v3056_v55, %v460_v62 }
 0x160   : > { %v411_v23 = vpop.xlane.xlu0 %410 }
 0x161   : > { %3055 = vst [vmem:[#allocation14_spill] sm:$0xff] %v2735_v48  ;;  %3057 = vst [vmem:[#allocation15_spill] sm:$0xff] %v2739_v41  ;;  %v461_v44 = vmul.f32 0.0078125, %v411_v23  ;;  %v557_v42 = vmul.f32 %v2735_v48, %v2735_v48  ;;  %v558_v36 = vmul.f32 %v2739_v41, %v2739_v41  ;;  %v2754_v48 = vld [vmem:[#allocation5] ss:$0 sm:$0xff] }
 0x163   : > { %v2747_v63 = vsub.f32 %v3058_v8, %v461_v44  ;;  %650 = vadd.xlane.f32.xlu0 %v556_v14  ;;  %652 = vadd.xlane.f32.xlu1 %v557_v42 }
 0x165   : > { %3059 = vst [vmem:[#allocation16_spill] sm:$0xff] %v2747_v63  ;;  %v559_v61 = vmul.f32 %v2747_v63, %v2747_v63 }
 0x167   : > { %654 = vadd.xlane.f32.xlu0 %v558_v36  ;;  %656 = vadd.xlane.f32.xlu1 %v559_v61 }
 0x194   : > { %v561_v50 = vpop.xlane.xlu1 %560 }
 0x195   : > { %v658_v45 = vmul.f32 0.0078125, %v561_v50 }
 0x197   : > { %v707_v11 = vadd.f32 1e-05, %v658_v45 }
 0x198   : > { %v565_v29 = vpop.xlane.xlu1 %564  ;;  %v563_v62 = vpop.xlane.xlu0 %562 }
 0x199   : > { %1767 = vrsqrt.f32 %v707_v11  ;;  %v660_v60 = vmul.f32 0.0078125, %v565_v29  ;;  %v659_v56 = vmul.f32 0.0078125, %v563_v62 }
 0x19b   : > { %v709_v55 = vadd.f32 1e-05, %v660_v60  ;;  %v708_v23 = vadd.f32 1e-05, %v659_v56 }
 0x19c   : > { %v569_v14 = vpop.xlane.xlu1 %568  ;;  %v567_v44 = vpop.xlane.xlu0 %566 }
 0x19d   : > { %1769 = vrsqrt.f32 %v709_v55  ;;  %v662_v42 = vmul.f32 0.0078125, %v569_v14  ;;  %v661_v8 = vmul.f32 0.0078125, %v567_v44 }
 0x19e   : > { %1771 = vrsqrt.f32 %v708_v23 }
 0x19f   : > { %v711_v41 = vadd.f32 1e-05, %v662_v42  ;;  %v710_v63 = vadd.f32 1e-05, %v661_v8 }
 0x1a0   : > { %v573_v36 = vpop.xlane.xlu1 %572  ;;  %v571_v61 = vpop.xlane.xlu0 %570 }
 0x1a1   : > { %1773 = vrsqrt.f32 %v711_v41  ;;  %v664_v50 = vmul.f32 0.0078125, %v573_v36  ;;  %v663_v45 = vmul.f32 0.0078125, %v571_v61 }
 0x1a2   : > { %1775 = vrsqrt.f32 %v710_v63 }
 0x1a3   : > { %v1768_v51 = vpop.eup %1767  ;;  %v713_v11 = vadd.f32 1e-05, %v664_v50  ;;  %v712_v29 = vadd.f32 1e-05, %v663_v45  ;;  %v2758_v50 = vld [vmem:[#allocation7] ss:$0 sm:$0xff] }
 0x1a4   : > { %v805_v62 = vmul.f32 %v1768_v51, %v2461_v47  ;;  %v577_v60 = vpop.xlane.xlu1 %576  ;;  %v575_v56 = vpop.xlane.xlu0 %574 }
 0x1a5   : > { %1777 = vrsqrt.f32 %v713_v11  ;;  %v666_v55 = vmul.f32 0.0078125, %v577_v60  ;;  %v665_v23 = vmul.f32 0.0078125, %v575_v56 }
 0x1a6   : > { %1779 = vrsqrt.f32 %v712_v29  ;;  %v861_v8 = vmul.f32 %v2754_v48, %v805_v62 }
 0x1a7   : > { %v1770_v14 = vpop.eup %1769  ;;  %v715_v44 = vadd.f32 1e-05, %v666_v55  ;;  %v714_v42 = vadd.f32 1e-05, %v665_v23 }
 0x1a8   : > { %v1772_v41 = vpop.eup %1771  ;;  %v807_v63 = vmul.f32 %v1770_v14, %v2465_v46  ;;  %v581_v36 = vpop.xlane.xlu1 %580  ;;  %v917_v62 = vadd.f32 %v2758_v50, %v861_v8 }
 0x1a9   : > { %v579_v61 = vpop.xlane.xlu0 %578  ;;  %v806_v47 = vmul.f32 %v1772_v41, %v2471_v58  ;;  %1781 = vrsqrt.f32 %v715_v44  ;;  %v668_v51 = vmul.f32 0.0078125, %v581_v36 }
 0x1aa   : > { %v667_v45 = vmul.f32 0.0078125, %v579_v61  ;;  %1783 = vrsqrt.f32 %v714_v42  ;;  %v863_v46 = vmul.f32 %v2754_v48, %v807_v63 }
 0x1ab   : > { %v1774_v11 = vpop.eup %1773  ;;  %v862_v29 = vmul.f32 %v2754_v48, %v806_v47  ;;  %v717_v60 = vadd.f32 1e-05, %v668_v51 }
 0x1ac   : > { %v716_v56 = vadd.f32 1e-05, %v667_v45  ;;  %v1776_v55 = vpop.eup %1775  ;;  %v809_v23 = vmul.f32 %v1774_v11, %v2483_v0  ;;  %v585_v14 = vpop.xlane.xlu1 %584  ;;  %v919_v63 = vadd.f32 %v2758_v50, %v863_v46 }
 0x1ad   : > { %v583_v54 = vpop.xlane.xlu0 %582  ;;  %v918_v58 = vadd.f32 %v2758_v50, %v862_v29  ;;  %v808_v44 = vmul.f32 %v1776_v55, %v2475_v2  ;;  %1785 = vrsqrt.f32 %v717_v60  ;;  %v670_v42 = vmul.f32 0.0078125, %v585_v14 }
 0x1ae   : > { %1787 = vrsqrt.f32 %v716_v56  ;;  %v669_v41 = vmul.f32 0.0078125, %v583_v54  ;;  %v865_v0 = vmul.f32 %v2754_v48, %v809_v23 }
 0x1af   : > { %v1778_v36 = vpop.eup %1777  ;;  %v1531_v61 = vpack.c.bf16 %v918_v58, %v917_v62  ;;  %v864_v47 = vmul.f32 %v2754_v48, %v808_v44  ;;  %v719_v8 = vadd.f32 1e-05, %v670_v42 }
 0x1b0   : > { %v1780_v51 = vpop.eup %1779  ;;  %v811_v45 = vmul.f32 %v1778_v36, %v2495_v7  ;;  %v718_v11 = vadd.f32 1e-05, %v669_v41  ;;  %v589_v29 = vpop.xlane.xlu1 %588  ;;  %v921_v58 = vadd.f32 %v2758_v50, %v865_v0 }
 0x1b1   : > { %v587_v2 = vpop.xlane.xlu0 %586  ;;  %1532 = vst [vmem:[%s2773_s23] sm:$0xff] %v1531_v61   ;;  %v920_v54 = vadd.f32 %v2758_v50, %v864_v47  ;;  %v810_v60 = vmul.f32 %v1780_v51, %v2487_v1  ;;  %1789 = vrsqrt.f32 %v719_v8  ;;  %v672_v56 = vmul.f32 0.0078125, %v589_v29 }
 0x1b2   : > { %1791 = vrsqrt.f32 %v718_v11  ;;  %v671_v55 = vmul.f32 0.0078125, %v587_v2  ;;  %v867_v44 = vmul.f32 %v2754_v48, %v811_v45 }
 0x1b3   : > { %v1782_v62 = vpop.eup %1781  ;;  %v1536_v46 = vpack.c.bf16 %v920_v54, %v919_v63  ;;  %v866_v7 = vmul.f32 %v2754_v48, %v810_v60  ;;  %v721_v23 = vadd.f32 1e-05, %v672_v56 }
 0x1b4   : > { %v1784_v14 = vpop.eup %1783  ;;  %v813_v42 = vmul.f32 %v1782_v62, %v2507_v10  ;;  %v720_v41 = vadd.f32 1e-05, %v671_v55  ;;  %v593_v36 = vpop.xlane.xlu1 %592  ;;  %v923_v10 = vadd.f32 %v2758_v50, %v867_v44 }
 0x1b5   : > { %v591_v1 = vpop.xlane.xlu0 %590  ;;  %1671 = vst [vmem:[%s2773_s23 + $0x8] sm:$0xff] %v1536_v46   ;;  %v922_v61 = vadd.f32 %v2758_v50, %v866_v7  ;;  %v812_v47 = vmul.f32 %v1784_v14, %v2499_v6  ;;  %1793 = vrsqrt.f32 %v721_v23  ;;  %v674_v8 = vmul.f32 0.0078125, %v593_v36 }
 0x1b6   : > { %1795 = vrsqrt.f32 %v720_v41  ;;  %v673_v51 = vmul.f32 0.0078125, %v591_v1  ;;  %v869_v2 = vmul.f32 %v2754_v48, %v813_v42 }
 0x1b7   : > { %v1786_v63 = vpop.eup %1785  ;;  %v1541_v11 = vpack.c.bf16 %v922_v61, %v921_v58  ;;  %v868_v0 = vmul.f32 %v2754_v48, %v812_v47  ;;  %v723_v45 = vadd.f32 1e-05, %v674_v8 }
 0x1b8   : > { %v1788_v29 = vpop.eup %1787  ;;  %v815_v54 = vmul.f32 %v1786_v63, %v2519_v13  ;;  %v722_v60 = vadd.f32 1e-05, %v673_v51  ;;  %v597_v56 = vpop.xlane.xlu1 %596  ;;  %v925_v13 = vadd.f32 %v2758_v50, %v869_v2 }
 0x1b9   : > { %v595_v6 = vpop.xlane.xlu0 %594  ;;  %1672 = vst [vmem:[%s2773_s23 + $0x10] sm:$0xff] %v1541_v11   ;;  %v924_v55 = vadd.f32 %v2758_v50, %v868_v0  ;;  %v814_v62 = vmul.f32 %v1788_v29, %v2511_v9  ;;  %1797 = vrsqrt.f32 %v723_v45  ;;  %v676_v46 = vmul.f32 0.0078125, %v597_v56 }
 0x1ba   : > { %1799 = vrsqrt.f32 %v722_v60  ;;  %v675_v7 = vmul.f32 0.0078125, %v595_v6  ;;  %v871_v41 = vmul.f32 %v2754_v48, %v815_v54 }
 0x1bb   : > { %v1790_v23 = vpop.eup %1789  ;;  %v1546_v14 = vpack.c.bf16 %v924_v55, %v923_v10  ;;  %v870_v58 = vmul.f32 %v2754_v48, %v814_v62  ;;  %v725_v44 = vadd.f32 1e-05, %v676_v46 }
 0x1bc   : > { %v1792_v42 = vpop.eup %1791  ;;  %v817_v36 = vmul.f32 %v1790_v23, %v2531_v16  ;;  %v724_v1 = vadd.f32 1e-05, %v675_v7  ;;  %v601_v61 = vpop.xlane.xlu1 %600  ;;  %v927_v16 = vadd.f32 %v2758_v50, %v871_v41 }
 0x1bd   : > { %v599_v9 = vpop.xlane.xlu0 %598  ;;  %1673 = vst [vmem:[%s2773_s23 + $0x18] sm:$0xff] %v1546_v14   ;;  %v926_v47 = vadd.f32 %v2758_v50, %v870_v58  ;;  %v816_v8 = vmul.f32 %v1792_v42, %v2523_v12  ;;  %1801 = vrsqrt.f32 %v725_v44  ;;  %v678_v51 = vmul.f32 0.0078125, %v601_v61 }
 0x1be   : > { %1803 = vrsqrt.f32 %v724_v1  ;;  %v677_v63 = vmul.f32 0.0078125, %v599_v9  ;;  %v873_v2 = vmul.f32 %v2754_v48, %v817_v36 }
 0x1bf   : > { %v1794_v11 = vpop.eup %1793  ;;  %v1551_v0 = vpack.c.bf16 %v926_v47, %v925_v13  ;;  %v872_v45 = vmul.f32 %v2754_v48, %v816_v8  ;;  %v727_v29 = vadd.f32 1e-05, %v678_v51 }
 0x1c0   : > { %v1796_v10 = vpop.eup %1795  ;;  %v819_v54 = vmul.f32 %v1794_v11, %v2543_v19  ;;  %v726_v60 = vadd.f32 1e-05, %v677_v63  ;;  %v605_v56 = vpop.xlane.xlu1 %604  ;;  %v929_v19 = vadd.f32 %v2758_v50, %v873_v2 }
 0x1c1   : > { %v603_v12 = vpop.xlane.xlu0 %602  ;;  %1674 = vst [vmem:[%s2773_s23 + $0x20] sm:$0xff] %v1551_v0   ;;  %v928_v6 = vadd.f32 %v2758_v50, %v872_v45  ;;  %v818_v55 = vmul.f32 %v1796_v10, %v2535_v15  ;;  %1805 = vrsqrt.f32 %v727_v29  ;;  %v680_v62 = vmul.f32 0.0078125, %v605_v56 }
 0x1c2   : > { %1807 = vrsqrt.f32 %v726_v60  ;;  %v679_v46 = vmul.f32 0.0078125, %v603_v12  ;;  %v875_v42 = vmul.f32 %v2754_v48, %v819_v54 }
 0x1c3   : > { %v1798_v7 = vpop.eup %1797  ;;  %v1556_v23 = vpack.c.bf16 %v928_v6, %v927_v16  ;;  %v874_v14 = vmul.f32 %v2754_v48, %v818_v55  ;;  %v729_v58 = vadd.f32 1e-05, %v680_v62 }
 0x1c4   : > { %v1800_v44 = vpop.eup %1799  ;;  %v821_v13 = vmul.f32 %v1798_v7, %v2555_v22  ;;  %v728_v41 = vadd.f32 1e-05, %v679_v46  ;;  %v609_v36 = vpop.xlane.xlu1 %608  ;;  %v931_v22 = vadd.f32 %v2758_v50, %v875_v42 }
 0x1c5   : > { %v607_v15 = vpop.xlane.xlu0 %606  ;;  %1675 = vst [vmem:[%s2773_s23 + $0x28] sm:$0xff] %v1556_v23   ;;  %v930_v1 = vadd.f32 %v2758_v50, %v874_v14  ;;  %v820_v61 = vmul.f32 %v1800_v44, %v2547_v18  ;;  %1809 = vrsqrt.f32 %v729_v58  ;;  %v682_v9 = vmul.f32 0.0078125, %v609_v36 }
 0x1c6   : > { %1811 = vrsqrt.f32 %v728_v41  ;;  %v681_v47 = vmul.f32 0.0078125, %v607_v15  ;;  %v877_v45 = vmul.f32 %v2754_v48, %v821_v13 }
 0x1c7   : > { %v1802_v8 = vpop.eup %1801  ;;  %v1561_v51 = vpack.c.bf16 %v930_v1, %v929_v19  ;;  %v876_v63 = vmul.f32 %v2754_v48, %v820_v61  ;;  %v731_v11 = vadd.f32 1e-05, %v682_v9 }
 0x1c8   : > { %v1804_v0 = vpop.eup %1803  ;;  %v823_v29 = vmul.f32 %v1802_v8, %v2567_v25  ;;  %v730_v10 = vadd.f32 1e-05, %v681_v47  ;;  %v613_v16 = vpop.xlane.xlu1 %612  ;;  %v933_v25 = vadd.f32 %v2758_v50, %v877_v45 }
 0x1c9   : > { %v611_v18 = vpop.xlane.xlu0 %610  ;;  %1676 = vst [vmem:[%s2773_s23 + $0x30] sm:$0xff] %v1561_v51   ;;  %v932_v2 = vadd.f32 %v2758_v50, %v876_v63  ;;  %v822_v54 = vmul.f32 %v1804_v0, %v2559_v21  ;;  %1813 = vrsqrt.f32 %v731_v11  ;;  %v684_v60 = vmul.f32 0.0078125, %v613_v16 }
 0x1ca   : > { %1815 = vrsqrt.f32 %v730_v10  ;;  %v683_v56 = vmul.f32 0.0078125, %v611_v18  ;;  %v879_v7 = vmul.f32 %v2754_v48, %v823_v29 }
 0x1cb   : > { %v1806_v12 = vpop.eup %1805  ;;  %v1566_v6 = vpack.c.bf16 %v932_v2, %v931_v22  ;;  %v878_v55 = vmul.f32 %v2754_v48, %v822_v54  ;;  %v733_v62 = vadd.f32 1e-05, %v684_v60 }
 0x1cc   : > { %v1808_v46 = vpop.eup %1807  ;;  %v825_v23 = vmul.f32 %v1806_v12, %v2579_v28  ;;  %v732_v14 = vadd.f32 1e-05, %v683_v56  ;;  %v617_v58 = vpop.xlane.xlu1 %616  ;;  %v935_v28 = vadd.f32 %v2758_v50, %v879_v7 }
 0x1cd   : > { %v615_v21 = vpop.xlane.xlu0 %614  ;;  %1677 = vst [vmem:[%s2773_s23 + $0x38] sm:$0xff] %v1566_v6   ;;  %v934_v44 = vadd.f32 %v2758_v50, %v878_v55  ;;  %v824_v19 = vmul.f32 %v1808_v46, %v2571_v24  ;;  %1817 = vrsqrt.f32 %v733_v62  ;;  %v686_v42 = vmul.f32 0.0078125, %v617_v58 }
 0x1ce   : > { %1819 = vrsqrt.f32 %v732_v14  ;;  %v685_v13 = vmul.f32 0.0078125, %v615_v21  ;;  %v881_v9 = vmul.f32 %v2754_v48, %v825_v23 }
 0x1cf   : > { %v1810_v41 = vpop.eup %1809  ;;  %v1571_v36 = vpack.c.bf16 %v934_v44, %v933_v25  ;;  %v880_v15 = vmul.f32 %v2754_v48, %v824_v19  ;;  %v735_v1 = vadd.f32 1e-05, %v686_v42 }
 0x1d0   : > { %v1812_v61 = vpop.eup %1811  ;;  %v827_v47 = vmul.f32 %v1810_v41, %v2591_v31  ;;  %v734_v8 = vadd.f32 1e-05, %v685_v13  ;;  %v621_v51 = vpop.xlane.xlu1 %620  ;;  %v937_v31 = vadd.f32 %v2758_v50, %v881_v9 }
 0x1d1   : > { %v619_v24 = vpop.xlane.xlu0 %618  ;;  %1678 = vst [vmem:[%s2773_s23 + $0x40] sm:$0xff] %v1571_v36   ;;  %v936_v63 = vadd.f32 %v2758_v50, %v880_v15  ;;  %v826_v11 = vmul.f32 %v1812_v61, %v2583_v27  ;;  %1821 = vrsqrt.f32 %v735_v1  ;;  %v688_v0 = vmul.f32 0.0078125, %v621_v51 }
 0x1d2   : > { %1823 = vrsqrt.f32 %v734_v8  ;;  %v687_v22 = vmul.f32 0.0078125, %v619_v24  ;;  %v883_v2 = vmul.f32 %v2754_v48, %v827_v47 }
 0x1d3   : > { %v1814_v45 = vpop.eup %1813  ;;  %v1576_v29 = vpack.c.bf16 %v936_v63, %v935_v28  ;;  %v882_v10 = vmul.f32 %v2754_v48, %v826_v11  ;;  %v737_v16 = vadd.f32 1e-05, %v688_v0 }
 0x1d4   : > { %v1816_v18 = vpop.eup %1815  ;;  %v829_v54 = vmul.f32 %v1814_v45, %v2603_v34  ;;  %v736_v60 = vadd.f32 1e-05, %v687_v22  ;;  %v625_v56 = vpop.xlane.xlu1 %624  ;;  %v939_v34 = vadd.f32 %v2758_v50, %v883_v2 }
 0x1d5   : > { %v623_v27 = vpop.xlane.xlu0 %622  ;;  %1679 = vst [vmem:[%s2773_s23 + $0x48] sm:$0xff] %v1576_v29   ;;  %v938_v12 = vadd.f32 %v2758_v50, %v882_v10  ;;  %v828_v6 = vmul.f32 %v1816_v18, %v2595_v30  ;;  %1825 = vrsqrt.f32 %v737_v16  ;;  %v690_v55 = vmul.f32 0.0078125, %v625_v56 }
 0x1d6   : > { %1827 = vrsqrt.f32 %v736_v60  ;;  %v689_v62 = vmul.f32 0.0078125, %v623_v27  ;;  %v885_v58 = vmul.f32 %v2754_v48, %v829_v54 }
 0x1d7   : > { %v1818_v46 = vpop.eup %1817  ;;  %v1581_v25 = vpack.c.bf16 %v938_v12, %v937_v31  ;;  %v884_v7 = vmul.f32 %v2754_v48, %v828_v6  ;;  %v739_v23 = vadd.f32 1e-05, %v690_v55 }
 0x1d8   : > { %v1820_v14 = vpop.eup %1819  ;;  %v831_v21 = vmul.f32 %v1818_v46, %v2615_v37  ;;  %v738_v44 = vadd.f32 1e-05, %v689_v62  ;;  %v629_v19 = vpop.xlane.xlu1 %628  ;;  %v941_v37 = vadd.f32 %v2758_v50, %v885_v58 }
 0x1d9   : > { %v627_v30 = vpop.xlane.xlu0 %626  ;;  %1680 = vst [vmem:[%s2773_s23 + $0x50] sm:$0xff] %v1581_v25   ;;  %v940_v42 = vadd.f32 %v2758_v50, %v884_v7  ;;  %v830_v13 = vmul.f32 %v1820_v14, %v2607_v33  ;;  %1829 = vrsqrt.f32 %v739_v23  ;;  %v692_v41 = vmul.f32 0.0078125, %v629_v19 }
 0x1da   : > { %1831 = vrsqrt.f32 %v738_v44  ;;  %v691_v36 = vmul.f32 0.0078125, %v627_v30  ;;  %v887_v47 = vmul.f32 %v2754_v48, %v831_v21 }
 0x1db   : > { %v1822_v15 = vpop.eup %1821  ;;  %v1586_v1 = vpack.c.bf16 %v940_v42, %v939_v34  ;;  %v886_v61 = vmul.f32 %v2754_v48, %v830_v13  ;;  %v741_v28 = vadd.f32 1e-05, %v692_v41 }
 0x1dc   : > { %v1824_v9 = vpop.eup %1823  ;;  %v833_v8 = vmul.f32 %v1822_v15, %v2627_v40  ;;  %v740_v51 = vadd.f32 1e-05, %v691_v36  ;;  %v633_v24 = vpop.xlane.xlu1 %632  ;;  %v943_v40 = vadd.f32 %v2758_v50, %v887_v47 }
 0x1dd   : > { %v631_v33 = vpop.xlane.xlu0 %630  ;;  %1681 = vst [vmem:[%s2773_s23 + $0x58] sm:$0xff] %v1586_v1   ;;  %v942_v63 = vadd.f32 %v2758_v50, %v886_v61  ;;  %v832_v11 = vmul.f32 %v1824_v9, %v2619_v38  ;;  %1833 = vrsqrt.f32 %v741_v28  ;;  %v694_v0 = vmul.f32 0.0078125, %v633_v24 }
 0x1de   : > { %1835 = vrsqrt.f32 %v740_v51  ;;  %v693_v22 = vmul.f32 0.0078125, %v631_v33  ;;  %v889_v31 = vmul.f32 %v2754_v48, %v833_v8 }
 0x1df   : > { %v1826_v45 = vpop.eup %1825  ;;  %v1591_v29 = vpack.c.bf16 %v942_v63, %v941_v37  ;;  %v888_v10 = vmul.f32 %v2754_v48, %v832_v11  ;;  %v743_v16 = vadd.f32 1e-05, %v694_v0 }
 0x1e0   : > { %v1828_v18 = vpop.eup %1827  ;;  %v835_v2 = vmul.f32 %v1826_v45, %v2639_v52  ;;  %v742_v54 = vadd.f32 1e-05, %v693_v22  ;;  %v637_v60 = vpop.xlane.xlu1 %636  ;;  %v945_v52 = vadd.f32 %v2758_v50, %v889_v31 }
 0x1e1   : > { %v635_v38 = vpop.xlane.xlu0 %634  ;;  %1682 = vst [vmem:[%s2773_s23 + $0x60] sm:$0xff] %v1591_v29   ;;  %v944_v56 = vadd.f32 %v2758_v50, %v888_v10  ;;  %v834_v27 = vmul.f32 %v1828_v18, %v2631_v4  ;;  %1837 = vrsqrt.f32 %v743_v16  ;;  %v696_v12 = vmul.f32 0.0078125, %v637_v60 }
 0x1e2   : > { %1839 = vrsqrt.f32 %v742_v54  ;;  %v695_v6 = vmul.f32 0.0078125, %v635_v38  ;;  %v891_v23 = vmul.f32 %v2754_v48, %v835_v2 }
 0x1e3   : > { %v1830_v55 = vpop.eup %1829  ;;  %v1596_v62 = vpack.c.bf16 %v944_v56, %v943_v40  ;;  %v890_v46 = vmul.f32 %v2754_v48, %v834_v27  ;;  %v745_v25 = vadd.f32 1e-05, %v696_v12 }
 0x1e4   : > { %v1832_v7 = vpop.eup %1831  ;;  %v837_v14 = vmul.f32 %v1830_v55, %v2651_v53  ;;  %v744_v34 = vadd.f32 1e-05, %v695_v6  ;;  %v641_v58 = vpop.xlane.xlu1 %640  ;;  %v947_v53 = vadd.f32 %v2758_v50, %v891_v23 }
 0x1e5   : > { %v639_v4 = vpop.xlane.xlu0 %638  ;;  %1683 = vst [vmem:[%s2773_s23 + $0x68] sm:$0xff] %v1596_v62   ;;  %v946_v21 = vadd.f32 %v2758_v50, %v890_v46  ;;  %v836_v44 = vmul.f32 %v1832_v7, %v2643_v35  ;;  %1841 = vrsqrt.f32 %v745_v25  ;;  %v698_v19 = vmul.f32 0.0078125, %v641_v58 }
 0x1e6   : > { %1843 = vrsqrt.f32 %v744_v34  ;;  %v697_v30 = vmul.f32 0.0078125, %v639_v4  ;;  %v893_v1 = vmul.f32 %v2754_v48, %v837_v14 }
 0x1e7   : > { %v1834_v42 = vpop.eup %1833  ;;  %v1601_v13 = vpack.c.bf16 %v946_v21, %v945_v52  ;;  %v892_v41 = vmul.f32 %v2754_v48, %v836_v44  ;;  %v747_v36 = vadd.f32 1e-05, %v698_v19 }
 0x1e8   : > { %v1836_v15 = vpop.eup %1835  ;;  %v839_v61 = vmul.f32 %v1834_v42, %v2663_v32  ;;  %v746_v28 = vadd.f32 1e-05, %v697_v30  ;;  %v645_v9 = vpop.xlane.xlu1 %644  ;;  %v949_v32 = vadd.f32 %v2758_v50, %v893_v1 }
 0x1e9   : > { %v643_v35 = vpop.xlane.xlu0 %642  ;;  %1684 = vst [vmem:[%s2773_s23 + $0x70] sm:$0xff] %v1601_v13   ;;  %v948_v37 = vadd.f32 %v2758_v50, %v892_v41  ;;  %v838_v47 = vmul.f32 %v1836_v15, %v2655_v59  ;;  %1845 = vrsqrt.f32 %v747_v36  ;;  %v700_v8 = vmul.f32 0.0078125, %v645_v9 }
 0x1ea   : > { %1847 = vrsqrt.f32 %v746_v28  ;;  %v699_v51 = vmul.f32 0.0078125, %v643_v35  ;;  %v895_v22 = vmul.f32 %v2754_v48, %v839_v61 }
 0x1eb   : > { %v1838_v24 = vpop.eup %1837  ;;  %v1606_v33 = vpack.c.bf16 %v948_v37, %v947_v53  ;;  %v894_v63 = vmul.f32 %v2754_v48, %v838_v47  ;;  %v749_v11 = vadd.f32 1e-05, %v700_v8 }
 0x1ec   : > { %v1840_v0 = vpop.eup %1839  ;;  %v841_v45 = vmul.f32 %v1838_v24, %v2675_v26  ;;  %v748_v29 = vadd.f32 1e-05, %v699_v51  ;;  %v649_v10 = vpop.xlane.xlu1 %648  ;;  %v951_v26 = vadd.f32 %v2758_v50, %v895_v22 }
 0x1ed   : > { %v647_v59 = vpop.xlane.xlu0 %646  ;;  %1685 = vst [vmem:[%s2773_s23 + $0x78] sm:$0xff] %v1606_v33   ;;  %v950_v16 = vadd.f32 %v2758_v50, %v894_v63  ;;  %v840_v18 = vmul.f32 %v1840_v0, %v2667_v43  ;;  %1849 = vrsqrt.f32 %v749_v11  ;;  %v702_v40 = vmul.f32 0.0078125, %v649_v10  ;;  %v3060_v0 = vld [vmem:[#allocation12_spill] sm:$0xff] }
 0x1ee   : > { %1851 = vrsqrt.f32 %v748_v29  ;;  %v701_v31 = vmul.f32 0.0078125, %v647_v59  ;;  %v897_v27 = vmul.f32 %v2754_v48, %v841_v45 }
 0x1ef   : > { %v1842_v2 = vpop.eup %1841  ;;  %v1611_v54 = vpack.c.bf16 %v950_v16, %v949_v32  ;;  %v896_v60 = vmul.f32 %v2754_v48, %v840_v18  ;;  %v751_v38 = vadd.f32 1e-05, %v702_v40  ;;  %v3061_v18 = vld [vmem:[#allocation14_spill] sm:$0xff] }
 0x1f0   : > { %v1844_v56 = vpop.eup %1843  ;;  %v843_v12 = vmul.f32 %v1842_v2, %v2687_v39  ;;  %v750_v6 = vadd.f32 1e-05, %v701_v31  ;;  %v653_v55 = vpop.xlane.xlu1 %652  ;;  %v953_v39 = vadd.f32 %v2758_v50, %v897_v27  ;;  %v3062_v31 = vld [vmem:[#allocation13_spill] sm:$0xff] }
 0x1f1   : > { %v651_v43 = vpop.xlane.xlu0 %650  ;;  %1686 = vst [vmem:[%s2773_s23 + $0x80] sm:$0xff] %v1611_v54   ;;  %v952_v62 = vadd.f32 %v2758_v50, %v896_v60  ;;  %v842_v46 = vmul.f32 %v1844_v56, %v2679_v17  ;;  %1853 = vrsqrt.f32 %v751_v38  ;;  %v704_v25 = vmul.f32 0.0078125, %v653_v55  ;;  %v3063_v56 = vld [vmem:[#allocation16_spill] sm:$0xff]  ;;  %v3064_v55 = vld [vmem:[#allocation15_spill] sm:$0xff] }
 0x1f2   : > { %1855 = vrsqrt.f32 %v750_v6  ;;  %v703_v7 = vmul.f32 0.0078125, %v651_v43  ;;  %v899_v4 = vmul.f32 %v2754_v48, %v843_v12 }
 0x1f3   : > { %v1846_v52 = vpop.eup %1845  ;;  %v1616_v23 = vpack.c.bf16 %v952_v62, %v951_v26  ;;  %v898_v14 = vmul.f32 %v2754_v48, %v842_v46  ;;  %v753_v34 = vadd.f32 1e-05, %v704_v25 }
 0x1f4   : > { %v1848_v58 = vpop.eup %1847  ;;  %v845_v21 = vmul.f32 %v1846_v52, %v2699_v3  ;;  %v752_v44 = vadd.f32 1e-05, %v703_v7  ;;  %v657_v19 = vpop.xlane.xlu1 %656  ;;  %v955_v3 = vadd.f32 %v2758_v50, %v899_v4 }
 0x1f5   : > { %v655_v17 = vpop.xlane.xlu0 %654  ;;  %1687 = vst [vmem:[%s2773_s23 + $0x88] sm:$0xff] %v1616_v23   ;;  %v954_v30 = vadd.f32 %v2758_v50, %v898_v14  ;;  %v844_v42 = vmul.f32 %v1848_v58, %v2691_v5  ;;  %1857 = vrsqrt.f32 %v753_v34  ;;  %v706_v13 = vmul.f32 0.0078125, %v657_v19 }
 0x1f6   : > { %1859 = vrsqrt.f32 %v752_v44  ;;  %v705_v41 = vmul.f32 0.0078125, %v655_v17  ;;  %v901_v35 = vmul.f32 %v2754_v48, %v845_v21 }
 0x1f7   : > { %v1850_v36 = vpop.eup %1849  ;;  %v1621_v15 = vpack.c.bf16 %v954_v30, %v953_v39  ;;  %v900_v53 = vmul.f32 %v2754_v48, %v844_v42  ;;  %v755_v1 = vadd.f32 1e-05, %v706_v13 }
 0x1f8   : > { %v1852_v61 = vpop.eup %1851  ;;  %v847_v28 = vmul.f32 %v1850_v36, %v2711_v20  ;;  %v754_v9 = vadd.f32 1e-05, %v705_v41  ;;  %v957_v20 = vadd.f32 %v2758_v50, %v901_v35 }
 0x1f9   : > { %1688 = vst [vmem:[%s2773_s23 + $0x90] sm:$0xff] %v1621_v15   ;;  %v956_v5 = vadd.f32 %v2758_v50, %v900_v53  ;;  %v846_v37 = vmul.f32 %v1852_v61, %v2703_v49  ;;  %1861 = vrsqrt.f32 %v755_v1 }
 0x1fa   : > { %1863 = vrsqrt.f32 %v754_v9  ;;  %v903_v33 = vmul.f32 %v2754_v48, %v847_v28 }
 0x1fb   : > { %v1854_v47 = vpop.eup %1853  ;;  %v1626_v8 = vpack.c.bf16 %v956_v5, %v955_v3  ;;  %v902_v51 = vmul.f32 %v2754_v48, %v846_v37 }
 0x1fc   : > { %v1856_v24 = vpop.eup %1855  ;;  %v849_v11 = vmul.f32 %v1854_v47, %v2723_v57  ;;  %v959_v10 = vadd.f32 %v2758_v50, %v903_v33 }
 0x1fd   : > { %1689 = vst [vmem:[%s2773_s23 + $0x98] sm:$0xff] %v1626_v8   ;;  %v958_v63 = vadd.f32 %v2758_v50, %v902_v51  ;;  %v848_v32 = vmul.f32 %v1856_v24, %v3060_v0 }
 0x1fe   : > { %v905_v59 = vmul.f32 %v2754_v48, %v849_v11 }
 0x1ff   : > { %v1858_v49 = vpop.eup %1857  ;;  %v1631_v22 = vpack.c.bf16 %v958_v63, %v957_v20  ;;  %v904_v45 = vmul.f32 %v2754_v48, %v848_v32 }
 0x200   : > { %v1860_v29 = vpop.eup %1859  ;;  %v851_v40 = vmul.f32 %v1858_v49, %v3061_v18  ;;  %v961_v27 = vadd.f32 %v2758_v50, %v905_v59 }
 0x201   : > { %1690 = vst [vmem:[%s2773_s23 + $0xa0] sm:$0xff] %v1631_v22   ;;  %v960_v16 = vadd.f32 %v2758_v50, %v904_v45  ;;  %v850_v57 = vmul.f32 %v1860_v29, %v3062_v31 }
 0x202   : > { %v907_v12 = vmul.f32 %v2754_v48, %v851_v40 }
 0x203   : > { %v1862_v2 = vpop.eup %1861  ;;  %v1636_v54 = vpack.c.bf16 %v960_v16, %v959_v10  ;;  %v906_v60 = vmul.f32 %v2754_v48, %v850_v57 }
 0x204   : > { %v1864_v38 = vpop.eup %1863  ;;  %v853_v26 = vmul.f32 %v1862_v2, %v3063_v56  ;;  %v963_v52 = vadd.f32 %v2758_v50, %v907_v12 }
 0x205   : > { %1691 = vst [vmem:[%s2773_s23 + $0xa8] sm:$0xff] %v1636_v54   ;;  %v962_v6 = vadd.f32 %v2758_v50, %v906_v60  ;;  %v852_v43 = vmul.f32 %v1864_v38, %v3064_v55 }
 0x206   : > { %v909_v62 = vmul.f32 %v2754_v48, %v853_v26 }
 0x207   : > { %v1641_v46 = vpack.c.bf16 %v962_v6, %v961_v27  ;;  %v908_v25 = vmul.f32 %v2754_v48, %v852_v43 }
 0x208   : > { %v965_v7 = vadd.f32 %v2758_v50, %v909_v62 }
 0x209   : > { %1692 = vst [vmem:[%s2773_s23 + $0xb0] sm:$0xff] %v1641_v46   ;;  %v964_v23 = vadd.f32 %v2758_v50, %v908_v25 }
 0x20a   : > { %v1430_v14 = vpack.c.bf16 %v965_v7, %v965_v7 }
 0x20b   : > { %v1646_v48 = vpack.c.bf16 %v964_v23, %v963_v52 }
 0x20c   : > { %1211 = vst [vmem:[%s2773_s23 + $0xc0] sm:$0xf] %v1430_v14 }
 0x20d   : > { %1693 = vst [vmem:[%s2773_s23 + $0xb8] sm:$0xff] %v1646_v48  }
 0x20e   : > { %1964 = shalt.err (!%p1961_p6)
}
 0x20f   : > { %s1965_s6 = scalar_lea.hbm %s2936_s11, 3136  ;;  %s1969_s29 = scalar_lea.hbm %s2987_s3, 6272 }
 0x210   : > { %p1966_p12 = scmp.ne.s32.totalorder %s2936_s11, %s1965_s6  ;;  %p1970_p11 = scmp.lt.u32.totalorder %s2936_s11, %s2987_s3 }
 0x211   : > { %p1971_p7 = scmp.lt.u32.totalorder %s1969_s29, %s1965_s6  ;;  %p1973_p8 = scmp.lt.u32.totalorder %s1965_s6, %s2936_s11 }
 0x212   : > { %p1967_p13 = pnand %p1966_p12, %p3065_p4 }
 0x213   : > { %p1972_p3 = por %p1971_p7, %p1970_p11 }
 0x214   : > { %p1968_p1 = pneg %p1967_p13 }
 0x215   : > { %p1974_p5 = por %p1973_p8, %p1972_p3 }
 0x217   : > { %p1975_p10 = pnand %p1974_p5, %p1968_p1 }
 0x219   : > { %1978 = shalt.err (!%p1975_p10)
}
 0x21a   : > { %s2029_s19 = smov 64   ;;  %s2030_s23 = smov 4  }
 0x21b   : > { %1706 = dma.vmem_to_hbm [thread:$0]  (%p3065_p4), %s2938_s30, 3136, %s2936_s11, %s1213_s16, %s2029_s19, %s2029_s19, %s2030_s23  }
 0x21c PF: > { %s1241_s26 = sand.u32 1, %s2009_s12   ;;  %p3066_p2 = scmp.ne.s32.totalorder %s3023_s25, 0 }
 0x21d   : > { %p3067_p0 = scmp.ge.s32.totalorder %s2021_s15, 2  ;;  %s1242_s9 = scalar_lea.sflag [#allocation4], %s1241_s26 }
 0x21f   : > { %p1720_p9 = pnand %p3067_p0, %p3066_p2 }
 0x221   : > { %2004 = dma.done.wait (!%p1720_p9), %s1242_s9, 3136  }
 0x222   : > { %2006 = vsyncadd (!%p1720_p9), %s1242_s9, 4294964160  ;;  %p17_p6 = scmp.ge.s32.totalorder %s2076_s18, 4   ;;  %s3068_s12 = smov %s2013_s13 }
 0x223   : > { %s3069_s13 = smov %s2017_s14  ;;  %s3070_s14 = smov %s2088_s21 }
 0x224   : > { %s3071_s15 = smov %s2076_s18  ;;  %19 = sbr.rel (!%p17_p6) target bundleno = 6 (0x6), region = 85 }
 0x22b   :  { %1247 = vsyncpa [#allocation3], 1 }
 0x22c   :  { %1249 = vsyncpa [#allocation3 + $0x1], 1 }
 0x22d   :  { %1250 = vsyncpa [#allocation6], 1 }
 0x22e   :  { %1251 = vsyncpa [#allocation4], 1 }
 0x22f   :  { %1253 = vsyncpa [#allocation4 + $0x1], 1 }

// kernel: _lambda_.3
= control target key start
LH: loop header
LB: loop body
LE: loop exit
PB: predicated region body
PF: predicated region fallthrough
CT: control target
= control target key end

     0   :  { %s13087_s0 = inlined_call_operand.hbm [shape: bf16[784,128], index: 0, kind: input, shape index: {}]   ;;  %s13088_s1 = inlined_call_operand.hbm [shape: bf16[784,384], index: 1, kind: input, shape index: {}]   ;;  %s13089_s2 = inlined_call_operand.hbm [shape: bf16[384,128], index: 2, kind: input, shape index: {}]   ;;  %s13090_s3 = inlined_call_operand.hbm [shape: f32[1,128], index: 3, kind: input, shape index: {}]   ;;  %s13091_s4 = inlined_call_operand.hbm [shape: f32[1,128], index: 4, kind: input, shape index: {}]   ;;  %s13092_s5 = inlined_call_operand.hbm [shape: f32[1,128], index: 5, kind: input, shape index: {}]   ;;  %s13093_s6 = inlined_call_operand.hbm [shape: bf16[128,512], index: 6, kind: input, shape index: {}]   ;;  %s13094_s7 = inlined_call_operand.hbm [shape: f32[1,512], index: 7, kind: input, shape index: {}]   ;;  %s13095_s8 = inlined_call_operand.hbm [shape: bf16[512,128], index: 8, kind: input, shape index: {}]   ;;  %s13096_s9 = inlined_call_operand.hbm [shape: f32[1,128], index: 9, kind: input, shape index: {}]   ;;  %s13097_s10 = inlined_call_operand.hbm [shape: bf16[784,128], index: 10, kind: output, shape index: {}]  }
   0x1   :  { %13332 = sst [smem:[#allocation231_spill]] %s13087_s0 }
   0x2   :  { %13333 = sst [smem:[#allocation232_spill]] %s13089_s2 }
   0x3   :  { %13334 = sst [smem:[#allocation233_spill]] %s13090_s3 }
   0x4   :  { %13335 = sst [smem:[#allocation234_spill]] %s13091_s4 }
   0x5   :  { %13336 = sst [smem:[#allocation235_spill]] %s13092_s5 }
   0x6   :  { %13337 = sst [smem:[#allocation236_spill]] %s13093_s6 }
   0x7   :  { %13338 = sst [smem:[#allocation237_spill]] %s13097_s10 }
   0x8   :  { %15 = vsyncpa [#allocation3], 0 }
   0x9   :  { %17 = vsyncpa [#allocation3 + $0x1], 0 }
   0xa   :  { %18 = vsyncpa [#allocation6], 0 }
   0xb   :  { %20 = vsyncpa [#allocation6 + $0x1], 0 }
   0xc   :  { %21 = vsyncpa [#allocation9], 0 }
   0xd   :  { %22 = vsyncpa [#allocation12], 0 }
   0xe   :  { %23 = vsyncpa [#allocation15], 0 }
   0xf   :  { %24 = vsyncpa [#allocation18], 0 }
  0x10   :  { %25 = vsyncpa [#allocation4], 0 }
  0x11   :  { %27 = vsyncpa [#allocation4 + $0x1], 0  ;;  %s8408_s13 = smov 0   ;;  %s8410_s14 = smov 0  }
  0x12   :  { %s8412_s15 = smov 0   ;;  %s8414_s16 = smov 0  }
  0x13 LB: > { %s8331_s17 = smov [#allocation7]   ;;  %s8429_s19 = sadd.s32 4294967295, %s8329_s16   ;;  %s8329_s16 = sphi %s8414_s16, %s14260_s16   ;;  %s8325_s15 = sphi %s8412_s15, %s14259_s15   ;;  %s8321_s14 = sphi %s8410_s14, %s14258_s14   ;;  %s8317_s13 = sphi %s8408_s13, %s14257_s13  }
  0x14   : > { %s296_s18 = sshll.u32 %s8331_s17, 4  ;;  %p6358_p0 = scmp.ge.s32.totalorder %s8329_s16, 1  ;;  %s8434_s18 = int_to_ptr.vmem [resolvable:$true] %s296_s18 }
  0x15   : > { %p13100_p1 = scmp.eq.s32.totalorder %s8429_s19, 0  ;;  %p284_p2 = scmp.lt.s32.totalorder %s8329_s16, 3 }
  0x16   : > { %s8332_s22 = smov [#allocation8]   ;;  %s8333_s24 = smov [#allocation11]  }
  0x17   : > { %p8436_p3 = pnand %p6358_p0, %p284_p2  ;;  %s310_s23 = sshll.u32 %s8332_s22, 4  ;;  %s8449_s23 = int_to_ptr.vmem [resolvable:$true] %s310_s23 }
  0x18   : > { %s332_s25 = sshll.u32 %s8333_s24, 4  ;;  %s13342_s2 = sld [smem:[#allocation232_spill]]  ;;  %s8451_s25 = int_to_ptr.vmem [resolvable:$true] %s332_s25 }
  0x19   : > { %s13339_s20 = scalar_select %p8436_p3, 1, 0 }
  0x1a   : > { %p7135_p5 = pneg %p8436_p3 }
  0x1b   : > { %13340 = sst [smem:[#allocation28_spill]] %s13339_s20 }
  0x1c   : > { %p8445_p6 = pnand %p7135_p5, %p13100_p1 }
  0x1e   : > { %s7955_s28 = scalar_lea.hbm %s13342_s2, 3072  ;;  %p8461_p8 = pneg %p8445_p6 }
  0x1f   : > { %p7956_p7 = scmp.ne.s32.totalorder %s13342_s2, %s7955_s28  ;;  %p7962_p11 = scmp.lt.u32.totalorder %s7955_s28, %s13342_s2 }
  0x21   : > { %p7958_p9 = pnand %p8461_p8, %p7956_p7 }
  0x23   : > { %p7959_p10 = pneg %p7958_p9 }
  0x25   : > { %p7964_p12 = pnand %p7962_p11, %p7959_p10 }
  0x27   : > { %7967 = shalt.err (!%p7964_p12)
}
  0x28   : > { %s7968_s22 = scalar_lea.vmem %s8434_s18, 3072  ;;  %p7976_p5 = scmp.lt.s32.totalorder %s8434_s18, %s8434_s18 }
  0x29   : > { %p7969_p13 = scmp.ne.s32.totalorder %s8434_s18, %s7968_s22  ;;  %p7977_p4 = scmp.lt.s32.totalorder %s7968_s22, %s7968_s22 }
  0x2b   : > { %p7971_p0 = pnand %p7969_p13, %p8461_p8  ;;  %p7978_p7 = por %p7977_p4, %p7976_p5 }
  0x2d   : > { %p7972_p2 = pneg %p7971_p0 }
  0x2f   : > { %p7979_p9 = pnand %p7978_p7, %p7972_p2 }
  0x31   : > { %7982 = shalt.err (!%p7979_p9)
}
  0x32   : > { %s13102_s24 = smov 64   ;;  %s13104_s26 = smov 4  }
  0x33   : > { %7138 = dma.hbm_to_vmem [thread:$0]  (!%p8445_p6), %s13342_s2, 3072, %s8434_s18, [#allocation6], %s13102_s24, %s13102_s24, %s13104_s26  }
  0x34   : > { %s13344_s3 = sld [smem:[#allocation233_spill]] }
  0x3a   : > { %s7983_s12 = scalar_lea.hbm %s13344_s3, 16 }
  0x3b   : > { %p7984_p4 = scmp.ne.s32.totalorder %s13344_s3, %s7983_s12  ;;  %p7990_p12 = scmp.lt.u32.totalorder %s7983_s12, %s13344_s3 }
  0x3d   : > { %p7986_p10 = pnand %p7984_p4, %p8461_p8 }
  0x3f   : > { %p7987_p11 = pneg %p7986_p10 }
  0x41   : > { %p7992_p13 = pnand %p7990_p12, %p7987_p11 }
  0x43   : > { %7995 = shalt.err (!%p7992_p13)
}
  0x44   : > { %s7996_s18 = scalar_lea.vmem %s8449_s23, 16  ;;  %s8003_s27 = scalar_lea.vmem %s8449_s23, 32 }
  0x45   : > { %p7997_p0 = scmp.ne.s32.totalorder %s8449_s23, %s7996_s18  ;;  %p8004_p7 = scmp.lt.s32.totalorder %s8449_s23, %s8449_s23 }
  0x46   : > { %p8005_p9 = scmp.lt.s32.totalorder %s8003_s27, %s7996_s18 }
  0x47   : > { %p7999_p2 = pnand %p7997_p0, %p8461_p8 }
  0x48   : > { %p8006_p4 = por %p8005_p9, %p8004_p7 }
  0x49   : > { %p8000_p5 = pneg %p7999_p2 }
  0x4b   : > { %p8007_p10 = pnand %p8006_p4, %p8000_p5 }
  0x4d   : > { %8010 = shalt.err (!%p8007_p10)
}
  0x4e   : > { %7141 = dma.hbm_to_vmem [thread:$0]  (!%p8445_p6), %s13344_s3, 16, %s8449_s23, [#allocation9]  }
  0x4f   : > { %s13345_s5 = sld [smem:[#allocation235_spill]] }
  0x55   : > { %s8011_s30 = scalar_lea.hbm %s13345_s5, 16 }
  0x56   : > { %p8012_p11 = scmp.ne.s32.totalorder %s13345_s5, %s8011_s30  ;;  %p8018_p0 = scmp.lt.u32.totalorder %s8011_s30, %s13345_s5 }
  0x58   : > { %p8014_p12 = pnand %p8012_p11, %p8461_p8 }
  0x5a   : > { %p8015_p13 = pneg %p8014_p12 }
  0x5c   : > { %p8020_p2 = pnand %p8018_p0, %p8015_p13 }
  0x5e   : > { %8023 = shalt.err (!%p8020_p2)
}
  0x5f   : > { %s8024_s23 = scalar_lea.vmem %s8451_s25, 16  ;;  %s8031_s27 = scalar_lea.vmem %s8451_s25, 32 }
  0x60   : > { %p8025_p5 = scmp.ne.s32.totalorder %s8451_s25, %s8024_s23  ;;  %p8032_p4 = scmp.lt.s32.totalorder %s8451_s25, %s8451_s25 }
  0x61   : > { %p8033_p10 = scmp.lt.s32.totalorder %s8031_s27, %s8024_s23 }
  0x62   : > { %p8027_p7 = pnand %p8025_p5, %p8461_p8 }
  0x63   : > { %p8034_p11 = por %p8033_p10, %p8032_p4 }
  0x64   : > { %p8028_p9 = pneg %p8027_p7 }
  0x66   : > { %p8035_p12 = pnand %p8034_p11, %p8028_p9 }
  0x68   : > { %8038 = shalt.err (!%p8035_p12)
}
  0x69   : > { %7147 = dma.hbm_to_vmem [thread:$0]  (!%p8445_p6), %s13345_s5, 16, %s8451_s25, [#allocation12]  }
  0x6a   : > { %s8336_s28 = smov [#allocation14]   ;;  %s8337_s30 = smov [#allocation10]  }
  0x6b   : > { %s356_s29 = sshll.u32 %s8336_s28, 4  ;;  %s321_s12 = sshll.u32 %s8337_s30, 4  ;;  %s357_s29 = int_to_ptr.vmem [resolvable:$true] %s356_s29  ;;  %s8533_s12 = int_to_ptr.vmem [resolvable:$true] %s321_s12 }
  0x6c   : > { %s8039_s18 = scalar_lea.hbm %s13094_s7, 64 }
  0x6d   : > { %p8040_p13 = scmp.ne.s32.totalorder %s13094_s7, %s8039_s18  ;;  %p8046_p5 = scmp.lt.u32.totalorder %s8039_s18, %s13094_s7 }
  0x6f   : > { %p8042_p0 = pnand %p8040_p13, %p8461_p8 }
  0x71   : > { %p8043_p2 = pneg %p8042_p0 }
  0x73   : > { %p8048_p7 = pnand %p8046_p5, %p8043_p2 }
  0x75   : > { %8051 = shalt.err (!%p8048_p7)
}
  0x76   : > { %s8052_s20 = scalar_lea.vmem %s357_s29, 64  ;;  %p8060_p11 = scmp.lt.s32.totalorder %s357_s29, %s357_s29 }
  0x77   : > { %p8053_p9 = scmp.ne.s32.totalorder %s357_s29, %s8052_s20  ;;  %p8061_p12 = scmp.lt.s32.totalorder %s8052_s20, %s8052_s20 }
  0x79   : > { %p8055_p4 = pnand %p8053_p9, %p8461_p8  ;;  %p8062_p1 = por %p8061_p12, %p8060_p11 }
  0x7b   : > { %p8056_p10 = pneg %p8055_p4 }
  0x7d   : > { %p8063_p3 = pnand %p8062_p1, %p8056_p10 }
  0x7f   : > { %8066 = shalt.err (!%p8063_p3)
}
  0x80   : > { %7153 = dma.hbm_to_vmem [thread:$0]  (!%p8445_p6), %s13094_s7, 64, %s357_s29, [#allocation15]  }
  0x81   : > { %s13346_s4 = sld [smem:[#allocation234_spill]] }
  0x87   : > { %s8067_s18 = scalar_lea.hbm %s13346_s4, 16 }
  0x88   : > { %p8068_p13 = scmp.ne.s32.totalorder %s13346_s4, %s8067_s18  ;;  %p8074_p1 = scmp.lt.u32.totalorder %s8067_s18, %s13346_s4 }
  0x8a   : > { %p8070_p0 = pnand %p8068_p13, %p8461_p8 }
  0x8c   : > { %p8071_p2 = pneg %p8070_p0 }
  0x8e   : > { %p8076_p3 = pnand %p8074_p1, %p8071_p2 }
  0x90   : > { %8079 = shalt.err (!%p8076_p3)
}
  0x91   : > { %s8080_s29 = scalar_lea.vmem %s8533_s12, 16  ;;  %s8087_s20 = scalar_lea.vmem %s8533_s12, 32 }
  0x92   : > { %p8081_p5 = scmp.ne.s32.totalorder %s8533_s12, %s8080_s29  ;;  %p8088_p4 = scmp.lt.s32.totalorder %s8533_s12, %s8533_s12 }
  0x93   : > { %p8089_p10 = scmp.lt.s32.totalorder %s8087_s20, %s8080_s29 }
  0x94   : > { %p8083_p7 = pnand %p8081_p5, %p8461_p8 }
  0x95   : > { %p8090_p11 = por %p8089_p10, %p8088_p4 }
  0x96   : > { %p8084_p9 = pneg %p8083_p7 }
  0x98   : > { %p8091_p12 = pnand %p8090_p11, %p8084_p9 }
  0x9a   : > { %8094 = shalt.err (!%p8091_p12)
}
  0x9b   : > { %7144 = dma.hbm_to_vmem [thread:$0]  (!%p8445_p6), %s13346_s4, 16, %s8533_s12, [#allocation9]  }
  0x9c   : > { %s8338_s17 = smov [#allocation13]   ;;  %s13347_s6 = sld [smem:[#allocation236_spill]] }
  0x9d   : > { %s342_s22 = sshll.u32 %s8338_s17, 4  ;;  %s343_s22 = int_to_ptr.vmem [resolvable:$true] %s342_s22 }
  0xa2   : > { %s8095_s27 = scalar_lea.hbm %s13347_s6, 4096 }
  0xa3   : > { %p8096_p13 = scmp.ne.s32.totalorder %s13347_s6, %s8095_s27  ;;  %p8102_p1 = scmp.lt.u32.totalorder %s8095_s27, %s13347_s6 }
  0xa5   : > { %p8098_p0 = pnand %p8096_p13, %p8461_p8 }
  0xa7   : > { %p8099_p2 = pneg %p8098_p0 }
  0xa9   : > { %p8104_p3 = pnand %p8102_p1, %p8099_p2 }
  0xab   : > { %8107 = shalt.err (!%p8104_p3)
}
  0xac   : > { %s8108_s12 = scalar_lea.vmem %s343_s22, 4096  ;;  %p8116_p4 = scmp.lt.s32.totalorder %s343_s22, %s343_s22 }
  0xad   : > { %p8109_p5 = scmp.ne.s32.totalorder %s343_s22, %s8108_s12  ;;  %p8117_p10 = scmp.lt.s32.totalorder %s8108_s12, %s8108_s12 }
  0xaf   : > { %p8111_p7 = pnand %p8109_p5, %p8461_p8  ;;  %p8118_p11 = por %p8117_p10, %p8116_p4 }
  0xb1   : > { %p8112_p9 = pneg %p8111_p7 }
  0xb3   : > { %p8119_p12 = pnand %p8118_p11, %p8112_p9 }
  0xb5   : > { %8122 = shalt.err (!%p8119_p12)
}
  0xb6   : > { %s8339_s28 = smov 256   ;;  %s8340_s30 = smov 16  }
  0xb7   : > { %7150 = dma.hbm_to_vmem [thread:$0]  (!%p8445_p6), %s13347_s6, 4096, %s343_s22, [#allocation12], %s8339_s28, %s8339_s28, %s8340_s30  }
  0xb8   : > { %s8341_s23 = smov [#allocation16]   ;;  %s8342_s10 = smov [#allocation17]  }
  0xb9   : > { %s366_s27 = sshll.u32 %s8341_s23, 4  ;;  %s380_s25 = sshll.u32 %s8342_s10, 4  ;;  %s367_s27 = int_to_ptr.vmem [resolvable:$true] %s366_s27  ;;  %s381_s25 = int_to_ptr.vmem [resolvable:$true] %s380_s25 }
  0xba   : > { %s8123_s12 = scalar_lea.hbm %s13095_s8, 4096 }
  0xbb   : > { %p8124_p13 = scmp.ne.s32.totalorder %s13095_s8, %s8123_s12  ;;  %p8130_p1 = scmp.lt.u32.totalorder %s8123_s12, %s13095_s8 }
  0xbd   : > { %p8126_p0 = pnand %p8124_p13, %p8461_p8 }
  0xbf   : > { %p8127_p2 = pneg %p8126_p0 }
  0xc1   : > { %p8132_p3 = pnand %p8130_p1, %p8127_p2 }
  0xc3   : > { %8135 = shalt.err (!%p8132_p3)
}
  0xc4   : > { %s8136_s22 = scalar_lea.vmem %s367_s27, 4096  ;;  %p8144_p4 = scmp.lt.s32.totalorder %s367_s27, %s367_s27 }
  0xc5   : > { %p8137_p5 = scmp.ne.s32.totalorder %s367_s27, %s8136_s22  ;;  %p8145_p10 = scmp.lt.s32.totalorder %s8136_s22, %s8136_s22 }
  0xc7   : > { %p8139_p7 = pnand %p8137_p5, %p8461_p8  ;;  %p8146_p11 = por %p8145_p10, %p8144_p4 }
  0xc9   : > { %p8140_p9 = pneg %p8139_p7 }
  0xcb   : > { %p8147_p12 = pnand %p8146_p11, %p8140_p9 }
  0xcd   : > { %8150 = shalt.err (!%p8147_p12)
}
  0xce   : > { %s13348_s24 = smov 4   ;;  %s13349_s26 = smov 64  }
  0xcf   : > { %7156 = dma.hbm_to_vmem [thread:$0]  (!%p8445_p6), %s13095_s8, 4096, %s367_s27, [#allocation15], %s13349_s26, %s13349_s26, %s13348_s24  }
  0xd0   : > { %s8151_s17 = scalar_lea.hbm %s13096_s9, 16 }
  0xd1   : > { %p8152_p13 = scmp.ne.s32.totalorder %s13096_s9, %s8151_s17  ;;  %p8158_p1 = scmp.lt.u32.totalorder %s8151_s17, %s13096_s9 }
  0xd3   : > { %p8154_p0 = pnand %p8152_p13, %p8461_p8 }
  0xd5   : > { %p8155_p2 = pneg %p8154_p0 }
  0xd7   : > { %p8160_p3 = pnand %p8158_p1, %p8155_p2 }
  0xd9   : > { %8163 = shalt.err (!%p8160_p3)
}
  0xda   : > { %s8164_s20 = scalar_lea.vmem %s381_s25, 16  ;;  %s8171_s27 = scalar_lea.vmem %s381_s25, 32 }
  0xdb   : > { %p8165_p5 = scmp.ne.s32.totalorder %s381_s25, %s8164_s20  ;;  %p8172_p4 = scmp.lt.s32.totalorder %s381_s25, %s381_s25 }
  0xdc   : > { %p8173_p10 = scmp.lt.s32.totalorder %s8171_s27, %s8164_s20 }
  0xdd   : > { %p8167_p7 = pnand %p8165_p5, %p8461_p8 }
  0xde   : > { %p8174_p11 = por %p8173_p10, %p8172_p4 }
  0xdf   : > { %p8168_p9 = pneg %p8167_p7 }
  0xe1   : > { %p8175_p12 = pnand %p8174_p11, %p8168_p9 }
  0xe3   : > { %8178 = shalt.err (!%p8175_p12)
}
  0xe4   : > { %7159 = dma.hbm_to_vmem [thread:$0]  (!%p8445_p6), %s13096_s9, 16, %s381_s25, [#allocation18]  }
  0xe5   : > { %s6357_s11 = sadd.s32 4294967294, %s8329_s16   ;;  %s8636_s21 = sadd.s32 1, %s8329_s16  }
  0xe6   : > { %s40_s2 = sadd.s32 1, %s8325_s15  ;;  %s37_s3 = ssub.s32 %s8329_s16, %s8636_s21 }
  0xe7   : > { %p47_p8 = scmp.ne.s32.totalorder %s8325_s15, %s8321_s14  ;;  %p38_p13 = scmp.eq.s32.totalorder %s37_s3, 0 }
  0xe8   : > { %p48_p0 = scmp.eq.s32.totalorder %s8329_s16, 0  ;;  %p53_p2 = scmp.ne.s32.totalorder %s8321_s14, %s8317_s13 }
  0xe9   : > { %p271_p1 = scmp.eq.s32.totalorder %s8429_s19, 1  ;;  %p13350_p5 = scmp.eq.s32.totalorder %s8429_s19, 0 }
  0xea   : > { %s8648_s28 = scalar_select %p38_p13, %s8325_s15, %s40_s2  }
  0xeb   : > { %p49_p3 = por %p48_p0, %p47_p8  ;;  %p8652_p7 = por %p13350_p5, %p53_p2 }
  0xec   : > { %p8656_p6 = por %p271_p1, %p47_p8  ;;  %p277_p9 = scmp.eq.s32.totalorder %s6357_s11, 1 }
  0xed   : > { %p7179_p4 = scmp.lt.s32.totalorder %s8329_s16, 2  ;;  %s8662_s17 = sand.u32 1, %s8325_s15  }
  0xee   : > { %s13352_s30 = scalar_select %p8656_p6, 1, 0 }
  0xef   : > { %p8664_p10 = por %p277_p9, %p53_p2  ;;  %s7092_s23 = smul.u32 196, %s8662_s17 }
  0xf0   : > { %p8669_p11 = pnand %p7179_p4, %p49_p3  ;;  %s6598_s29 = smul.u32 3136, %s8329_s16 }
  0xf1   : > { %s13353_s18 = scalar_select %p8664_p10, 1, 0 }
  0xf2   : > { %s13355_s0 = sld [smem:[#allocation231_spill]]  ;;  %s395_s11 = scalar_lea.vmem [#allocation2], %s7092_s23 }
  0xf3   : > { %s402_s2 = sshll.u32 %s395_s11, 4  ;;  %s392_s3 = scalar_lea.sflag [#allocation3], %s8662_s17  ;;  %s8680_s2 = int_to_ptr.vmem [resolvable:$true] %s402_s2 }
  0xf4   : > { %p8181_p8 = pneg %p8669_p11 }
  0xf8   : > { %s8678_s22 = scalar_lea.hbm %s13355_s0, %s6598_s29  ;;  %s8184_s12 = scalar_lea.hbm %s13355_s0, 6272 }
  0xf9   : > { %s8179_s4 = scalar_lea.hbm %s8678_s22, 3136  ;;  %p8185_p2 = scmp.lt.u32.totalorder %s8678_s22, %s13355_s0 }
  0xfa   : > { %p8180_p12 = scmp.ne.s32.totalorder %s8678_s22, %s8179_s4  ;;  %p8186_p1 = scmp.lt.u32.totalorder %s8184_s12, %s8179_s4 }
  0xfb   : > { %p8188_p5 = scmp.lt.u32.totalorder %s8179_s4, %s8678_s22 }
  0xfc   : > { %p8182_p13 = pnand %p8181_p8, %p8180_p12  ;;  %p8187_p3 = por %p8186_p1, %p8185_p2 }
  0xfe   : > { %p8183_p0 = pneg %p8182_p13  ;;  %p8189_p9 = por %p8188_p5, %p8187_p3 }
 0x100   : > { %p8190_p4 = pnand %p8189_p9, %p8183_p0 }
 0x102   : > { %8193 = shalt.err (!%p8190_p4)
}
 0x103   : > { %s8194_s23 = scalar_lea.vmem %s8680_s2, 3136  ;;  %s8343_s11 = smov [#allocation2]  }
 0x104   : > { %p8195_p12 = scmp.ne.s32.totalorder %s8680_s2, %s8194_s23  ;;  %s8199_s27 = sshll.u32 %s8343_s11, 4  ;;  %s8200_s27 = int_to_ptr.vmem [resolvable:$false] %s8199_s27 }
 0x105   : > { %s8201_s5 = scalar_lea.vmem %s8200_s27, 6272  ;;  %p8202_p6 = scmp.lt.s32.totalorder %s8680_s2, %s8200_s27 }
 0x106   : > { %p8197_p13 = pnand %p8195_p12, %p8181_p8  ;;  %p8203_p2 = scmp.lt.s32.totalorder %s8201_s5, %s8194_s23 }
 0x108   : > { %p8198_p10 = pneg %p8197_p13  ;;  %p8204_p1 = por %p8203_p2, %p8202_p6 }
 0x10a   : > { %p8205_p3 = pnand %p8204_p1, %p8198_p10 }
 0x10c   : > { %8208 = shalt.err (!%p8205_p3)
}
 0x10d   : > { %7163 = dma.hbm_to_vmem [thread:$0]  (!%p8669_p11), %s8678_s22, 3136, %s8680_s2, %s392_s3, %s13349_s26, %s13349_s26, %s13348_s24  }
 0x10e   : > { %s7093_s4 = smul.u32 588, %s8662_s17  ;;  %s13356_s5 = sand.u32 1, %s8329_s16  }
 0x10f   : > { %s7180_s20 = smul.u32 9408, %s8329_s16  ;;  %s8724_s0 = scalar_lea.sflag [#allocation6], %s13356_s5 }
 0x110   : > { %s416_s11 = scalar_lea.vmem [#allocation5], %s7093_s4  ;;  %s8214_s17 = scalar_lea.hbm %s13088_s1, 18816 }
 0x111   : > { %s8718_s23 = scalar_lea.hbm %s13088_s1, %s7180_s20  ;;  %s424_s27 = sshll.u32 %s416_s11, 4  ;;  %s8720_s27 = int_to_ptr.vmem [resolvable:$true] %s424_s27 }
 0x112   : > { %s8209_s6 = scalar_lea.hbm %s8718_s23, 9408  ;;  %p8215_p5 = scmp.lt.u32.totalorder %s8718_s23, %s13088_s1 }
 0x113   : > { %p8210_p6 = scmp.ne.s32.totalorder %s8718_s23, %s8209_s6  ;;  %p8216_p9 = scmp.lt.u32.totalorder %s8214_s17, %s8209_s6 }
 0x114   : > { %p8218_p12 = scmp.lt.u32.totalorder %s8209_s6, %s8718_s23 }
 0x115   : > { %p8212_p10 = pnand %p8210_p6, %p8181_p8  ;;  %p8217_p4 = por %p8216_p9, %p8215_p5 }
 0x117   : > { %p8213_p0 = pneg %p8212_p10  ;;  %p8219_p13 = por %p8218_p12, %p8217_p4 }
 0x119   : > { %p8220_p2 = pnand %p8219_p13, %p8213_p0 }
 0x11b   : > { %8223 = shalt.err (!%p8220_p2)
}
 0x11c   : > { %s8224_s3 = scalar_lea.vmem %s8720_s27, 9408  ;;  %s8344_s4 = smov [#allocation5]  }
 0x11d   : > { %p8225_p1 = scmp.ne.s32.totalorder %s8720_s27, %s8224_s3  ;;  %s8229_s20 = sshll.u32 %s8344_s4, 4  ;;  %s8230_s20 = int_to_ptr.vmem [resolvable:$false] %s8229_s20 }
 0x11e   : > { %s8231_s29 = scalar_lea.vmem %s8230_s20, 18816  ;;  %p8232_p10 = scmp.lt.s32.totalorder %s8720_s27, %s8230_s20 }
 0x11f   : > { %p8227_p3 = pnand %p8225_p1, %p8181_p8  ;;  %p8233_p5 = scmp.lt.s32.totalorder %s8231_s29, %s8224_s3 }
 0x121   : > { %p8228_p6 = pneg %p8227_p3  ;;  %p8234_p9 = por %p8233_p5, %p8232_p10 }
 0x123   : > { %p8235_p4 = pnand %p8234_p9, %p8228_p6 }
 0x125   : > { %8238 = shalt.err (!%p8235_p4)
}
 0x126   : > { %s8345_s6 = smov 192   ;;  %s8346_s12 = smov 12  }
 0x127   : > { %7166 = dma.hbm_to_vmem [thread:$0]  (!%p8669_p11), %s8718_s23, 9408, %s8720_s27, %s8724_s0, %s8345_s6, %s8345_s6, %s8346_s12  }
 0x128   : > { %s13357_s11 = sld [smem:[#allocation28_spill]] }
 0x12e   : > { %p13358_p8 = scmp.ne.s32.totalorder %s13357_s11, 0 }
 0x130   : > { %436 = sbr.rel (%p13358_p8) target bundleno = 1962 (0x7aa), region = 60 }
 0x137   : > { %s8753_s5 = sand.u32 1, %s8321_s14  }
 0x138   : > { %s7095_s24 = smul.u32 196, %s8753_s5  ;;  %s439_s26 = scalar_lea.sflag [#allocation3], %s8753_s5 }
 0x13a   : > { %s8759_s17 = scalar_lea.vmem [#allocation2], %s7095_s24 }
 0x13b   : > { %8284 = dma.done.wait (%p8652_p7), %s439_s26, 3136  }
 0x13c   : > { %8286 = vsyncadd (%p8652_p7), %s439_s26, 4294964160  ;;  %s447_s0 = sand.u32 1, %s8429_s19   ;;  %s7096_s10 = smul.u32 588, %s8753_s5 }
 0x13d   : > { %s448_s23 = scalar_lea.sflag [#allocation6], %s447_s0 }
 0x13e   : > { %s8767_s27 = scalar_lea.vmem [#allocation5], %s7096_s10 }
 0x13f   : > { %8288 = dma.done.wait (%p8652_p7), %s448_s23, 9408  }
 0x140   : > { %8290 = vsyncadd (%p8652_p7), %s448_s23, 4294957888  ;;  %p13359_p11 = scmp.eq.s32.totalorder %s8429_s19, 0 }
 0x142   : > { %8292 = dma.done.wait (%p13359_p11), [#allocation6], 3072   ;;  %p13360_p0 = pmov %p13359_p11 }
 0x144   : > { %8294 = vsyncadd (%p13360_p0), [#allocation6], 4294964224  ;;  %p13361_p12 = pmov %p13360_p0 }
 0x145   : > { %p13362_p13 = pmov %p13360_p0 }
 0x146   : > { %8296 = dma.done.wait (%p13361_p12), [#allocation9], 32  }
 0x147   : > { %8298 = vsyncadd (%p13362_p13), [#allocation9], 4294967264  ;;  %p13363_p2 = pmov %p13360_p0 }
 0x148   : > { %p13364_p1 = pmov %p13360_p0 }
 0x149   : > { %8300 = dma.done.wait (%p13363_p2), [#allocation12], 4112  }
 0x14a   : > { %8302 = vsyncadd (%p13364_p1), [#allocation12], 4294963184  ;;  %p13365_p7 = pmov %p13360_p0 }
 0x14b   : > { %p13366_p3 = pmov %p13360_p0 }
 0x14c   : > { %8304 = dma.done.wait (%p13365_p7), [#allocation15], 4160  }
 0x14d   : > { %8306 = vsyncadd (%p13366_p3), [#allocation15], 4294963136  ;;  %p13367_p6 = pmov %p13360_p0 }
 0x14e   : > { %p13368_p10 = pmov %p13360_p0 }
 0x14f   : > { %8308 = dma.done.wait (%p13367_p6), [#allocation18], 16  }
 0x150   : > { %8310 = vsyncadd (%p13368_p10), [#allocation18], 4294967280  ;;  %v13107_v0 = vmov 0   ;;  %v8348_v1 = vmov 0.0   ;;  %vm8349_vm0 = vmmov 0   ;;  %v7241_v2 = vld [vmem:[#allocation7] sm:$0xff]  }
 0x151   : > { %1221 = vmatprep.subr.bf16.mxu0 %v13107_v0  ;;  %6944 = vmatprep.subr.bf16.mxu1 %v8348_v1  ;;  %v7242_v3 = vld [vmem:[#allocation7 + $0x8] sm:$0xff]   ;;  %v7243_v4 = vld [vmem:[#allocation7 + $0x10] sm:$0xff]   ;;  %v7249_v5 = vld [vmem:[#allocation7 + $0x80] sm:$0xff]   ;;  %s12846_s25 = scalar_lea.vmem [#allocation19], %s7095_s24  ;;  %s6648_s22 = smul.u32 3136, %s8429_s19 }
 0x152   : > { %6960 = vmatprep.mubr.msk.bf16.mxu1 %vm8349_vm0, %v8348_v1  ;;  %1222 = vmatpush1.bf16.msra.mxu0 %v7241_v2  ;;  %v7244_v6 = vld [vmem:[#allocation7 + $0x18] sm:$0xff]   ;;  %v7251_v7 = vld [vmem:[#allocation7 + $0x88] sm:$0xff]   ;;  %v7245_v8 = vld [vmem:[#allocation7 + $0x20] sm:$0xff]   ;;  %s6185_s2 = sshll.u32 %s12846_s25, 4  ;;  %s14253_s20 = sld [smem:[#allocation237_spill]]  ;;  %s13042_s2 = int_to_ptr.vmem [resolvable:$true] %s6185_s2 }
 0x153   : > { %1223 = vmatprep.subr.bf16.mxu0 %v13107_v0  ;;  %6945 = vmatpush3.bf16.msra.mxu1 %v7249_v5  ;;  %v7253_v9 = vld [vmem:[#allocation7 + $0x90] sm:$0xff]   ;;  %v7246_v10 = vld [vmem:[#allocation7 + $0x28] sm:$0xff]   ;;  %v7255_v11 = vld [vmem:[#allocation7 + $0x98] sm:$0xff]   ;;  %s6172_s19 = scalar_lea.sflag [#allocation4], %s8753_s5  ;;  %s8239_s6 = scalar_lea.vmem %s13042_s2, 3136 }
 0x154   : > { %6946 = vmatprep.subr.bf16.mxu1 %v8348_v1  ;;  %v7247_v12 = vld [vmem:[#allocation7 + $0x30] sm:$0xff]   ;;  %v7257_v13 = vld [vmem:[#allocation7 + $0xa0] sm:$0xff]   ;;  %v7248_v14 = vld [vmem:[#allocation7 + $0x38] sm:$0xff]   ;;  %p8240_p5 = scmp.ne.s32.totalorder %s13042_s2, %s8239_s6  ;;  %p14254_p9 = scmp.ne.s32.totalorder %s13352_s30, 0 }
 0x155   : > { %v7267_v15 = vld [vmem:[%s8767_s27 + $0x4] ss:$12 sps:$4 sm:$0xff]   ;;  %v7261_v18 = vld [vmem:[#allocation7 + $0xb0] sm:$0xff]   ;;  %s8350_s12 = smov [#allocation19]  }
 0x156   : > { %1224 = vmatpush1.bf16.msra.mxu0 %v7242_v3  ;;  %v7259_v16 = vld [vmem:[#allocation7 + $0xa8] sm:$0xff]   ;;  %1253 = vmatprep.mubr.bf16.mxu0 %v7267_v15  ;;  %v7250_v17 = vld [vmem:[#allocation7 + $0x40] sm:$0xff]   ;;  %v7263_v20 = vld [vmem:[#allocation7 + $0xb8] sm:$0xff]   ;;  %p8241_p4 = pnand %p8240_p5, %p14254_p9  ;;  %s8243_s11 = sshll.u32 %s8350_s12, 4  ;;  %s8244_s11 = int_to_ptr.vmem [resolvable:$false] %s8243_s11 }
 0x157   : > { %1225 = vmatprep.subr.bf16.mxu0 %v13107_v0  ;;  %6947 = vmatpush3.bf16.msra.mxu1 %v7251_v7  ;;  %v7252_v19 = vld [vmem:[#allocation7 + $0x48] sm:$0xff]   ;;  %v7254_v22 = vld [vmem:[#allocation7 + $0x50] sm:$0xff]   ;;  %v7256_v23 = vld [vmem:[#allocation7 + $0x58] sm:$0xff]   ;;  %s8245_s24 = scalar_lea.vmem %s8244_s11, 6272  ;;  %p8246_p11 = scmp.lt.s32.totalorder %s13042_s2, %s8244_s11 }
 0x158   : > { %6948 = vmatprep.subr.bf16.mxu1 %v8348_v1  ;;  %v7268_v21 = vld [vmem:[%s8767_s27 + $0x8] ss:$12 sps:$4 sm:$0xff]   ;;  %v7271_v24 = vld [vmem:[%s8767_s27 + $0x20] ss:$12 sps:$4 sm:$0xff]   ;;  %v7276_v27 = vld [vmem:[%s8767_s27 + $0x38] ss:$12 sps:$4 sm:$0xff]   ;;  %s13040_s29 = scalar_lea.hbm %s14253_s20, %s6648_s22  ;;  %p8242_p8 = pneg %p8241_p4 }
 0x159   : > { %v7258_v25 = vld [vmem:[#allocation7 + $0x60] sm:$0xff]   ;;  %v7260_v26 = vld [vmem:[#allocation7 + $0x68] sm:$0xff]   ;;  %v7262_v28 = vld [vmem:[#allocation7 + $0x70] sm:$0xff]   ;;  %p8247_p0 = scmp.lt.s32.totalorder %s8245_s24, %s8239_s6 }
 0x15a   : > { %1226 = vmatpush1.bf16.msra.mxu0 %v7243_v4  ;;  %v7264_v29 = vld [vmem:[#allocation7 + $0x78] sm:$0xff]   ;;  %v7265_v30 = vld [vmem:[%s8767_s27] ss:$12 sps:$4 sm:$0xff]  }
 0x15b   : > { %1227 = vmatprep.subr.bf16.mxu0 %v13107_v0  ;;  %6949 = vmatpush3.bf16.msra.mxu1 %v7253_v9  ;;  %v7280_v31 = vld [vmem:[%s8767_s27 + $0x50] ss:$12 sps:$4 sm:$0xff]   ;;  %v7272_v33 = vld [vmem:[%s8767_s27 + $0x18] ss:$12 sps:$4 sm:$0xff]   ;;  %v7284_v34 = vld [vmem:[%s8767_s27 + $0x68] ss:$12 sps:$4 sm:$0xff]   ;;  %p8248_p12 = por %p8247_p0, %p8246_p11 }
 0x15c   : > { %6950 = vmatprep.subr.bf16.mxu1 %v8348_v1  ;;  %v7269_v32 = vld [vmem:[%s8767_s27 + $0x1c] ss:$12 sps:$4 sm:$0xff]   ;;  %v7273_v35 = vld [vmem:[%s8767_s27 + $0x34] ss:$12 sps:$4 sm:$0xff]   ;;  %v7277_v38 = vld [vmem:[%s8767_s27 + $0x4c] ss:$12 sps:$4 sm:$0xff]  }
 0x15d   : > { %v7275_v36 = vld [vmem:[%s8767_s27 + $0x30] ss:$12 sps:$4 sm:$0xff]   ;;  %v7288_v37 = vld [vmem:[%s8767_s27 + $0x80] ss:$12 sps:$4 sm:$0xff]   ;;  %v7279_v39 = vld [vmem:[%s8767_s27 + $0x48] ss:$12 sps:$4 sm:$0xff]   ;;  %p8249_p13 = pnand %p8248_p12, %p8242_p8 }
 0x15e   : > { %1228 = vmatpush1.bf16.msra.mxu0 %v7244_v6  ;;  %v7292_v40 = vld [vmem:[%s8767_s27 + $0x98] ss:$12 sps:$4 sm:$0xff]   ;;  %v7283_v42 = vld [vmem:[%s8767_s27 + $0x60] ss:$12 sps:$4 sm:$0xff]   ;;  %v7296_v43 = vld [vmem:[%s8767_s27 + $0xb0] ss:$12 sps:$4 sm:$0xff]  }
 0x15f   : > { %1229 = vmatprep.subr.bf16.mxu0 %v13107_v0  ;;  %6951 = vmatpush3.bf16.msra.mxu1 %v7255_v11  ;;  %v7281_v41 = vld [vmem:[%s8767_s27 + $0x64] ss:$12 sps:$4 sm:$0xff]   ;;  %v7285_v44 = vld [vmem:[%s8767_s27 + $0x7c] ss:$12 sps:$4 sm:$0xff]   ;;  %v7289_v47 = vld [vmem:[%s8767_s27 + $0x94] ss:$12 sps:$4 sm:$0xff]  }
 0x160   : > { %6952 = vmatprep.subr.bf16.mxu1 %v8348_v1  ;;  %v7287_v45 = vld [vmem:[%s8767_s27 + $0x78] ss:$12 sps:$4 sm:$0xff]   ;;  %v7300_v46 = vld [vmem:[%s8767_s27 + $0xc8] ss:$12 sps:$4 sm:$0xff]   ;;  %v7291_v48 = vld [vmem:[%s8767_s27 + $0x90] ss:$12 sps:$4 sm:$0xff]  }
 0x161   : > { %v7304_v49 = vld [vmem:[%s8767_s27 + $0xe0] ss:$12 sps:$4 sm:$0xff]   ;;  %v7295_v51 = vld [vmem:[%s8767_s27 + $0xa8] ss:$12 sps:$4 sm:$0xff]   ;;  %v7308_v52 = vld [vmem:[%s8767_s27 + $0xf8] ss:$12 sps:$4 sm:$0xff]  }
 0x162   : > { %1230 = vmatpush1.bf16.msra.mxu0 %v7245_v8  ;;  %v7293_v50 = vld [vmem:[%s8767_s27 + $0xac] ss:$12 sps:$4 sm:$0xff]   ;;  %v7297_v53 = vld [vmem:[%s8767_s27 + $0xc4] ss:$12 sps:$4 sm:$0xff]   ;;  %v7301_v56 = vld [vmem:[%s8767_s27 + $0xdc] ss:$12 sps:$4 sm:$0xff]  }
 0x163   : > { %1231 = vmatprep.subr.bf16.mxu0 %v13107_v0  ;;  %6953 = vmatpush3.bf16.msra.mxu1 %v7257_v13  ;;  %v7299_v54 = vld [vmem:[%s8767_s27 + $0xc0] ss:$12 sps:$4 sm:$0xff]   ;;  %v7312_v55 = vld [vmem:[%s8767_s27 + $0x110] ss:$12 sps:$4 sm:$0xff]   ;;  %v7303_v57 = vld [vmem:[%s8767_s27 + $0xd8] ss:$12 sps:$4 sm:$0xff]  }
 0x164   : > { %6954 = vmatprep.subr.bf16.mxu1 %v8348_v1  ;;  %v7316_v58 = vld [vmem:[%s8767_s27 + $0x128] ss:$12 sps:$4 sm:$0xff]   ;;  %v7307_v60 = vld [vmem:[%s8767_s27 + $0xf0] ss:$12 sps:$4 sm:$0xff]   ;;  %v7320_v61 = vld [vmem:[%s8767_s27 + $0x140] ss:$12 sps:$4 sm:$0xff]  }
 0x165   : > { %v7305_v59 = vld [vmem:[%s8767_s27 + $0xf4] ss:$12 sps:$4 sm:$0xff]   ;;  %v7309_v62 = vld [vmem:[%s8767_s27 + $0x10c] ss:$12 sps:$4 sm:$0xff]   ;;  %v7313_v3 = vld [vmem:[%s8767_s27 + $0x124] ss:$12 sps:$4 sm:$0xff]  }
 0x166   : > { %1232 = vmatpush1.bf16.msra.mxu0 %v7246_v10  ;;  %v7311_v63 = vld [vmem:[%s8767_s27 + $0x108] ss:$12 sps:$4 sm:$0xff]   ;;  %v7324_v2 = vld [vmem:[%s8767_s27 + $0x158] ss:$12 sps:$4 sm:$0xff]   ;;  %v7315_v4 = vld [vmem:[%s8767_s27 + $0x120] ss:$12 sps:$4 sm:$0xff]  }
 0x167   : > { %1233 = vmatprep.subr.bf16.mxu0 %v13107_v0  ;;  %6955 = vmatpush3.bf16.msra.mxu1 %v7259_v16  ;;  %v7328_v5 = vld [vmem:[%s8767_s27 + $0x170] ss:$12 sps:$4 sm:$0xff]   ;;  %v7319_v7 = vld [vmem:[%s8767_s27 + $0x138] ss:$12 sps:$4 sm:$0xff]   ;;  %v7332_v8 = vld [vmem:[%s8767_s27 + $0x188] ss:$12 sps:$4 sm:$0xff]  }
 0x168   : > { %6956 = vmatprep.subr.bf16.mxu1 %v8348_v1  ;;  %v7317_v6 = vld [vmem:[%s8767_s27 + $0x13c] ss:$12 sps:$4 sm:$0xff]   ;;  %v7321_v9 = vld [vmem:[%s8767_s27 + $0x154] ss:$12 sps:$4 sm:$0xff]   ;;  %v7329_v15 = vld [vmem:[%s8767_s27 + $0x184] ss:$12 sps:$4 sm:$0xff]  }
 0x169   : > { %v7323_v10 = vld [vmem:[%s8767_s27 + $0x150] ss:$12 sps:$4 sm:$0xff]   ;;  %v7336_v11 = vld [vmem:[%s8767_s27 + $0x1a0] ss:$12 sps:$4 sm:$0xff]   ;;  %v7327_v13 = vld [vmem:[%s8767_s27 + $0x168] ss:$12 sps:$4 sm:$0xff]  }
 0x16a   : > { %1234 = vmatpush1.bf16.msra.mxu0 %v7247_v12  ;;  %v7325_v12 = vld [vmem:[%s8767_s27 + $0x16c] ss:$12 sps:$4 sm:$0xff]  }
 0x16b   : > { %1235 = vmatprep.subr.bf16.mxu0 %v13107_v0  ;;  %6957 = vmatpush3.bf16.msra.mxu1 %v7261_v18  ;;  %v7331_v16 = vld [vmem:[%s8767_s27 + $0x180] ss:$12 sps:$4 sm:$0xff]   ;;  %v7333_v18 = vld [vmem:[%s8767_s27 + $0x19c] ss:$12 sps:$4 sm:$0xff]  }
 0x16c   : > { %6958 = vmatprep.subr.bf16.mxu1 %v8348_v1 }
 0x16e   : > { %1236 = vmatpush1.bf16.msra.mxu0 %v7248_v14  ;;  %v7340_v14 = vld [vmem:[%s8767_s27 + $0x1b8] ss:$12 sps:$4 sm:$0xff]  }
 0x16f   : > { %1237 = vmatprep.subr.bf16.mxu0 %v13107_v0  ;;  %6959 = vmatpush3.bf16.msra.mxu1 %v7263_v20  ;;  %v7337_v20 = vld [vmem:[%s8767_s27 + $0x1b4] ss:$12 sps:$4 sm:$0xff]  }
 0x172   : > { %1238 = vmatpush1.bf16.msra.mxu0 %v7250_v17  ;;  %6961 = vmatmul.mubr.bf16.vlgmr.msra.gmra.mrb[0].mxu1 %v7268_v21  ;;  %v7344_v17 = vld [vmem:[%s8767_s27 + $0x1d0] ss:$12 sps:$4 sm:$0xff]  }
 0x173   : > { %1239 = vmatprep.subr.bf16.mxu0 %v13107_v0  ;;  %6964 = vmatprep.mubr.msk.bf16.mxu1 %vm8349_vm0, %v8348_v1  ;;  %v7339_v21 = vld [vmem:[%s8767_s27 + $0x1b0] ss:$12 sps:$4 sm:$0xff]  }
 0x176   : > { %1240 = vmatpush1.bf16.msra.mxu0 %v7252_v19  ;;  %v7335_v19 = vld [vmem:[%s8767_s27 + $0x198] ss:$12 sps:$4 sm:$0xff]  }
 0x177   : > { %1241 = vmatprep.subr.bf16.mxu0 %v13107_v0 }
 0x17a   : > { %1242 = vmatpush1.bf16.msra.mxu0 %v7254_v22  ;;  %6965 = vmatmul.mubr.bf16.gmra.mrb[4].mxu1 %v7271_v24  ;;  %v7341_v22 = vld [vmem:[%s8767_s27 + $0x1cc] ss:$12 sps:$4 sm:$0xff]   ;;  %v7345_v24 = vld [vmem:[%s8767_s27 + $0x1e4] ss:$12 sps:$4 sm:$0xff]  }
 0x17b   : > { %1243 = vmatprep.subr.bf16.mxu0 %v13107_v0  ;;  %6968 = vmatprep.mubr.msk.bf16.mxu1 %vm8349_vm0, %v8348_v1 }
 0x17e   : > { %1244 = vmatpush1.bf16.msra.mxu0 %v7256_v23  ;;  %v7343_v23 = vld [vmem:[%s8767_s27 + $0x1c8] ss:$12 sps:$4 sm:$0xff]  }
 0x17f   : > { %1245 = vmatprep.subr.bf16.mxu0 %v13107_v0 }
 0x182   : > { %1246 = vmatpush1.bf16.msra.mxu0 %v7258_v25  ;;  %6969 = vmatmul.mubr.bf16.gmra.mrb[8].mxu1 %v7276_v27  ;;  %v7347_v25 = vld [vmem:[%s8767_s27 + $0x1e0] ss:$12 sps:$4 sm:$0xff]   ;;  %v7349_v27 = vld [vmem:[%s8767_s27 + $0x1fc] ss:$12 sps:$4 sm:$0xff]  }
 0x183   : > { %1247 = vmatprep.subr.bf16.mxu0 %v13107_v0  ;;  %6972 = vmatprep.mubr.msk.bf16.mxu1 %vm8349_vm0, %v8348_v1 }
 0x186   : > { %1248 = vmatpush1.bf16.msra.mxu0 %v7260_v26  ;;  %v7348_v26 = vld [vmem:[%s8767_s27 + $0x1e8] ss:$12 sps:$4 sm:$0xff]  }
 0x187   : > { %1249 = vmatprep.subr.bf16.mxu0 %v13107_v0 }
 0x18a   : > { %1250 = vmatpush1.bf16.msra.mxu0 %v7262_v28  ;;  %6973 = vmatmul.mubr.bf16.gmra.mrb[12].mxu1 %v7280_v31  ;;  %v7352_v28 = vld [vmem:[%s8767_s27 + $0x200] ss:$12 sps:$4 sm:$0xff]   ;;  %v7356_v31 = vld [vmem:[%s8767_s27 + $0x218] ss:$12 sps:$4 sm:$0xff]  }
 0x18b   : > { %1251 = vmatprep.subr.bf16.mxu0 %v13107_v0  ;;  %6976 = vmatprep.mubr.msk.bf16.mxu1 %vm8349_vm0, %v8348_v1 }
 0x18e   : > { %1252 = vmatpush1.bf16.msra.mxu0 %v7264_v29  ;;  %v7351_v29 = vld [vmem:[%s8767_s27 + $0x1f8] ss:$12 sps:$4 sm:$0xff]  }
 0x191   : > { %1254 = vmatmul.mubr.bf16.vlgmr.msra.gmra.mrb[0].mxu0 %v7265_v30  ;;  %v7353_v30 = vld [vmem:[%s8767_s27 + $0x214] ss:$12 sps:$4 sm:$0xff]  }
 0x192   : > { %1261 = vmatprep.mubr.bf16.mxu0 %v7269_v32  ;;  %6977 = vmatmul.mubr.bf16.gmra.mrb[16].mxu1 %v7284_v34  ;;  %v7355_v32 = vld [vmem:[%s8767_s27 + $0x210] ss:$12 sps:$4 sm:$0xff]   ;;  %v625_v34 = vld [vmem:[%s8767_s27 + $0x240] sm:$0xff] }
 0x193   : > { %6980 = vmatprep.mubr.msk.bf16.mxu1 %vm8349_vm0, %v8348_v1 }
 0x199   : > { %1262 = vmatmul.mubr.bf16.gmra.mrb[4].mxu0 %v7272_v33  ;;  %v7357_v33 = vld [vmem:[%s8767_s27 + $0x22c] ss:$12 sps:$4 sm:$0xff]  }
 0x19a   : > { %1269 = vmatprep.mubr.bf16.mxu0 %v7273_v35  ;;  %6981 = vmatmul.mubr.bf16.gmra.mrb[20].mxu1 %v7288_v37  ;;  %v7360_v35 = vld [vmem:[%s8767_s27 + $0x230] ss:$12 sps:$4 sm:$0xff]   ;;  %v7359_v37 = vld [vmem:[%s8767_s27 + $0x228] ss:$12 sps:$4 sm:$0xff]  }
 0x19b   : > { %6984 = vmatprep.mubr.msk.bf16.mxu1 %vm8349_vm0, %v8348_v1 }
 0x1a1   : > { %1270 = vmatmul.mubr.bf16.gmra.mrb[8].mxu0 %v7275_v36 }
 0x1a2   : > { %1277 = vmatprep.mubr.bf16.mxu0 %v7277_v38  ;;  %6985 = vmatmul.mubr.bf16.gmra.mrb[24].mxu1 %v7292_v40 }
 0x1a3   : > { %6988 = vmatprep.mubr.msk.bf16.mxu1 %vm8349_vm0, %v8348_v1 }
 0x1a9   : > { %1278 = vmatmul.mubr.bf16.gmra.mrb[12].mxu0 %v7279_v39  ;;  %v6453_v39 = vcombine.high %v625_v34, %v625_v34 }
 0x1aa   : > { %1285 = vmatprep.mubr.bf16.mxu0 %v7281_v41  ;;  %6989 = vmatmul.mubr.bf16.gmra.mrb[28].mxu1 %v7296_v43 }
 0x1ab   : > { %6992 = vmatprep.mubr.msk.bf16.mxu1 %vm8349_vm0, %v8348_v1 }
 0x1b1   : > { %1286 = vmatmul.mubr.bf16.gmra.mrb[16].mxu0 %v7283_v42  ;;  %v7363_v42 = vld [vmem:[%s8767_s27 + $0x248] ss:$0 sps:$4 sm:$0xff]  }
 0x1b2   : > { %1293 = vmatprep.mubr.bf16.mxu0 %v7285_v44  ;;  %6993 = vmatmul.mubr.bf16.gmra.mrb[32].mxu1 %v7300_v46  ;;  %v6452_v44 = vcombine.low %v625_v34, %v625_v34 }
 0x1b3   : > { %6996 = vmatprep.mubr.msk.bf16.mxu1 %vm8349_vm0, %v8348_v1 }
 0x1b9   : > { %1294 = vmatmul.mubr.bf16.gmra.mrb[20].mxu0 %v7287_v45 }
 0x1ba   : > { %1301 = vmatprep.mubr.bf16.mxu0 %v7289_v47  ;;  %6997 = vmatmul.mubr.bf16.gmra.mrb[36].mxu1 %v7304_v49 }
 0x1bb   : > { %7000 = vmatprep.mubr.msk.bf16.mxu1 %vm8349_vm0, %v8348_v1 }
 0x1c1   : > { %1302 = vmatmul.mubr.bf16.gmra.mrb[24].mxu0 %v7291_v48 }
 0x1c2   : > { %1309 = vmatprep.mubr.bf16.mxu0 %v7293_v50  ;;  %7001 = vmatmul.mubr.bf16.gmra.mrb[40].mxu1 %v7308_v52  ;;  %v8943_v52 = vld [vmem:[#allocation8] ss:$0 sm:$0xff] }
 0x1c3   : > { %7004 = vmatprep.mubr.msk.bf16.mxu1 %vm8349_vm0, %v8348_v1 }
 0x1c9   : > { %1310 = vmatmul.mubr.bf16.gmra.mrb[28].mxu0 %v7295_v51 }
 0x1ca   : > { %1317 = vmatprep.mubr.bf16.mxu0 %v7297_v53  ;;  %7005 = vmatmul.mubr.bf16.gmra.mrb[44].mxu1 %v7312_v55 }
 0x1cb   : > { %7008 = vmatprep.mubr.msk.bf16.mxu1 %vm8349_vm0, %v8348_v1 }
 0x1d1   : > { %1318 = vmatmul.mubr.bf16.gmra.mrb[32].mxu0 %v7299_v54 }
 0x1d2   : > { %1325 = vmatprep.mubr.bf16.mxu0 %v7301_v56  ;;  %7009 = vmatmul.mubr.bf16.gmra.mrb[48].mxu1 %v7316_v58 }
 0x1d3   : > { %7012 = vmatprep.mubr.msk.bf16.mxu1 %vm8349_vm0, %v8348_v1 }
 0x1d9   : > { %1326 = vmatmul.mubr.bf16.gmra.mrb[36].mxu0 %v7303_v57 }
 0x1da   : > { %1333 = vmatprep.mubr.bf16.mxu0 %v7305_v59  ;;  %7013 = vmatmul.mubr.bf16.gmra.mrb[52].mxu1 %v7320_v61 }
 0x1db   : > { %7016 = vmatprep.mubr.msk.bf16.mxu1 %vm8349_vm0, %v8348_v1 }
 0x1e1   : > { %1334 = vmatmul.mubr.bf16.gmra.mrb[40].mxu0 %v7307_v60 }
 0x1e2   : > { %1341 = vmatprep.mubr.bf16.mxu0 %v7309_v62  ;;  %7017 = vmatmul.mubr.bf16.gmra.mrb[56].mxu1 %v7324_v2 }
 0x1e3   : > { %7020 = vmatprep.mubr.msk.bf16.mxu1 %vm8349_vm0, %v8348_v1 }
 0x1e9   : > { %1342 = vmatmul.mubr.bf16.gmra.mrb[44].mxu0 %v7311_v63 }
 0x1ea   : > { %1349 = vmatprep.mubr.bf16.mxu0 %v7313_v3  ;;  %7021 = vmatmul.mubr.bf16.gmra.mrb[60].mxu1 %v7328_v5 }
 0x1eb   : > { %7024 = vmatprep.mubr.msk.bf16.mxu1 %vm8349_vm0, %v8348_v1 }
 0x1f1   : > { %1350 = vmatmul.mubr.bf16.gmra.mrb[48].mxu0 %v7315_v4 }
 0x1f2   : > { %1357 = vmatprep.mubr.bf16.mxu0 %v7317_v6  ;;  %7025 = vmatmul.mubr.bf16.gmra.mrb[64].mxu1 %v7332_v8  ;;  %v6865_v6 = vld [vmem:[%s8759_s17 + $0x8] sm:$0xff]  }
 0x1f3   : > { %7028 = vmatprep.mubr.msk.bf16.mxu1 %vm8349_vm0, %v8348_v1 }
 0x1f9   : > { %1358 = vmatmul.mubr.bf16.gmra.mrb[52].mxu0 %v7319_v7 }
 0x1fa   : > { %1365 = vmatprep.mubr.bf16.mxu0 %v7321_v9  ;;  %7029 = vmatmul.mubr.bf16.gmra.mrb[68].mxu1 %v7336_v11 }
 0x1fb   : > { %7032 = vmatprep.mubr.msk.bf16.mxu1 %vm8349_vm0, %v8348_v1 }
 0x201   : > { %1366 = vmatmul.mubr.bf16.gmra.mrb[56].mxu0 %v7323_v10 }
 0x202   : > { %1373 = vmatprep.mubr.bf16.mxu0 %v7325_v12  ;;  %7033 = vmatmul.mubr.bf16.gmra.mrb[72].mxu1 %v7340_v14  ;;  %v6655_v12 = vunpack.c.l.bf16 %v6865_v6 }
 0x203   : > { %7036 = vmatprep.mubr.msk.bf16.mxu1 %vm8349_vm0, %v8348_v1 }
 0x209   : > { %1374 = vmatmul.mubr.bf16.gmra.mrb[60].mxu0 %v7327_v13 }
 0x20a   : > { %1381 = vmatprep.mubr.bf16.mxu0 %v7329_v15  ;;  %7037 = vmatmul.mubr.bf16.gmra.mrb[76].mxu1 %v7344_v17 }
 0x20b   : > { %7040 = vmatprep.mubr.msk.bf16.mxu1 %vm8349_vm0, %v8348_v1 }
 0x211   : > { %1382 = vmatmul.mubr.bf16.gmra.mrb[64].mxu0 %v7331_v16 }
 0x212   : > { %1389 = vmatprep.mubr.bf16.mxu0 %v7333_v18  ;;  %7041 = vmatmul.mubr.bf16.gmra.mrb[80].mxu1 %v7348_v26 }
 0x213   : > { %7044 = vmatprep.mubr.msk.bf16.mxu1 %vm8349_vm0, %v8348_v1 }
 0x219   : > { %1390 = vmatmul.mubr.bf16.gmra.mrb[68].mxu0 %v7335_v19 }
 0x21a   : > { %1397 = vmatprep.mubr.bf16.mxu0 %v7337_v20  ;;  %7045 = vmatmul.mubr.bf16.gmra.mrb[84].mxu1 %v7352_v28 }
 0x21b   : > { %7048 = vmatprep.mubr.msk.bf16.mxu1 %vm8349_vm0, %v8348_v1 }
 0x221   : > { %1398 = vmatmul.mubr.bf16.gmra.mrb[72].mxu0 %v7339_v21 }
 0x222   : > { %1405 = vmatprep.mubr.bf16.mxu0 %v7341_v22  ;;  %7049 = vmatmul.mubr.bf16.gmra.mrb[88].mxu1 %v7356_v31  ;;  %v6656_v22 = vunpack.c.h.bf16 %v6865_v6 }
 0x223   : > { %7052 = vmatprep.mubr.msk.bf16.mxu1 %vm8349_vm0, %v8348_v1 }
 0x229   : > { %1406 = vmatmul.mubr.bf16.gmra.mrb[76].mxu0 %v7343_v23  ;;  %v6866_v23 = vld [vmem:[%s8759_s17 + $0x10] sm:$0xff]  }
 0x22a   : > { %1413 = vmatprep.mubr.bf16.mxu0 %v7345_v24  ;;  %7053 = vmatmul.mubr.bf16.gmra.mrb[92].mxu1 %v7360_v35 }
 0x22b   : > { %7056 = vmatprep.mubr.msk.bf16.mxu1 %vm8349_vm0, %v8348_v1  ;;  %v6650_v1 = vld [vmem:[%s8759_s17] sm:$0xff]  }
 0x22c   : > { %v6651_v57 = vunpack.c.l.bf16 %v6650_v1  ;;  %v6652_v5 = vunpack.c.h.bf16 %v6650_v1 }
 0x231   : > { %1414 = vmatmul.mubr.bf16.gmra.mrb[80].mxu0 %v7347_v25 }
 0x232   : > { %1421 = vmatprep.mubr.bf16.mxu0 %v7349_v27  ;;  %7057 = vmatmul.mubr.bf16.gmra.mrb[96].mxu1 %v7363_v42 }
 0x233   : > { %2755 = vmatprep.mubr.bf16.mxu1 %v13107_v0 }
 0x239   : > { %1422 = vmatmul.mubr.bf16.gmra.mrb[84].mxu0 %v7351_v29  ;;  %v6659_v29 = vunpack.c.l.bf16 %v6866_v23 }
 0x23a   : > { %1429 = vmatprep.mubr.bf16.mxu0 %v7353_v30 }
 0x241   : > { %1430 = vmatmul.mubr.bf16.gmra.mrb[88].mxu0 %v7355_v32 }
 0x242   : > { %1437 = vmatprep.mubr.bf16.mxu0 %v7357_v33 }
 0x245   : > { %v1487_v36 = vpop.f32.mrb[0].mxu1 }
 0x246   : > { %v6962_v38 = vpop.f32.mrb[1].mxu1 }
 0x247   : > { %v1490_v40 = vpop.f32.mrb[2].mxu1 }
 0x248   : > { %v6963_v41 = vpop.f32.mrb[3].mxu1 }
 0x249   : > { %1438 = vmatmul.mubr.bf16.gmra.mrb[92].mxu0 %v7359_v37 }
 0x24a   : > { %1445 = vmatprep.mubr.bf16.mxu0 %v6453_v39 }
 0x24d   : > { %v1495_v43 = vpop.f32.mrb[4].mxu1 }
 0x24e   : > { %v6966_v45 = vpop.f32.mrb[5].mxu1 }
 0x24f   : > { %v1498_v46 = vpop.f32.mrb[6].mxu1 }
 0x250   : > { %v6967_v47 = vpop.f32.mrb[7].mxu1 }
 0x251   : > { %1446 = vmatmul.mubr.bf16.gmra.mrb[96].mxu0 %v6452_v44 }
 0x252   : > { %3036 = vmatprep.mubr.bf16.mxu0 %v13107_v0 }
 0x255   : > { %v1503_v48 = vpop.f32.mrb[8].mxu1 }
 0x256   : > { %v6970_v49 = vpop.f32.mrb[9].mxu1 }
 0x257   : > { %v1506_v50 = vpop.f32.mrb[10].mxu1 }
 0x258   : > { %v6971_v51 = vpop.f32.mrb[11].mxu1 }
 0x25d   : > { %v8946_v54 = vpop.f32.mrb[12].mxu1 }
 0x25e   : > { %v6974_v58 = vpop.f32.mrb[13].mxu1 }
 0x25f   : > { %v8949_v60 = vpop.f32.mrb[14].mxu1  ;;  %v6868_v58 = vld [vmem:[%s8759_s17 + $0x20] sm:$0xff]  }
 0x260   : > { %v6975_v2 = vpop.f32.mrb[15].mxu1 }
 0x261   : > { %v6667_v2 = vunpack.c.l.bf16 %v6868_v58 }
 0x264   : > { %v1255_v53 = vpop.f32.mrb[0].mxu0 }
 0x265   : > { %v1256_v55 = vadd.f32 %v8943_v52, %v1255_v53  ;;  %v1257_v56 = vpop.f32.mrb[1].mxu0  ;;  %v8956_v8 = vpop.f32.mrb[16].mxu1 }
 0x266   : > { %v1258_v59 = vpop.f32.mrb[2].mxu0  ;;  %v6978_v13 = vpop.f32.mrb[17].mxu1 }
 0x267   : > { %v1488_v61 = vadd.f32 %v1487_v36, %v1256_v55  ;;  %v1259_v62 = vadd.f32 %v8943_v52, %v1258_v59  ;;  %v1260_v63 = vpop.f32.mrb[3].mxu0  ;;  %v8961_v15 = vpop.f32.mrb[18].mxu1  ;;  %v6660_v36 = vunpack.c.h.bf16 %v6866_v23 }
 0x268   : > { %v6979_v19 = vpop.f32.mrb[19].mxu1 }
 0x269   : > { %v1491_v3 = vadd.f32 %v1490_v40, %v1259_v62  ;;  %v8952_v4 = vadd.f32 %v6651_v57, %v1488_v61  ;;  %v6867_v40 = vld [vmem:[%s8759_s17 + $0x18] sm:$0xff]  }
 0x26a   : > { %v6664_v53 = vunpack.c.h.bf16 %v6867_v40 }
 0x26b   : > { %13369 = vst [vmem:[#allocation29_spill] sm:$0xff] %v8952_v4  ;;  %1832 = vadd.xlane.f32.xlu0 %v8952_v4  ;;  %v8959_v11 = vadd.f32 %v6652_v5, %v1491_v3 }
 0x26c   : > { %v1263_v7 = vpop.f32.mrb[4].mxu0 }
 0x26d   : > { %v1264_v9 = vadd.f32 %v8943_v52, %v1263_v7  ;;  %v1265_v10 = vpop.f32.mrb[5].mxu0  ;;  %13370 = vst [vmem:[#allocation30_spill] sm:$0xff] %v8959_v11  ;;  %v8969_v25 = vpop.f32.mrb[20].mxu1 }
 0x26e   : > { %v1266_v14 = vpop.f32.mrb[6].mxu0  ;;  %v6982_v30 = vpop.f32.mrb[21].mxu1  ;;  %v6668_v10 = vunpack.c.h.bf16 %v6868_v58 }
 0x26f   : > { %v1496_v16 = vadd.f32 %v1495_v43, %v1264_v9  ;;  %v1267_v17 = vadd.f32 %v8943_v52, %v1266_v14  ;;  %v1268_v18 = vpop.f32.mrb[7].mxu0  ;;  %1834 = vadd.xlane.f32.xlu0 %v8959_v11  ;;  %v8974_v32 = vpop.f32.mrb[22].mxu1 }
 0x270   : > { %v6983_v37 = vpop.f32.mrb[23].mxu1 }
 0x271   : > { %v1499_v20 = vadd.f32 %v1498_v46, %v1267_v17  ;;  %v8965_v21 = vadd.f32 %v6655_v12, %v1496_v16  ;;  %v6663_v46 = vunpack.c.l.bf16 %v6867_v40  ;;  %v6869_v16 = vld [vmem:[%s8759_s17 + $0x28] sm:$0xff]  }
 0x272   : > { %v6672_v30 = vunpack.c.h.bf16 %v6869_v16 }
 0x273   : > { %13371 = vst [vmem:[#allocation31_spill] sm:$0xff] %v8965_v21  ;;  %1836 = vadd.xlane.f32.xlu1 %v8965_v21  ;;  %v8972_v28 = vadd.f32 %v6656_v22, %v1499_v20 }
 0x274   : > { %v1271_v24 = vpop.f32.mrb[8].mxu0 }
 0x275   : > { %v1272_v26 = vadd.f32 %v8943_v52, %v1271_v24  ;;  %v1273_v27 = vpop.f32.mrb[9].mxu0  ;;  %13372 = vst [vmem:[#allocation32_spill] sm:$0xff] %v8972_v28  ;;  %v8984_v43 = vpop.f32.mrb[24].mxu1 }
 0x276   : > { %v1274_v31 = vpop.f32.mrb[10].mxu0  ;;  %v6986_v47 = vpop.f32.mrb[25].mxu1 }
 0x277   : > { %v1504_v33 = vadd.f32 %v1503_v48, %v1272_v26  ;;  %v1275_v34 = vadd.f32 %v8943_v52, %v1274_v31  ;;  %v1276_v35 = vpop.f32.mrb[11].mxu0  ;;  %1838 = vadd.xlane.f32.xlu1 %v8972_v28  ;;  %v8988_v49 = vpop.f32.mrb[26].mxu1 }
 0x278   : > { %v6987_v55 = vpop.f32.mrb[27].mxu1  ;;  %v6870_v35 = vld [vmem:[%s8759_s17 + $0x30] sm:$0xff]  }
 0x279   : > { %v1507_v38 = vadd.f32 %v1506_v50, %v1275_v34  ;;  %v8978_v39 = vadd.f32 %v6659_v29, %v1504_v33  ;;  %v6871_v55 = vld [vmem:[%s8759_s17 + $0x38] sm:$0xff]  }
 0x27b   : > { %13373 = vst [vmem:[#allocation33_spill] sm:$0xff] %v8978_v39  ;;  %1840 = vadd.xlane.f32.xlu0 %v8978_v39  ;;  %v8982_v41 = vadd.f32 %v6660_v36, %v1507_v38 }
 0x27c   : > { %v1279_v42 = vpop.f32.mrb[12].mxu0 }
 0x27d   : > { %13374 = vst [vmem:[#allocation34_spill] sm:$0xff] %v8982_v41  ;;  %v1280_v44 = vadd.f32 %v8943_v52, %v1279_v42  ;;  %v1281_v45 = vpop.f32.mrb[13].mxu0  ;;  %1842 = vadd.xlane.f32.xlu1 %v8982_v41  ;;  %v8999_v62 = vpop.f32.mrb[28].mxu1 }
 0x27e   : > { %v1282_v48 = vpop.f32.mrb[14].mxu0  ;;  %v6990_v3 = vpop.f32.mrb[29].mxu1 }
 0x27f   : > { %v1512_v50 = vadd.f32 %v8946_v54, %v1280_v44  ;;  %v1283_v51 = vadd.f32 %v8943_v52, %v1282_v48  ;;  %v1284_v1 = vpop.f32.mrb[15].mxu0 }
 0x281   : > { %v1515_v56 = vadd.f32 %v8949_v60, %v1283_v51  ;;  %v8993_v57 = vadd.f32 %v6663_v46, %v1512_v50  ;;  %v9003_v60 = vpop.f32.mrb[30].mxu1  ;;  %v6676_v50 = vunpack.c.h.bf16 %v6870_v35 }
 0x282   : > { %v6991_v12 = vpop.f32.mrb[31].mxu1 }
 0x283   : > { %13375 = vst [vmem:[#allocation35_spill] sm:$0xff] %v8993_v57  ;;  %1844 = vadd.xlane.f32.xlu0 %v8993_v57  ;;  %v8997_v59 = vadd.f32 %v6664_v53, %v1515_v56 }
 0x284   : > { %v1287_v61 = vpop.f32.mrb[16].mxu0 }
 0x285   : > { %13376 = vst [vmem:[#allocation36_spill] sm:$0xff] %v8997_v59  ;;  %v1288_v54 = vadd.f32 %v8943_v52, %v1287_v61  ;;  %v1289_v63 = vpop.f32.mrb[17].mxu0  ;;  %1846 = vadd.xlane.f32.xlu1 %v8997_v59  ;;  %v9014_v19 = vpop.f32.mrb[32].mxu1 }
 0x286   : > { %v1290_v5 = vpop.f32.mrb[18].mxu0  ;;  %v6994_v23 = vpop.f32.mrb[33].mxu1 }
 0x287   : > { %v1291_v6 = vadd.f32 %v8943_v52, %v1290_v5  ;;  %v1520_v7 = vadd.f32 %v8956_v8, %v1288_v54  ;;  %v1292_v9 = vpop.f32.mrb[19].mxu0  ;;  %v6671_v8 = vunpack.c.l.bf16 %v6869_v16  ;;  %v6872_v16 = vld [vmem:[%s8759_s17 + $0x40] sm:$0xff]  }
 0x288   : > { %v6680_v9 = vunpack.c.h.bf16 %v6871_v55 }
 0x289   : > { %v1523_v13 = vadd.f32 %v8961_v15, %v1291_v6  ;;  %v9008_v14 = vadd.f32 %v6667_v2, %v1520_v7  ;;  %v9018_v15 = vpop.f32.mrb[34].mxu1 }
 0x28a   : > { %v6995_v31 = vpop.f32.mrb[35].mxu1 }
 0x28b   : > { %13377 = vst [vmem:[#allocation37_spill] sm:$0xff] %v9008_v14  ;;  %1848 = vadd.xlane.f32.xlu0 %v9008_v14  ;;  %v9012_v17 = vadd.f32 %v6668_v10, %v1523_v13  ;;  %v6684_v31 = vunpack.c.h.bf16 %v6872_v16 }
 0x28c   : > { %v1295_v18 = vpop.f32.mrb[20].mxu0 }
 0x28d   : > { %13378 = vst [vmem:[#allocation38_spill] sm:$0xff] %v9012_v17  ;;  %v1296_v20 = vadd.f32 %v8943_v52, %v1295_v18  ;;  %v1297_v22 = vpop.f32.mrb[21].mxu0  ;;  %1850 = vadd.xlane.f32.xlu1 %v9012_v17  ;;  %v9029_v38 = vpop.f32.mrb[36].mxu1 }
 0x28e   : > { %v1298_v24 = vpop.f32.mrb[22].mxu0  ;;  %v6998_v44 = vpop.f32.mrb[37].mxu1 }
 0x28f   : > { %v1299_v26 = vadd.f32 %v8943_v52, %v1298_v24  ;;  %v1528_v27 = vadd.f32 %v8969_v25, %v1296_v20  ;;  %v1300_v29 = vpop.f32.mrb[23].mxu0  ;;  %v6675_v25 = vunpack.c.l.bf16 %v6870_v35 }
 0x291   : > { %v1531_v33 = vadd.f32 %v8974_v32, %v1299_v26  ;;  %v9023_v34 = vadd.f32 %v6671_v8, %v1528_v27  ;;  %v9033_v32 = vpop.f32.mrb[38].mxu1 }
 0x292   : > { %v6999_v51 = vpop.f32.mrb[39].mxu1 }
 0x293   : > { %13379 = vst [vmem:[#allocation39_spill] sm:$0xff] %v9023_v34  ;;  %1852 = vadd.xlane.f32.xlu0 %v9023_v34  ;;  %v9027_v36 = vadd.f32 %v6672_v30, %v1531_v33 }
 0x294   : > { %v1303_v37 = vpop.f32.mrb[24].mxu0 }
 0x295   : > { %13380 = vst [vmem:[#allocation40_spill] sm:$0xff] %v9027_v36  ;;  %v1304_v40 = vadd.f32 %v8943_v52, %v1303_v37  ;;  %v1305_v42 = vpop.f32.mrb[25].mxu0  ;;  %1854 = vadd.xlane.f32.xlu1 %v9027_v36  ;;  %v9044_v61 = vpop.f32.mrb[40].mxu1 }
 0x296   : > { %v1306_v45 = vpop.f32.mrb[26].mxu0  ;;  %v7002_v2 = vpop.f32.mrb[41].mxu1 }
 0x297   : > { %v1307_v46 = vadd.f32 %v8943_v52, %v1306_v45  ;;  %v1536_v47 = vadd.f32 %v8984_v43, %v1304_v40  ;;  %v1308_v48 = vpop.f32.mrb[27].mxu0  ;;  %v6679_v43 = vunpack.c.l.bf16 %v6871_v55  ;;  %v6873_v40 = vld [vmem:[%s8759_s17 + $0x48] sm:$0xff]  }
 0x299   : > { %v1539_v1 = vadd.f32 %v8988_v49, %v1307_v46  ;;  %v9038_v53 = vadd.f32 %v6675_v25, %v1536_v47  ;;  %v1570_v49 = vpop.f32.mrb[42].mxu1 }
 0x29a   : > { %v7003_v10 = vpop.f32.mrb[43].mxu1 }
 0x29b   : > { %13381 = vst [vmem:[#allocation41_spill] sm:$0xff] %v9038_v53  ;;  %1856 = vadd.xlane.f32.xlu0 %v9038_v53  ;;  %v9042_v56 = vadd.f32 %v6676_v50, %v1539_v1  ;;  %v6688_v1 = vunpack.c.h.bf16 %v6873_v40 }
 0x29c   : > { %v1311_v58 = vpop.f32.mrb[28].mxu0 }
 0x29d   : > { %13382 = vst [vmem:[#allocation42_spill] sm:$0xff] %v9042_v56  ;;  %v1312_v54 = vadd.f32 %v8943_v52, %v1311_v58  ;;  %v1313_v63 = vpop.f32.mrb[29].mxu0  ;;  %1858 = vadd.xlane.f32.xlu1 %v9042_v56  ;;  %v1575_v22 = vpop.f32.mrb[44].mxu1 }
 0x29e   : > { %v1314_v3 = vpop.f32.mrb[30].mxu0  ;;  %v7006_v24 = vpop.f32.mrb[45].mxu1 }
 0x29f   : > { %v1315_v5 = vadd.f32 %v8943_v52, %v1314_v3  ;;  %v1544_v6 = vadd.f32 %v8999_v62, %v1312_v54  ;;  %v1316_v7 = vpop.f32.mrb[31].mxu0  ;;  %v6683_v62 = vunpack.c.l.bf16 %v6872_v16  ;;  %v1578_v27 = vpop.f32.mrb[46].mxu1 }
 0x2a0   : > { %v7007_v33 = vpop.f32.mrb[47].mxu1 }
 0x2a1   : > { %v1547_v12 = vadd.f32 %v9003_v60, %v1315_v5  ;;  %v9051_v13 = vadd.f32 %v6679_v43, %v1544_v6 }
 0x2a3   : > { %13383 = vst [vmem:[#allocation43_spill] sm:$0xff] %v9051_v13  ;;  %1860 = vadd.xlane.f32.xlu0 %v9051_v13  ;;  %v9055_v18 = vadd.f32 %v6680_v9, %v1547_v12 }
 0x2a4   : > { %v1319_v20 = vpop.f32.mrb[32].mxu0 }
 0x2a5   : > { %13384 = vst [vmem:[#allocation44_spill] sm:$0xff] %v9055_v18  ;;  %v1320_v8 = vadd.f32 %v8943_v52, %v1319_v20  ;;  %v1321_v23 = vpop.f32.mrb[33].mxu0  ;;  %1862 = vadd.xlane.f32.xlu1 %v9055_v18  ;;  %v1583_v44 = vpop.f32.mrb[48].mxu1 }
 0x2a6   : > { %v1322_v26 = vpop.f32.mrb[34].mxu0  ;;  %v7010_v47 = vpop.f32.mrb[49].mxu1 }
 0x2a7   : > { %v1323_v60 = vadd.f32 %v8943_v52, %v1322_v26  ;;  %v1552_v29 = vadd.f32 %v9014_v19, %v1320_v8  ;;  %v1324_v30 = vpop.f32.mrb[35].mxu0  ;;  %v6687_v19 = vunpack.c.l.bf16 %v6873_v40  ;;  %v1586_v50 = vpop.f32.mrb[50].mxu1 }
 0x2a8   : > { %v7011_v58 = vpop.f32.mrb[51].mxu1 }
 0x2a9   : > { %v1555_v35 = vadd.f32 %v9018_v15, %v1323_v60  ;;  %v9062_v37 = vadd.f32 %v6683_v62, %v1552_v29 }
 0x2ab   : > { %13385 = vst [vmem:[#allocation45_spill] sm:$0xff] %v9062_v37  ;;  %1864 = vadd.xlane.f32.xlu0 %v9062_v37  ;;  %v9066_v42 = vadd.f32 %v6684_v31, %v1555_v35 }
 0x2ac   : > { %v1327_v25 = vpop.f32.mrb[36].mxu0 }
 0x2ad   : > { %13386 = vst [vmem:[#allocation46_spill] sm:$0xff] %v9066_v42  ;;  %v1328_v45 = vadd.f32 %v8943_v52, %v1327_v25  ;;  %v1329_v46 = vpop.f32.mrb[37].mxu0  ;;  %1866 = vadd.xlane.f32.xlu1 %v9066_v42  ;;  %v1591_v3 = vpop.f32.mrb[52].mxu1 }
 0x2ae   : > { %v1330_v48 = vpop.f32.mrb[38].mxu0  ;;  %v7014_v7 = vpop.f32.mrb[53].mxu1 }
 0x2af   : > { %v1331_v15 = vadd.f32 %v8943_v52, %v1330_v48  ;;  %v1560_v51 = vadd.f32 %v9029_v38, %v1328_v45  ;;  %v1332_v55 = vpop.f32.mrb[39].mxu0  ;;  %v1594_v9 = vpop.f32.mrb[54].mxu1 }
 0x2b0   : > { %v7015_v16 = vpop.f32.mrb[55].mxu1 }
 0x2b1   : > { %v1563_v54 = vadd.f32 %v9033_v32, %v1331_v15  ;;  %v9073_v63 = vadd.f32 %v6687_v19, %v1560_v51  ;;  %v7366_v16 = vld [vmem:[#allocation13 + $0x4] ss:$16 sps:$4 sm:$0xff]  }
 0x2b2   : > { %2723 = vmatprep.subr.bf16.mxu1 %v7366_v16 }
 0x2b3   : > { %13387 = vst [vmem:[#allocation47_spill] sm:$0xff] %v9073_v63  ;;  %1868 = vadd.xlane.f32.xlu0 %v9073_v63  ;;  %v9076_v43 = vadd.f32 %v6688_v1, %v1563_v54 }
 0x2b4   : > { %v1335_v2 = vpop.f32.mrb[40].mxu0 }
 0x2b5   : > { %13388 = vst [vmem:[#allocation48_spill] sm:$0xff] %v9076_v43  ;;  %1870 = vadd.xlane.f32.xlu1 %v9076_v43  ;;  %v1336_v5 = vadd.f32 %v8943_v52, %v1335_v2  ;;  %v1337_v6 = vpop.f32.mrb[41].mxu0  ;;  %v1599_v23 = vpop.f32.mrb[56].mxu1 }
 0x2b6   : > { %v1338_v38 = vpop.f32.mrb[42].mxu0  ;;  %v7018_v26 = vpop.f32.mrb[57].mxu1 }
 0x2b7   : > { %v1339_v10 = vadd.f32 %v8943_v52, %v1338_v38  ;;  %v9082_v32 = vadd.f32 %v9044_v61, %v1336_v5  ;;  %v1340_v12 = vpop.f32.mrb[43].mxu0  ;;  %v1602_v29 = vpop.f32.mrb[58].mxu1  ;;  %v7375_v26 = vld [vmem:[#allocation13 + $0x2c] ss:$16 sps:$4 sm:$0xff]  }
 0x2b8   : > { %v7019_v35 = vpop.f32.mrb[59].mxu1 }
 0x2b9   : > { %v9084_v20 = vadd.f32 %v1570_v49, %v1339_v10 }
 0x2bc   : > { %v1343_v8 = vpop.f32.mrb[44].mxu0 }
 0x2bd   : > { %v1344_v62 = vadd.f32 %v8943_v52, %v1343_v8  ;;  %v1345_v24 = vpop.f32.mrb[45].mxu0  ;;  %v1607_v25 = vpop.f32.mrb[60].mxu1  ;;  %v7367_v8 = vld [vmem:[#allocation13 + $0x8] ss:$16 sps:$4 sm:$0xff]  }
 0x2be   : > { %v1346_v60 = vpop.f32.mrb[46].mxu0  ;;  %v7022_v46 = vpop.f32.mrb[61].mxu1  ;;  %v7372_v24 = vld [vmem:[#allocation13 + $0x24] ss:$16 sps:$4 sm:$0xff]  }
 0x2bf   : > { %v1347_v30 = vadd.f32 %v8943_v52, %v1346_v60  ;;  %v9088_v31 = vadd.f32 %v1575_v22, %v1344_v62  ;;  %v1348_v33 = vpop.f32.mrb[47].mxu0  ;;  %v1610_v47 = vpop.f32.mrb[62].mxu1  ;;  %v7369_v62 = vld [vmem:[#allocation13 + $0xc] ss:$16 sps:$4 sm:$0xff]   ;;  %v7370_v60 = vld [vmem:[#allocation13 + $0x20] ss:$16 sps:$4 sm:$0xff]  }
 0x2c0   : > { %v7023_v1 = vpop.f32.mrb[63].mxu1  ;;  %3004 = vmatprep.subr.bf16.mxu0 %v7369_v62 }
 0x2c1   : > { %v9090_v61 = vadd.f32 %v1578_v27, %v1347_v30  ;;  %3005 = vmatpush1.bf16.msra.mxu0 %v7367_v8  ;;  %v7373_v30 = vld [vmem:[#allocation13 + $0x28] ss:$16 sps:$4 sm:$0xff]  }
 0x2c2   : > { %3006 = vmatprep.subr.bf16.mxu0 %v7375_v26 }
 0x2c4   : > { %v1351_v40 = vpop.f32.mrb[48].mxu0 }
 0x2c5   : > { %v1352_v49 = vadd.f32 %v8943_v52, %v1351_v40  ;;  %v1353_v45 = vpop.f32.mrb[49].mxu0  ;;  %v1615_v58 = vpop.f32.mrb[64].mxu1  ;;  %3007 = vmatpush1.bf16.msra.mxu0 %v7373_v30 }
 0x2c6   : > { %v1354_v19 = vpop.f32.mrb[50].mxu0  ;;  %v7026_v2 = vpop.f32.mrb[65].mxu1 }
 0x2c7   : > { %v1355_v48 = vadd.f32 %v8943_v52, %v1354_v19  ;;  %v9094_v15 = vadd.f32 %v1583_v44, %v1352_v49  ;;  %v1356_v51 = vpop.f32.mrb[51].mxu0  ;;  %v1618_v6 = vpop.f32.mrb[66].mxu1  ;;  %v7364_v44 = vld [vmem:[#allocation13] ss:$16 sps:$4 sm:$0xff]  }
 0x2c8   : > { %v7027_v12 = vpop.f32.mrb[67].mxu1  ;;  %2724 = vmatpush1.bf16.msra.mxu1 %v7364_v44 }
 0x2c9   : > { %v9096_v22 = vadd.f32 %v1586_v50, %v1355_v48  ;;  %2725 = vmatprep.subr.bf16.mxu1 %v7372_v24 }
 0x2cc   : > { %v1359_v55 = vpop.f32.mrb[52].mxu0  ;;  %2726 = vmatpush1.bf16.msra.mxu1 %v7370_v60 }
 0x2cd   : > { %v1360_v27 = vadd.f32 %v8943_v52, %v1359_v55  ;;  %v1361_v54 = vpop.f32.mrb[53].mxu0 }
 0x2ce   : > { %v1362_v5 = vpop.f32.mrb[54].mxu0 }
 0x2cf   : > { %v1363_v7 = vadd.f32 %v8943_v52, %v1362_v5  ;;  %v9100_v38 = vadd.f32 %v1591_v3, %v1360_v27  ;;  %v1364_v10 = vpop.f32.mrb[55].mxu0  ;;  %v1623_v3 = vpop.f32.mrb[68].mxu1 }
 0x2d0   : > { %v7030_v49 = vpop.f32.mrb[69].mxu1 }
 0x2d1   : > { %v9102_v50 = vadd.f32 %v1594_v9, %v1363_v7  ;;  %v1626_v46 = vpop.f32.mrb[70].mxu1 }
 0x2d2   : > { %v7031_v51 = vpop.f32.mrb[71].mxu1 }
 0x2d4   : > { %v1367_v33 = vpop.f32.mrb[56].mxu0 }
 0x2d5   : > { %v1368_v35 = vadd.f32 %v8943_v52, %v1367_v33  ;;  %v1369_v40 = vpop.f32.mrb[57].mxu0  ;;  %v1631_v27 = vpop.f32.mrb[72].mxu1 }
 0x2d6   : > { %v1370_v45 = vpop.f32.mrb[58].mxu0  ;;  %v7034_v5 = vpop.f32.mrb[73].mxu1 }
 0x2d7   : > { %v9105_v9 = vadd.f32 %v1599_v23, %v1368_v35  ;;  %v1371_v19 = vadd.f32 %v8943_v52, %v1370_v45  ;;  %v1372_v48 = vpop.f32.mrb[59].mxu0  ;;  %v1634_v10 = vpop.f32.mrb[74].mxu1 }
 0x2d8   : > { %v7035_v16 = vpop.f32.mrb[75].mxu1 }
 0x2d9   : > { %v9108_v1 = vadd.f32 %v1602_v29, %v1371_v19 }
 0x2dc   : > { %v1375_v55 = vpop.f32.mrb[60].mxu0 }
 0x2dd   : > { %v1376_v54 = vadd.f32 %v8943_v52, %v1375_v55  ;;  %v1377_v2 = vpop.f32.mrb[61].mxu0  ;;  %v1639_v24 = vpop.f32.mrb[76].mxu1 }
 0x2de   : > { %v1378_v7 = vpop.f32.mrb[62].mxu0  ;;  %v7038_v60 = vpop.f32.mrb[77].mxu1 }
 0x2df   : > { %v9111_v12 = vadd.f32 %v1607_v25, %v1376_v54  ;;  %v1379_v23 = vadd.f32 %v8943_v52, %v1378_v7  ;;  %v1380_v44 = vpop.f32.mrb[63].mxu0  ;;  %v1642_v33 = vpop.f32.mrb[78].mxu1 }
 0x2e0   : > { %v7039_v49 = vpop.f32.mrb[79].mxu1 }
 0x2e1   : > { %v9114_v8 = vadd.f32 %v1610_v47, %v1379_v23 }
 0x2e4   : > { %v1383_v62 = vpop.f32.mrb[64].mxu0 }
 0x2e5   : > { %v1384_v29 = vadd.f32 %v8943_v52, %v1383_v62  ;;  %v1385_v26 = vpop.f32.mrb[65].mxu0  ;;  %v1647_v0 = vpop.f32.mrb[80].mxu1 }
 0x2e6   : > { %v1386_v30 = vpop.f32.mrb[66].mxu0  ;;  %v6874_v26 = vld [vmem:[%s8759_s17 + $0x50] sm:$0xff]  }
 0x2e7   : > { %v9117_v35 = vadd.f32 %v1615_v58, %v1384_v29  ;;  %v1387_v40 = vadd.f32 %v8943_v52, %v1386_v30  ;;  %v1388_v25 = vpop.f32.mrb[67].mxu0 }
 0x2e9   : > { %v9120_v45 = vadd.f32 %v1618_v6, %v1387_v40 }
 0x2ec   : > { %v1391_v19 = vpop.f32.mrb[68].mxu0 }
 0x2ed   : > { %v1392_v47 = vadd.f32 %v8943_v52, %v1391_v19  ;;  %v1393_v48 = vpop.f32.mrb[69].mxu0 }
 0x2ee   : > { %v1394_v51 = vpop.f32.mrb[70].mxu0 }
 0x2ef   : > { %v9123_v55 = vadd.f32 %v1623_v3, %v1392_v47  ;;  %v1395_v54 = vadd.f32 %v8943_v52, %v1394_v51  ;;  %v1396_v2 = vpop.f32.mrb[71].mxu0 }
 0x2f1   : > { %v9126_v5 = vadd.f32 %v1626_v46, %v1395_v54  ;;  %v6691_v46 = vunpack.c.l.bf16 %v6874_v26 }
 0x2f4   : > { %v1399_v58 = vpop.f32.mrb[72].mxu0 }
 0x2f5   : > { %v1400_v7 = vadd.f32 %v8943_v52, %v1399_v58  ;;  %v1401_v23 = vpop.f32.mrb[73].mxu0 }
 0x2f6   : > { %v1402_v44 = vpop.f32.mrb[74].mxu0  ;;  %v6875_v23 = vld [vmem:[%s8759_s17 + $0x58] sm:$0xff]  }
 0x2f7   : > { %v9129_v6 = vadd.f32 %v1631_v27, %v1400_v7  ;;  %v1403_v16 = vadd.f32 %v8943_v52, %v1402_v44  ;;  %v1404_v62 = vpop.f32.mrb[75].mxu0 }
 0x2f8   : > { %v1833_v29 = vpop.xlane.xlu0 %1832  ;;  %v6692_v62 = vunpack.c.h.bf16 %v6874_v26 }
 0x2f9   : > { %v1931_v60 = vmul.f32 0.0078125, %v1833_v29  ;;  %v9133_v3 = vadd.f32 %v1634_v10, %v1403_v16  ;;  %v9145_v10 = vadd.f32 %v6691_v46, %v9082_v32  ;;  %v6695_v32 = vunpack.c.l.bf16 %v6875_v23 }
 0x2fb   : > { %v9136_v30 = vsub.f32 %v8952_v4, %v1931_v60  ;;  %13389 = vst [vmem:[#allocation49_spill] sm:$0xff] %v9145_v10 }
 0x2fc   : > { %v1835_v40 = vpop.xlane.xlu0 %1834  ;;  %v1407_v25 = vpop.f32.mrb[76].mxu0 }
 0x2fd   : > { %v1932_v49 = vmul.f32 0.0078125, %v1835_v40  ;;  %v2029_v27 = vmul.f32 %v9136_v30, %v9136_v30  ;;  %v1408_v19 = vadd.f32 %v8943_v52, %v1407_v25  ;;  %v1409_v47 = vpop.f32.mrb[77].mxu0  ;;  %v9162_v25 = vadd.f32 %v6692_v62, %v9084_v20  ;;  %v7381_v62 = vld [vmem:[#allocation13 + $0x4c] ss:$16 sps:$4 sm:$0xff]  }
 0x2fe   : > { %v1410_v48 = vpop.f32.mrb[78].mxu0  ;;  %3008 = vmatprep.subr.bf16.mxu0 %v7381_v62  ;;  %v7385_v62 = vld [vmem:[#allocation13 + $0x68] ss:$16 sps:$4 sm:$0xff]  }
 0x2ff   : > { %v9142_v51 = vsub.f32 %v8959_v11, %v1932_v49  ;;  %2078 = vadd.xlane.f32.xlu0 %v2029_v27  ;;  %v9147_v54 = vadd.f32 %v1639_v24, %v1408_v19  ;;  %v1411_v2 = vadd.f32 %v8943_v52, %v1410_v48  ;;  %v1412_v58 = vpop.f32.mrb[79].mxu0  ;;  %13390 = vst [vmem:[#allocation50_spill] sm:$0xff] %v9162_v25  ;;  %v6876_v27 = vld [vmem:[%s8759_s17 + $0x60] sm:$0xff]   ;;  %v6696_v48 = vunpack.c.h.bf16 %v6875_v23 }
 0x300   : > { %v1837_v7 = vpop.xlane.xlu1 %1836  ;;  %v7378_v23 = vld [vmem:[#allocation13 + $0x44] ss:$16 sps:$4 sm:$0xff]  }
 0x301   : > { %v1933_v44 = vmul.f32 0.0078125, %v1837_v7  ;;  %v2030_v16 = vmul.f32 %v9142_v51, %v9142_v51  ;;  %v9153_v29 = vadd.f32 %v1642_v33, %v1411_v2  ;;  %v9169_v33 = vadd.f32 %v6695_v32, %v9088_v31  ;;  %2727 = vmatprep.subr.bf16.mxu1 %v7378_v23  ;;  %v7382_v23 = vld [vmem:[#allocation13 + $0x60] ss:$16 sps:$4 sm:$0xff]  }
 0x302   : > { %v6699_v7 = vunpack.c.l.bf16 %v6876_v27 }
 0x303   : > { %v9156_v60 = vsub.f32 %v8965_v21, %v1933_v44  ;;  %1872 = vadd.xlane.f32.xlu0 %v9145_v10  ;;  %2080 = vadd.xlane.f32.xlu1 %v2030_v16  ;;  %13391 = vst [vmem:[#allocation51_spill] sm:$0xff] %v9169_v33  ;;  %v9182_v44 = vadd.f32 %v6696_v48, %v9090_v61  ;;  %v6879_v21 = vld [vmem:[%s8759_s17 + $0x78] sm:$0xff]  }
 0x304   : > { %v1839_v24 = vpop.xlane.xlu1 %1838  ;;  %v9188_v32 = vadd.f32 %v6699_v7, %v9094_v15 }
 0x305   : > { %v1934_v46 = vmul.f32 0.0078125, %v1839_v24  ;;  %v2031_v40 = vmul.f32 %v9156_v60, %v9156_v60  ;;  %13392 = vst [vmem:[#allocation52_spill] sm:$0xff] %v9182_v44  ;;  %v7376_v24 = vld [vmem:[#allocation13 + $0x40] ss:$16 sps:$4 sm:$0xff]  }
 0x306   : > { %13393 = vst [vmem:[#allocation53_spill] sm:$0xff] %v9188_v32  ;;  %2728 = vmatpush1.bf16.msra.mxu1 %v7376_v24 }
 0x307   : > { %v9165_v49 = vsub.f32 %v8972_v28, %v1934_v46  ;;  %2082 = vadd.xlane.f32.xlu0 %v2031_v40  ;;  %1874 = vadd.xlane.f32.xlu1 %v9162_v25  ;;  %v7379_v46 = vld [vmem:[#allocation13 + $0x48] ss:$16 sps:$4 sm:$0xff]  }
 0x308   : > { %v1841_v26 = vpop.xlane.xlu0 %1840  ;;  %3009 = vmatpush1.bf16.msra.mxu0 %v7379_v46 }
 0x309   : > { %v1935_v19 = vmul.f32 0.0078125, %v1841_v26  ;;  %v2032_v47 = vmul.f32 %v9165_v49, %v9165_v49  ;;  %v9191_v26 = vld [vmem:[%s8759_s17 + $0x68] sm:$0xff]  }
 0x30a   : > { %v1843_v2 = vpop.xlane.xlu1 %1842 }
 0x30b   : > { %v9175_v20 = vsub.f32 %v8978_v39, %v1935_v19  ;;  %v1936_v58 = vmul.f32 0.0078125, %v1843_v2  ;;  %1876 = vadd.xlane.f32.xlu0 %v9169_v33  ;;  %2084 = vadd.xlane.f32.xlu1 %v2032_v47  ;;  %v6700_v19 = vunpack.c.h.bf16 %v6876_v27  ;;  %v7384_v2 = vld [vmem:[#allocation13 + $0x64] ss:$16 sps:$4 sm:$0xff]   ;;  %v6703_v27 = vunpack.c.l.bf16 %v9191_v26 }
 0x30c   : > { %2729 = vmatprep.subr.bf16.mxu1 %v7384_v2 }
 0x30d   : > { %v9179_v31 = vsub.f32 %v8982_v41, %v1936_v58  ;;  %v2033_v16 = vmul.f32 %v9175_v20, %v9175_v20  ;;  %v7387_v58 = vld [vmem:[#allocation13 + $0x6c] ss:$16 sps:$4 sm:$0xff]   ;;  %2730 = vmatpush1.bf16.msra.mxu1 %v7382_v23  ;;  %v7042_v41 = vpop.f32.mrb[81].mxu1 }
 0x30e   : > { %3010 = vmatprep.subr.bf16.mxu0 %v7387_v58  ;;  %v6878_v23 = vld [vmem:[%s8759_s17 + $0x70] sm:$0xff]  }
 0x30f   : > { %1878 = vadd.xlane.f32.xlu1 %v9182_v44  ;;  %2086 = vadd.xlane.f32.xlu0 %v2033_v16  ;;  %v2034_v47 = vmul.f32 %v9179_v31, %v9179_v31  ;;  %v1415_v16 = vpop.f32.mrb[80].mxu0  ;;  %v7391_v41 = vld [vmem:[#allocation13 + $0x88] ss:$16 sps:$4 sm:$0xff]  }
 0x310   : > { %v1845_v40 = vpop.xlane.xlu0 %1844  ;;  %v1417_v24 = vpop.f32.mrb[81].mxu0  ;;  %3011 = vmatpush1.bf16.msra.mxu0 %v7385_v62 }
 0x311   : > { %v1937_v61 = vmul.f32 0.0078125, %v1845_v40  ;;  %v9201_v40 = vadd.f32 %v6700_v19, %v9096_v22  ;;  %v7390_v22 = vld [vmem:[#allocation13 + $0x84] ss:$16 sps:$4 sm:$0xff]   ;;  %v9210_v19 = vadd.f32 %v6703_v27, %v9100_v38  ;;  %v6704_v24 = vunpack.c.h.bf16 %v9191_v26 }
 0x312   : > { %v1847_v48 = vpop.xlane.xlu1 %1846  ;;  %2731 = vmatprep.subr.bf16.mxu1 %v7390_v22  ;;  %v6707_v22 = vunpack.c.l.bf16 %v6878_v23 }
 0x313   : > { %v9196_v15 = vsub.f32 %v8993_v57, %v1937_v61  ;;  %v1938_v7 = vmul.f32 0.0078125, %v1847_v48  ;;  %2088 = vadd.xlane.f32.xlu1 %v2034_v47  ;;  %1880 = vadd.xlane.f32.xlu0 %v9188_v32  ;;  %13394 = vst [vmem:[#allocation54_spill] sm:$0xff] %v9201_v40  ;;  %v1416_v47 = vadd.f32 %v8943_v52, %v1415_v16  ;;  %v1418_v48 = vpop.f32.mrb[82].mxu0  ;;  %13395 = vst [vmem:[#allocation55_spill] sm:$0xff] %v9210_v19  ;;  %v7388_v16 = vld [vmem:[#allocation13 + $0x80] ss:$16 sps:$4 sm:$0xff]  }
 0x314   : > { %v1420_v57 = vpop.f32.mrb[83].mxu0  ;;  %v1419_v2 = vadd.f32 %v8943_v52, %v1418_v48  ;;  %2732 = vmatpush1.bf16.msra.mxu1 %v7388_v16  ;;  %v9227_v28 = vadd.f32 %v6704_v24, %v9102_v50  ;;  %v7402_v24 = vld [vmem:[#allocation13 + $0xc4] ss:$16 sps:$4 sm:$0xff]  }
 0x315   : > { %v9204_v46 = vsub.f32 %v8997_v59, %v1938_v7  ;;  %v2035_v61 = vmul.f32 %v9196_v15, %v9196_v15  ;;  %v9214_v58 = vadd.f32 %v1647_v0, %v1416_v47  ;;  %v1650_v7 = vpop.f32.mrb[82].mxu1  ;;  %v7393_v57 = vld [vmem:[#allocation13 + $0x8c] ss:$16 sps:$4 sm:$0xff]   ;;  %v7396_v0 = vld [vmem:[#allocation13 + $0xa4] ss:$16 sps:$4 sm:$0xff]  }
 0x316   : > { %v7043_v62 = vpop.f32.mrb[83].mxu1  ;;  %v9220_v27 = vadd.f32 %v1650_v7, %v1419_v2  ;;  %3012 = vmatprep.subr.bf16.mxu0 %v7393_v57  ;;  %v7399_v47 = vld [vmem:[#allocation13 + $0xac] ss:$16 sps:$4 sm:$0xff]   ;;  %13396 = vst [vmem:[#allocation56_spill] sm:$0xff] %v9227_v28  ;;  %2733 = vmatprep.subr.bf16.mxu1 %v7396_v0  ;;  %v7397_v7 = vld [vmem:[#allocation13 + $0xa8] ss:$16 sps:$4 sm:$0xff]   ;;  %v6708_v0 = vunpack.c.h.bf16 %v6878_v23 }
 0x317   : > { %1882 = vadd.xlane.f32.xlu1 %v9201_v40  ;;  %2090 = vadd.xlane.f32.xlu0 %v2035_v61  ;;  %v2036_v38 = vmul.f32 %v9204_v46, %v9204_v46  ;;  %v1423_v62 = vpop.f32.mrb[84].mxu0 }
 0x318   : > { %v1849_v59 = vpop.xlane.xlu0 %1848  ;;  %3013 = vmatpush1.bf16.msra.mxu0 %v7391_v41  ;;  %v1425_v2 = vpop.f32.mrb[85].mxu0  ;;  %v1424_v57 = vadd.f32 %v8943_v52, %v1423_v62  ;;  %v9236_v41 = vadd.f32 %v6707_v22, %v9105_v9 }
 0x319   : > { %v1939_v39 = vmul.f32 0.0078125, %v1849_v59  ;;  %v7394_v59 = vld [vmem:[#allocation13 + $0xa0] ss:$16 sps:$4 sm:$0xff]   ;;  %3014 = vmatprep.subr.bf16.mxu0 %v7399_v47 }
 0x31a   : > { %v1851_v61 = vpop.xlane.xlu1 %1850  ;;  %2734 = vmatpush1.bf16.msra.mxu1 %v7394_v59  ;;  %13397 = vst [vmem:[#allocation57_spill] sm:$0xff] %v9236_v41  ;;  %v7400_v47 = vld [vmem:[#allocation13 + $0xc0] ss:$16 sps:$4 sm:$0xff]  }
 0x31b   : > { %v9223_v48 = vsub.f32 %v9008_v14, %v1939_v39  ;;  %v1940_v26 = vmul.f32 0.0078125, %v1851_v61  ;;  %2092 = vadd.xlane.f32.xlu1 %v2036_v38  ;;  %1884 = vadd.xlane.f32.xlu0 %v9210_v19  ;;  %v1426_v38 = vpop.f32.mrb[86].mxu0  ;;  %v1655_v61 = vpop.f32.mrb[84].mxu1 }
 0x31c   : > { %v1428_v14 = vpop.f32.mrb[87].mxu0  ;;  %v7046_v50 = vpop.f32.mrb[85].mxu1  ;;  %v9240_v2 = vadd.f32 %v1655_v61, %v1424_v57  ;;  %3015 = vmatpush1.bf16.msra.mxu0 %v7397_v7  ;;  %2735 = vmatprep.subr.bf16.mxu1 %v7402_v24  ;;  %v7411_v57 = vld [vmem:[#allocation13 + $0xec] ss:$16 sps:$4 sm:$0xff]   ;;  %v9251_v7 = vadd.f32 %v6708_v0, %v9108_v1 }
 0x31d   : > { %v9230_v16 = vsub.f32 %v9012_v17, %v1940_v26  ;;  %v2037_v39 = vmul.f32 %v9223_v48, %v9223_v48  ;;  %v1427_v26 = vadd.f32 %v8943_v52, %v1426_v38  ;;  %v1658_v62 = vpop.f32.mrb[86].mxu1  ;;  %v7403_v14 = vld [vmem:[#allocation13 + $0xc8] ss:$16 sps:$4 sm:$0xff]   ;;  %v7405_v50 = vld [vmem:[#allocation13 + $0xcc] ss:$16 sps:$4 sm:$0xff]   ;;  %v1431_v24 = vpop.f32.mrb[88].mxu0 }
 0x31e   : > { %v7047_v59 = vpop.f32.mrb[87].mxu1  ;;  %2736 = vmatpush1.bf16.msra.mxu1 %v7400_v47  ;;  %3016 = vmatprep.subr.bf16.mxu0 %v7405_v50  ;;  %13398 = vst [vmem:[#allocation58_spill] sm:$0xff] %v9251_v7  ;;  %v1432_v1 = vadd.f32 %v8943_v52, %v1431_v24 }
 0x31f   : > { %1886 = vadd.xlane.f32.xlu1 %v9227_v28  ;;  %2094 = vadd.xlane.f32.xlu0 %v2037_v39  ;;  %v2038_v9 = vmul.f32 %v9230_v16, %v9230_v16  ;;  %v9245_v22 = vadd.f32 %v1658_v62, %v1427_v26  ;;  %v7408_v39 = vld [vmem:[#allocation13 + $0xe4] ss:$16 sps:$4 sm:$0xff]   ;;  %v7406_v59 = vld [vmem:[#allocation13 + $0xe0] ss:$16 sps:$4 sm:$0xff]   ;;  %v1433_v26 = vpop.f32.mrb[89].mxu0  ;;  %v1663_v50 = vpop.f32.mrb[88].mxu1 }
 0x320   : > { %v1853_v17 = vpop.xlane.xlu0 %1852  ;;  %3017 = vmatpush1.bf16.msra.mxu0 %v7403_v14  ;;  %2737 = vmatprep.subr.bf16.mxu1 %v7408_v39  ;;  %v7409_v62 = vld [vmem:[#allocation13 + $0xe8] ss:$16 sps:$4 sm:$0xff]   ;;  %v1434_v0 = vpop.f32.mrb[90].mxu0  ;;  %v6712_v39 = vunpack.c.h.bf16 %v6879_v21  ;;  %v9266_v26 = vadd.f32 %v1663_v50, %v1432_v1 }
 0x321   : > { %v1941_v11 = vmul.f32 0.0078125, %v1853_v17  ;;  %v6711_v17 = vunpack.c.l.bf16 %v6879_v21  ;;  %3018 = vmatprep.subr.bf16.mxu0 %v7411_v57 }
 0x322   : > { %v1855_v23 = vpop.xlane.xlu1 %1854  ;;  %2738 = vmatpush1.bf16.msra.mxu1 %v7406_v59 }
 0x323   : > { %v9248_v38 = vsub.f32 %v9023_v34, %v1941_v11  ;;  %v1942_v61 = vmul.f32 0.0078125, %v1855_v23  ;;  %2096 = vadd.xlane.f32.xlu1 %v2038_v9  ;;  %1888 = vadd.xlane.f32.xlu0 %v9236_v41  ;;  %v1436_v9 = vpop.f32.mrb[91].mxu0  ;;  %v7050_v23 = vpop.f32.mrb[89].mxu1  ;;  %v13400_v34 = vmov 0   ;;  %v9262_v14 = vadd.f32 %v6711_v17, %v9111_v12 }
 0x324   : > { %5412 = vmatprep.subr.bf16.mxu1 %v13400_v34  ;;  %v1666_v24 = vpop.f32.mrb[90].mxu1  ;;  %3019 = vmatpush1.bf16.msra.mxu0 %v7409_v62 }
 0x325   : > { %v9255_v47 = vsub.f32 %v9027_v36, %v1942_v61  ;;  %v2039_v11 = vmul.f32 %v9248_v38, %v9248_v38  ;;  %13401 = vst [vmem:[#allocation60_spill] sm:$0xff] %v9262_v14  ;;  %v1435_v61 = vadd.f32 %v8943_v52, %v1434_v0  ;;  %v6880_v36 = vld [vmem:[%s8759_s17 + $0x80] sm:$0xff]   ;;  %v7051_v59 = vpop.f32.mrb[91].mxu1  ;;  %5644 = vmatprep.subr.bf16.mxu0 %v13400_v34 }
 0x326   : > { %v9278_v52 = vadd.f32 %v6712_v39, %v9114_v8  ;;  %v6715_v62 = vunpack.c.l.bf16 %v6880_v36  ;;  %v1671_v59 = vpop.f32.mrb[92].mxu1 }
 0x327   : > { %13399 = vst [vmem:[#allocation59_spill] sm:$0xff] %v9255_v47  ;;  %1890 = vadd.xlane.f32.xlu1 %v9251_v7  ;;  %2098 = vadd.xlane.f32.xlu0 %v2039_v11  ;;  %v2040_v23 = vmul.f32 %v9255_v47, %v9255_v47  ;;  %v9271_v4 = vadd.f32 %v1666_v24, %v1435_v61  ;;  %v1439_v11 = vpop.f32.mrb[92].mxu0  ;;  %v7934_v61 = vld [vmem:[#allocation8] ss:$0 sm:$0xff]  ;;  %v7054_v39 = vpop.f32.mrb[93].mxu1 }
 0x328   : > { %v1857_v57 = vpop.xlane.xlu0 %1856  ;;  %13403 = vst [vmem:[#allocation62_spill] sm:$0xff] %v9278_v52  ;;  %v1441_v1 = vpop.f32.mrb[93].mxu0  ;;  %v1440_v24 = vadd.f32 %v7934_v61, %v1439_v11 }
 0x329   : > { %v1943_v9 = vmul.f32 0.0078125, %v1857_v57  ;;  %v1442_v57 = vpop.f32.mrb[94].mxu0  ;;  %v1674_v1 = vpop.f32.mrb[94].mxu1 }
 0x32a   : > { %v1859_v12 = vpop.xlane.xlu1 %1858  ;;  %v1444_v8 = vpop.f32.mrb[95].mxu0 }
 0x32b   : > { %v9275_v21 = vsub.f32 %v9038_v53, %v1943_v9  ;;  %v1944_v17 = vmul.f32 0.0078125, %v1859_v12  ;;  %2100 = vadd.xlane.f32.xlu1 %v2040_v23  ;;  %1892 = vadd.xlane.f32.xlu0 %v9262_v14  ;;  %v9287_v9 = vadd.f32 %v6715_v62, %v9117_v35  ;;  %v6716_v23 = vunpack.c.h.bf16 %v6880_v36  ;;  %v6881_v53 = vld [vmem:[%s8759_s17 + $0x88] sm:$0xff]  }
 0x32c   : > { %v1443_v12 = vadd.f32 %v7934_v61, %v1442_v57 }
 0x32d   : > { %13402 = vst [vmem:[#allocation61_spill] sm:$0xff] %v9275_v21  ;;  %v9282_v0 = vsub.f32 %v9042_v56, %v1944_v17  ;;  %v2041_v50 = vmul.f32 %v9275_v21, %v9275_v21  ;;  %13405 = vst [vmem:[#allocation64_spill] sm:$0xff] %v9287_v9  ;;  %v9290_v17 = vadd.f32 %v1671_v59, %v1440_v24  ;;  %v7055_v21 = vpop.f32.mrb[95].mxu1 }
 0x32e   : > { %v9295_v8 = vadd.f32 %v1674_v1, %v1443_v12  ;;  %v9301_v62 = vadd.f32 %v6716_v23, %v9120_v45  ;;  %v1447_v21 = vpop.f32.mrb[96].mxu0  ;;  %v6720_v23 = vunpack.c.h.bf16 %v6881_v53 }
 0x32f   : > { %13404 = vst [vmem:[#allocation63_spill] sm:$0xff] %v9282_v0  ;;  %1894 = vadd.xlane.f32.xlu1 %v9278_v52  ;;  %2102 = vadd.xlane.f32.xlu0 %v2041_v50  ;;  %v2042_v11 = vmul.f32 %v9282_v0, %v9282_v0  ;;  %v6719_v50 = vunpack.c.l.bf16 %v6881_v53  ;;  %v1448_v57 = vadd.f32 %v7934_v61, %v1447_v21  ;;  %v1449_v59 = vpop.f32.mrb[97].mxu0 }
 0x330   : > { %v1861_v56 = vpop.xlane.xlu0 %1860  ;;  %13406 = vst [vmem:[#allocation65_spill] sm:$0xff] %v9301_v62  ;;  %v1450_v12 = vpop.f32.mrb[98].mxu0 }
 0x331   : > { %v1945_v47 = vmul.f32 0.0078125, %v1861_v56  ;;  %v9310_v45 = vadd.f32 %v6719_v50, %v9123_v55  ;;  %v9322_v50 = vadd.f32 %v6720_v23, %v9126_v5  ;;  %v6883_v12 = vld [vmem:[%s8759_s17 + $0x98] sm:$0xff]  }
 0x332   : > { %v1863_v39 = vpop.xlane.xlu1 %1862 }
 0x333   : > { %v9298_v35 = vsub.f32 %v9051_v13, %v1945_v47  ;;  %v1946_v36 = vmul.f32 0.0078125, %v1863_v39  ;;  %2104 = vadd.xlane.f32.xlu1 %v2042_v11  ;;  %1896 = vadd.xlane.f32.xlu0 %v9287_v9  ;;  %v1679_v47 = vpop.f32.mrb[96].mxu1  ;;  %13407 = vst [vmem:[#allocation66_spill] sm:$0xff] %v9310_v45  ;;  %v1451_v11 = vpop.f32.mrb[99].mxu0  ;;  %13408 = vst [vmem:[#allocation67_spill] sm:$0xff] %v9322_v50 }
 0x334   : > { %v9313_v1 = vadd.f32 %v1679_v47, %v1448_v57  ;;  %v7058_v39 = vpop.f32.mrb[97].mxu1 }
 0x335   : > { %v9305_v56 = vsub.f32 %v9055_v18, %v1946_v36  ;;  %v2043_v24 = vmul.f32 %v9298_v35, %v9298_v35  ;;  %v6882_v18 = vld [vmem:[%s8759_s17 + $0x90] sm:$0xff]   ;;  %v1682_v13 = vpop.f32.mrb[98].mxu1 }
 0x336   : > { %v7059_v21 = vpop.f32.mrb[99].mxu1 }
 0x337   : > { %1898 = vadd.xlane.f32.xlu1 %v9301_v62  ;;  %2106 = vadd.xlane.f32.xlu0 %v2043_v24  ;;  %v2044_v61 = vmul.f32 %v9305_v56, %v9305_v56  ;;  %v6723_v24 = vunpack.c.l.bf16 %v6882_v18 }
 0x338   : > { %v1865_v36 = vpop.xlane.xlu0 %1864 }
 0x339   : > { %v1947_v0 = vmul.f32 0.0078125, %v1865_v36  ;;  %v9331_v47 = vadd.f32 %v6723_v24, %v9129_v6  ;;  %v6727_v6 = vunpack.c.l.bf16 %v6883_v12 }
 0x33a   : > { %v1867_v59 = vpop.xlane.xlu1 %1866 }
 0x33b   : > { %v9319_v55 = vsub.f32 %v9062_v37, %v1947_v0  ;;  %v1948_v53 = vmul.f32 0.0078125, %v1867_v59  ;;  %2108 = vadd.xlane.f32.xlu1 %v2044_v61  ;;  %1900 = vadd.xlane.f32.xlu0 %v9310_v45  ;;  %13409 = vst [vmem:[#allocation68_spill] sm:$0xff] %v9331_v47  ;;  %v6724_v0 = vunpack.c.h.bf16 %v6882_v18 }
 0x33d   : > { %v9326_v13 = vsub.f32 %v9066_v42, %v1948_v53  ;;  %v2045_v57 = vmul.f32 %v9319_v55, %v9319_v55  ;;  %v9341_v61 = vadd.f32 %v6724_v0, %v9133_v3  ;;  %v9350_v53 = vadd.f32 %v6727_v6, %v9147_v54 }
 0x33e   : > { %v6728_v3 = vunpack.c.h.bf16 %v6883_v12 }
 0x33f   : > { %1902 = vadd.xlane.f32.xlu1 %v9322_v50  ;;  %2110 = vadd.xlane.f32.xlu0 %v2045_v57  ;;  %v2046_v11 = vmul.f32 %v9326_v13, %v9326_v13  ;;  %13410 = vst [vmem:[#allocation69_spill] sm:$0xff] %v9341_v61  ;;  %13411 = vst [vmem:[#allocation70_spill] sm:$0xff] %v9350_v53 }
 0x340   : > { %v1869_v5 = vpop.xlane.xlu0 %1868  ;;  %v9356_v57 = vadd.f32 %v6728_v3, %v9153_v29 }
 0x341   : > { %v1949_v23 = vmul.f32 0.0078125, %v1869_v5 }
 0x342   : > { %v1871_v39 = vpop.xlane.xlu1 %1870  ;;  %13412 = vst [vmem:[#allocation71_spill] sm:$0xff] %v9356_v57 }
 0x343   : > { %v9338_v36 = vsub.f32 %v9073_v63, %v1949_v23  ;;  %v1950_v21 = vmul.f32 0.0078125, %v1871_v39  ;;  %2112 = vadd.xlane.f32.xlu1 %v2046_v11  ;;  %1904 = vadd.xlane.f32.xlu0 %v9331_v47  ;;  %v6884_v39 = vld [vmem:[%s8759_s17 + $0xa0] sm:$0xff]  }
 0x344   : > { %v6731_v29 = vunpack.c.l.bf16 %v6884_v39 }
 0x345   : > { %v9345_v18 = vsub.f32 %v9076_v43, %v1950_v21  ;;  %v2047_v59 = vmul.f32 %v9338_v36, %v9338_v36 }
 0x347   : > { %1906 = vadd.xlane.f32.xlu1 %v9341_v61  ;;  %2114 = vadd.xlane.f32.xlu0 %v2047_v59  ;;  %v2048_v24 = vmul.f32 %v9345_v18, %v9345_v18 }
 0x34b   : > { %2116 = vadd.xlane.f32.xlu1 %v2048_v24  ;;  %1908 = vadd.xlane.f32.xlu0 %v9350_v53 }
 0x34f   : > { %1910 = vadd.xlane.f32.xlu1 %v9356_v57 }
 0x38c   : > { %v2079_v0 = vpop.xlane.xlu0 %2078 }
 0x38d   : > { %v2176_v5 = vmul.f32 0.0078125, %v2079_v0 }
 0x38f   : > { %v2225_v23 = vadd.f32 1e-05, %v2176_v5 }
 0x390   : > { %v2081_v54 = vpop.xlane.xlu1 %2080  ;;  %v1873_v11 = vpop.xlane.xlu0 %1872 }
 0x391   : > { %7444 = vrsqrt.f32 %v2225_v23  ;;  %v2177_v21 = vmul.f32 0.0078125, %v2081_v54  ;;  %v1951_v12 = vmul.f32 0.0078125, %v1873_v11  ;;  %v9370_v54 = vadd.f32 %v6731_v29, %v9214_v58 }
 0x392   : > { %v6732_v11 = vunpack.c.h.bf16 %v6884_v39 }
 0x393   : > { %v2226_v6 = vadd.f32 1e-05, %v2177_v21  ;;  %v9362_v59 = vsub.f32 %v9145_v10, %v1951_v12  ;;  %13413 = vst [vmem:[#allocation72_spill] sm:$0xff] %v9370_v54  ;;  %v6885_v10 = vld [vmem:[%s8759_s17 + $0xa8] sm:$0xff]  }
 0x394   : > { %v1875_v3 = vpop.xlane.xlu1 %1874  ;;  %v2083_v24 = vpop.xlane.xlu0 %2082  ;;  %v9381_v39 = vadd.f32 %v6732_v11, %v9220_v27  ;;  %v6736_v11 = vunpack.c.h.bf16 %v6885_v10 }
 0x395   : > { %7446 = vrsqrt.f32 %v2226_v6  ;;  %v1952_v43 = vmul.f32 0.0078125, %v1875_v3  ;;  %v2178_v63 = vmul.f32 0.0078125, %v2083_v24  ;;  %v2049_v0 = vmul.f32 %v9362_v59, %v9362_v59 }
 0x396   : > { %13415 = vst [vmem:[#allocation74_spill] sm:$0xff] %v9381_v39 }
 0x397   : > { %v9367_v5 = vsub.f32 %v9162_v25, %v1952_v43  ;;  %v2227_v23 = vadd.f32 1e-05, %v2178_v63  ;;  %2118 = vadd.xlane.f32.xlu0 %v2049_v0  ;;  %v6735_v63 = vunpack.c.l.bf16 %v6885_v10  ;;  %v9407_v10 = vadd.f32 %v6736_v11, %v9245_v22 }
 0x398   : > { %v2085_v21 = vpop.xlane.xlu1 %2084  ;;  %v1877_v12 = vpop.xlane.xlu0 %1876 }
 0x399   : > { %7448 = vrsqrt.f32 %v2227_v23  ;;  %v2179_v42 = vmul.f32 0.0078125, %v2085_v21  ;;  %v1953_v6 = vmul.f32 0.0078125, %v1877_v12  ;;  %v2050_v3 = vmul.f32 %v9367_v5, %v9367_v5  ;;  %v9383_v23 = vld [vmem:[#allocation10] ss:$0 sm:$0xff]  ;;  %13418 = vst [vmem:[#allocation77_spill] sm:$0xff] %v9407_v10 }
 0x39b   : > { %v7445_v24 = vpop.eup %7444  ;;  %v2228_v37 = vadd.f32 1e-05, %v2179_v42  ;;  %v9376_v43 = vsub.f32 %v9169_v33, %v1953_v6  ;;  %2120 = vadd.xlane.f32.xlu1 %v2050_v3  ;;  %1912 = vadd.xlane.f32.xlu0 %v9370_v54 }
 0x39c   : > { %v2323_v58 = vmul.f32 %v7445_v24, %v9136_v30  ;;  %v1879_v29 = vpop.xlane.xlu1 %1878  ;;  %v2087_v0 = vpop.xlane.xlu0 %2086  ;;  %v9391_v30 = vadd.f32 %v6735_v63, %v9240_v2 }
 0x39d   : > { %13414 = vst [vmem:[#allocation73_spill] sm:$0xff] %v9376_v43  ;;  %7450 = vrsqrt.f32 %v2228_v37  ;;  %v1954_v21 = vmul.f32 0.0078125, %v1879_v29  ;;  %v2180_v42 = vmul.f32 0.0078125, %v2087_v0  ;;  %v2051_v12 = vmul.f32 %v9376_v43, %v9376_v43  ;;  %v6886_v0 = vld [vmem:[%s8759_s17 + $0xb0] sm:$0xff]  }
 0x39e   : > { %13417 = vst [vmem:[#allocation76_spill] sm:$0xff] %v9391_v30  ;;  %v2379_v27 = vmul.f32 %v9383_v23, %v2323_v58 }
 0x39f   : > { %v7447_v6 = vpop.eup %7446  ;;  %v9388_v3 = vsub.f32 %v9182_v44, %v1954_v21  ;;  %v2229_v33 = vadd.f32 1e-05, %v2180_v42  ;;  %1914 = vadd.xlane.f32.xlu1 %v9381_v39  ;;  %2122 = vadd.xlane.f32.xlu0 %v2051_v12  ;;  %v9399_v42 = vld [vmem:[#allocation11] ss:$0 sm:$0xff] }
 0x3a0   : > { %v2324_v37 = vmul.f32 %v7447_v6, %v9142_v51  ;;  %v2089_v24 = vpop.xlane.xlu1 %2088  ;;  %v1881_v29 = vpop.xlane.xlu0 %1880  ;;  %v6739_v51 = vunpack.c.l.bf16 %v6886_v0 }
 0x3a1   : > { %13416 = vst [vmem:[#allocation75_spill] sm:$0xff] %v9388_v3  ;;  %7452 = vrsqrt.f32 %v2229_v33  ;;  %v2181_v25 = vmul.f32 0.0078125, %v2089_v24  ;;  %v1955_v43 = vmul.f32 0.0078125, %v1881_v29  ;;  %v2052_v21 = vmul.f32 %v9388_v3, %v9388_v3 }
 0x3a2   : > { %v2380_v2 = vmul.f32 %v9383_v23, %v2324_v37  ;;  %v2435_v24 = vadd.f32 %v9399_v42, %v2379_v27  ;;  %v9418_v3 = vadd.f32 %v6739_v51, %v9266_v26 }
 0x3a3   : > { %v7449_v63 = vpop.eup %7448  ;;  %v2230_v12 = vadd.f32 1e-05, %v2181_v25  ;;  %v9403_v58 = vsub.f32 %v9188_v32, %v1955_v43  ;;  %2124 = vadd.xlane.f32.xlu1 %v2052_v21  ;;  %1916 = vadd.xlane.f32.xlu0 %v9391_v30 }
 0x3a4   : > { %v1883_v33 = vpop.xlane.xlu1 %1882  ;;  %v2091_v6 = vpop.xlane.xlu0 %2090  ;;  %v2436_v29 = vadd.f32 %v9399_v42, %v2380_v2  ;;  %v2325_v37 = vmul.f32 %v7449_v63, %v9156_v60  ;;  %13419 = vst [vmem:[#allocation78_spill] sm:$0xff] %v9418_v3  ;;  %v6740_v60 = vunpack.c.h.bf16 %v6886_v0  ;;  %v6887_v63 = vld [vmem:[%s8759_s17 + $0xb8] sm:$0xff]  }
 0x3a5   : > { %7454 = vrsqrt.f32 %v2230_v12  ;;  %v1956_v25 = vmul.f32 0.0078125, %v1883_v33  ;;  %v2182_v43 = vmul.f32 0.0078125, %v2091_v6  ;;  %v2053_v21 = vmul.f32 %v9403_v58, %v9403_v58 }
 0x3a6   : > { %v2484_v32 = vpack.c.bf16 %v2436_v29, %v2435_v24  ;;  %v2381_v33 = vmul.f32 %v9383_v23, %v2325_v37 }
 0x3a7   : > { %v7451_v44 = vpop.eup %7450  ;;  %v9415_v22 = vsub.f32 %v9201_v40, %v1956_v25  ;;  %v2231_v11 = vadd.f32 1e-05, %v2182_v43  ;;  %1918 = vadd.xlane.f32.xlu1 %v9407_v10  ;;  %2126 = vadd.xlane.f32.xlu0 %v2053_v21 }
 0x3a8   : > { %v2093_v27 = vpop.xlane.xlu1 %2092  ;;  %2756 = vmatmul.mubr.bf16.vlgmr.msra.gmra.mrb[100].mxu1 %v2484_v32  ;;  %3037 = vmatmul.mubr.bf16.vlgmr.msra.gmra.mrb[100].mxu0 %v2484_v32  ;;  %v1885_v2 = vpop.xlane.xlu0 %1884  ;;  %v2326_v12 = vmul.f32 %v7451_v44, %v9165_v49  ;;  %v6743_v49 = vunpack.c.l.bf16 %v6887_v63  ;;  %v9434_v44 = vadd.f32 %v6740_v60, %v9271_v4  ;;  %v2437_v43 = vadd.f32 %v9399_v42, %v2381_v33 }
 0x3a9   : > { %7456 = vrsqrt.f32 %v2231_v11  ;;  %v2183_v6 = vmul.f32 0.0078125, %v2093_v27  ;;  %v1957_v24 = vmul.f32 0.0078125, %v1885_v2  ;;  %v2054_v26 = vmul.f32 %v9415_v22, %v9415_v22  ;;  %2765 = vmatprep.mubr.bf16.mxu1 %v13400_v34  ;;  %3046 = vmatprep.mubr.bf16.mxu0 %v13400_v34 }
 0x3aa   : > { %v2382_v0 = vmul.f32 %v9383_v23, %v2326_v12  ;;  %13420 = vst [vmem:[#allocation79_spill] sm:$0xff] %v9434_v44 }
 0x3ab   : > { %v7453_v51 = vpop.eup %7452  ;;  %v2232_v32 = vadd.f32 1e-05, %v2183_v6  ;;  %v9430_v29 = vsub.f32 %v9210_v19, %v1957_v24  ;;  %2128 = vadd.xlane.f32.xlu1 %v2054_v26  ;;  %1920 = vadd.xlane.f32.xlu0 %v9418_v3  ;;  %v9445_v26 = vadd.f32 %v6743_v49, %v9290_v17 }
 0x3ac   : > { %v1887_v37 = vpop.xlane.xlu1 %1886  ;;  %v2095_v25 = vpop.xlane.xlu0 %2094  ;;  %v2438_v21 = vadd.f32 %v9399_v42, %v2382_v0  ;;  %v2327_v11 = vmul.f32 %v7453_v51, %v9175_v20  ;;  %v6744_v20 = vunpack.c.h.bf16 %v6887_v63  ;;  %v1733_v51 = vld [vmem:[%s8759_s17 + $0xc0] sm:$0xf] }
 0x3ad   : > { %7458 = vrsqrt.f32 %v2232_v32  ;;  %v1958_v27 = vmul.f32 0.0078125, %v1887_v37  ;;  %v2184_v2 = vmul.f32 0.0078125, %v2095_v25  ;;  %v2055_v12 = vmul.f32 %v9430_v29, %v9430_v29  ;;  %13421 = vst [vmem:[#allocation80_spill] sm:$0xff] %v9445_v26 }
 0x3ae   : > { %v2485_v6 = vpack.c.bf16 %v2438_v21, %v2437_v43  ;;  %v2383_v37 = vmul.f32 %v9383_v23, %v2327_v11  ;;  %v9461_v11 = vadd.f32 %v6744_v20, %v9295_v8 }
 0x3af   : > { %v7455_v24 = vpop.eup %7454  ;;  %v9442_v4 = vsub.f32 %v9227_v28, %v1958_v27  ;;  %v2233_v60 = vadd.f32 1e-05, %v2184_v2  ;;  %1922 = vadd.xlane.f32.xlu1 %v9434_v44  ;;  %2130 = vadd.xlane.f32.xlu0 %v2055_v12 }
 0x3b0   : > { %v2097_v33 = vpop.xlane.xlu1 %2096  ;;  %2766 = vmatmul.mubr.bf16.gmra.mrb[104].mxu1 %v2485_v6  ;;  %3047 = vmatmul.mubr.bf16.gmra.mrb[104].mxu0 %v2485_v6  ;;  %v1889_v0 = vpop.xlane.xlu0 %1888  ;;  %v2328_v32 = vmul.f32 %v7455_v24, %v9179_v31  ;;  %v1782_v31 = vunpack.c.l.bf16 %v1733_v51  ;;  %13422 = vst [vmem:[#allocation81_spill] sm:$0xff] %v9461_v11  ;;  %v2439_v6 = vadd.f32 %v9399_v42, %v2383_v37 }
 0x3b1   : > { %7460 = vrsqrt.f32 %v2233_v60  ;;  %v2185_v25 = vmul.f32 0.0078125, %v2097_v33  ;;  %v1959_v43 = vmul.f32 0.0078125, %v1889_v0  ;;  %v2056_v17 = vmul.f32 %v9442_v4, %v9442_v4  ;;  %2775 = vmatprep.mubr.bf16.mxu1 %v13400_v34  ;;  %3056 = vmatprep.mubr.bf16.mxu0 %v13400_v34 }
 0x3b2   : > { %v2384_v63 = vmul.f32 %v9383_v23, %v2328_v32  ;;  %v9472_v20 = vadd.f32 %v1782_v31, %v9313_v1 }
 0x3b3   : > { %v7457_v49 = vpop.eup %7456  ;;  %v2234_v21 = vadd.f32 1e-05, %v2185_v25  ;;  %v9457_v27 = vsub.f32 %v9236_v41, %v1959_v43  ;;  %2132 = vadd.xlane.f32.xlu1 %v2056_v17  ;;  %1924 = vadd.xlane.f32.xlu0 %v9445_v26 }
 0x3b4   : > { %v1891_v2 = vpop.xlane.xlu1 %1890  ;;  %v2099_v12 = vpop.xlane.xlu0 %2098  ;;  %v2440_v24 = vadd.f32 %v9399_v42, %v2384_v63  ;;  %v2329_v60 = vmul.f32 %v7457_v49, %v9196_v15  ;;  %13423 = vst [vmem:[#allocation82_spill] sm:$0xff] %v9472_v20 }
 0x3b5   : > { %7462 = vrsqrt.f32 %v2234_v21  ;;  %v1960_v33 = vmul.f32 0.0078125, %v1891_v2  ;;  %v2186_v0 = vmul.f32 0.0078125, %v2099_v12  ;;  %v2057_v32 = vmul.f32 %v9457_v27, %v9457_v27 }
 0x3b6   : > { %v2486_v25 = vpack.c.bf16 %v2440_v24, %v2439_v6  ;;  %v2385_v63 = vmul.f32 %v9383_v23, %v2329_v60 }
 0x3b7   : > { %v7459_v43 = vpop.eup %7458  ;;  %v9469_v51 = vsub.f32 %v9251_v7, %v1960_v33  ;;  %v2235_v8 = vadd.f32 1e-05, %v2186_v0  ;;  %1926 = vadd.xlane.f32.xlu1 %v9461_v11  ;;  %2134 = vadd.xlane.f32.xlu0 %v2057_v32 }
 0x3b8   : > { %v2101_v37 = vpop.xlane.xlu1 %2100  ;;  %2776 = vmatmul.mubr.bf16.gmra.mrb[108].mxu1 %v2486_v25  ;;  %3057 = vmatmul.mubr.bf16.gmra.mrb[108].mxu0 %v2486_v25  ;;  %v1893_v15 = vpop.xlane.xlu0 %1892  ;;  %v2330_v17 = vmul.f32 %v7459_v43, %v9204_v46  ;;  %v2441_v60 = vadd.f32 %v9399_v42, %v2385_v63 }
 0x3b9   : > { %7464 = vrsqrt.f32 %v2235_v8  ;;  %v2187_v49 = vmul.f32 0.0078125, %v2101_v37  ;;  %v1961_v21 = vmul.f32 0.0078125, %v1893_v15  ;;  %v2058_v2 = vmul.f32 %v9469_v51, %v9469_v51  ;;  %2785 = vmatprep.mubr.bf16.mxu1 %v13400_v34  ;;  %3066 = vmatprep.mubr.bf16.mxu0 %v13400_v34 }
 0x3ba   : > { %v2386_v1 = vmul.f32 %v9383_v23, %v2330_v17 }
 0x3bb   : > { %v7461_v31 = vpop.eup %7460  ;;  %v2236_v12 = vadd.f32 1e-05, %v2187_v49  ;;  %v9483_v6 = vsub.f32 %v9262_v14, %v1961_v21  ;;  %2136 = vadd.xlane.f32.xlu1 %v2058_v2  ;;  %1928 = vadd.xlane.f32.xlu0 %v9472_v20 }
 0x3bc   : > { %v1895_v46 = vpop.xlane.xlu1 %1894  ;;  %v2103_v24 = vpop.xlane.xlu0 %2102  ;;  %v2442_v33 = vadd.f32 %v9399_v42, %v2386_v1  ;;  %v2331_v0 = vmul.f32 %v7461_v31, %v9223_v48 }
 0x3bd   : > { %7466 = vrsqrt.f32 %v2236_v12  ;;  %v1962_v32 = vmul.f32 0.0078125, %v1895_v46  ;;  %v2188_v25 = vmul.f32 0.0078125, %v2103_v24  ;;  %v2059_v43 = vmul.f32 %v9483_v6, %v9483_v6 }
 0x3be   : > { %v2487_v8 = vpack.c.bf16 %v2442_v33, %v2441_v60  ;;  %v2387_v48 = vmul.f32 %v9383_v23, %v2331_v0 }
 0x3bf   : > { %v7463_v37 = vpop.eup %7462  ;;  %v9492_v15 = vsub.f32 %v9278_v52, %v1962_v32  ;;  %v2237_v17 = vadd.f32 1e-05, %v2188_v25  ;;  %2138 = vadd.xlane.f32.xlu1 %v2059_v43 }
 0x3c0   : > { %v2105_v49 = vpop.xlane.xlu1 %2104  ;;  %2786 = vmatmul.mubr.bf16.gmra.mrb[112].mxu1 %v2487_v8  ;;  %3067 = vmatmul.mubr.bf16.gmra.mrb[112].mxu0 %v2487_v8  ;;  %v1897_v63 = vpop.xlane.xlu0 %1896  ;;  %v2332_v21 = vmul.f32 %v7463_v37, %v9230_v16  ;;  %v2443_v0 = vadd.f32 %v9399_v42, %v2387_v48 }
 0x3c1   : > { %7468 = vrsqrt.f32 %v2237_v17  ;;  %v2189_v2 = vmul.f32 0.0078125, %v2105_v49  ;;  %v1963_v1 = vmul.f32 0.0078125, %v1897_v63  ;;  %v2060_v31 = vmul.f32 %v9492_v15, %v9492_v15  ;;  %2795 = vmatprep.mubr.bf16.mxu1 %v13400_v34  ;;  %3076 = vmatprep.mubr.bf16.mxu0 %v13400_v34 }
 0x3c2   : > { %v2388_v12 = vmul.f32 %v9383_v23, %v2332_v21 }
 0x3c3   : > { %v7465_v46 = vpop.eup %7464  ;;  %v2238_v24 = vadd.f32 1e-05, %v2189_v2  ;;  %v9502_v60 = vsub.f32 %v9287_v9, %v1963_v1  ;;  %2140 = vadd.xlane.f32.xlu0 %v2060_v31  ;;  %v13424_v1 = vld [vmem:[#allocation59_spill] sm:$0xff] }
 0x3c4   : > { %v1899_v16 = vpop.xlane.xlu1 %1898  ;;  %v2107_v33 = vpop.xlane.xlu0 %2106  ;;  %v2444_v32 = vadd.f32 %v9399_v42, %v2388_v12  ;;  %v2333_v25 = vmul.f32 %v7465_v46, %v9248_v38 }
 0x3c5   : > { %7470 = vrsqrt.f32 %v2238_v24  ;;  %v1964_v43 = vmul.f32 0.0078125, %v1899_v16  ;;  %v2190_v8 = vmul.f32 0.0078125, %v2107_v33  ;;  %v2061_v37 = vmul.f32 %v9502_v60, %v9502_v60 }
 0x3c6   : > { %v2488_v17 = vpack.c.bf16 %v2444_v32, %v2443_v0  ;;  %v2389_v38 = vmul.f32 %v9383_v23, %v2333_v25 }
 0x3c7   : > { %v7467_v49 = vpop.eup %7466  ;;  %v9510_v63 = vsub.f32 %v9301_v62, %v1964_v43  ;;  %v2239_v21 = vadd.f32 1e-05, %v2190_v8  ;;  %2142 = vadd.xlane.f32.xlu1 %v2061_v37 }
 0x3c8   : > { %v2109_v2 = vpop.xlane.xlu1 %2108  ;;  %2796 = vmatmul.mubr.bf16.gmra.mrb[116].mxu1 %v2488_v17  ;;  %3077 = vmatmul.mubr.bf16.gmra.mrb[116].mxu0 %v2488_v17  ;;  %v1901_v48 = vpop.xlane.xlu0 %1900  ;;  %v2334_v31 = vmul.f32 %v7467_v49, %v13424_v1  ;;  %v2445_v8 = vadd.f32 %v9399_v42, %v2389_v38  ;;  %v13425_v17 = vld [vmem:[#allocation61_spill] sm:$0xff] }
 0x3c9   : > { %7472 = vrsqrt.f32 %v2239_v21  ;;  %v2191_v12 = vmul.f32 0.0078125, %v2109_v2  ;;  %v1965_v46 = vmul.f32 0.0078125, %v1901_v48  ;;  %v2062_v24 = vmul.f32 %v9510_v63, %v9510_v63  ;;  %2805 = vmatprep.mubr.bf16.mxu1 %v13400_v34  ;;  %3086 = vmatprep.mubr.bf16.mxu0 %v13400_v34 }
 0x3ca   : > { %v2390_v16 = vmul.f32 %v9383_v23, %v2334_v31 }
 0x3cb   : > { %v7469_v33 = vpop.eup %7468  ;;  %v2240_v0 = vadd.f32 1e-05, %v2191_v12  ;;  %v9520_v32 = vsub.f32 %v9310_v45, %v1965_v46  ;;  %2144 = vadd.xlane.f32.xlu0 %v2062_v24 }
 0x3cc   : > { %v1903_v43 = vpop.xlane.xlu1 %1902  ;;  %v2111_v25 = vpop.xlane.xlu0 %2110  ;;  %v2446_v37 = vadd.f32 %v9399_v42, %v2390_v16  ;;  %v2335_v49 = vmul.f32 %v7469_v33, %v13425_v17  ;;  %v13426_v16 = vld [vmem:[#allocation63_spill] sm:$0xff] }
 0x3cd   : > { %7474 = vrsqrt.f32 %v2240_v0  ;;  %v1966_v21 = vmul.f32 0.0078125, %v1903_v43  ;;  %v2192_v2 = vmul.f32 0.0078125, %v2111_v25  ;;  %v2063_v48 = vmul.f32 %v9520_v32, %v9520_v32 }
 0x3ce   : > { %v2489_v1 = vpack.c.bf16 %v2446_v37, %v2445_v8  ;;  %v2391_v33 = vmul.f32 %v9383_v23, %v2335_v49 }
 0x3cf   : > { %v7471_v31 = vpop.eup %7470  ;;  %v9528_v12 = vsub.f32 %v9322_v50, %v1966_v21  ;;  %v2241_v46 = vadd.f32 1e-05, %v2192_v2  ;;  %2146 = vadd.xlane.f32.xlu1 %v2063_v48 }
 0x3d0   : > { %v2113_v24 = vpop.xlane.xlu1 %2112  ;;  %2806 = vmatmul.mubr.bf16.gmra.mrb[120].mxu1 %v2489_v1  ;;  %3087 = vmatmul.mubr.bf16.gmra.mrb[120].mxu0 %v2489_v1  ;;  %v1905_v38 = vpop.xlane.xlu0 %1904  ;;  %v2336_v45 = vmul.f32 %v7471_v31, %v13426_v16  ;;  %v2447_v48 = vadd.f32 %v9399_v42, %v2391_v33 }
 0x3d1   : > { %7476 = vrsqrt.f32 %v2241_v46  ;;  %v2193_v0 = vmul.f32 0.0078125, %v2113_v24  ;;  %v1967_v43 = vmul.f32 0.0078125, %v1905_v38  ;;  %v2064_v25 = vmul.f32 %v9528_v12, %v9528_v12  ;;  %2815 = vmatprep.mubr.bf16.mxu1 %v13400_v34  ;;  %3096 = vmatprep.mubr.bf16.mxu0 %v13400_v34 }
 0x3d2   : > { %v2392_v8 = vmul.f32 %v9383_v23, %v2336_v45 }
 0x3d3   : > { %v7473_v37 = vpop.eup %7472  ;;  %v2242_v17 = vadd.f32 1e-05, %v2193_v0  ;;  %v9538_v21 = vsub.f32 %v9331_v47, %v1967_v43  ;;  %2148 = vadd.xlane.f32.xlu0 %v2064_v25 }
 0x3d4   : > { %v1907_v2 = vpop.xlane.xlu1 %1906  ;;  %v2115_v49 = vpop.xlane.xlu0 %2114  ;;  %v2448_v1 = vadd.f32 %v9399_v42, %v2392_v8  ;;  %v2337_v31 = vmul.f32 %v7473_v37, %v9298_v35 }
 0x3d5   : > { %7478 = vrsqrt.f32 %v2242_v17  ;;  %v1968_v46 = vmul.f32 0.0078125, %v1907_v2  ;;  %v2194_v24 = vmul.f32 0.0078125, %v2115_v49  ;;  %v2065_v45 = vmul.f32 %v9538_v21, %v9538_v21 }
 0x3d6   : > { %v2490_v38 = vpack.c.bf16 %v2448_v1, %v2447_v48  ;;  %v2393_v35 = vmul.f32 %v9383_v23, %v2337_v31 }
 0x3d7   : > { %v7475_v16 = vpop.eup %7474  ;;  %v9546_v0 = vsub.f32 %v9341_v61, %v1968_v46  ;;  %v2243_v43 = vadd.f32 1e-05, %v2194_v24  ;;  %2150 = vadd.xlane.f32.xlu1 %v2065_v45 }
 0x3d8   : > { %v2117_v25 = vpop.xlane.xlu1 %2116  ;;  %2816 = vmatmul.mubr.bf16.gmra.mrb[124].mxu1 %v2490_v38  ;;  %3097 = vmatmul.mubr.bf16.gmra.mrb[124].mxu0 %v2490_v38  ;;  %v1909_v33 = vpop.xlane.xlu0 %1908  ;;  %v2338_v8 = vmul.f32 %v7475_v16, %v9305_v56  ;;  %v2449_v31 = vadd.f32 %v9399_v42, %v2393_v35 }
 0x3d9   : > { %7480 = vrsqrt.f32 %v2243_v43  ;;  %v2195_v37 = vmul.f32 0.0078125, %v2117_v25  ;;  %v1969_v17 = vmul.f32 0.0078125, %v1909_v33  ;;  %v2066_v2 = vmul.f32 %v9546_v0, %v9546_v0  ;;  %2825 = vmatprep.mubr.bf16.mxu1 %v13400_v34  ;;  %3106 = vmatprep.mubr.bf16.mxu0 %v13400_v34 }
 0x3da   : > { %v2394_v49 = vmul.f32 %v9383_v23, %v2338_v8 }
 0x3db   : > { %v7477_v48 = vpop.eup %7476  ;;  %v2244_v1 = vadd.f32 1e-05, %v2195_v37  ;;  %v9556_v46 = vsub.f32 %v9350_v53, %v1969_v17  ;;  %2152 = vadd.xlane.f32.xlu0 %v2066_v2 }
 0x3dc   : > { %v1911_v56 = vpop.xlane.xlu1 %1910  ;;  %v2450_v24 = vadd.f32 %v9399_v42, %v2394_v49  ;;  %v2339_v45 = vmul.f32 %v7477_v48, %v9319_v55 }
 0x3dd   : > { %7482 = vrsqrt.f32 %v2244_v1  ;;  %v1970_v38 = vmul.f32 0.0078125, %v1911_v56  ;;  %v2067_v16 = vmul.f32 %v9556_v46, %v9556_v46 }
 0x3de   : > { %v2491_v43 = vpack.c.bf16 %v2450_v24, %v2449_v31  ;;  %v2395_v35 = vmul.f32 %v9383_v23, %v2339_v45  ;;  %v7412_v24 = vld [vmem:[#allocation16] sm:$0xff]  }
 0x3df   : > { %v7479_v25 = vpop.eup %7478  ;;  %v9564_v33 = vsub.f32 %v9356_v57, %v1970_v38  ;;  %2154 = vadd.xlane.f32.xlu1 %v2067_v16  ;;  %5413 = vmatpush1.bf16.msra.mxu1 %v7412_v24 }
 0x3e0   : > { %2826 = vmatmul.mubr.bf16.gmra.mrb[128].mxu1 %v2491_v43  ;;  %3107 = vmatmul.mubr.bf16.gmra.mrb[128].mxu0 %v2491_v43  ;;  %v2340_v8 = vmul.f32 %v7479_v25, %v9326_v13  ;;  %v2451_v2 = vadd.f32 %v9399_v42, %v2395_v35  ;;  %v7414_v43 = vld [vmem:[#allocation16 + $0x10] sm:$0xff]   ;;  %v7415_v25 = vld [vmem:[#allocation16 + $0x80] sm:$0xff]  }
 0x3e1   : > { %v2068_v55 = vmul.f32 %v9564_v33, %v9564_v33  ;;  %2835 = vmatprep.mubr.bf16.mxu1 %v13400_v34  ;;  %3116 = vmatprep.mubr.bf16.mxu0 %v13400_v34 }
 0x3e2   : > { %v2396_v37 = vmul.f32 %v9383_v23, %v2340_v8  ;;  %5414 = vmatprep.subr.bf16.mxu1 %v13400_v34  ;;  %5645 = vmatpush1.bf16.msra.mxu0 %v7415_v25 }
 0x3e3   : > { %v7481_v17 = vpop.eup %7480  ;;  %2156 = vadd.xlane.f32.xlu0 %v2068_v55  ;;  %5646 = vmatprep.subr.bf16.mxu0 %v13400_v34 }
 0x3e4   : > { %v2452_v49 = vadd.f32 %v9399_v42, %v2396_v37  ;;  %v2341_v48 = vmul.f32 %v7481_v17, %v9338_v36 }
 0x3e6   : > { %v2492_v13 = vpack.c.bf16 %v2452_v49, %v2451_v2  ;;  %v2397_v31 = vmul.f32 %v9383_v23, %v2341_v48 }
 0x3e7   : > { %v7483_v1 = vpop.eup %7482 }
 0x3e8   : > { %2836 = vmatmul.mubr.bf16.gmra.mrb[132].mxu1 %v2492_v13  ;;  %3117 = vmatmul.mubr.bf16.gmra.mrb[132].mxu0 %v2492_v13  ;;  %v2342_v56 = vmul.f32 %v7483_v1, %v9345_v18  ;;  %v2453_v38 = vadd.f32 %v9399_v42, %v2397_v31  ;;  %v7413_v18 = vld [vmem:[#allocation16 + $0x8] sm:$0xff]  }
 0x3e9   : > { %2845 = vmatprep.mubr.bf16.mxu1 %v13400_v34  ;;  %3126 = vmatprep.mubr.bf16.mxu0 %v13400_v34 }
 0x3ea   : > { %v2398_v45 = vmul.f32 %v9383_v23, %v2342_v56  ;;  %5415 = vmatpush1.bf16.msra.mxu1 %v7413_v18  ;;  %v7417_v18 = vld [vmem:[#allocation16 + $0x88] sm:$0xff]  }
 0x3eb   : > { %5416 = vmatprep.subr.bf16.mxu1 %v13400_v34  ;;  %5647 = vmatpush1.bf16.msra.mxu0 %v7417_v18 }
 0x3ec   : > { %v2454_v36 = vadd.f32 %v9399_v42, %v2398_v45  ;;  %5648 = vmatprep.subr.bf16.mxu0 %v13400_v34 }
 0x3ee   : > { %v2493_v16 = vpack.c.bf16 %v2454_v36, %v2453_v38  ;;  %5417 = vmatpush1.bf16.msra.mxu1 %v7414_v43  ;;  %v7416_v38 = vld [vmem:[#allocation16 + $0x18] sm:$0xff]  }
 0x3ef   : > { %5418 = vmatprep.subr.bf16.mxu1 %v13400_v34 }
 0x3f0   : > { %2846 = vmatmul.mubr.bf16.gmra.mrb[136].mxu1 %v2493_v16  ;;  %3127 = vmatmul.mubr.bf16.gmra.mrb[136].mxu0 %v2493_v16 }
 0x3f1   : > { %2855 = vmatprep.mubr.bf16.mxu1 %v13400_v34  ;;  %3136 = vmatprep.mubr.bf16.mxu0 %v13400_v34 }
 0x3f2   : > { %5419 = vmatpush1.bf16.msra.mxu1 %v7416_v38 }
 0x3f3   : > { %5420 = vmatprep.subr.bf16.mxu1 %v13400_v34 }
 0x424   : > { %v2119_v8 = vpop.xlane.xlu0 %2118 }
 0x425   : > { %v2196_v35 = vmul.f32 0.0078125, %v2119_v8 }
 0x427   : > { %v2245_v55 = vadd.f32 1e-05, %v2196_v35 }
 0x428   : > { %v2121_v37 = vpop.xlane.xlu1 %2120  ;;  %v1913_v17 = vpop.xlane.xlu0 %1912 }
 0x429   : > { %7484 = vrsqrt.f32 %v2245_v55  ;;  %v2197_v2 = vmul.f32 0.0078125, %v2121_v37  ;;  %v1971_v49 = vmul.f32 0.0078125, %v1913_v17 }
 0x42b   : > { %v2246_v48 = vadd.f32 1e-05, %v2197_v2  ;;  %v9590_v13 = vsub.f32 %v9370_v54, %v1971_v49 }
 0x42c   : > { %v1915_v1 = vpop.xlane.xlu1 %1914  ;;  %v2123_v56 = vpop.xlane.xlu0 %2122 }
 0x42d   : > { %7486 = vrsqrt.f32 %v2246_v48  ;;  %v1972_v31 = vmul.f32 0.0078125, %v1915_v1  ;;  %v2198_v24 = vmul.f32 0.0078125, %v2123_v56  ;;  %v2069_v45 = vmul.f32 %v9590_v13, %v9590_v13 }
 0x42f   : > { %v9595_v36 = vsub.f32 %v9381_v39, %v1972_v31  ;;  %v2247_v16 = vadd.f32 1e-05, %v2198_v24  ;;  %2158 = vadd.xlane.f32.xlu1 %v2069_v45 }
 0x430   : > { %v2125_v43 = vpop.xlane.xlu1 %2124  ;;  %v1917_v25 = vpop.xlane.xlu0 %1916 }
 0x431   : > { %13427 = vst [vmem:[#allocation59_spill] sm:$0xff] %v9595_v36  ;;  %7488 = vrsqrt.f32 %v2247_v16  ;;  %v2199_v8 = vmul.f32 0.0078125, %v2125_v43  ;;  %v1973_v35 = vmul.f32 0.0078125, %v1917_v25  ;;  %v2070_v55 = vmul.f32 %v9595_v36, %v9595_v36 }
 0x433   : > { %v7485_v37 = vpop.eup %7484  ;;  %v2248_v17 = vadd.f32 1e-05, %v2199_v8  ;;  %v9602_v2 = vsub.f32 %v9391_v30, %v1973_v35  ;;  %2160 = vadd.xlane.f32.xlu0 %v2070_v55 }
 0x434   : > { %v1919_v49 = vpop.xlane.xlu1 %1918  ;;  %v2127_v48 = vpop.xlane.xlu0 %2126  ;;  %v2343_v1 = vmul.f32 %v7485_v37, %v9362_v59 }
 0x435   : > { %13428 = vst [vmem:[#allocation61_spill] sm:$0xff] %v9602_v2  ;;  %7490 = vrsqrt.f32 %v2248_v17  ;;  %v1974_v56 = vmul.f32 0.0078125, %v1919_v49  ;;  %v2200_v31 = vmul.f32 0.0078125, %v2127_v48  ;;  %v2071_v24 = vmul.f32 %v9602_v2, %v9602_v2 }
 0x436   : > { %v2399_v8 = vmul.f32 %v9383_v23, %v2343_v1 }
 0x437   : > { %v7487_v45 = vpop.eup %7486  ;;  %v9608_v38 = vsub.f32 %v9407_v10, %v1974_v56  ;;  %v2249_v16 = vadd.f32 1e-05, %v2200_v31  ;;  %2162 = vadd.xlane.f32.xlu1 %v2071_v24  ;;  %v13431_v24 = vld [vmem:[#allocation73_spill] sm:$0xff] }
 0x438   : > { %v2129_v18 = vpop.xlane.xlu1 %2128  ;;  %v1921_v43 = vpop.xlane.xlu0 %1920  ;;  %v2344_v25 = vmul.f32 %v7487_v45, %v9367_v5  ;;  %v2455_v5 = vadd.f32 %v9399_v42, %v2399_v8 }
 0x439   : > { %13429 = vst [vmem:[#allocation63_spill] sm:$0xff] %v9608_v38  ;;  %7492 = vrsqrt.f32 %v2249_v16  ;;  %v2201_v59 = vmul.f32 0.0078125, %v2129_v18  ;;  %v1975_v35 = vmul.f32 0.0078125, %v1921_v43  ;;  %v2072_v55 = vmul.f32 %v9608_v38, %v9608_v38 }
 0x43a   : > { %v2400_v37 = vmul.f32 %v9383_v23, %v2344_v25  ;;  %v7418_v25 = vld [vmem:[#allocation16 + $0x20] sm:$0xff]  }
 0x43b   : > { %v7489_v17 = vpop.eup %7488  ;;  %v2250_v49 = vadd.f32 1e-05, %v2201_v59  ;;  %v9616_v48 = vsub.f32 %v9418_v3, %v1975_v35  ;;  %2164 = vadd.xlane.f32.xlu0 %v2072_v55  ;;  %5421 = vmatpush1.bf16.msra.mxu1 %v7418_v25 }
 0x43c   : > { %v1923_v56 = vpop.xlane.xlu1 %1922  ;;  %v2131_v31 = vpop.xlane.xlu0 %2130  ;;  %v2456_v1 = vadd.f32 %v9399_v42, %v2400_v37  ;;  %v2345_v45 = vmul.f32 %v7489_v17, %v13431_v24  ;;  %v13433_v17 = vld [vmem:[#allocation75_spill] sm:$0xff]  ;;  %5422 = vmatprep.subr.bf16.mxu1 %v13400_v34 }
 0x43d   : > { %13430 = vst [vmem:[#allocation83_spill] sm:$0xff] %v9616_v48  ;;  %7494 = vrsqrt.f32 %v2250_v49  ;;  %v1976_v16 = vmul.f32 0.0078125, %v1923_v56  ;;  %v2202_v18 = vmul.f32 0.0078125, %v2131_v31  ;;  %v2073_v43 = vmul.f32 %v9616_v48, %v9616_v48 }
 0x43e   : > { %v2494_v59 = vpack.c.bf16 %v2456_v1, %v2455_v5  ;;  %v2401_v56 = vmul.f32 %v9383_v23, %v2345_v45 }
 0x43f   : > { %v7491_v10 = vpop.eup %7490  ;;  %v9624_v35 = vsub.f32 %v9434_v44, %v1976_v16  ;;  %v2251_v55 = vadd.f32 1e-05, %v2202_v18  ;;  %2166 = vadd.xlane.f32.xlu1 %v2073_v43 }
 0x440   : > { %v2133_v8 = vpop.xlane.xlu1 %2132  ;;  %2856 = vmatmul.mubr.bf16.gmra.mrb[140].mxu1 %v2494_v59  ;;  %3137 = vmatmul.mubr.bf16.gmra.mrb[140].mxu0 %v2494_v59  ;;  %v1925_v37 = vpop.xlane.xlu0 %1924  ;;  %v2346_v49 = vmul.f32 %v7491_v10, %v13433_v17  ;;  %v2457_v25 = vadd.f32 %v9399_v42, %v2401_v56 }
 0x441   : > { %13432 = vst [vmem:[#allocation73_spill] sm:$0xff] %v9624_v35  ;;  %7496 = vrsqrt.f32 %v2251_v55  ;;  %v2203_v31 = vmul.f32 0.0078125, %v2133_v8  ;;  %v1977_v24 = vmul.f32 0.0078125, %v1925_v37  ;;  %v2074_v5 = vmul.f32 %v9624_v35, %v9624_v35  ;;  %2865 = vmatprep.mubr.bf16.mxu1 %v13400_v34  ;;  %3146 = vmatprep.mubr.bf16.mxu0 %v13400_v34 }
 0x442   : > { %v2402_v1 = vmul.f32 %v9383_v23, %v2346_v49 }
 0x443   : > { %v7493_v16 = vpop.eup %7492  ;;  %v2252_v18 = vadd.f32 1e-05, %v2203_v31  ;;  %v9635_v10 = vsub.f32 %v9445_v26, %v1977_v24  ;;  %2168 = vadd.xlane.f32.xlu0 %v2074_v5 }
 0x444   : > { %v1927_v45 = vpop.xlane.xlu1 %1926  ;;  %v2135_v43 = vpop.xlane.xlu0 %2134  ;;  %v2458_v59 = vadd.f32 %v9399_v42, %v2402_v1  ;;  %v2347_v55 = vmul.f32 %v7493_v16, %v9403_v58 }
 0x445   : > { %13434 = vst [vmem:[#allocation75_spill] sm:$0xff] %v9635_v10  ;;  %7498 = vrsqrt.f32 %v2252_v18  ;;  %v1978_v8 = vmul.f32 0.0078125, %v1927_v45  ;;  %v2204_v37 = vmul.f32 0.0078125, %v2135_v43  ;;  %v2075_v17 = vmul.f32 %v9635_v10, %v9635_v10 }
 0x446   : > { %v2495_v49 = vpack.c.bf16 %v2458_v59, %v2457_v25  ;;  %v2403_v58 = vmul.f32 %v9383_v23, %v2347_v55 }
 0x447   : > { %v7495_v31 = vpop.eup %7494  ;;  %v9643_v24 = vsub.f32 %v9461_v11, %v1978_v8  ;;  %v2253_v5 = vadd.f32 1e-05, %v2204_v37  ;;  %2170 = vadd.xlane.f32.xlu1 %v2075_v17 }
 0x448   : > { %v2137_v26 = vpop.xlane.xlu1 %2136  ;;  %2866 = vmatmul.mubr.bf16.gmra.mrb[144].mxu1 %v2495_v49  ;;  %3147 = vmatmul.mubr.bf16.gmra.mrb[144].mxu0 %v2495_v49  ;;  %v1929_v56 = vpop.xlane.xlu0 %1928  ;;  %v2348_v1 = vmul.f32 %v7495_v31, %v9415_v22  ;;  %v7419_v22 = vld [vmem:[#allocation16 + $0x90] sm:$0xff]  }
 0x449   : > { %13435 = vst [vmem:[#allocation84_spill] sm:$0xff] %v9643_v24  ;;  %7500 = vrsqrt.f32 %v2253_v5  ;;  %v2205_v16 = vmul.f32 0.0078125, %v2137_v26  ;;  %v1979_v18 = vmul.f32 0.0078125, %v1929_v56  ;;  %v2076_v45 = vmul.f32 %v9643_v24, %v9643_v24  ;;  %2875 = vmatprep.mubr.bf16.mxu1 %v13400_v34  ;;  %3156 = vmatprep.mubr.bf16.mxu0 %v13400_v34 }
 0x44a   : > { %v2404_v43 = vmul.f32 %v9383_v23, %v2348_v1  ;;  %v2459_v26 = vadd.f32 %v9399_v42, %v2403_v58  ;;  %5649 = vmatpush1.bf16.msra.mxu0 %v7419_v22 }
 0x44b   : > { %v7497_v25 = vpop.eup %7496  ;;  %v2254_v59 = vadd.f32 1e-05, %v2205_v16  ;;  %v9653_v8 = vsub.f32 %v9472_v20, %v1979_v18  ;;  %2172 = vadd.xlane.f32.xlu0 %v2076_v45  ;;  %5650 = vmatprep.subr.bf16.mxu0 %v13400_v34 }
 0x44c   : > { %v2139_v55 = vpop.xlane.xlu1 %2138  ;;  %v2460_v37 = vadd.f32 %v9399_v42, %v2404_v43  ;;  %v2349_v17 = vmul.f32 %v7497_v25, %v9430_v29 }
 0x44d   : > { %13436 = vst [vmem:[#allocation85_spill] sm:$0xff] %v9653_v8  ;;  %7502 = vrsqrt.f32 %v2254_v59  ;;  %v2206_v49 = vmul.f32 0.0078125, %v2139_v55  ;;  %v2077_v31 = vmul.f32 %v9653_v8, %v9653_v8 }
 0x44e   : > { %v2496_v5 = vpack.c.bf16 %v2460_v37, %v2459_v26  ;;  %v2405_v18 = vmul.f32 %v9383_v23, %v2349_v17 }
 0x44f   : > { %v7499_v56 = vpop.eup %7498  ;;  %v2255_v1 = vadd.f32 1e-05, %v2206_v49  ;;  %2174 = vadd.xlane.f32.xlu1 %v2077_v31 }
 0x450   : > { %2876 = vmatmul.mubr.bf16.gmra.mrb[148].mxu1 %v2496_v5  ;;  %3157 = vmatmul.mubr.bf16.gmra.mrb[148].mxu0 %v2496_v5  ;;  %v2141_v16 = vpop.xlane.xlu0 %2140  ;;  %v2350_v58 = vmul.f32 %v7499_v56, %v9442_v4  ;;  %v2461_v22 = vadd.f32 %v9399_v42, %v2405_v18 }
 0x451   : > { %7504 = vrsqrt.f32 %v2255_v1  ;;  %v2207_v29 = vmul.f32 0.0078125, %v2141_v16  ;;  %2885 = vmatprep.mubr.bf16.mxu1 %v13400_v34  ;;  %3166 = vmatprep.mubr.bf16.mxu0 %v13400_v34  ;;  %v7420_v16 = vld [vmem:[#allocation16 + $0x28] sm:$0xff]  }
 0x452   : > { %v2406_v45 = vmul.f32 %v9383_v23, %v2350_v58  ;;  %5423 = vmatpush1.bf16.msra.mxu1 %v7420_v16 }
 0x453   : > { %v7501_v43 = vpop.eup %7500  ;;  %v2256_v25 = vadd.f32 1e-05, %v2207_v29  ;;  %5424 = vmatprep.subr.bf16.mxu1 %v13400_v34 }
 0x454   : > { %v2143_v59 = vpop.xlane.xlu1 %2142  ;;  %v2462_v55 = vadd.f32 %v9399_v42, %v2406_v45  ;;  %v2351_v26 = vmul.f32 %v7501_v43, %v9457_v27 }
 0x455   : > { %7506 = vrsqrt.f32 %v2256_v25  ;;  %v2208_v4 = vmul.f32 0.0078125, %v2143_v59 }
 0x456   : > { %v2497_v37 = vpack.c.bf16 %v2462_v55, %v2461_v22  ;;  %v2407_v56 = vmul.f32 %v9383_v23, %v2351_v26 }
 0x457   : > { %v7503_v17 = vpop.eup %7502  ;;  %v2257_v49 = vadd.f32 1e-05, %v2208_v4 }
 0x458   : > { %2886 = vmatmul.mubr.bf16.gmra.mrb[152].mxu1 %v2497_v37  ;;  %3167 = vmatmul.mubr.bf16.gmra.mrb[152].mxu0 %v2497_v37  ;;  %v2145_v31 = vpop.xlane.xlu0 %2144  ;;  %v2352_v5 = vmul.f32 %v7503_v17, %v9469_v51  ;;  %v2463_v45 = vadd.f32 %v9399_v42, %v2407_v56  ;;  %v7421_v17 = vld [vmem:[#allocation16 + $0x98] sm:$0xff]  }
 0x459   : > { %7508 = vrsqrt.f32 %v2257_v49  ;;  %v2209_v1 = vmul.f32 0.0078125, %v2145_v31  ;;  %2895 = vmatprep.mubr.bf16.mxu1 %v13400_v34  ;;  %3176 = vmatprep.mubr.bf16.mxu0 %v13400_v34 }
 0x45a   : > { %v2408_v27 = vmul.f32 %v9383_v23, %v2352_v5  ;;  %5651 = vmatpush1.bf16.msra.mxu0 %v7421_v17 }
 0x45b   : > { %v7505_v58 = vpop.eup %7504  ;;  %v2258_v18 = vadd.f32 1e-05, %v2209_v1  ;;  %5652 = vmatprep.subr.bf16.mxu0 %v13400_v34 }
 0x45c   : > { %v2147_v29 = vpop.xlane.xlu1 %2146  ;;  %v2464_v43 = vadd.f32 %v9399_v42, %v2408_v27  ;;  %v2353_v51 = vmul.f32 %v7505_v58, %v9483_v6 }
 0x45d   : > { %7510 = vrsqrt.f32 %v2258_v18  ;;  %v2210_v25 = vmul.f32 0.0078125, %v2147_v29 }
 0x45e   : > { %v2498_v59 = vpack.c.bf16 %v2464_v43, %v2463_v45  ;;  %v2409_v37 = vmul.f32 %v9383_v23, %v2353_v51  ;;  %v7422_v45 = vld [vmem:[#allocation16 + $0x30] sm:$0xff]   ;;  %v9688_v51 = vld [vmem:[#allocation10] ss:$0 sm:$0xff] }
 0x45f   : > { %v7507_v22 = vpop.eup %7506  ;;  %v2259_v55 = vadd.f32 1e-05, %v2210_v25  ;;  %5425 = vmatpush1.bf16.msra.mxu1 %v7422_v45 }
 0x460   : > { %2896 = vmatmul.mubr.bf16.gmra.mrb[156].mxu1 %v2498_v59  ;;  %3177 = vmatmul.mubr.bf16.gmra.mrb[156].mxu0 %v2498_v59  ;;  %v2149_v26 = vpop.xlane.xlu0 %2148  ;;  %v2354_v4 = vmul.f32 %v7507_v22, %v9492_v15  ;;  %v2465_v1 = vadd.f32 %v9399_v42, %v2409_v37 }
 0x461   : > { %7512 = vrsqrt.f32 %v2259_v55  ;;  %v2211_v49 = vmul.f32 0.0078125, %v2149_v26  ;;  %2905 = vmatprep.mubr.bf16.mxu1 %v13400_v34  ;;  %3186 = vmatprep.mubr.bf16.mxu0 %v13400_v34  ;;  %v2543_v55 = vlaneseq }
 0x462   : > { %v2410_v6 = vmul.f32 %v9383_v23, %v2354_v4  ;;  %5426 = vmatprep.subr.bf16.mxu1 %v13400_v34 }
 0x463   : > { %v7509_v31 = vpop.eup %7508  ;;  %v2260_v5 = vadd.f32 1e-05, %v2211_v49 }
 0x464   : > { %v2151_v56 = vpop.xlane.xlu1 %2150  ;;  %v2466_v15 = vadd.f32 %v9399_v42, %v2410_v6  ;;  %v2355_v16 = vmul.f32 %v7509_v31, %v9502_v60 }
 0x465   : > { %7514 = vrsqrt.f32 %v2260_v5  ;;  %v2212_v27 = vmul.f32 0.0078125, %v2151_v56  ;;  %v2544_v56 = vshrl.u32 %v2543_v55, 7 }
 0x466   : > { %v2499_v58 = vpack.c.bf16 %v2466_v15, %v2465_v1  ;;  %v2411_v25 = vmul.f32 %v9688_v51, %v2355_v16 }
 0x467   : > { %v7511_v18 = vpop.eup %7510  ;;  %v2261_v29 = vadd.f32 1e-05, %v2212_v27 }
 0x468   : > { %2906 = vmatmul.mubr.bf16.gmra.mrb[160].mxu1 %v2499_v58  ;;  %3187 = vmatmul.mubr.bf16.gmra.mrb[160].mxu0 %v2499_v58  ;;  %v2153_v23 = vpop.xlane.xlu0 %2152  ;;  %v2356_v43 = vmul.f32 %v7511_v18, %v9510_v63  ;;  %v9695_v63 = vld [vmem:[#allocation11] ss:$0 sm:$0xff]  ;;  %v2545_v58 = vsub.s32 0, %v2544_v56  ;;  %v2553_v18 = vsub.s32 2, %v2544_v56 }
 0x469   : > { %7516 = vrsqrt.f32 %v2261_v29  ;;  %v2213_v59 = vmul.f32 0.0078125, %v2153_v23  ;;  %2915 = vmatprep.mubr.bf16.mxu1 %v13400_v34  ;;  %3196 = vmatprep.mubr.bf16.mxu0 %v13400_v34  ;;  %v2467_v4 = vadd.f32 %v9695_v63, %v2411_v25  ;;  %v2549_v25 = vsub.s32 1, %v2544_v56 }
 0x46a   : > { %v2412_v42 = vmul.f32 %v9688_v51, %v2356_v43  ;;  %v2541_v43 = vld [vmem:[#allocation14] sm:$0xf] }
 0x46b   : > { %v7513_v60 = vpop.eup %7512  ;;  %v2262_v22 = vadd.f32 1e-05, %v2213_v59  ;;  %v2557_v59 = vsub.s32 3, %v2544_v56  ;;  %v9708_v55 = vrot.slane %v2541_v43, %v2545_v58 }
 0x46c   : > { %v2155_v26 = vpop.xlane.xlu1 %2154  ;;  %v2468_v37 = vadd.f32 %v9695_v63, %v2412_v42  ;;  %v2357_v17 = vmul.f32 %v7513_v60, %v9520_v32  ;;  %v7423_v42 = vld [vmem:[#allocation16 + $0xa0] sm:$0xff]  }
 0x46d   : > { %7518 = vrsqrt.f32 %v2262_v22  ;;  %v2214_v49 = vmul.f32 0.0078125, %v2155_v26  ;;  %5653 = vmatpush1.bf16.msra.mxu0 %v7423_v42 }
 0x46e   : > { %v2500_v6 = vpack.c.bf16 %v2468_v37, %v2467_v4  ;;  %v2413_v15 = vmul.f32 %v9688_v51, %v2357_v17  ;;  %v9710_v4 = vrot.slane %v2541_v43, %v2553_v18  ;;  %5654 = vmatprep.subr.bf16.mxu0 %v13400_v34 }
 0x46f   : > { %v7515_v31 = vpop.eup %7514  ;;  %v2263_v5 = vadd.f32 1e-05, %v2214_v49  ;;  %v9714_v49 = vrot.slane %v2541_v43, %v2549_v25 }
 0x470   : > { %2916 = vmatmul.mubr.bf16.gmra.mrb[164].mxu1 %v2500_v6  ;;  %3197 = vmatmul.mubr.bf16.gmra.mrb[164].mxu0 %v2500_v6  ;;  %v2358_v1 = vmul.f32 %v7515_v31, %v9528_v12  ;;  %v2157_v16 = vpop.xlane.xlu0 %2156  ;;  %v2469_v45 = vadd.f32 %v9695_v63, %v2413_v15 }
 0x471   : > { %7520 = vrsqrt.f32 %v2263_v5  ;;  %2925 = vmatprep.mubr.bf16.mxu1 %v13400_v34  ;;  %3206 = vmatprep.mubr.bf16.mxu0 %v13400_v34  ;;  %v2215_v29 = vmul.f32 0.0078125, %v2157_v16  ;;  %13437 = vst [vmem:[#allocation86_spill] sm:$0xff] %v9714_v49 }
 0x472   : > { %v2414_v32 = vmul.f32 %v9688_v51, %v2358_v1 }
 0x473   : > { %v7517_v27 = vpop.eup %7516  ;;  %v2264_v26 = vadd.f32 1e-05, %v2215_v29 }
 0x474   : > { %v2470_v23 = vadd.f32 %v9695_v63, %v2414_v32  ;;  %v2359_v12 = vmul.f32 %v7517_v27, %v9538_v21  ;;  %v9716_v21 = vrot.slane %v2541_v43, %v2557_v59 }
 0x475   : > { %7522 = vrsqrt.f32 %v2264_v26 }
 0x476   : > { %v2501_v60 = vpack.c.bf16 %v2470_v23, %v2469_v45  ;;  %v2415_v17 = vmul.f32 %v9688_v51, %v2359_v12  ;;  %13438 = vst [vmem:[#allocation87_spill] sm:$0xff] %v9716_v21 }
 0x477   : > { %v7519_v22 = vpop.eup %7518 }
 0x478   : > { %2926 = vmatmul.mubr.bf16.gmra.mrb[168].mxu1 %v2501_v60  ;;  %3207 = vmatmul.mubr.bf16.gmra.mrb[168].mxu0 %v2501_v60  ;;  %v2360_v37 = vmul.f32 %v7519_v22, %v9546_v0  ;;  %v2471_v32 = vadd.f32 %v9695_v63, %v2415_v17 }
 0x479   : > { %2935 = vmatprep.mubr.bf16.mxu1 %v13400_v34  ;;  %3216 = vmatprep.mubr.bf16.mxu0 %v13400_v34 }
 0x47a   : > { %v2416_v6 = vmul.f32 %v9688_v51, %v2360_v37 }
 0x47b   : > { %v7521_v31 = vpop.eup %7520  ;;  %v2757_v5 = vpop.f32.mrb[100].mxu1 }
 0x47c   : > { %v3038_v56 = vpop.f32.mrb[100].mxu0  ;;  %v9723_v0 = vadd.f32 %v2757_v5, %v9708_v55  ;;  %v2759_v15 = vpop.f32.mrb[101].mxu1  ;;  %v2472_v45 = vadd.f32 %v9695_v63, %v2416_v6  ;;  %v9737_v23 = vmul.f32 %v7521_v31, %v9556_v46 }
 0x47d   : > { %v9726_v1 = vadd.f32 %v3038_v56, %v9710_v4  ;;  %v3040_v16 = vpop.f32.mrb[101].mxu0  ;;  %v9730_v27 = vadd.f32 %v2759_v15, %v9714_v49  ;;  %v2761_v18 = vpop.f32.mrb[102].mxu1 }
 0x47e   : > { %v9733_v58 = vadd.f32 %v3040_v16, %v9716_v21  ;;  %v3042_v29 = vpop.f32.mrb[102].mxu0  ;;  %v3285_v43 = vmul.f32 %v9723_v0, %v9723_v0  ;;  %v9744_v25 = vadd.f32 %v2761_v18, %v9708_v55  ;;  %v2763_v42 = vpop.f32.mrb[103].mxu1  ;;  %v2502_v9 = vpack.c.bf16 %v2472_v45, %v2471_v32 }
 0x47f   : > { %13439 = vst [vmem:[#allocation88_spill] sm:$0xff] %v9730_v27  ;;  %v3287_v12 = vmul.f32 %v9726_v1, %v9726_v1  ;;  %v9747_v59 = vadd.f32 %v3042_v29, %v9710_v4  ;;  %v3044_v60 = vpop.f32.mrb[103].mxu0  ;;  %v3286_v22 = vmul.f32 %v9730_v27, %v9730_v27  ;;  %v9754_v26 = vadd.f32 %v2763_v42, %v9714_v49  ;;  %v9779_v53 = vpop.eup %7522 }
 0x480   : > { %13440 = vst [vmem:[#allocation89_spill] sm:$0xff] %v9733_v58  ;;  %v3288_v46 = vmul.f32 %v9733_v58, %v9733_v58  ;;  %v9757_v37 = vadd.f32 %v3044_v60, %v9716_v21  ;;  %v3481_v17 = vmul.f32 %v3285_v43, %v9723_v0  ;;  %v3289_v31 = vmul.f32 %v9744_v25, %v9744_v25 }
 0x481   : > { %13441 = vst [vmem:[#allocation90_spill] sm:$0xff] %v9754_v26  ;;  %v3483_v6 = vmul.f32 %v3287_v12, %v9726_v1  ;;  %v3291_v5 = vmul.f32 %v9747_v59, %v9747_v59  ;;  %v3482_v56 = vmul.f32 %v3286_v22, %v9730_v27  ;;  %v3290_v16 = vmul.f32 %v9754_v26, %v9754_v26 }
 0x482   : > { %13442 = vst [vmem:[#allocation91_spill] sm:$0xff] %v9757_v37  ;;  %v3484_v15 = vmul.f32 %v3288_v46, %v9733_v58  ;;  %v3292_v18 = vmul.f32 %v9757_v37, %v9757_v37  ;;  %v3677_v29 = vmul.f32 0.044715, %v3481_v17  ;;  %v3485_v12 = vmul.f32 %v3289_v31, %v9744_v25  ;;  %2936 = vmatmul.mubr.bf16.gmra.mrb[172].mxu1 %v2502_v9 }
 0x483   : > { %v3679_v43 = vmul.f32 0.044715, %v3483_v6  ;;  %v3487_v42 = vmul.f32 %v3291_v5, %v9747_v59  ;;  %v3678_v60 = vmul.f32 0.044715, %v3482_v56  ;;  %v3486_v11 = vmul.f32 %v3290_v16, %v9754_v26  ;;  %v2767_v44 = vpop.f32.mrb[104].mxu1  ;;  %v3048_v46 = vpop.f32.mrb[104].mxu0  ;;  %3217 = vmatmul.mubr.bf16.gmra.mrb[172].mxu0 %v2502_v9  ;;  %2945 = vmatprep.mubr.bf16.mxu1 %v13400_v34 }
 0x484   : > { %v3680_v20 = vmul.f32 0.044715, %v3484_v15  ;;  %v3488_v22 = vmul.f32 %v3292_v18, %v9757_v37  ;;  %v3873_v3 = vadd.f32 %v3677_v29, %v9723_v0  ;;  %v3681_v39 = vmul.f32 0.044715, %v3485_v12  ;;  %v2769_v17 = vpop.f32.mrb[105].mxu1  ;;  %v3050_v6 = vpop.f32.mrb[105].mxu0  ;;  %3226 = vmatprep.mubr.bf16.mxu0 %v13400_v34 }
 0x485   : > { %v3875_v30 = vadd.f32 %v3679_v43, %v9726_v1  ;;  %v3683_v54 = vmul.f32 0.044715, %v3487_v42  ;;  %v3874_v31 = vadd.f32 %v3678_v60, %v9730_v27  ;;  %v3682_v56 = vmul.f32 0.044715, %v3486_v11  ;;  %v2771_v57 = vpop.f32.mrb[106].mxu1  ;;  %v3052_v16 = vpop.f32.mrb[106].mxu0 }
 0x486   : > { %v3876_v5 = vadd.f32 %v3680_v20, %v9733_v58  ;;  %v3684_v15 = vmul.f32 0.044715, %v3488_v22  ;;  %v4069_v18 = vmul.f32 0.7978846, %v3873_v3  ;;  %v3877_v29 = vadd.f32 %v3681_v39, %v9744_v25  ;;  %v2773_v12 = vpop.f32.mrb[107].mxu1  ;;  %v3054_v42 = vpop.f32.mrb[107].mxu0 }
 0x487   : > { %v4071_v61 = vmul.f32 0.7978846, %v3875_v30  ;;  %v3879_v43 = vadd.f32 %v3683_v54, %v9747_v59  ;;  %v4070_v47 = vmul.f32 0.7978846, %v3874_v31  ;;  %v3878_v60 = vadd.f32 %v3682_v56, %v9754_v26  ;;  %v7424_v11 = vld [vmem:[#allocation16 + $0x38] sm:$0xff]  }
 0x488   : > { %v4072_v50 = vmul.f32 0.7978846, %v3876_v5  ;;  %v3880_v20 = vadd.f32 %v3684_v15, %v9757_v37  ;;  %7524 = vtanh.f32 %v4069_v18  ;;  %v4073_v22 = vmul.f32 0.7978846, %v3877_v29  ;;  %5427 = vmatpush1.bf16.msra.mxu1 %v7424_v11  ;;  %v7425_v11 = vld [vmem:[#allocation16 + $0xa8] sm:$0xff]   ;;  %v7430_v37 = vld [vmem:[#allocation16 + $0xc0] sm:$0xff]  }
 0x489   : > { %v4075_v62 = vmul.f32 0.7978846, %v3879_v43  ;;  %7526 = vtanh.f32 %v4071_v61  ;;  %v4074_v3 = vmul.f32 0.7978846, %v3878_v60  ;;  %v9786_v39 = vadd.f32 %v2767_v44, %v9708_v55  ;;  %5428 = vmatprep.subr.bf16.mxu1 %v13400_v34  ;;  %5655 = vmatpush1.bf16.msra.mxu0 %v7425_v11 }
 0x48a   : > { %v4076_v30 = vmul.f32 0.7978846, %v3880_v20  ;;  %7528 = vtanh.f32 %v4070_v47  ;;  %v9789_v54 = vadd.f32 %v3048_v46, %v9710_v4  ;;  %v9792_v31 = vadd.f32 %v2769_v17, %v9714_v49  ;;  %5656 = vmatprep.subr.bf16.mxu0 %v13400_v34 }
 0x48b   : > { %13443 = vst [vmem:[#allocation92_spill] sm:$0xff] %v9786_v39  ;;  %v9795_v5 = vadd.f32 %v3050_v6, %v9716_v21  ;;  %7530 = vtanh.f32 %v4072_v50  ;;  %v3293_v61 = vmul.f32 %v9786_v39, %v9786_v39  ;;  %v9800_v44 = vadd.f32 %v2771_v57, %v9708_v55  ;;  %v9807_v9 = vpop.f32.mrb[108].mxu1  ;;  %v9809_v32 = vpop.f32.mrb[108].mxu0 }
 0x48c   : > { %13444 = vst [vmem:[#allocation93_spill] sm:$0xff] %v9789_v54  ;;  %13445 = vst [vmem:[#allocation94_spill] sm:$0xff] %v9792_v31  ;;  %v9803_v47 = vadd.f32 %v3052_v16, %v9710_v4  ;;  %7532 = vtanh.f32 %v4073_v22  ;;  %v3295_v50 = vmul.f32 %v9789_v54, %v9789_v54  ;;  %v3294_v45 = vmul.f32 %v9792_v31, %v9792_v31  ;;  %v9817_v46 = vpop.f32.mrb[109].mxu1  ;;  %v9819_v17 = vpop.f32.mrb[109].mxu0 }
 0x48d   : > { %13446 = vst [vmem:[#allocation95_spill] sm:$0xff] %v9795_v5  ;;  %13447 = vst [vmem:[#allocation96_spill] sm:$0xff] %v9800_v44  ;;  %v3296_v57 = vmul.f32 %v9795_v5, %v9795_v5  ;;  %7534 = vtanh.f32 %v4075_v62  ;;  %v3489_v6 = vmul.f32 %v3293_v61, %v9786_v39  ;;  %v3297_v56 = vmul.f32 %v9800_v44, %v9800_v44  ;;  %v9827_v16 = vpop.f32.mrb[110].mxu1  ;;  %v9829_v18 = vpop.f32.mrb[110].mxu0 }
 0x48e   : > { %13448 = vst [vmem:[#allocation97_spill] sm:$0xff] %v9803_v47  ;;  %v3299_v15 = vmul.f32 %v9803_v47, %v9803_v47  ;;  %7536 = vtanh.f32 %v4074_v3  ;;  %v3491_v29 = vmul.f32 %v3295_v50, %v9789_v54  ;;  %v3490_v43 = vmul.f32 %v3294_v45, %v9792_v31  ;;  %v9834_v62 = vpop.f32.mrb[111].mxu1  ;;  %v9836_v20 = vpop.f32.mrb[111].mxu0 }
 0x48f   : > { %v3492_v60 = vmul.f32 %v3296_v57, %v9795_v5  ;;  %7538 = vtanh.f32 %v4076_v30  ;;  %v3685_v22 = vmul.f32 0.044715, %v3489_v6  ;;  %v3493_v61 = vmul.f32 %v3297_v56, %v9800_v44 }
 0x490   : > { %v3495_v52 = vmul.f32 %v3299_v15, %v9803_v47  ;;  %v3687_v14 = vmul.f32 0.044715, %v3491_v29  ;;  %v3686_v7 = vmul.f32 0.044715, %v3490_v43  ;;  %v9841_v50 = vadd.f32 %v2773_v12, %v9714_v49 }
 0x491   : > { %v3688_v3 = vmul.f32 0.044715, %v3492_v60  ;;  %v3881_v45 = vadd.f32 %v3685_v22, %v9786_v39  ;;  %v3689_v57 = vmul.f32 0.044715, %v3493_v61  ;;  %v9845_v28 = vadd.f32 %v3054_v42, %v9716_v21  ;;  %v7428_v39 = vld [vmem:[#allocation16 + $0x48] sm:$0xff]  }
 0x492   : > { %13449 = vst [vmem:[#allocation98_spill] sm:$0xff] %v9841_v50  ;;  %v3691_v41 = vmul.f32 0.044715, %v3495_v52  ;;  %v7525_v30 = vpop.eup %7524  ;;  %v3883_v6 = vadd.f32 %v3687_v14, %v9789_v54  ;;  %v3882_v56 = vadd.f32 %v3686_v7, %v9792_v31  ;;  %v3298_v12 = vmul.f32 %v9841_v50, %v9841_v50 }
 0x493   : > { %13450 = vst [vmem:[#allocation99_spill] sm:$0xff] %v9845_v28  ;;  %v3884_v15 = vadd.f32 %v3688_v3, %v9795_v5  ;;  %v7527_v29 = vpop.eup %7526  ;;  %v4461_v43 = vadd.f32 1.0, %v7525_v30  ;;  %v4077_v60 = vmul.f32 0.7978846, %v3881_v45  ;;  %v3885_v52 = vadd.f32 %v3689_v57, %v9800_v44  ;;  %v9855_v11 = vpop.f32.mrb[112].mxu1 }
 0x494   : > { %v3887_v42 = vadd.f32 %v3691_v41, %v9803_v47  ;;  %v9857_v22 = vpop.f32.mrb[112].mxu0  ;;  %v9859_v61 = vpop.eup %7528  ;;  %v4463_v14 = vadd.f32 1.0, %v7527_v29  ;;  %v4079_v7 = vmul.f32 0.7978846, %v3883_v6  ;;  %v4078_v19 = vmul.f32 0.7978846, %v3882_v56 }
 0x495   : > { %13451 = vst [vmem:[#allocation100_spill] sm:$0xff] %v9859_v61  ;;  %v3494_v3 = vmul.f32 %v3298_v12, %v9841_v50  ;;  %v9862_v40 = vpop.f32.mrb[113].mxu1  ;;  %v9864_v54 = vpop.eup %7530  ;;  %v4657_v45 = vmul.f32 0.5, %v4461_v43  ;;  %7540 = vtanh.f32 %v4077_v60  ;;  %v4080_v57 = vmul.f32 0.7978846, %v3884_v15 }
 0x496   : > { %13452 = vst [vmem:[#allocation101_spill] sm:$0xff] %v9864_v54  ;;  %v4081_v30 = vmul.f32 0.7978846, %v3885_v52  ;;  %v9866_v41 = vpop.f32.mrb[113].mxu0  ;;  %v7533_v47 = vpop.eup %7532  ;;  %v4659_v8 = vmul.f32 0.5, %v4463_v14  ;;  %7542 = vtanh.f32 %v4079_v7  ;;  %v3300_v43 = vmul.f32 %v9845_v28, %v9845_v28  ;;  %v7426_v52 = vld [vmem:[#allocation16 + $0x40] sm:$0xff]  }
 0x497   : > { %v4083_v24 = vmul.f32 0.7978846, %v3887_v42  ;;  %v3690_v10 = vmul.f32 0.044715, %v3494_v3  ;;  %v9868_v29 = vpop.f32.mrb[114].mxu1  ;;  %v7535_v6 = vpop.eup %7534  ;;  %v9871_v56 = vmul.f32 %v4657_v45, %v9723_v0  ;;  %v4465_v12 = vadd.f32 1.0, %v7533_v47  ;;  %5429 = vmatpush1.bf16.msra.mxu1 %v7426_v52 }
 0x498   : > { %7544 = vtanh.f32 %v4078_v19  ;;  %v9875_v15 = vpop.f32.mrb[114].mxu0  ;;  %v9877_v60 = vpop.f32.mrb[115].mxu1  ;;  %v7427_v14 = vld [vmem:[#allocation16 + $0xb0] sm:$0xff]   ;;  %v9882_v42 = vmul.f32 %v4659_v8, %v9726_v1  ;;  %v4467_v3 = vadd.f32 1.0, %v7535_v6  ;;  %v3496_v35 = vmul.f32 %v3300_v43, %v9845_v28  ;;  %5430 = vmatprep.subr.bf16.mxu1 %v13400_v34 }
 0x499   : > { %13453 = vst [vmem:[#allocation102_spill] sm:$0xff] %v9871_v56  ;;  %v9879_v7 = vpop.eup %7536  ;;  %7546 = vtanh.f32 %v4080_v57  ;;  %v3886_v0 = vadd.f32 %v3690_v10, %v9841_v50  ;;  %v9885_v47 = vpop.f32.mrb[115].mxu0  ;;  %v4661_v45 = vmul.f32 0.5, %v4465_v12  ;;  %v2362_v44 = vmul.f32 %v9779_v53, %v9564_v33  ;;  %5657 = vmatpush1.bf16.msra.mxu0 %v7427_v14  ;;  %v7429_v57 = vld [vmem:[#allocation16 + $0xb8] sm:$0xff]  }
 0x49a   : > { %13454 = vst [vmem:[#allocation103_spill] sm:$0xff] %v9879_v7  ;;  %13455 = vst [vmem:[#allocation104_spill] sm:$0xff] %v9882_v42  ;;  %v9887_v19 = vpop.eup %7538  ;;  %7548 = vtanh.f32 %v4081_v30  ;;  %v4663_v8 = vmul.f32 0.5, %v4467_v3  ;;  %v2417_v10 = vmul.f32 %v9688_v51, %v9737_v23  ;;  %5658 = vmatprep.subr.bf16.mxu0 %v13400_v34  ;;  %v3692_v6 = vmul.f32 0.044715, %v3496_v35 }
 0x49b   : > { %13456 = vst [vmem:[#allocation105_spill] sm:$0xff] %v9887_v19  ;;  %7550 = vtanh.f32 %v4083_v24  ;;  %v4082_v1 = vmul.f32 0.7978846, %v3886_v0  ;;  %v9897_v30 = vmul.f32 %v4661_v45, %v9744_v25  ;;  %v2418_v53 = vmul.f32 %v9688_v51, %v2362_v44  ;;  %v9904_v24 = vpop.f32.mrb[116].mxu1  ;;  %v9906_v12 = vpop.f32.mrb[116].mxu0  ;;  %5431 = vmatpush1.bf16.msra.mxu1 %v7428_v39 }
 0x49c   : > { %v9902_v33 = vadd.f32 %v9807_v9, %v9708_v55  ;;  %v9909_v23 = vmul.f32 %v4663_v8, %v9747_v59  ;;  %v2473_v43 = vadd.f32 %v9695_v63, %v2417_v10  ;;  %v9914_v25 = vadd.f32 %v9809_v32, %v9710_v4  ;;  %v9916_v35 = vpop.f32.mrb[117].mxu1  ;;  %v9918_v51 = vpop.f32.mrb[117].mxu0  ;;  %5432 = vmatprep.subr.bf16.mxu1 %v13400_v34 }
 0x49d   : > { %13457 = vst [vmem:[#allocation106_spill] sm:$0xff] %v9897_v30  ;;  %7552 = vtanh.f32 %v4082_v1  ;;  %v3888_v9 = vadd.f32 %v3692_v6, %v9845_v28  ;;  %v2474_v52 = vadd.f32 %v9695_v63, %v2418_v53  ;;  %v9926_v14 = vpop.f32.mrb[118].mxu1  ;;  %v9928_v3 = vpop.f32.mrb[118].mxu0  ;;  %v9936_v45 = vadd.f32 %v9817_v46, %v9714_v49  ;;  %5659 = vmatpush1.bf16.msra.mxu0 %v7429_v57 }
 0x49e   : > { %13458 = vst [vmem:[#allocation107_spill] sm:$0xff] %v9902_v33  ;;  %13459 = vst [vmem:[#allocation108_spill] sm:$0xff] %v9909_v23  ;;  %v3301_v59 = vmul.f32 %v9902_v33, %v9902_v33  ;;  %v3303_v0 = vmul.f32 %v9914_v25, %v9914_v25  ;;  %v9940_v63 = vadd.f32 %v9819_v17, %v9716_v21  ;;  %v9942_v8 = vpop.f32.mrb[119].mxu1  ;;  %v9944_v1 = vpop.f32.mrb[119].mxu0  ;;  %5660 = vmatprep.subr.bf16.mxu0 %v13400_v34 }
 0x49f   : > { %13460 = vst [vmem:[#allocation109_spill] sm:$0xff] %v9914_v25  ;;  %13461 = vst [vmem:[#allocation110_spill] sm:$0xff] %v9936_v45  ;;  %v9946_v39 = vpop.eup %7540  ;;  %v4084_v10 = vmul.f32 0.7978846, %v3888_v9  ;;  %v2503_v6 = vpack.c.bf16 %v2474_v52, %v2473_v43  ;;  %v9951_v32 = vadd.f32 %v9827_v16, %v9708_v55  ;;  %v3302_v57 = vmul.f32 %v9936_v45, %v9936_v45 }
 0x4a0   : > { %13462 = vst [vmem:[#allocation111_spill] sm:$0xff] %v9940_v63  ;;  %13463 = vst [vmem:[#allocation112_spill] sm:$0xff] %v9946_v39  ;;  %v3497_v53 = vmul.f32 %v3301_v59, %v9902_v33  ;;  %v9955_v46 = vpop.eup %7542  ;;  %v3499_v17 = vmul.f32 %v3303_v0, %v9914_v25  ;;  %v3304_v43 = vmul.f32 %v9940_v63, %v9940_v63 }
 0x4a1   : > { %13464 = vst [vmem:[#allocation113_spill] sm:$0xff] %v9951_v32  ;;  %13465 = vst [vmem:[#allocation114_spill] sm:$0xff] %v9955_v46  ;;  %v9964_v9 = vadd.f32 %v9829_v18, %v9710_v4  ;;  %7554 = vtanh.f32 %v4084_v10  ;;  %2946 = vmatmul.mubr.bf16.gmra.mrb[176].mxu1 %v2503_v6  ;;  %3227 = vmatmul.mubr.bf16.gmra.mrb[176].mxu0 %v2503_v6  ;;  %v3305_v59 = vmul.f32 %v9951_v32, %v9951_v32 }
 0x4a2   : > { %v9966_v16 = vpop.eup %7544  ;;  %v3693_v52 = vmul.f32 0.044715, %v3497_v53  ;;  %v9972_v0 = vadd.f32 %v9834_v62, %v9714_v49  ;;  %v3695_v42 = vmul.f32 0.044715, %v3499_v17  ;;  %v3498_v23 = vmul.f32 %v3302_v57, %v9936_v45  ;;  %2955 = vmatprep.mubr.bf16.mxu1 %v13400_v34  ;;  %3236 = vmatprep.mubr.bf16.mxu0 %v13400_v34 }
 0x4a3   : > { %13466 = vst [vmem:[#allocation115_spill] sm:$0xff] %v9964_v9  ;;  %13467 = vst [vmem:[#allocation116_spill] sm:$0xff] %v9966_v16  ;;  %v9974_v44 = vpop.eup %7546  ;;  %v3500_v18 = vmul.f32 %v3304_v43, %v9940_v63  ;;  %v3307_v10 = vmul.f32 %v9964_v9, %v9964_v9  ;;  %v3501_v62 = vmul.f32 %v3305_v59, %v9951_v32  ;;  %v9992_v43 = vpop.f32.mrb[120].mxu1  ;;  %5661 = vmatpush1.bf16.msra.mxu0 %v7430_v37 }
 0x4a4   : > { %13468 = vst [vmem:[#allocation117_spill] sm:$0xff] %v9972_v0  ;;  %13469 = vst [vmem:[#allocation118_spill] sm:$0xff] %v9974_v44  ;;  %v9982_v6 = vpop.eup %7548  ;;  %v3889_v53 = vadd.f32 %v3693_v52, %v9902_v33  ;;  %v3306_v17 = vmul.f32 %v9972_v0, %v9972_v0  ;;  %v9990_v57 = vadd.f32 %v9836_v20, %v9716_v21  ;;  %v9994_v56 = vpop.f32.mrb[120].mxu0  ;;  %v3694_v28 = vmul.f32 0.044715, %v3498_v23  ;;  %v7431_v44 = vld [vmem:[#allocation16 + $0x50] sm:$0xff]  }
 0x4a5   : > { %13470 = vst [vmem:[#allocation119_spill] sm:$0xff] %v9982_v6  ;;  %v9996_v30 = vpop.eup %7550  ;;  %v3891_v46 = vadd.f32 %v3695_v42, %v9914_v25  ;;  %v3696_v48 = vmul.f32 0.044715, %v3500_v18  ;;  %v3503_v52 = vmul.f32 %v3307_v10, %v9964_v9  ;;  %v10000_v59 = vpop.f32.mrb[121].mxu1  ;;  %v3697_v50 = vmul.f32 0.044715, %v3501_v62  ;;  %5433 = vmatpush1.bf16.msra.mxu1 %v7431_v44  ;;  %5662 = vmatprep.subr.bf16.mxu0 %v13400_v34 }
 0x4a6   : > { %13471 = vst [vmem:[#allocation120_spill] sm:$0xff] %v9990_v57  ;;  %13472 = vst [vmem:[#allocation121_spill] sm:$0xff] %v9996_v30  ;;  %v10002_v33 = vpop.f32.mrb[121].mxu0  ;;  %v4085_v5 = vmul.f32 0.7978846, %v3889_v53  ;;  %v3502_v20 = vmul.f32 %v3306_v17, %v9972_v0  ;;  %v3308_v31 = vmul.f32 %v9990_v57, %v9990_v57  ;;  %v10007_v38 = vpop.f32.mrb[122].mxu1  ;;  %v3890_v18 = vadd.f32 %v3694_v28, %v9936_v45 }
 0x4a7   : > { %v10009_v30 = vpop.f32.mrb[122].mxu0  ;;  %v10011_v42 = vpop.eup %7552  ;;  %v4087_v23 = vmul.f32 0.7978846, %v3891_v46  ;;  %v3892_v10 = vadd.f32 %v3696_v48, %v9940_v63  ;;  %v3699_v25 = vmul.f32 0.044715, %v3503_v52  ;;  %v3893_v62 = vadd.f32 %v3697_v50, %v9951_v32  ;;  %5434 = vmatprep.subr.bf16.mxu1 %v13400_v34 }
 0x4a8   : > { %13473 = vst [vmem:[#allocation122_spill] sm:$0xff] %v10011_v42  ;;  %v10015_v6 = vpop.f32.mrb[123].mxu1  ;;  %v10017_v53 = vpop.f32.mrb[123].mxu0  ;;  %7556 = vtanh.f32 %v4085_v5  ;;  %v3698_v17 = vmul.f32 0.044715, %v3502_v20  ;;  %v3504_v39 = vmul.f32 %v3308_v31, %v9990_v57  ;;  %v10025_v63 = vadd.f32 %v9855_v11, %v9708_v55  ;;  %v7432_v5 = vld [vmem:[#allocation16 + $0xc8] sm:$0xff]  }
 0x4a9   : > { %7558 = vtanh.f32 %v4087_v23  ;;  %v4086_v42 = vmul.f32 0.7978846, %v3890_v18  ;;  %v4088_v46 = vmul.f32 0.7978846, %v3892_v10  ;;  %v3895_v28 = vadd.f32 %v3699_v25, %v9964_v9  ;;  %5663 = vmatpush1.bf16.msra.mxu0 %v7432_v5 }
 0x4aa   : > { %v4089_v45 = vmul.f32 0.7978846, %v3893_v62  ;;  %v3894_v48 = vadd.f32 %v3698_v17, %v9972_v0  ;;  %v3700_v52 = vmul.f32 0.044715, %v3504_v39  ;;  %13474 = vst [vmem:[#allocation123_spill] sm:$0xff] %v10025_v63  ;;  %v10029_v50 = vadd.f32 %v9857_v22, %v9710_v4  ;;  %5664 = vmatprep.subr.bf16.mxu0 %v13400_v34 }
 0x4ab   : > { %7560 = vtanh.f32 %v4086_v42  ;;  %v4091_v31 = vmul.f32 0.7978846, %v3895_v28  ;;  %v10033_v25 = vadd.f32 %v9862_v40, %v9714_v49  ;;  %v10037_v39 = vpop.eup %7554  ;;  %v3309_v44 = vmul.f32 %v10025_v63, %v10025_v63  ;;  %v10042_v20 = vpop.f32.mrb[124].mxu1 }
 0x4ac   : > { %13475 = vst [vmem:[#allocation124_spill] sm:$0xff] %v10029_v50  ;;  %13477 = vst [vmem:[#allocation126_spill] sm:$0xff] %v10037_v39  ;;  %7562 = vtanh.f32 %v4088_v46  ;;  %v4090_v37 = vmul.f32 0.7978846, %v3894_v48  ;;  %v3896_v11 = vadd.f32 %v3700_v52, %v9990_v57  ;;  %v10044_v22 = vpop.f32.mrb[124].mxu0  ;;  %v3311_v40 = vmul.f32 %v10029_v50, %v10029_v50  ;;  %v10054_v18 = vpop.f32.mrb[125].mxu1 }
 0x4ad   : > { %13476 = vst [vmem:[#allocation125_spill] sm:$0xff] %v10033_v25  ;;  %7564 = vtanh.f32 %v4089_v45  ;;  %v3310_v42 = vmul.f32 %v10033_v25, %v10033_v25  ;;  %v10052_v23 = vadd.f32 %v9866_v41, %v9716_v21  ;;  %v10056_v10 = vpop.f32.mrb[125].mxu0  ;;  %v3505_v17 = vmul.f32 %v3309_v44, %v10025_v63  ;;  %v10063_v46 = vpop.f32.mrb[126].mxu1  ;;  %v7433_v48 = vld [vmem:[#allocation16 + $0xd0] sm:$0xff]   ;;  %v7434_v41 = vld [vmem:[#allocation16 + $0x58] sm:$0xff]  }
 0x4ae   : > { %7566 = vtanh.f32 %v4091_v31  ;;  %v4092_v62 = vmul.f32 0.7978846, %v3896_v11  ;;  %v10061_v45 = vadd.f32 %v9868_v29, %v9708_v55  ;;  %v10065_v28 = vpop.f32.mrb[126].mxu0  ;;  %v3507_v52 = vmul.f32 %v3311_v40, %v10029_v50  ;;  %v10071_v11 = vpop.f32.mrb[127].mxu1  ;;  %5435 = vmatpush1.bf16.msra.mxu1 %v7434_v41  ;;  %5665 = vmatpush1.bf16.msra.mxu0 %v7433_v48  ;;  %v7435_v41 = vld [vmem:[#allocation16 + $0xd8] sm:$0xff]  }
 0x4af   : > { %13478 = vst [vmem:[#allocation127_spill] sm:$0xff] %v10052_v23  ;;  %7568 = vtanh.f32 %v4090_v37  ;;  %v3506_v9 = vmul.f32 %v3310_v42, %v10033_v25  ;;  %v3312_v31 = vmul.f32 %v10052_v23, %v10052_v23  ;;  %v10073_v44 = vpop.f32.mrb[127].mxu0  ;;  %v3701_v29 = vmul.f32 0.044715, %v3505_v17  ;;  %5436 = vmatprep.subr.bf16.mxu1 %v13400_v34  ;;  %5666 = vmatprep.subr.bf16.mxu0 %v13400_v34 }
 0x4b0   : > { %13479 = vst [vmem:[#allocation128_spill] sm:$0xff] %v10061_v45  ;;  %7570 = vtanh.f32 %v4092_v62  ;;  %v3313_v5 = vmul.f32 %v10061_v45, %v10061_v45  ;;  %v10080_v37 = vadd.f32 %v9875_v15, %v9710_v4  ;;  %v3703_v40 = vmul.f32 0.044715, %v3507_v52 }
 0x4b1   : > { %v3702_v42 = vmul.f32 0.044715, %v3506_v9  ;;  %v3508_v32 = vmul.f32 %v3312_v31, %v10052_v23  ;;  %v10085_v57 = vadd.f32 %v9877_v60, %v9714_v49  ;;  %v3897_v17 = vadd.f32 %v3701_v29, %v10025_v63 }
 0x4b2   : > { %13480 = vst [vmem:[#allocation129_spill] sm:$0xff] %v10080_v37  ;;  %v10088_v62 = vpop.eup %7556  ;;  %v3509_v0 = vmul.f32 %v3313_v5, %v10061_v45  ;;  %v3315_v15 = vmul.f32 %v10080_v37, %v10080_v37  ;;  %v10096_v9 = vadd.f32 %v9885_v47, %v9716_v21  ;;  %v3899_v60 = vadd.f32 %v3703_v40, %v10029_v50 }
 0x4b3   : > { %13481 = vst [vmem:[#allocation130_spill] sm:$0xff] %v10085_v57  ;;  %13482 = vst [vmem:[#allocation131_spill] sm:$0xff] %v10088_v62  ;;  %v10098_v52 = vpop.eup %7558  ;;  %v3898_v31 = vadd.f32 %v3702_v42, %v10033_v25  ;;  %v3704_v62 = vmul.f32 0.044715, %v3508_v32  ;;  %v3314_v29 = vmul.f32 %v10085_v57, %v10085_v57  ;;  %v4093_v5 = vmul.f32 0.7978846, %v3897_v17  ;;  %5667 = vmatpush1.bf16.msra.mxu0 %v7435_v41 }
 0x4b4   : > { %13483 = vst [vmem:[#allocation132_spill] sm:$0xff] %v10096_v9  ;;  %13484 = vst [vmem:[#allocation133_spill] sm:$0xff] %v10098_v52  ;;  %v3705_v63 = vmul.f32 0.044715, %v3509_v0  ;;  %v3511_v39 = vmul.f32 %v3315_v15, %v10080_v37  ;;  %v3316_v47 = vmul.f32 %v10096_v9, %v10096_v9  ;;  %v10108_v48 = vpop.f32.mrb[128].mxu1  ;;  %v10110_v52 = vpop.f32.mrb[128].mxu0  ;;  %5668 = vmatprep.subr.bf16.mxu0 %v13400_v34 }
 0x4b5   : > { %v10112_v40 = vpop.eup %7560  ;;  %v4095_v42 = vmul.f32 0.7978846, %v3899_v60  ;;  %v4094_v32 = vmul.f32 0.7978846, %v3898_v31  ;;  %v3900_v50 = vadd.f32 %v3704_v62, %v10052_v23  ;;  %v3510_v25 = vmul.f32 %v3314_v29, %v10085_v57  ;;  %v10116_v58 = vpop.f32.mrb[129].mxu1  ;;  %v7436_v62 = vld [vmem:[#allocation16 + $0x60] sm:$0xff]  }
 0x4b6   : > { %13485 = vst [vmem:[#allocation134_spill] sm:$0xff] %v10112_v40  ;;  %v10118_v0 = vpop.f32.mrb[129].mxu0  ;;  %v10120_v17 = vpop.eup %7562  ;;  %7572 = vtanh.f32 %v4093_v5  ;;  %v3901_v15 = vadd.f32 %v3705_v63, %v10061_v45  ;;  %v3707_v26 = vmul.f32 0.044715, %v3511_v39  ;;  %v3512_v16 = vmul.f32 %v3316_v47, %v10096_v9  ;;  %v7437_v31 = vld [vmem:[#allocation16 + $0xe0] sm:$0xff]   ;;  %5437 = vmatpush1.bf16.msra.mxu1 %v7436_v62 }
 0x4b7   : > { %13486 = vst [vmem:[#allocation135_spill] sm:$0xff] %v10120_v17  ;;  %v10124_v27 = vpop.f32.mrb[130].mxu1  ;;  %v10126_v60 = vpop.f32.mrb[130].mxu0  ;;  %7574 = vtanh.f32 %v4095_v42  ;;  %v4096_v23 = vmul.f32 0.7978846, %v3900_v50  ;;  %v10132_v5 = vadd.f32 %v9904_v24, %v9708_v55  ;;  %v7438_v50 = vld [vmem:[#allocation16 + $0x68] sm:$0xff]   ;;  %v10149_v17 = vadd.f32 %v9906_v12, %v9710_v4  ;;  %5438 = vmatprep.subr.bf16.mxu1 %v13400_v34  ;;  %5669 = vmatpush1.bf16.msra.mxu0 %v7437_v31 }
 0x4b8   : > { %v10128_v29 = vpop.eup %7564  ;;  %v3706_v40 = vmul.f32 0.044715, %v3510_v25  ;;  %v10134_v63 = vpop.f32.mrb[131].mxu1  ;;  %7576 = vtanh.f32 %v4094_v32  ;;  %v4097_v41 = vmul.f32 0.7978846, %v3901_v15  ;;  %v3903_v45 = vadd.f32 %v3707_v26, %v10080_v37  ;;  %5670 = vmatprep.subr.bf16.mxu0 %v13400_v34 }
 0x4b9   : > { %13487 = vst [vmem:[#allocation136_spill] sm:$0xff] %v10128_v29  ;;  %13488 = vst [vmem:[#allocation137_spill] sm:$0xff] %v10132_v5  ;;  %v10136_v39 = vpop.f32.mrb[131].mxu0  ;;  %v10139_v47 = vpop.eup %7566  ;;  %v3708_v29 = vmul.f32 0.044715, %v3512_v16  ;;  %7578 = vtanh.f32 %v4096_v23  ;;  %v3317_v42 = vmul.f32 %v10132_v5, %v10132_v5  ;;  %v10157_v23 = vadd.f32 %v9916_v35, %v9714_v49 }
 0x4ba   : > { %13489 = vst [vmem:[#allocation138_spill] sm:$0xff] %v10139_v47  ;;  %v10142_v25 = vpop.eup %7568  ;;  %v3902_v24 = vadd.f32 %v3706_v40, %v10085_v57  ;;  %13491 = vst [vmem:[#allocation140_spill] sm:$0xff] %v10149_v17  ;;  %7580 = vtanh.f32 %v4097_v41  ;;  %v4099_v26 = vmul.f32 0.7978846, %v3903_v45  ;;  %v7439_v40 = vld [vmem:[#allocation16 + $0xe8] sm:$0xff]   ;;  %v3319_v12 = vmul.f32 %v10149_v17, %v10149_v17  ;;  %5439 = vmatpush1.bf16.msra.mxu1 %v7438_v50 }
 0x4bb   : > { %13490 = vst [vmem:[#allocation139_spill] sm:$0xff] %v10142_v25  ;;  %v10152_v32 = vpop.eup %7570  ;;  %v3904_v16 = vadd.f32 %v3708_v29, %v10096_v9  ;;  %13493 = vst [vmem:[#allocation142_spill] sm:$0xff] %v10157_v23  ;;  %v3513_v62 = vmul.f32 %v3317_v42, %v10132_v5  ;;  %v10164_v37 = vadd.f32 %v9918_v51, %v9716_v21  ;;  %v10173_v29 = vpop.f32.mrb[132].mxu1  ;;  %5440 = vmatprep.subr.bf16.mxu1 %v13400_v34 }
 0x4bc   : > { %13492 = vst [vmem:[#allocation141_spill] sm:$0xff] %v10152_v32  ;;  %v4098_v15 = vmul.f32 0.7978846, %v3902_v24  ;;  %7582 = vtanh.f32 %v4099_v26  ;;  %v3318_v35 = vmul.f32 %v10157_v23, %v10157_v23  ;;  %v10171_v31 = vadd.f32 %v9926_v14, %v9708_v55  ;;  %v10175_v41 = vpop.f32.mrb[132].mxu0  ;;  %v10180_v26 = vpop.f32.mrb[133].mxu1  ;;  %v7440_v14 = vld [vmem:[#allocation16 + $0x70] sm:$0xff]   ;;  %5671 = vmatpush1.bf16.msra.mxu0 %v7439_v40 }
 0x4bd   : > { %13494 = vst [vmem:[#allocation143_spill] sm:$0xff] %v10164_v37  ;;  %v4100_v45 = vmul.f32 0.7978846, %v3904_v16  ;;  %v3709_v24 = vmul.f32 0.044715, %v3513_v62  ;;  %v3515_v51 = vmul.f32 %v3319_v12, %v10149_v17  ;;  %v3320_v42 = vmul.f32 %v10164_v37, %v10164_v37  ;;  %v10182_v16 = vpop.f32.mrb[133].mxu0  ;;  %5672 = vmatprep.subr.bf16.mxu0 %v13400_v34 }
 0x4be   : > { %13495 = vst [vmem:[#allocation144_spill] sm:$0xff] %v10171_v31  ;;  %7584 = vtanh.f32 %v4098_v15  ;;  %v3514_v9 = vmul.f32 %v3318_v35, %v10157_v23  ;;  %v3321_v50 = vmul.f32 %v10171_v31, %v10171_v31  ;;  %v10190_v15 = vadd.f32 %v9928_v3, %v9710_v4  ;;  %v10192_v62 = vpop.f32.mrb[134].mxu1  ;;  %v10200_v35 = vpop.f32.mrb[134].mxu0  ;;  %v7441_v3 = vld [vmem:[#allocation16 + $0xf0] sm:$0xff]   ;;  %5441 = vmatpush1.bf16.msra.mxu1 %v7440_v14 }
 0x4bf   : > { %7586 = vtanh.f32 %v4100_v45  ;;  %v3905_v12 = vadd.f32 %v3709_v24, %v10132_v5  ;;  %v3711_v57 = vmul.f32 0.044715, %v3515_v51  ;;  %v3516_v47 = vmul.f32 %v3320_v42, %v10164_v37  ;;  %v10202_v32 = vpop.f32.mrb[135].mxu1  ;;  %v7442_v42 = vld [vmem:[#allocation16 + $0x78] sm:$0xff]   ;;  %5442 = vmatprep.subr.bf16.mxu1 %v13400_v34 }
 0x4c0   : > { %13496 = vst [vmem:[#allocation145_spill] sm:$0xff] %v10190_v15  ;;  %v10198_v45 = vadd.f32 %v9942_v8, %v9714_v49  ;;  %v10205_v25 = vpop.eup %7572  ;;  %v3710_v19 = vmul.f32 0.044715, %v3514_v9  ;;  %v3517_v40 = vmul.f32 %v3321_v50, %v10171_v31  ;;  %v3323_v24 = vmul.f32 %v10190_v15, %v10190_v15  ;;  %v10214_v8 = vpop.f32.mrb[135].mxu0  ;;  %5673 = vmatpush1.bf16.msra.mxu0 %v7441_v3 }
 0x4c1   : > { %13498 = vst [vmem:[#allocation147_spill] sm:$0xff] %v10205_v25  ;;  %v10212_v51 = vadd.f32 %v9944_v1, %v9716_v21  ;;  %v10216_v5 = vpop.eup %7574  ;;  %v4101_v54 = vmul.f32 0.7978846, %v3905_v12  ;;  %v3907_v7 = vadd.f32 %v3711_v57, %v10149_v17  ;;  %v3712_v25 = vmul.f32 0.044715, %v3516_v47  ;;  %v7443_v12 = vld [vmem:[#allocation16 + $0xf8] sm:$0xff]   ;;  %5674 = vmatprep.subr.bf16.mxu0 %v13400_v34 }
 0x4c2   : > { %13497 = vst [vmem:[#allocation146_spill] sm:$0xff] %v10198_v45  ;;  %13500 = vst [vmem:[#allocation149_spill] sm:$0xff] %v10216_v5  ;;  %v3322_v9 = vmul.f32 %v10198_v45, %v10198_v45  ;;  %v10222_v50 = vpop.eup %7576  ;;  %v3906_v1 = vadd.f32 %v3710_v19, %v10157_v23  ;;  %v3713_v61 = vmul.f32 0.044715, %v3517_v40  ;;  %v3519_v2 = vmul.f32 %v3323_v24, %v10190_v15 }
 0x4c3   : > { %13499 = vst [vmem:[#allocation148_spill] sm:$0xff] %v10212_v51  ;;  %13501 = vst [vmem:[#allocation150_spill] sm:$0xff] %v10222_v50  ;;  %v3324_v14 = vmul.f32 %v10212_v51, %v10212_v51  ;;  %v10228_v5 = vpop.eup %7578  ;;  %7588 = vtanh.f32 %v4101_v54  ;;  %v4103_v57 = vmul.f32 0.7978846, %v3907_v7  ;;  %v3908_v47 = vadd.f32 %v3712_v25, %v10164_v37  ;;  %v10237_v3 = vpop.f32.mrb[136].mxu1  ;;  %5443 = vmatpush1.bf16.msra.mxu1 %v7442_v42 }
 0x4c4   : > { %v3518_v17 = vmul.f32 %v3322_v9, %v10198_v45  ;;  %v10233_v50 = vpop.eup %7580  ;;  %v4102_v19 = vmul.f32 0.7978846, %v3906_v1  ;;  %v3909_v40 = vadd.f32 %v3713_v61, %v10171_v31  ;;  %v3715_v24 = vmul.f32 0.044715, %v3519_v2  ;;  %v10239_v36 = vpop.f32.mrb[136].mxu0  ;;  %7060 = vmatprep.subr.bf16.mxu1 %v13400_v34  ;;  %5675 = vmatpush1.bf16.msra.mxu0 %v7443_v12 }
 0x4c5   : > { %13502 = vst [vmem:[#allocation151_spill] sm:$0xff] %v10233_v50  ;;  %v3520_v23 = vmul.f32 %v3324_v14, %v10212_v51  ;;  %7590 = vtanh.f32 %v4103_v57  ;;  %v4104_v54 = vmul.f32 0.7978846, %v3908_v47  ;;  %v10243_v25 = vadd.f32 %v9992_v43, %v9708_v55  ;;  %v10245_v9 = vpop.f32.mrb[137].mxu1  ;;  %v10247_v1 = vpop.f32.mrb[137].mxu0 }
 0x4c6   : > { %v3714_v7 = vmul.f32 0.044715, %v3518_v17  ;;  %v10250_v2 = vpop.eup %7582  ;;  %7592 = vtanh.f32 %v4102_v19  ;;  %v4105_v61 = vmul.f32 0.7978846, %v3909_v40  ;;  %v3911_v14 = vadd.f32 %v3715_v24, %v10190_v15  ;;  %v10253_v57 = vpop.f32.mrb[138].mxu1 }
 0x4c7   : > { %13503 = vst [vmem:[#allocation152_spill] sm:$0xff] %v10243_v25  ;;  %13504 = vst [vmem:[#allocation153_spill] sm:$0xff] %v10250_v2  ;;  %v3716_v42 = vmul.f32 0.044715, %v3520_v23  ;;  %7594 = vtanh.f32 %v4104_v54  ;;  %v3325_v47 = vmul.f32 %v10243_v25, %v10243_v25  ;;  %v10262_v31 = vadd.f32 %v9994_v56, %v9710_v4  ;;  %v10264_v19 = vpop.f32.mrb[138].mxu0  ;;  %v10266_v40 = vpop.f32.mrb[139].mxu1 }
 0x4c8   : > { %v10255_v17 = vpop.eup %7584  ;;  %v3910_v43 = vadd.f32 %v3714_v7, %v10198_v45  ;;  %7596 = vtanh.f32 %v4105_v61  ;;  %v4107_v12 = vmul.f32 0.7978846, %v3911_v14  ;;  %v10273_v54 = vadd.f32 %v10000_v59, %v9714_v49  ;;  %v10275_v7 = vpop.f32.mrb[139].mxu0 }
 0x4c9   : > { %13505 = vst [vmem:[#allocation154_spill] sm:$0xff] %v10262_v31  ;;  %v10268_v23 = vpop.eup %7586  ;;  %v3912_v24 = vadd.f32 %v3716_v42, %v10212_v51  ;;  %v3521_v56 = vmul.f32 %v3325_v47, %v10243_v25  ;;  %v3327_v37 = vmul.f32 %v10262_v31, %v10262_v31  ;;  %v10282_v45 = vadd.f32 %v10002_v33, %v9716_v21 }
 0x4ca   : > { %13506 = vst [vmem:[#allocation155_spill] sm:$0xff] %v10268_v23  ;;  %13507 = vst [vmem:[#allocation156_spill] sm:$0xff] %v10273_v54  ;;  %v4106_v15 = vmul.f32 0.7978846, %v3910_v43  ;;  %7598 = vtanh.f32 %v4107_v12  ;;  %v3326_v14 = vmul.f32 %v10273_v54, %v10273_v54  ;;  %v10288_v59 = vadd.f32 %v10007_v38, %v9708_v55 }
 0x4cb   : > { %13508 = vst [vmem:[#allocation157_spill] sm:$0xff] %v10282_v45  ;;  %v4108_v61 = vmul.f32 0.7978846, %v3912_v24  ;;  %v3717_v42 = vmul.f32 0.044715, %v3521_v56  ;;  %v3523_v43 = vmul.f32 %v3327_v37, %v10262_v31  ;;  %v3328_v47 = vmul.f32 %v10282_v45, %v10282_v45 }
 0x4cc   : > { %13509 = vst [vmem:[#allocation158_spill] sm:$0xff] %v10288_v59  ;;  %7600 = vtanh.f32 %v4106_v15  ;;  %v3522_v33 = vmul.f32 %v3326_v14, %v10273_v54  ;;  %v3329_v12 = vmul.f32 %v10288_v59, %v10288_v59  ;;  %v10298_v24 = vadd.f32 %v10009_v30, %v9710_v4 }
 0x4cd   : > { %7602 = vtanh.f32 %v4108_v61  ;;  %v10300_v51 = vpop.eup %7588  ;;  %v3913_v38 = vadd.f32 %v3717_v42, %v10243_v25  ;;  %v3719_v15 = vmul.f32 0.044715, %v3523_v43  ;;  %v3524_v37 = vmul.f32 %v3328_v47, %v10282_v45 }
 0x4ce   : > { %13510 = vst [vmem:[#allocation159_spill] sm:$0xff] %v10298_v24  ;;  %13511 = vst [vmem:[#allocation160_spill] sm:$0xff] %v10300_v51  ;;  %v10306_v56 = vadd.f32 %v10015_v6, %v9714_v49  ;;  %v3718_v61 = vmul.f32 0.044715, %v3522_v33  ;;  %v3525_v14 = vmul.f32 %v3329_v12, %v10288_v59  ;;  %v3331_v2 = vmul.f32 %v10298_v24, %v10298_v24 }
 0x4cf   : > { %v10313_v30 = vadd.f32 %v10017_v53, %v9716_v21  ;;  %v10315_v51 = vpop.eup %7590  ;;  %v4109_v42 = vmul.f32 0.7978846, %v3913_v38  ;;  %v3915_v43 = vadd.f32 %v3719_v15, %v10262_v31  ;;  %v3720_v47 = vmul.f32 0.044715, %v3524_v37 }
 0x4d0   : > { %13512 = vst [vmem:[#allocation161_spill] sm:$0xff] %v10306_v56  ;;  %13514 = vst [vmem:[#allocation163_spill] sm:$0xff] %v10315_v51  ;;  %v3330_v6 = vmul.f32 %v10306_v56, %v10306_v56  ;;  %v10320_v25 = vpop.eup %7592  ;;  %v3914_v33 = vadd.f32 %v3718_v61, %v10273_v54  ;;  %v3721_v12 = vmul.f32 0.044715, %v3525_v14  ;;  %v3527_v50 = vmul.f32 %v3331_v2, %v10298_v24 }
 0x4d1   : > { %13513 = vst [vmem:[#allocation162_spill] sm:$0xff] %v10313_v30  ;;  %13515 = vst [vmem:[#allocation164_spill] sm:$0xff] %v10320_v25  ;;  %v3332_v53 = vmul.f32 %v10313_v30, %v10313_v30  ;;  %v10326_v23 = vpop.eup %7594  ;;  %7604 = vtanh.f32 %v4109_v42  ;;  %v4111_v38 = vmul.f32 0.7978846, %v3915_v43  ;;  %v3916_v15 = vadd.f32 %v3720_v47, %v10282_v45 }
 0x4d2   : > { %13516 = vst [vmem:[#allocation165_spill] sm:$0xff] %v10326_v23  ;;  %v3526_v37 = vmul.f32 %v3330_v6, %v10306_v56  ;;  %v10330_v31 = vpop.eup %7596  ;;  %v4110_v51 = vmul.f32 0.7978846, %v3914_v33  ;;  %v3917_v25 = vadd.f32 %v3721_v12, %v10288_v59  ;;  %v3723_v61 = vmul.f32 0.044715, %v3527_v50 }
 0x4d3   : > { %v3528_v14 = vmul.f32 %v3332_v53, %v10313_v30  ;;  %7606 = vtanh.f32 %v4111_v38  ;;  %v4112_v2 = vmul.f32 0.7978846, %v3916_v15  ;;  %v10336_v23 = vadd.f32 %v10042_v20, %v9708_v55 }
 0x4d4   : > { %v3722_v54 = vmul.f32 0.044715, %v3526_v37  ;;  %v10338_v42 = vpop.eup %7598  ;;  %7608 = vtanh.f32 %v4110_v51  ;;  %v4113_v43 = vmul.f32 0.7978846, %v3917_v25  ;;  %v3919_v47 = vadd.f32 %v3723_v61, %v10298_v24 }
 0x4d5   : > { %13517 = vst [vmem:[#allocation166_spill] sm:$0xff] %v10336_v23  ;;  %13518 = vst [vmem:[#allocation167_spill] sm:$0xff] %v10338_v42  ;;  %v3724_v6 = vmul.f32 0.044715, %v3528_v14  ;;  %7610 = vtanh.f32 %v4112_v2  ;;  %v3333_v12 = vmul.f32 %v10336_v23, %v10336_v23  ;;  %v10348_v53 = vadd.f32 %v10044_v22, %v9710_v4 }
 0x4d6   : > { %v10341_v33 = vpop.eup %7600  ;;  %v3918_v50 = vadd.f32 %v3722_v54, %v10306_v56  ;;  %7612 = vtanh.f32 %v4113_v43  ;;  %v4115_v51 = vmul.f32 0.7978846, %v3919_v47  ;;  %v10355_v38 = vadd.f32 %v10054_v18, %v9714_v49 }
 0x4d7   : > { %13519 = vst [vmem:[#allocation168_spill] sm:$0xff] %v10348_v53  ;;  %v10350_v20 = vpop.eup %7602  ;;  %v3920_v25 = vadd.f32 %v3724_v6, %v10313_v30  ;;  %v3529_v54 = vmul.f32 %v3333_v12, %v10336_v23  ;;  %v3335_v37 = vmul.f32 %v10348_v53, %v10348_v53  ;;  %v10362_v22 = vadd.f32 %v10056_v10, %v9716_v21 }
 0x4d8   : > { %13520 = vst [vmem:[#allocation169_spill] sm:$0xff] %v10355_v38  ;;  %v4114_v15 = vmul.f32 0.7978846, %v3918_v50  ;;  %7614 = vtanh.f32 %v4115_v51  ;;  %v3334_v14 = vmul.f32 %v10355_v38, %v10355_v38  ;;  %v10368_v2 = vadd.f32 %v10063_v46, %v9708_v55 }
 0x4d9   : > { %13521 = vst [vmem:[#allocation170_spill] sm:$0xff] %v10362_v22  ;;  %v4116_v61 = vmul.f32 0.7978846, %v3920_v25  ;;  %v3725_v18 = vmul.f32 0.044715, %v3529_v54  ;;  %v3531_v43 = vmul.f32 %v3335_v37, %v10348_v53  ;;  %v3336_v47 = vmul.f32 %v10362_v22, %v10362_v22 }
 0x4da   : > { %13522 = vst [vmem:[#allocation171_spill] sm:$0xff] %v10368_v2  ;;  %7616 = vtanh.f32 %v4114_v15  ;;  %v3530_v10 = vmul.f32 %v3334_v14, %v10355_v38  ;;  %v3337_v6 = vmul.f32 %v10368_v2, %v10368_v2  ;;  %v10378_v50 = vadd.f32 %v10065_v28, %v9710_v4 }
 0x4db   : > { %7618 = vtanh.f32 %v4116_v61  ;;  %v10380_v12 = vpop.eup %7604  ;;  %v3921_v46 = vadd.f32 %v3725_v18, %v10336_v23  ;;  %v3727_v51 = vmul.f32 0.044715, %v3531_v43  ;;  %v3532_v25 = vmul.f32 %v3336_v47, %v10362_v22 }
 0x4dc   : > { %13523 = vst [vmem:[#allocation172_spill] sm:$0xff] %v10378_v50  ;;  %13524 = vst [vmem:[#allocation173_spill] sm:$0xff] %v10380_v12  ;;  %v10386_v15 = vadd.f32 %v10071_v11, %v9714_v49  ;;  %v3726_v54 = vmul.f32 0.044715, %v3530_v10  ;;  %v3533_v37 = vmul.f32 %v3337_v6, %v10368_v2  ;;  %v3339_v61 = vmul.f32 %v10378_v50, %v10378_v50 }
 0x4dd   : > { %v10393_v28 = vadd.f32 %v10073_v44, %v9716_v21  ;;  %v10395_v14 = vpop.eup %7606  ;;  %v4117_v18 = vmul.f32 0.7978846, %v3921_v46  ;;  %v3923_v43 = vadd.f32 %v3727_v51, %v10348_v53  ;;  %v3728_v47 = vmul.f32 0.044715, %v3532_v25 }
 0x4de   : > { %13525 = vst [vmem:[#allocation174_spill] sm:$0xff] %v10386_v15  ;;  %13527 = vst [vmem:[#allocation176_spill] sm:$0xff] %v10395_v14  ;;  %v3338_v11 = vmul.f32 %v10386_v15, %v10386_v15  ;;  %v10400_v23 = vpop.eup %7608  ;;  %v3922_v10 = vadd.f32 %v3726_v54, %v10355_v38  ;;  %v3729_v6 = vmul.f32 0.044715, %v3533_v37  ;;  %v3535_v24 = vmul.f32 %v3339_v61, %v10378_v50 }
 0x4df   : > { %13526 = vst [vmem:[#allocation175_spill] sm:$0xff] %v10393_v28  ;;  %13528 = vst [vmem:[#allocation177_spill] sm:$0xff] %v10400_v23  ;;  %v3340_v44 = vmul.f32 %v10393_v28, %v10393_v28  ;;  %v10406_v59 = vpop.eup %7610  ;;  %7620 = vtanh.f32 %v4117_v18  ;;  %v4119_v46 = vmul.f32 0.7978846, %v3923_v43  ;;  %v3924_v51 = vadd.f32 %v3728_v47, %v10362_v22 }
 0x4e0   : > { %13529 = vst [vmem:[#allocation178_spill] sm:$0xff] %v10406_v59  ;;  %v3534_v25 = vmul.f32 %v3338_v11, %v10386_v15  ;;  %v10410_v53 = vpop.eup %7612  ;;  %v4118_v14 = vmul.f32 0.7978846, %v3922_v10  ;;  %v3925_v12 = vadd.f32 %v3729_v6, %v10368_v2  ;;  %v3731_v54 = vmul.f32 0.044715, %v3535_v24 }
 0x4e1   : > { %13530 = vst [vmem:[#allocation179_spill] sm:$0xff] %v10410_v53  ;;  %v3536_v37 = vmul.f32 %v3340_v44, %v10393_v28  ;;  %7622 = vtanh.f32 %v4119_v46  ;;  %v4120_v61 = vmul.f32 0.7978846, %v3924_v51  ;;  %v10416_v30 = vadd.f32 %v10108_v48, %v9708_v55 }
 0x4e2   : > { %v3730_v38 = vmul.f32 0.044715, %v3534_v25  ;;  %v10418_v18 = vpop.eup %7614  ;;  %7624 = vtanh.f32 %v4118_v14  ;;  %v4121_v43 = vmul.f32 0.7978846, %v3925_v12  ;;  %v3927_v47 = vadd.f32 %v3731_v54, %v10378_v50 }
 0x4e3   : > { %13531 = vst [vmem:[#allocation180_spill] sm:$0xff] %v10416_v30  ;;  %13532 = vst [vmem:[#allocation181_spill] sm:$0xff] %v10418_v18  ;;  %v3732_v11 = vmul.f32 0.044715, %v3536_v37  ;;  %7626 = vtanh.f32 %v4120_v61  ;;  %v3341_v6 = vmul.f32 %v10416_v30, %v10416_v30  ;;  %v10428_v44 = vadd.f32 %v10110_v52, %v9710_v4 }
 0x4e4   : > { %v10421_v10 = vpop.eup %7616  ;;  %v3926_v24 = vadd.f32 %v3730_v38, %v10386_v15  ;;  %7628 = vtanh.f32 %v4121_v43  ;;  %v4123_v14 = vmul.f32 0.7978846, %v3927_v47  ;;  %v10435_v46 = vadd.f32 %v10116_v58, %v9714_v49 }
 0x4e5   : > { %13533 = vst [vmem:[#allocation182_spill] sm:$0xff] %v10421_v10  ;;  %13534 = vst [vmem:[#allocation183_spill] sm:$0xff] %v10428_v44  ;;  %v10430_v48 = vpop.eup %7618  ;;  %v3928_v12 = vadd.f32 %v3732_v11, %v10393_v28  ;;  %v3537_v38 = vmul.f32 %v3341_v6, %v10416_v30  ;;  %v3343_v25 = vmul.f32 %v10428_v44, %v10428_v44 }
 0x4e6   : > { %13535 = vst [vmem:[#allocation184_spill] sm:$0xff] %v10430_v48  ;;  %13536 = vst [vmem:[#allocation185_spill] sm:$0xff] %v10435_v46  ;;  %v4122_v51 = vmul.f32 0.7978846, %v3926_v24  ;;  %v10442_v52 = vadd.f32 %v10118_v0, %v9716_v21  ;;  %7630 = vtanh.f32 %v4123_v14  ;;  %v3342_v37 = vmul.f32 %v10435_v46, %v10435_v46 }
 0x4e7   : > { %v4124_v54 = vmul.f32 0.7978846, %v3928_v12  ;;  %v10448_v61 = vadd.f32 %v10124_v27, %v9708_v55  ;;  %v3733_v58 = vmul.f32 0.044715, %v3537_v38  ;;  %v3539_v43 = vmul.f32 %v3343_v25, %v10428_v44 }
 0x4e8   : > { %13537 = vst [vmem:[#allocation186_spill] sm:$0xff] %v10442_v52  ;;  %7632 = vtanh.f32 %v4122_v51  ;;  %v3344_v47 = vmul.f32 %v10442_v52, %v10442_v52  ;;  %v3538_v0 = vmul.f32 %v3342_v37, %v10435_v46  ;;  %v10458_v24 = vadd.f32 %v10126_v60, %v9710_v4 }
 0x4e9   : > { %13538 = vst [vmem:[#allocation187_spill] sm:$0xff] %v10448_v61  ;;  %7634 = vtanh.f32 %v4124_v54  ;;  %v3345_v11 = vmul.f32 %v10448_v61, %v10448_v61  ;;  %v10460_v6 = vpop.eup %7620  ;;  %v3929_v27 = vadd.f32 %v3733_v58, %v10416_v30  ;;  %v3735_v14 = vmul.f32 0.044715, %v3539_v43 }
 0x4ea   : > { %13539 = vst [vmem:[#allocation188_spill] sm:$0xff] %v10458_v24  ;;  %13540 = vst [vmem:[#allocation189_spill] sm:$0xff] %v10460_v6  ;;  %v3540_v12 = vmul.f32 %v3344_v47, %v10442_v52  ;;  %v10466_v51 = vadd.f32 %v10134_v63, %v9714_v49  ;;  %v3734_v38 = vmul.f32 0.044715, %v3538_v0  ;;  %v3347_v54 = vmul.f32 %v10458_v24, %v10458_v24 }
 0x4eb   : > { %v3541_v25 = vmul.f32 %v3345_v11, %v10448_v61  ;;  %v10473_v60 = vadd.f32 %v10136_v39, %v9716_v21  ;;  %v10475_v37 = vpop.eup %7622  ;;  %v4125_v58 = vmul.f32 0.7978846, %v3929_v27  ;;  %v3931_v43 = vadd.f32 %v3735_v14, %v10428_v44 }
 0x4ec   : > { %13541 = vst [vmem:[#allocation190_spill] sm:$0xff] %v10466_v51  ;;  %13543 = vst [vmem:[#allocation192_spill] sm:$0xff] %v10475_v37  ;;  %v3736_v47 = vmul.f32 0.044715, %v3540_v12  ;;  %v3346_v63 = vmul.f32 %v10466_v51, %v10466_v51  ;;  %v10480_v30 = vpop.eup %7624  ;;  %v3930_v0 = vadd.f32 %v3734_v38, %v10435_v46  ;;  %v3543_v50 = vmul.f32 %v3347_v54, %v10458_v24 }
 0x4ed   : > { %13542 = vst [vmem:[#allocation191_spill] sm:$0xff] %v10473_v60  ;;  %13544 = vst [vmem:[#allocation193_spill] sm:$0xff] %v10480_v30  ;;  %v3737_v11 = vmul.f32 0.044715, %v3541_v25  ;;  %v3348_v39 = vmul.f32 %v10473_v60, %v10473_v60  ;;  %v10486_v2 = vpop.eup %7626  ;;  %7636 = vtanh.f32 %v4125_v58  ;;  %v4127_v27 = vmul.f32 0.7978846, %v3931_v43 }
 0x4ee   : > { %13545 = vst [vmem:[#allocation194_spill] sm:$0xff] %v10486_v2  ;;  %v3932_v14 = vadd.f32 %v3736_v47, %v10442_v52  ;;  %v3542_v12 = vmul.f32 %v3346_v63, %v10466_v51  ;;  %v10490_v44 = vpop.eup %7628  ;;  %v4126_v37 = vmul.f32 0.7978846, %v3930_v0  ;;  %v3739_v38 = vmul.f32 0.044715, %v3543_v50 }
 0x4ef   : > { %13546 = vst [vmem:[#allocation195_spill] sm:$0xff] %v10490_v44  ;;  %v3933_v6 = vadd.f32 %v3737_v11, %v10448_v61  ;;  %v3544_v25 = vmul.f32 %v3348_v39, %v10473_v60  ;;  %7638 = vtanh.f32 %v4127_v27  ;;  %v10496_v28 = vadd.f32 %v10173_v29, %v9708_v55  ;;  %v2159_v29 = vpop.xlane.xlu1 %2158  ;;  %v13608_v44 = vld [vmem:[#allocation95_spill] sm:$0xff] }
 0x4f0   : > { %v4128_v54 = vmul.f32 0.7978846, %v3932_v14  ;;  %v3738_v46 = vmul.f32 0.044715, %v3542_v12  ;;  %v10498_v58 = vpop.eup %7630  ;;  %7640 = vtanh.f32 %v4126_v37  ;;  %v3935_v47 = vadd.f32 %v3739_v38, %v10458_v24 }
 0x4f1   : > { %13547 = vst [vmem:[#allocation196_spill] sm:$0xff] %v10496_v28  ;;  %13548 = vst [vmem:[#allocation197_spill] sm:$0xff] %v10498_v58  ;;  %v4129_v43 = vmul.f32 0.7978846, %v3933_v6  ;;  %v3740_v63 = vmul.f32 0.044715, %v3544_v25  ;;  %v3349_v11 = vmul.f32 %v10496_v28, %v10496_v28  ;;  %v10508_v39 = vadd.f32 %v10175_v41, %v9710_v4 }
 0x4f2   : > { %v10501_v0 = vpop.eup %7632  ;;  %7642 = vtanh.f32 %v4128_v54  ;;  %v3934_v50 = vadd.f32 %v3738_v46, %v10466_v51  ;;  %v4131_v6 = vmul.f32 0.7978846, %v3935_v47  ;;  %v10515_v14 = vadd.f32 %v10180_v26, %v9714_v49 }
 0x4f3   : > { %13549 = vst [vmem:[#allocation198_spill] sm:$0xff] %v10501_v0  ;;  %13550 = vst [vmem:[#allocation199_spill] sm:$0xff] %v10508_v39  ;;  %v10510_v27 = vpop.eup %7634  ;;  %7644 = vtanh.f32 %v4129_v43  ;;  %v3936_v37 = vadd.f32 %v3740_v63, %v10473_v60  ;;  %v3545_v46 = vmul.f32 %v3349_v11, %v10496_v28  ;;  %v3351_v38 = vmul.f32 %v10508_v39, %v10508_v39 }
 0x4f4   : > { %13551 = vst [vmem:[#allocation200_spill] sm:$0xff] %v10510_v27  ;;  %13552 = vst [vmem:[#allocation201_spill] sm:$0xff] %v10515_v14  ;;  %v4130_v12 = vmul.f32 0.7978846, %v3934_v50  ;;  %v10522_v41 = vadd.f32 %v10182_v16, %v9716_v21  ;;  %7646 = vtanh.f32 %v4131_v6  ;;  %v3350_v54 = vmul.f32 %v10515_v14, %v10515_v14  ;;  %v13611_v27 = vld [vmem:[#allocation99_spill] sm:$0xff] }
 0x4f5   : > { %v4132_v25 = vmul.f32 0.7978846, %v3936_v37  ;;  %v2216_v43 = vmul.f32 0.0078125, %v2159_v29  ;;  %v3741_v47 = vmul.f32 0.044715, %v3545_v46  ;;  %v3547_v26 = vmul.f32 %v3351_v38, %v10508_v39 }
 0x4f6   : > { %13553 = vst [vmem:[#allocation202_spill] sm:$0xff] %v10522_v41  ;;  %7648 = vtanh.f32 %v4130_v12  ;;  %v3352_v63 = vmul.f32 %v10522_v41, %v10522_v41  ;;  %v3546_v50 = vmul.f32 %v3350_v54, %v10515_v14  ;;  %v10532_v16 = vadd.f32 %v10192_v62, %v9708_v55 }
 0x4f7   : > { %7650 = vtanh.f32 %v4132_v25  ;;  %v2265_v11 = vadd.f32 1e-05, %v2216_v43  ;;  %v10534_v6 = vpop.eup %7636  ;;  %v3937_v37 = vadd.f32 %v3741_v47, %v10496_v28  ;;  %v3743_v29 = vmul.f32 0.044715, %v3547_v26 }
 0x4f8   : > { %13554 = vst [vmem:[#allocation203_spill] sm:$0xff] %v10532_v16  ;;  %13555 = vst [vmem:[#allocation204_spill] sm:$0xff] %v10534_v6  ;;  %v3548_v12 = vmul.f32 %v3352_v63, %v10522_v41  ;;  %v10540_v46 = vadd.f32 %v10200_v35, %v9710_v4  ;;  %v3742_v38 = vmul.f32 0.044715, %v3546_v50  ;;  %v3353_v25 = vmul.f32 %v10532_v16, %v10532_v16 }
 0x4f9   : > { %7652 = vrsqrt.f32 %v2265_v11  ;;  %v10546_v62 = vadd.f32 %v10202_v32, %v9714_v49  ;;  %v10548_v54 = vpop.eup %7638  ;;  %v4133_v43 = vmul.f32 0.7978846, %v3937_v37  ;;  %v3939_v47 = vadd.f32 %v3743_v29, %v10508_v39  ;;  %v2161_v37 = vpop.xlane.xlu0 %2160 }
 0x4fa   : > { %13556 = vst [vmem:[#allocation205_spill] sm:$0xff] %v10540_v46  ;;  %13558 = vst [vmem:[#allocation207_spill] sm:$0xff] %v10548_v54  ;;  %v3744_v26 = vmul.f32 0.044715, %v3548_v12  ;;  %v3355_v63 = vmul.f32 %v10540_v46, %v10540_v46  ;;  %v10553_v35 = vpop.eup %7640  ;;  %v3938_v50 = vadd.f32 %v3742_v38, %v10515_v14  ;;  %v3549_v11 = vmul.f32 %v3353_v25, %v10532_v16 }
 0x4fb   : > { %13557 = vst [vmem:[#allocation206_spill] sm:$0xff] %v10546_v62  ;;  %13559 = vst [vmem:[#allocation208_spill] sm:$0xff] %v10553_v35  ;;  %v3354_v28 = vmul.f32 %v10546_v62, %v10546_v62  ;;  %v10561_v32 = vadd.f32 %v10214_v8, %v9716_v21  ;;  %7654 = vtanh.f32 %v4133_v43  ;;  %v4135_v29 = vmul.f32 0.7978846, %v3939_v47 }
 0x4fc   : > { %v10563_v24 = vpop.eup %7642  ;;  %v3940_v12 = vadd.f32 %v3744_v26, %v10522_v41  ;;  %v3551_v39 = vmul.f32 %v3355_v63, %v10540_v46  ;;  %v4134_v38 = vmul.f32 0.7978846, %v3938_v50  ;;  %v3745_v25 = vmul.f32 0.044715, %v3549_v11 }
 0x4fd   : > { %13560 = vst [vmem:[#allocation209_spill] sm:$0xff] %v10561_v32  ;;  %13561 = vst [vmem:[#allocation210_spill] sm:$0xff] %v10563_v24  ;;  %v10567_v61 = vpop.eup %7644  ;;  %v3550_v14 = vmul.f32 %v3354_v28, %v10546_v62  ;;  %v3356_v54 = vmul.f32 %v10561_v32, %v10561_v32  ;;  %7656 = vtanh.f32 %v4135_v29  ;;  %v2217_v60 = vmul.f32 0.0078125, %v2161_v37  ;;  %v13606_v24 = vld [vmem:[#allocation94_spill] sm:$0xff] }
 0x4fe   : > { %13562 = vst [vmem:[#allocation211_spill] sm:$0xff] %v10567_v61  ;;  %v4136_v8 = vmul.f32 0.7978846, %v3940_v12  ;;  %v3747_v6 = vmul.f32 0.044715, %v3551_v39  ;;  %v10572_v52 = vpop.eup %7646  ;;  %7658 = vtanh.f32 %v4134_v38  ;;  %v3941_v43 = vadd.f32 %v3745_v25, %v10532_v16 }
 0x4ff   : > { %13563 = vst [vmem:[#allocation212_spill] sm:$0xff] %v10572_v52  ;;  %v3746_v47 = vmul.f32 0.044715, %v3550_v14  ;;  %v3552_v26 = vmul.f32 %v3356_v54, %v10561_v32  ;;  %v2266_v50 = vadd.f32 1e-05, %v2217_v60  ;;  %v10581_v11 = vadd.f32 %v10237_v3, %v9708_v55  ;;  %v2163_v3 = vpop.xlane.xlu1 %2162  ;;  %v13602_v52 = vld [vmem:[#allocation112_spill] sm:$0xff] }
 0x500   : > { %v10576_v63 = vpop.eup %7648  ;;  %7660 = vtanh.f32 %v4136_v8  ;;  %v3943_v28 = vadd.f32 %v3747_v6, %v10540_v46  ;;  %v4137_v37 = vmul.f32 0.7978846, %v3941_v43  ;;  %v10588_v14 = vadd.f32 %v10239_v36, %v9710_v4 }
 0x501   : > { %13564 = vst [vmem:[#allocation213_spill] sm:$0xff] %v10576_v63  ;;  %13565 = vst [vmem:[#allocation214_spill] sm:$0xff] %v10581_v11  ;;  %v10583_v39 = vpop.eup %7650  ;;  %v3942_v29 = vadd.f32 %v3746_v47, %v10546_v62  ;;  %v3748_v12 = vmul.f32 0.044715, %v3552_v26  ;;  %7662 = vrsqrt.f32 %v2266_v50  ;;  %v3357_v6 = vmul.f32 %v10581_v11, %v10581_v11 }
 0x502   : > { %13566 = vst [vmem:[#allocation215_spill] sm:$0xff] %v10583_v39  ;;  %13567 = vst [vmem:[#allocation216_spill] sm:$0xff] %v10588_v14  ;;  %v4139_v54 = vmul.f32 0.7978846, %v3943_v28  ;;  %v10594_v60 = vadd.f32 %v10245_v9, %v9714_v49  ;;  %7664 = vtanh.f32 %v4137_v37  ;;  %v3359_v36 = vmul.f32 %v10588_v14, %v10588_v14 }
 0x503   : > { %v10596_v38 = vpop.eup %7652  ;;  %v4138_v25 = vmul.f32 0.7978846, %v3942_v29  ;;  %v3944_v8 = vadd.f32 %v3748_v12, %v10561_v32  ;;  %v3553_v43 = vmul.f32 %v3357_v6, %v10581_v11  ;;  %v10606_v9 = vadd.f32 %v10247_v1, %v9716_v21 }
 0x504   : > { %13568 = vst [vmem:[#allocation217_spill] sm:$0xff] %v10594_v60  ;;  %7666 = vtanh.f32 %v4139_v54  ;;  %v3358_v47 = vmul.f32 %v10594_v60, %v10594_v60  ;;  %v3555_v28 = vmul.f32 %v3359_v36, %v10588_v14  ;;  %v2218_v50 = vmul.f32 0.0078125, %v2163_v3 }
 0x505   : > { %13569 = vst [vmem:[#allocation218_spill] sm:$0xff] %v10606_v9  ;;  %7668 = vtanh.f32 %v4138_v25  ;;  %v4140_v26 = vmul.f32 0.7978846, %v3944_v8  ;;  %v10609_v37 = vpop.eup %7654  ;;  %v3749_v29 = vmul.f32 0.044715, %v3553_v43  ;;  %v3360_v54 = vmul.f32 %v10606_v9, %v10606_v9 }
 0x506   : > { %13570 = vst [vmem:[#allocation219_spill] sm:$0xff] %v10609_v37  ;;  %v3554_v12 = vmul.f32 %v3358_v47, %v10594_v60  ;;  %v10616_v6 = vadd.f32 %v10253_v57, %v9708_v55  ;;  %v3751_v1 = vmul.f32 0.044715, %v3555_v28  ;;  %v2267_v46 = vadd.f32 1e-05, %v2218_v50  ;;  %v2165_v28 = vpop.xlane.xlu0 %2164 }
 0x507   : > { %7670 = vtanh.f32 %v4140_v26  ;;  %v10620_v25 = vadd.f32 %v10264_v19, %v9710_v4  ;;  %v10622_v3 = vpop.eup %7656  ;;  %v3945_v8 = vadd.f32 %v3749_v29, %v10581_v11  ;;  %v3556_v43 = vmul.f32 %v3360_v54, %v10606_v9 }
 0x508   : > { %13571 = vst [vmem:[#allocation220_spill] sm:$0xff] %v10616_v6  ;;  %13573 = vst [vmem:[#allocation222_spill] sm:$0xff] %v10622_v3  ;;  %v3750_v36 = vmul.f32 0.044715, %v3554_v12  ;;  %v3361_v47 = vmul.f32 %v10616_v6, %v10616_v6  ;;  %v10628_v16 = vpop.eup %7658  ;;  %v3947_v57 = vadd.f32 %v3751_v1, %v10588_v14  ;;  %7672 = vrsqrt.f32 %v2267_v46  ;;  %v2167_v3 = vpop.xlane.xlu1 %2166 }
 0x509   : > { %13572 = vst [vmem:[#allocation221_spill] sm:$0xff] %v10620_v25  ;;  %13574 = vst [vmem:[#allocation223_spill] sm:$0xff] %v10628_v16  ;;  %v3363_v26 = vmul.f32 %v10620_v25, %v10620_v25  ;;  %v10635_v19 = vadd.f32 %v10266_v40, %v9714_v49  ;;  %v4141_v29 = vmul.f32 0.7978846, %v3945_v8  ;;  %v3752_v54 = vmul.f32 0.044715, %v3556_v43 }
 0x50a   : > { %v10637_v50 = vpop.eup %7660  ;;  %v3946_v12 = vadd.f32 %v3750_v36, %v10594_v60  ;;  %v3557_v11 = vmul.f32 %v3361_v47, %v10616_v6  ;;  %v4143_v37 = vmul.f32 0.7978846, %v3947_v57  ;;  %v10646_v40 = vadd.f32 %v10275_v7, %v9716_v21  ;;  %v2169_v60 = vpop.xlane.xlu0 %2168 }
 0x50b   : > { %13575 = vst [vmem:[#allocation224_spill] sm:$0xff] %v10635_v19  ;;  %13576 = vst [vmem:[#allocation225_spill] sm:$0xff] %v10637_v50  ;;  %v3559_v46 = vmul.f32 %v3363_v26, %v10620_v25  ;;  %v3362_v1 = vmul.f32 %v10635_v19, %v10635_v19  ;;  %v7663_v14 = vpop.eup %7662  ;;  %7674 = vtanh.f32 %v4141_v29  ;;  %v3948_v8 = vadd.f32 %v3752_v54, %v10606_v9 }
 0x50c   : > { %13577 = vst [vmem:[#allocation226_spill] sm:$0xff] %v10646_v40  ;;  %v4142_v32 = vmul.f32 0.7978846, %v3946_v12  ;;  %v3753_v36 = vmul.f32 0.044715, %v3557_v11  ;;  %v10649_v43 = vpop.eup %7664  ;;  %7676 = vtanh.f32 %v4143_v37  ;;  %v3364_v26 = vmul.f32 %v10646_v40, %v10646_v40  ;;  %v2171_v62 = vpop.xlane.xlu1 %2170 }
 0x50d   : > { %13578 = vst [vmem:[#allocation227_spill] sm:$0xff] %v10649_v43  ;;  %v3755_v47 = vmul.f32 0.044715, %v3559_v46  ;;  %v3558_v57 = vmul.f32 %v3362_v1, %v10635_v19  ;;  %v4144_v7 = vmul.f32 0.7978846, %v3948_v8  ;;  %v2219_v12 = vmul.f32 0.0078125, %v2165_v28 }
 0x50e   : > { %v10654_v41 = vpop.eup %7666  ;;  %7678 = vtanh.f32 %v4142_v32  ;;  %v3949_v29 = vadd.f32 %v3753_v36, %v10616_v6  ;;  %v3560_v46 = vmul.f32 %v3364_v26, %v10646_v40  ;;  %v2220_v1 = vmul.f32 0.0078125, %v2167_v3  ;;  %v2173_v6 = vpop.xlane.xlu0 %2172 }
 0x50f   : > { %13579 = vst [vmem:[#allocation228_spill] sm:$0xff] %v10654_v41  ;;  %v10657_v54 = vpop.eup %7668  ;;  %v3951_v11 = vadd.f32 %v3755_v47, %v10620_v25  ;;  %v3754_v37 = vmul.f32 0.044715, %v3558_v57  ;;  %7680 = vtanh.f32 %v4144_v7  ;;  %v2268_v43 = vadd.f32 1e-05, %v2219_v12  ;;  %v13582_v7 = vld [vmem:[#allocation59_spill] sm:$0xff] }
 0x510   : > { %13580 = vst [vmem:[#allocation229_spill] sm:$0xff] %v10657_v54  ;;  %v4145_v9 = vmul.f32 0.7978846, %v3949_v29  ;;  %v2221_v50 = vmul.f32 0.0078125, %v2169_v60  ;;  %v3756_v36 = vmul.f32 0.044715, %v3560_v46  ;;  %v2363_v47 = vmul.f32 %v10596_v38, %v9590_v13  ;;  %v2175_v57 = vpop.xlane.xlu1 %2174 }
 0x511   : > { %v10661_v16 = vpop.eup %7670  ;;  %v4147_v32 = vmul.f32 0.7978846, %v3951_v11  ;;  %v3950_v8 = vadd.f32 %v3754_v37, %v10635_v19  ;;  %v2269_v28 = vadd.f32 1e-05, %v2220_v1  ;;  %v2222_v54 = vmul.f32 0.0078125, %v2171_v62  ;;  %v13589_v25 = vld [vmem:[#allocation101_spill] sm:$0xff] }
 0x512   : > { %13581 = vst [vmem:[#allocation230_spill] sm:$0xff] %v10661_v16  ;;  %7682 = vtanh.f32 %v4145_v9  ;;  %v2270_v41 = vadd.f32 1e-05, %v2221_v50  ;;  %v7673_v3 = vpop.eup %7672  ;;  %v3952_v60 = vadd.f32 %v3756_v36, %v10646_v40  ;;  %v2364_v29 = vmul.f32 %v7663_v14, %v13582_v7  ;;  %v10668_v11 = vld [vmem:[#allocation10] ss:$0 sm:$0xff] }
 0x513   : > { %7684 = vtanh.f32 %v4147_v32  ;;  %v4146_v26 = vmul.f32 0.7978846, %v3950_v8  ;;  %v2271_v12 = vadd.f32 1e-05, %v2222_v54  ;;  %v2419_v37 = vmul.f32 %v10668_v11, %v2363_v47  ;;  %v10672_v38 = vpop.f32.mrb[140].mxu1  ;;  %v10674_v46 = vpop.f32.mrb[140].mxu0 }
 0x514   : > { %7686 = vrsqrt.f32 %v2268_v43  ;;  %v2223_v9 = vmul.f32 0.0078125, %v2173_v6  ;;  %v4148_v62 = vmul.f32 0.7978846, %v3952_v60  ;;  %v2420_v50 = vmul.f32 %v10668_v11, %v2364_v29  ;;  %v10678_v14 = vld [vmem:[#allocation11] ss:$0 sm:$0xff]  ;;  %v13584_v32 = vld [vmem:[#allocation61_spill] sm:$0xff] }
 0x515   : > { %7688 = vtanh.f32 %v4146_v26  ;;  %v2224_v13 = vmul.f32 0.0078125, %v2175_v57  ;;  %v10676_v1 = vpop.eup %7674  ;;  %v2475_v43 = vadd.f32 %v10678_v14, %v2419_v37  ;;  %v2365_v8 = vmul.f32 %v7673_v3, %v13584_v32  ;;  %v10682_v6 = vpop.f32.mrb[141].mxu1  ;;  %v13586_v60 = vld [vmem:[#allocation100_spill] sm:$0xff] }
 0x516   : > { %13583 = vst [vmem:[#allocation59_spill] sm:$0xff] %v10676_v1  ;;  %7690 = vrsqrt.f32 %v2269_v28  ;;  %v2272_v54 = vadd.f32 1e-05, %v2223_v9  ;;  %v10684_v36 = vpop.f32.mrb[141].mxu0  ;;  %v10686_v47 = vpop.eup %7676  ;;  %v2476_v57 = vadd.f32 %v10678_v14, %v2420_v50  ;;  %v4462_v7 = vadd.f32 1.0, %v13586_v60  ;;  %v13588_v9 = vld [vmem:[#allocation103_spill] sm:$0xff] }
 0x517   : > { %13585 = vst [vmem:[#allocation61_spill] sm:$0xff] %v10686_v47  ;;  %7692 = vtanh.f32 %v4148_v62  ;;  %v2273_v26 = vadd.f32 1e-05, %v2224_v13  ;;  %v10690_v28 = vpop.f32.mrb[142].mxu1  ;;  %v10692_v29 = vpop.f32.mrb[142].mxu0  ;;  %v2421_v3 = vmul.f32 %v10668_v11, %v2365_v8  ;;  %v4466_v32 = vadd.f32 1.0, %v13588_v9 }
 0x518   : > { %v10694_v37 = vpop.eup %7678  ;;  %7694 = vrsqrt.f32 %v2270_v41  ;;  %v4464_v1 = vadd.f32 1.0, %v13589_v25  ;;  %v10699_v47 = vpop.f32.mrb[143].mxu1  ;;  %v2504_v50 = vpack.c.bf16 %v2476_v57, %v2475_v43  ;;  %v4658_v13 = vmul.f32 0.5, %v4462_v7  ;;  %v13590_v60 = vld [vmem:[#allocation105_spill] sm:$0xff]  ;;  %v13592_v25 = vld [vmem:[#allocation88_spill] sm:$0xff] }
 0x519   : > { %13587 = vst [vmem:[#allocation100_spill] sm:$0xff] %v10694_v37  ;;  %v10701_v62 = vpop.f32.mrb[143].mxu0  ;;  %7696 = vrsqrt.f32 %v2271_v12  ;;  %v4468_v40 = vadd.f32 1.0, %v13590_v60  ;;  %v10704_v19 = vpop.eup %7680  ;;  %v10707_v41 = vadd.f32 %v10678_v14, %v2421_v3  ;;  %v4662_v8 = vmul.f32 0.5, %v4466_v32  ;;  %v13593_v12 = vld [vmem:[#allocation116_spill] sm:$0xff]  ;;  %v13596_v3 = vld [vmem:[#allocation89_spill] sm:$0xff] }
 0x51a   : > { %13591 = vst [vmem:[#allocation103_spill] sm:$0xff] %v10704_v19  ;;  %7698 = vrsqrt.f32 %v2272_v54  ;;  %v4660_v37 = vmul.f32 0.5, %v4464_v1  ;;  %2956 = vmatmul.mubr.bf16.gmra.mrb[180].mxu1 %v2504_v50  ;;  %3237 = vmatmul.mubr.bf16.gmra.mrb[180].mxu0 %v2504_v50  ;;  %v10710_v9 = vmul.f32 %v4658_v13, %v13592_v25  ;;  %v4470_v43 = vadd.f32 1.0, %v13593_v12  ;;  %v13595_v54 = vld [vmem:[#allocation90_spill] sm:$0xff] }
 0x51b   : > { %7700 = vrsqrt.f32 %v2273_v26  ;;  %v4664_v16 = vmul.f32 0.5, %v4468_v40  ;;  %2965 = vmatprep.mubr.bf16.mxu1 %v13400_v34  ;;  %3246 = vmatprep.mubr.bf16.mxu0 %v13400_v34  ;;  %v10718_v7 = vmul.f32 %v4662_v8, %v13595_v54  ;;  %v13597_v32 = vld [vmem:[#allocation122_spill] sm:$0xff]  ;;  %v13600_v40 = vld [vmem:[#allocation91_spill] sm:$0xff]  ;;  %v4469_v61 = vadd.f32 1.0, %v13602_v52  ;;  %v10732_v51 = vpop.f32.mrb[144].mxu1  ;;  %v10734_v8 = vpop.f32.mrb[144].mxu0 }
 0x51c   : > { %v10713_v57 = vpop.eup %7682  ;;  %v10721_v1 = vmul.f32 %v4660_v37, %v13596_v3  ;;  %v4474_v26 = vadd.f32 1.0, %v13597_v32  ;;  %v13598_v50 = vld [vmem:[#allocation118_spill] sm:$0xff]  ;;  %v4666_v12 = vmul.f32 0.5, %v4470_v43  ;;  %v10739_v39 = vpop.f32.mrb[145].mxu1 }
 0x51d   : > { %13594 = vst [vmem:[#allocation101_spill] sm:$0xff] %v10713_v57  ;;  %v4472_v13 = vadd.f32 1.0, %v13598_v50  ;;  %v10725_v60 = vpop.eup %7684  ;;  %v10728_v25 = vmul.f32 %v4664_v16, %v13600_v40  ;;  %v13601_v57 = vld [vmem:[#allocation126_spill] sm:$0xff]  ;;  %v13603_v50 = vld [vmem:[#allocation119_spill] sm:$0xff]  ;;  %v10741_v16 = vpop.f32.mrb[145].mxu0 }
 0x51e   : > { %13599 = vst [vmem:[#allocation105_spill] sm:$0xff] %v10725_v60  ;;  %v4476_v19 = vadd.f32 1.0, %v13601_v57  ;;  %v7687_v37 = vpop.eup %7686  ;;  %v4670_v3 = vmul.f32 0.5, %v4474_v26  ;;  %v4473_v60 = vadd.f32 1.0, %v13603_v50  ;;  %v13605_v57 = vld [vmem:[#allocation63_spill] sm:$0xff]  ;;  %v10749_v63 = vmul.f32 %v4666_v12, %v13606_v24  ;;  %v10751_v54 = vpop.f32.mrb[146].mxu1 }
 0x51f   : > { %v4668_v32 = vmul.f32 0.5, %v4472_v13  ;;  %v10743_v43 = vpop.eup %7688  ;;  %v2366_v52 = vmul.f32 %v7687_v37, %v13605_v57  ;;  %v10753_v26 = vpop.f32.mrb[146].mxu0  ;;  %v13607_v50 = vld [vmem:[#allocation98_spill] sm:$0xff]  ;;  %v13610_v12 = vld [vmem:[#allocation83_spill] sm:$0xff] }
 0x520   : > { %13604 = vst [vmem:[#allocation88_spill] sm:$0xff] %v10743_v43  ;;  %v4672_v35 = vmul.f32 0.5, %v4476_v19  ;;  %v7691_v13 = vpop.eup %7690  ;;  %v10756_v58 = vmul.f32 %v4670_v3, %v13607_v50  ;;  %v4665_v43 = vmul.f32 0.5, %v4469_v61  ;;  %v4669_v37 = vmul.f32 0.5, %v4473_v60  ;;  %v10761_v57 = vpop.f32.mrb[147].mxu1  ;;  %v13612_v3 = vld [vmem:[#allocation114_spill] sm:$0xff] }
 0x521   : > { %v10759_v22 = vmul.f32 %v4668_v32, %v13608_v44  ;;  %v10763_v40 = vpop.f32.mrb[147].mxu0  ;;  %v10765_v24 = vpop.eup %7692  ;;  %v2422_v19 = vmul.f32 %v10668_v11, %v2366_v52  ;;  %v2367_v15 = vmul.f32 %v7691_v13, %v13610_v12  ;;  %v4471_v50 = vadd.f32 1.0, %v13612_v3  ;;  %v13613_v61 = vld [vmem:[#allocation92_spill] sm:$0xff]  ;;  %v13616_v12 = vld [vmem:[#allocation73_spill] sm:$0xff]  ;;  %v13617_v44 = vld [vmem:[#allocation75_spill] sm:$0xff] }
 0x522   : > { %13609 = vst [vmem:[#allocation116_spill] sm:$0xff] %v10765_v24  ;;  %v10770_v2 = vmul.f32 %v4672_v35, %v13611_v27  ;;  %v7695_v0 = vpop.eup %7694  ;;  %v10776_v60 = vmul.f32 %v4665_v43, %v13613_v61  ;;  %v13614_v32 = vld [vmem:[#allocation96_spill] sm:$0xff]  ;;  %v13615_v24 = vld [vmem:[#allocation121_spill] sm:$0xff] }
 0x523   : > { %v10779_v30 = vmul.f32 %v4669_v37, %v13614_v32  ;;  %v4475_v18 = vadd.f32 1.0, %v13615_v24  ;;  %v7697_v52 = vpop.eup %7696  ;;  %v2478_v13 = vadd.f32 %v10678_v14, %v2422_v19  ;;  %v2368_v27 = vmul.f32 %v7695_v0, %v13616_v12  ;;  %v13618_v12 = vld [vmem:[#allocation84_spill] sm:$0xff]  ;;  %v10794_v56 = vpop.f32.mrb[148].mxu1  ;;  %v13622_v43 = vld [vmem:[#allocation93_spill] sm:$0xff] }
 0x524   : > { %v2423_v35 = vmul.f32 %v10668_v11, %v2367_v15  ;;  %v7699_v53 = vpop.eup %7698  ;;  %v2369_v45 = vmul.f32 %v7697_v52, %v13617_v44  ;;  %v4667_v37 = vmul.f32 0.5, %v4471_v50  ;;  %13619 = vst [vmem:[#allocation90_spill] sm:$0xff] %v10794_v56  ;;  %v10796_v3 = vpop.f32.mrb[148].mxu0  ;;  %v13621_v52 = vld [vmem:[#allocation85_spill] sm:$0xff] }
 0x525   : > { %v4671_v61 = vmul.f32 0.5, %v4475_v18  ;;  %v7701_v32 = vpop.eup %7700  ;;  %v2505_v24 = vpack.c.bf16 %v2478_v13, %v10707_v41  ;;  %v2424_v19 = vmul.f32 %v10668_v11, %v2368_v27  ;;  %v2370_v15 = vmul.f32 %v7699_v53, %v13618_v12  ;;  %13620 = vst [vmem:[#allocation89_spill] sm:$0xff] %v10796_v3  ;;  %v13623_v18 = vld [vmem:[#allocation97_spill] sm:$0xff]  ;;  %v10806_v41 = vpop.f32.mrb[149].mxu1  ;;  %v13627_v12 = vld [vmem:[#allocation139_spill] sm:$0xff] }
 0x526   : > { %v2479_v0 = vadd.f32 %v10678_v14, %v2423_v35  ;;  %v2425_v44 = vmul.f32 %v10668_v11, %v2369_v45  ;;  %v2371_v48 = vmul.f32 %v7701_v32, %v13621_v52  ;;  %v10801_v50 = vmul.f32 %v4667_v37, %v13622_v43  ;;  %13624 = vst [vmem:[#allocation122_spill] sm:$0xff] %v10806_v41  ;;  %v10808_v13 = vpop.f32.mrb[149].mxu0  ;;  %v13626_v35 = vld [vmem:[#allocation134_spill] sm:$0xff]  ;;  %v10814_v52 = vpop.f32.mrb[150].mxu1  ;;  %v13633_v3 = vld [vmem:[#allocation141_spill] sm:$0xff] }
 0x527   : > { %v10804_v59 = vmul.f32 %v4671_v61, %v13623_v18  ;;  %13625 = vst [vmem:[#allocation118_spill] sm:$0xff] %v10808_v13  ;;  %2966 = vmatmul.mubr.bf16.gmra.mrb[184].mxu1 %v2505_v24  ;;  %3247 = vmatmul.mubr.bf16.gmra.mrb[184].mxu0 %v2505_v24  ;;  %v2480_v53 = vadd.f32 %v10678_v14, %v2424_v19  ;;  %v4478_v45 = vadd.f32 1.0, %v13626_v35  ;;  %v4482_v32 = vadd.f32 1.0, %v13627_v12  ;;  %v10816_v43 = vpop.f32.mrb[150].mxu0  ;;  %v13630_v19 = vld [vmem:[#allocation135_spill] sm:$0xff]  ;;  %v10825_v18 = vpop.f32.mrb[151].mxu1 }
 0x528   : > { %v2426_v27 = vmul.f32 %v10668_v11, %v2370_v15  ;;  %13628 = vst [vmem:[#allocation91_spill] sm:$0xff] %v10814_v52  ;;  %13629 = vst [vmem:[#allocation126_spill] sm:$0xff] %v10816_v43  ;;  %2975 = vmatprep.mubr.bf16.mxu1 %v13400_v34  ;;  %3256 = vmatprep.mubr.bf16.mxu0 %v13400_v34  ;;  %v2481_v37 = vadd.f32 %v10678_v14, %v2425_v44  ;;  %v4480_v15 = vadd.f32 1.0, %v13630_v19  ;;  %v10827_v35 = vpop.f32.mrb[151].mxu0  ;;  %v13635_v24 = vld [vmem:[#allocation110_spill] sm:$0xff] }
 0x529   : > { %v2427_v61 = vmul.f32 %v10668_v11, %v2371_v48  ;;  %13631 = vst [vmem:[#allocation112_spill] sm:$0xff] %v10825_v18  ;;  %13632 = vst [vmem:[#allocation119_spill] sm:$0xff] %v10827_v35  ;;  %v2506_v12 = vpack.c.bf16 %v2480_v53, %v2479_v0  ;;  %v4674_v52 = vmul.f32 0.5, %v4478_v45  ;;  %v4678_v13 = vmul.f32 0.5, %v4482_v32  ;;  %v13634_v48 = vld [vmem:[#allocation131_spill] sm:$0xff]  ;;  %v13636_v18 = vld [vmem:[#allocation117_spill] sm:$0xff] }
 0x52a   : > { %v2482_v43 = vadd.f32 %v10678_v14, %v2426_v27  ;;  %v4484_v44 = vadd.f32 1.0, %v13633_v3  ;;  %v4676_v56 = vmul.f32 0.5, %v4480_v15  ;;  %v4477_v11 = vadd.f32 1.0, %v13634_v48  ;;  %v13637_v0 = vld [vmem:[#allocation136_spill] sm:$0xff]  ;;  %v13638_v32 = vld [vmem:[#allocation111_spill] sm:$0xff]  ;;  %v13658_v35 = vld [vmem:[#allocation125_spill] sm:$0xff] }
 0x52b   : > { %v2483_v41 = vadd.f32 %v10678_v14, %v2427_v61  ;;  %v10836_v19 = vmul.f32 %v4674_v52, %v13635_v24  ;;  %v10839_v23 = vmul.f32 %v4678_v13, %v13636_v18  ;;  %v4481_v53 = vadd.f32 1.0, %v13637_v0  ;;  %v13640_v52 = vld [vmem:[#allocation138_spill] sm:$0xff]  ;;  %v10851_v48 = vpop.f32.mrb[152].mxu1  ;;  %v10853_v13 = vpop.f32.mrb[152].mxu0  ;;  %v13643_v18 = vld [vmem:[#allocation120_spill] sm:$0xff] }
 0x52c   : > { %v10833_v10 = vpack.c.bf16 %v2482_v43, %v2481_v37  ;;  %v4680_v45 = vmul.f32 0.5, %v4484_v44  ;;  %v10845_v14 = vmul.f32 %v4676_v56, %v13638_v32  ;;  %v4673_v3 = vmul.f32 0.5, %v4477_v11  ;;  %v13639_v37 = vld [vmem:[#allocation133_spill] sm:$0xff]  ;;  %13641 = vst [vmem:[#allocation63_spill] sm:$0xff] %v10851_v48  ;;  %13642 = vst [vmem:[#allocation94_spill] sm:$0xff] %v10853_v13  ;;  %v13644_v44 = vld [vmem:[#allocation107_spill] sm:$0xff] }
 0x52d   : > { %v10842_v27 = vpack.c.bf16 %v2483_v41, %v2483_v41  ;;  %v4677_v43 = vmul.f32 0.5, %v4481_v53  ;;  %v4479_v15 = vadd.f32 1.0, %v13639_v37  ;;  %v4483_v24 = vadd.f32 1.0, %v13640_v52  ;;  %v13645_v56 = vld [vmem:[#allocation150_spill] sm:$0xff]  ;;  %v10863_v61 = vpop.f32.mrb[153].mxu1  ;;  %v10865_v53 = vpop.f32.mrb[153].mxu0 }
 0x52e   : > { %v10856_v41 = vmul.f32 %v4680_v45, %v13643_v18  ;;  %v10859_v0 = vmul.f32 %v4673_v3, %v13644_v44  ;;  %v4486_v11 = vadd.f32 1.0, %v13645_v56  ;;  %v4490_v32 = vadd.f32 1.0, %v10255_v17  ;;  %13646 = vst [vmem:[#allocation98_spill] sm:$0xff] %v10863_v61  ;;  %13647 = vst [vmem:[#allocation95_spill] sm:$0xff] %v10865_v53  ;;  %v13648_v37 = vld [vmem:[#allocation113_spill] sm:$0xff]  ;;  %v10871_v18 = vpop.f32.mrb[154].mxu1 }
 0x52f   : > { %2976 = vmatmul.mubr.bf16.gmra.mrb[188].mxu1 %v2506_v12  ;;  %3257 = vmatmul.mubr.bf16.gmra.mrb[188].mxu0 %v2506_v12  ;;  %v10868_v52 = vmul.f32 %v4677_v43, %v13648_v37  ;;  %v4675_v13 = vmul.f32 0.5, %v4479_v15  ;;  %v4679_v48 = vmul.f32 0.5, %v4483_v24  ;;  %v4488_v45 = vadd.f32 1.0, %v10228_v5  ;;  %13649 = vst [vmem:[#allocation83_spill] sm:$0xff] %v10871_v18  ;;  %v10873_v3 = vpop.f32.mrb[154].mxu0  ;;  %v13651_v56 = vld [vmem:[#allocation155_spill] sm:$0xff] }
 0x530   : > { %13650 = vst [vmem:[#allocation99_spill] sm:$0xff] %v10873_v3  ;;  %2985 = vmatprep.mubr.bf16.mxu1 %v13400_v34  ;;  %3266 = vmatprep.mubr.bf16.mxu0 %v13400_v34  ;;  %v4682_v44 = vmul.f32 0.5, %v4486_v11  ;;  %v4686_v12 = vmul.f32 0.5, %v4490_v32  ;;  %v4492_v43 = vadd.f32 1.0, %v13651_v56  ;;  %v10880_v37 = vpop.f32.mrb[155].mxu1  ;;  %v10882_v15 = vpop.f32.mrb[155].mxu0 }
 0x531   : > { %13652 = vst [vmem:[#allocation114_spill] sm:$0xff] %v10880_v37  ;;  %13653 = vst [vmem:[#allocation92_spill] sm:$0xff] %v10882_v15  ;;  %v13654_v24 = vld [vmem:[#allocation109_spill] sm:$0xff]  ;;  %v13656_v18 = vld [vmem:[#allocation115_spill] sm:$0xff]  ;;  %v4684_v61 = vmul.f32 0.5, %v4488_v45  ;;  %v10900_v15 = vadd.f32 %v10672_v38, %v9708_v55 }
 0x532   : > { %v10887_v3 = vmul.f32 %v4675_v13, %v13654_v24  ;;  %v10890_v53 = vmul.f32 %v4679_v48, %v13656_v18  ;;  %v10893_v17 = vmul.f32 %v4682_v44, %v13658_v35  ;;  %v13660_v11 = vld [vmem:[#allocation130_spill] sm:$0xff]  ;;  %v4688_v56 = vmul.f32 0.5, %v4492_v43  ;;  %v13663_v13 = vld [vmem:[#allocation127_spill] sm:$0xff]  ;;  %v13666_v18 = vld [vmem:[#allocation132_spill] sm:$0xff] }
 0x533   : > { %v10896_v32 = vmul.f32 %v4686_v12, %v13660_v11  ;;  %13662 = vst [vmem:[#allocation84_spill] sm:$0xff] %v10900_v15  ;;  %v10905_v24 = vmul.f32 %v4684_v61, %v13663_v13  ;;  %v10909_v48 = vadd.f32 %v10674_v46, %v9710_v4  ;;  %v10913_v35 = vadd.f32 %v10682_v6, %v9714_v49  ;;  %v10938_v11 = vpop.f32.mrb[156].mxu1 }
 0x534   : > { %13655 = vst [vmem:[#allocation96_spill] sm:$0xff] %v10887_v3  ;;  %13657 = vst [vmem:[#allocation121_spill] sm:$0xff] %v10890_v53  ;;  %v10918_v38 = vmul.f32 %v4688_v56, %v13666_v18  ;;  %v3365_v44 = vmul.f32 %v10900_v15, %v10900_v15  ;;  %v10924_v61 = vadd.f32 %v10684_v36, %v9716_v21  ;;  %v10940_v56 = vpop.f32.mrb[156].mxu0  ;;  %v10951_v45 = vpop.f32.mrb[157].mxu1 }
 0x535   : > { %13659 = vst [vmem:[#allocation73_spill] sm:$0xff] %v10893_v17  ;;  %13661 = vst [vmem:[#allocation75_spill] sm:$0xff] %v10896_v32  ;;  %v3367_v46 = vmul.f32 %v10909_v48, %v10909_v48  ;;  %v3366_v6 = vmul.f32 %v10913_v35, %v10913_v35  ;;  %v10932_v12 = vadd.f32 %v10690_v28, %v9708_v55  ;;  %v10962_v37 = vpop.f32.mrb[158].mxu1 }
 0x536   : > { %13664 = vst [vmem:[#allocation85_spill] sm:$0xff] %v10905_v24  ;;  %13665 = vst [vmem:[#allocation93_spill] sm:$0xff] %v10909_v48  ;;  %v10936_v43 = vadd.f32 %v10692_v29, %v9710_v4  ;;  %v3561_v13 = vmul.f32 %v3365_v44, %v10900_v15  ;;  %v3368_v18 = vmul.f32 %v10924_v61, %v10924_v61  ;;  %v10953_v29 = vpop.f32.mrb[157].mxu0 }
 0x537   : > { %13667 = vst [vmem:[#allocation97_spill] sm:$0xff] %v10918_v38  ;;  %13668 = vst [vmem:[#allocation134_spill] sm:$0xff] %v10932_v12  ;;  %v10949_v28 = vadd.f32 %v10699_v47, %v9714_v49  ;;  %2986 = vmatmul.mubr.bf16.gmra.mrb[192].mxu1 %v10833_v10  ;;  %3267 = vmatmul.mubr.bf16.gmra.mrb[192].mxu0 %v10833_v10  ;;  %v3563_v5 = vmul.f32 %v3367_v46, %v10909_v48  ;;  %v10964_v47 = vpop.f32.mrb[158].mxu0 }
 0x538   : > { %13669 = vst [vmem:[#allocation139_spill] sm:$0xff] %v10936_v43  ;;  %13670 = vst [vmem:[#allocation135_spill] sm:$0xff] %v10938_v11  ;;  %v3562_v36 = vmul.f32 %v3366_v6, %v10913_v35  ;;  %v3369_v44 = vmul.f32 %v10932_v12, %v10932_v12  ;;  %2995 = vmatprep.mubr.bf16.mxu1 %v13400_v34  ;;  %3276 = vmatprep.mubr.bf16.mxu0 %v13400_v34 }
 0x539   : > { %13671 = vst [vmem:[#allocation141_spill] sm:$0xff] %v10940_v56  ;;  %13672 = vst [vmem:[#allocation131_spill] sm:$0xff] %v10951_v45  ;;  %v13674_v56 = vld [vmem:[#allocation147_spill] sm:$0xff]  ;;  %v3564_v10 = vmul.f32 %v3368_v18, %v10924_v61  ;;  %v3371_v46 = vmul.f32 %v10936_v43, %v10936_v43  ;;  %v3370_v6 = vmul.f32 %v10949_v28, %v10949_v28  ;;  %v10973_v45 = vpop.f32.mrb[159].mxu1 }
 0x53a   : > { %13673 = vst [vmem:[#allocation110_spill] sm:$0xff] %v10953_v29  ;;  %v4485_v11 = vadd.f32 1.0, %v13674_v56  ;;  %13675 = vst [vmem:[#allocation117_spill] sm:$0xff] %v10962_v37  ;;  %v3757_v29 = vmul.f32 0.044715, %v3561_v13  ;;  %v10975_v56 = vpop.f32.mrb[159].mxu0  ;;  %v10980_v38 = vadd.f32 %v10701_v62, %v9716_v21 }
 0x53b   : > { %13676 = vst [vmem:[#allocation136_spill] sm:$0xff] %v10964_v47  ;;  %13677 = vst [vmem:[#allocation111_spill] sm:$0xff] %v10973_v45  ;;  %v3759_v37 = vmul.f32 0.044715, %v3563_v5  ;;  %v3758_v24 = vmul.f32 0.044715, %v3562_v36  ;;  %v3565_v47 = vmul.f32 %v3369_v44, %v10932_v12  ;;  %v3567_v17 = vmul.f32 %v3371_v46, %v10936_v43 }
 0x53c   : > { %13678 = vst [vmem:[#allocation133_spill] sm:$0xff] %v10975_v56  ;;  %v3953_v13 = vadd.f32 %v3757_v29, %v10900_v15  ;;  %v3760_v18 = vmul.f32 0.044715, %v3564_v10  ;;  %v3566_v32 = vmul.f32 %v3370_v6, %v10949_v28  ;;  %v3372_v5 = vmul.f32 %v10980_v38, %v10980_v38  ;;  %v10992_v6 = vpop.f32.mrb[160].mxu1  ;;  %v7940_v15 = vld [vmem:[#allocation16 + $0x88] sm:$0xff]  }
 0x53d   : > { %v3955_v42 = vadd.f32 %v3759_v37, %v10909_v48  ;;  %v3954_v45 = vadd.f32 %v3758_v24, %v10913_v35  ;;  %v3761_v56 = vmul.f32 0.044715, %v3565_v47  ;;  %v3763_v62 = vmul.f32 0.044715, %v3567_v17  ;;  %v10994_v37 = vpop.f32.mrb[160].mxu0  ;;  %v10998_v48 = vpop.f32.mrb[161].mxu1 }
 0x53e   : > { %v4149_v36 = vmul.f32 0.7978846, %v3953_v13  ;;  %v3956_v44 = vadd.f32 %v3760_v18, %v10924_v61  ;;  %v3762_v3 = vmul.f32 0.044715, %v3566_v32  ;;  %v3568_v46 = vmul.f32 %v3372_v5, %v10980_v38  ;;  %v11000_v17 = vpop.f32.mrb[161].mxu0  ;;  %v11005_v18 = vpop.f32.mrb[162].mxu1 }
 0x53f   : > { %v4151_v53 = vmul.f32 0.7978846, %v3955_v42  ;;  %v4150_v29 = vmul.f32 0.7978846, %v3954_v45  ;;  %v3957_v10 = vadd.f32 %v3761_v56, %v10932_v12  ;;  %v3959_v47 = vadd.f32 %v3763_v62, %v10936_v43  ;;  %2996 = vmatmul.mubr.bf16.gmra.mrb[196].mxu1 %v10842_v27  ;;  %3277 = vmatmul.mubr.bf16.gmra.mrb[196].mxu0 %v10842_v27  ;;  %v13679_v45 = vld [vmem:[#allocation151_spill] sm:$0xff]  ;;  %v11013_v27 = vpop.f32.mrb[162].mxu0 }
 0x540   : > { %7702 = vtanh.f32 %v4149_v36  ;;  %v4152_v24 = vmul.f32 0.7978846, %v3956_v44  ;;  %v3958_v13 = vadd.f32 %v3762_v3, %v10949_v28  ;;  %v3764_v32 = vmul.f32 0.044715, %v3568_v46  ;;  %v13682_v46 = vld [vmem:[#allocation149_spill] sm:$0xff]  ;;  %v11017_v43 = vpop.f32.mrb[163].mxu1 }
 0x541   : > { %7704 = vtanh.f32 %v4151_v53  ;;  %v4153_v42 = vmul.f32 0.7978846, %v3957_v10  ;;  %v4489_v56 = vadd.f32 1.0, %v13679_v45  ;;  %v13680_v5 = vpack.c.bf16 %v10718_v7, %v10710_v9  ;;  %v11019_v9 = vpop.f32.mrb[163].mxu0  ;;  %v13683_v7 = vld [vmem:[#allocation123_spill] sm:$0xff] }
 0x542   : > { %v13681_v3 = vpack.c.bf16 %v10728_v25, %v10721_v1  ;;  %7706 = vtanh.f32 %v4150_v29  ;;  %v4155_v36 = vmul.f32 0.7978846, %v3959_v47  ;;  %v4154_v44 = vmul.f32 0.7978846, %v3958_v13  ;;  %v13684_v25 = vld [vmem:[#allocation153_spill] sm:$0xff]  ;;  %v13685_v47 = vld [vmem:[#allocation164_spill] sm:$0xff] }
 0x543   : > { %5444 = vmatprep.mubr.bf16.mxu1 %v13680_v5  ;;  %v4681_v62 = vmul.f32 0.5, %v4485_v11  ;;  %7708 = vtanh.f32 %v4152_v24  ;;  %v3960_v53 = vadd.f32 %v3764_v32, %v10980_v38  ;;  %v4685_v10 = vmul.f32 0.5, %v4489_v56  ;;  %v13686_v24 = vld [vmem:[#allocation128_spill] sm:$0xff] }
 0x544   : > { %5676 = vmatprep.mubr.bf16.mxu0 %v13681_v3  ;;  %v4487_v45 = vadd.f32 1.0, %v13682_v46  ;;  %7710 = vtanh.f32 %v4153_v42  ;;  %v4491_v29 = vadd.f32 1.0, %v13684_v25  ;;  %v4494_v11 = vadd.f32 1.0, %v13685_v47  ;;  %v13688_v25 = vld [vmem:[#allocation165_spill] sm:$0xff]  ;;  %v13694_v42 = vld [vmem:[#allocation108_spill] sm:$0xff] }
 0x545   : > { %v11022_v1 = vmul.f32 %v4681_v62, %v13683_v7  ;;  %7712 = vtanh.f32 %v4155_v36  ;;  %v4156_v13 = vmul.f32 0.7978846, %v3960_v53  ;;  %v11027_v5 = vmul.f32 %v4685_v10, %v13686_v24  ;;  %v13687_v62 = vld [vmem:[#allocation124_spill] sm:$0xff]  ;;  %v11036_v36 = vpop.f32.mrb[164].mxu1  ;;  %v13689_v53 = vld [vmem:[#allocation129_spill] sm:$0xff] }
 0x546   : > { %v4683_v32 = vmul.f32 0.5, %v4487_v45  ;;  %7714 = vtanh.f32 %v4154_v44  ;;  %v4687_v56 = vmul.f32 0.5, %v4491_v29  ;;  %v4498_v3 = vadd.f32 1.0, %v10341_v33  ;;  %v13690_v44 = vld [vmem:[#allocation142_spill] sm:$0xff] }
 0x547   : > { %v4690_v46 = vmul.f32 0.5, %v4494_v11  ;;  %7716 = vtanh.f32 %v4156_v13  ;;  %v4496_v47 = vadd.f32 1.0, %v13688_v25  ;;  %v4500_v33 = vadd.f32 1.0, %v10350_v20  ;;  %v13691_v11 = vld [vmem:[#allocation106_spill] sm:$0xff] }
 0x548   : > { %v11033_v7 = vmul.f32 %v4683_v32, %v13687_v62  ;;  %v11039_v10 = vmul.f32 %v4687_v56, %v13689_v53  ;;  %v4694_v45 = vmul.f32 0.5, %v4498_v3  ;;  %v13692_v13 = vld [vmem:[#allocation102_spill] sm:$0xff]  ;;  %v13695_v32 = vld [vmem:[#allocation104_spill] sm:$0xff]  ;;  %v11053_v12 = vadd.f32 %v10732_v51, %v9708_v55 }
 0x549   : > { %v11042_v29 = vmul.f32 %v4690_v46, %v13690_v44  ;;  %v13693_v24 = vpack.c.bf16 %v13691_v11, %v13692_v13  ;;  %v13696_v62 = vpack.c.bf16 %v13694_v42, %v13695_v32  ;;  %v4692_v25 = vmul.f32 0.5, %v4496_v47  ;;  %v13703_v47 = vld [vmem:[#allocation146_spill] sm:$0xff]  ;;  %v13706_v11 = vld [vmem:[#allocation143_spill] sm:$0xff]  ;;  %v13707_v13 = vld [vmem:[#allocation148_spill] sm:$0xff] }
 0x54a   : > { %13697 = vst [vmem:[#allocation138_spill] sm:$0xff] %v11053_v12  ;;  %v11057_v56 = vadd.f32 %v10734_v8, %v9710_v4  ;;  %v11061_v20 = vadd.f32 %v10739_v39, %v9714_v49  ;;  %v11063_v3 = vpop.eup %7702  ;;  %v13701_v46 = vpack.c.bf16 %v10756_v58, %v10749_v63  ;;  %v13702_v42 = vpack.c.bf16 %v10770_v2, %v10759_v22 }
 0x54b   : > { %5445 = vmatmul.mubr.bf16.vlgmr.msra.gmra.mrb[200].mxu1 %v13693_v24  ;;  %5677 = vmatmul.mubr.bf16.vlgmr.msra.gmra.mrb[200].mxu0 %v13696_v62  ;;  %13700 = vst [vmem:[#allocation150_spill] sm:$0xff] %v11063_v3  ;;  %v11074_v8 = vmul.f32 %v4694_v45, %v13703_v47  ;;  %v4696_v53 = vmul.f32 0.5, %v4500_v33  ;;  %v11078_v39 = vadd.f32 %v10741_v16, %v9716_v21  ;;  %v11080_v44 = vpop.eup %7704  ;;  %v7939_v45 = vld [vmem:[#allocation16 + $0x80] sm:$0xff]  }
 0x54c   : > { %13698 = vst [vmem:[#allocation120_spill] sm:$0xff] %v11057_v56  ;;  %13699 = vst [vmem:[#allocation107_spill] sm:$0xff] %v11061_v20  ;;  %5452 = vmatprep.mubr.bf16.mxu1 %v13701_v46  ;;  %5684 = vmatprep.mubr.bf16.mxu0 %v13702_v42  ;;  %v11083_v58 = vmul.f32 %v4692_v25, %v13706_v11  ;;  %v3373_v22 = vmul.f32 %v11053_v12, %v11053_v12  ;;  %v11091_v33 = vpop.eup %7706 }
 0x54d   : > { %13704 = vst [vmem:[#allocation113_spill] sm:$0xff] %v11078_v39  ;;  %13705 = vst [vmem:[#allocation155_spill] sm:$0xff] %v11080_v44  ;;  %v3375_v2 = vmul.f32 %v11057_v56, %v11057_v56  ;;  %v3374_v63 = vmul.f32 %v11061_v20, %v11061_v20  ;;  %7076 = vmatpush1.bf16.msra.mxu1 %v7939_v45  ;;  %v11096_v24 = vmul.f32 %v4696_v53, %v13707_v13  ;;  %v11105_v25 = vpop.eup %7708 }
 0x54e   : > { %v3376_v32 = vmul.f32 %v11078_v39, %v11078_v39  ;;  %v11102_v62 = vadd.f32 %v10751_v54, %v9708_v55  ;;  %7061 = vmatprep.subr.bf16.mxu1 %v13400_v34  ;;  %v3569_v46 = vmul.f32 %v3373_v22, %v11053_v12  ;;  %v11112_v53 = vadd.f32 %v10753_v26, %v9710_v4  ;;  %v11114_v11 = vpop.eup %7710 }
 0x54f   : > { %v3571_v42 = vmul.f32 %v3375_v2, %v11057_v56  ;;  %v3570_v47 = vmul.f32 %v3374_v63, %v11061_v20  ;;  %13710 = vst [vmem:[#allocation125_spill] sm:$0xff] %v11114_v11  ;;  %v11123_v22 = vadd.f32 %v10761_v57, %v9714_v49  ;;  %v11125_v2 = vpop.eup %7712  ;;  %v11136_v57 = vadd.f32 %v10763_v40, %v9716_v21  ;;  %v13716_v40 = vld [vmem:[#allocation160_spill] sm:$0xff] }
 0x550   : > { %13708 = vst [vmem:[#allocation109_spill] sm:$0xff] %v11102_v62  ;;  %13709 = vst [vmem:[#allocation115_spill] sm:$0xff] %v11112_v53  ;;  %v3572_v45 = vmul.f32 %v3376_v32, %v11078_v39  ;;  %v3377_v13 = vmul.f32 %v11102_v62, %v11102_v62  ;;  %v3765_v63 = vmul.f32 0.044715, %v3569_v46  ;;  %v3379_v51 = vmul.f32 %v11112_v53, %v11112_v53  ;;  %v11129_v54 = vpop.eup %7714 }
 0x551   : > { %13711 = vst [vmem:[#allocation130_spill] sm:$0xff] %v11123_v22  ;;  %13712 = vst [vmem:[#allocation127_spill] sm:$0xff] %v11125_v2  ;;  %v3767_v16 = vmul.f32 0.044715, %v3571_v42  ;;  %v3766_v26 = vmul.f32 0.044715, %v3570_v47  ;;  %7077 = vmatpush1.bf16.msra.mxu1 %v7940_v15  ;;  %v3378_v11 = vmul.f32 %v11123_v22, %v11123_v22  ;;  %v11139_v46 = vpop.eup %7716  ;;  %v13714_v42 = vpack.c.bf16 %v10779_v30, %v10776_v60 }
 0x552   : > { %v3768_v32 = vmul.f32 0.044715, %v3572_v45  ;;  %v3573_v44 = vmul.f32 %v3377_v13, %v11102_v62  ;;  %13713 = vst [vmem:[#allocation132_spill] sm:$0xff] %v11136_v57  ;;  %7062 = vmatprep.subr.bf16.mxu1 %v13400_v34  ;;  %v13715_v15 = vpack.c.bf16 %v10804_v59, %v10801_v50  ;;  %v3961_v47 = vadd.f32 %v3765_v63, %v11053_v12 }
 0x553   : > { %5453 = vmatmul.mubr.bf16.gmra.mrb[204].mxu1 %v13714_v42  ;;  %v3963_v45 = vadd.f32 %v3767_v16, %v11057_v56  ;;  %v3962_v13 = vadd.f32 %v3766_v26, %v11061_v20  ;;  %v4493_v2 = vadd.f32 1.0, %v13716_v40  ;;  %v13717_v3 = vpack.c.bf16 %v10839_v23, %v10836_v19  ;;  %v11160_v16 = vpop.f32.mrb[164].mxu0  ;;  %v7941_v19 = vld [vmem:[#allocation16 + $0x90] sm:$0xff]  }
 0x554   : > { %5685 = vmatmul.mubr.bf16.gmra.mrb[204].mxu0 %v13715_v15  ;;  %v13718_v30 = vpack.c.bf16 %v10856_v41, %v10845_v14  ;;  %v3964_v60 = vadd.f32 %v3768_v32, %v11078_v39  ;;  %v3769_v59 = vmul.f32 0.044715, %v3573_v44  ;;  %v3575_v50 = vmul.f32 %v3379_v51, %v11112_v53 }
 0x555   : > { %5460 = vmatprep.mubr.bf16.mxu1 %v13717_v3  ;;  %v3574_v63 = vmul.f32 %v3378_v11, %v11123_v22  ;;  %v4157_v26 = vmul.f32 0.7978846, %v3961_v47  ;;  %v4159_v42 = vmul.f32 0.7978846, %v3963_v45  ;;  %v4158_v15 = vmul.f32 0.7978846, %v3962_v13  ;;  %7078 = vmatpush1.bf16.msra.mxu1 %v7941_v19 }
 0x556   : > { %5692 = vmatprep.mubr.bf16.mxu0 %v13718_v30  ;;  %v3380_v23 = vmul.f32 %v11136_v57, %v11136_v57  ;;  %v4160_v3 = vmul.f32 0.7978846, %v3964_v60  ;;  %v3965_v14 = vadd.f32 %v3769_v59, %v11102_v62  ;;  %v3771_v41 = vmul.f32 0.044715, %v3575_v50  ;;  %7063 = vmatprep.subr.bf16.mxu1 %v13400_v34  ;;  %v11168_v47 = vpop.f32.mrb[165].mxu1  ;;  %v11170_v45 = vpop.f32.mrb[165].mxu0 }
 0x557   : > { %v3770_v32 = vmul.f32 0.044715, %v3574_v63  ;;  %7718 = vtanh.f32 %v4157_v26  ;;  %v4497_v44 = vadd.f32 1.0, %v10330_v31  ;;  %v4689_v11 = vmul.f32 0.5, %v4493_v2  ;;  %v11174_v60 = vpop.f32.mrb[166].mxu1  ;;  %v13719_v63 = vld [vmem:[#allocation137_spill] sm:$0xff] }
 0x558   : > { %v3576_v51 = vmul.f32 %v3380_v23, %v11136_v57  ;;  %7720 = vtanh.f32 %v4159_v42  ;;  %v4161_v13 = vmul.f32 0.7978846, %v3965_v14  ;;  %v3967_v40 = vadd.f32 %v3771_v41, %v11112_v53  ;;  %v7942_v31 = vld [vmem:[#allocation16 + $0x98] sm:$0xff]   ;;  %v11180_v14 = vpop.f32.mrb[166].mxu0  ;;  %v13728_v53 = vld [vmem:[#allocation73_spill] sm:$0xff] }
 0x559   : > { %v3966_v30 = vadd.f32 %v3770_v32, %v11123_v22  ;;  %7722 = vtanh.f32 %v4158_v15  ;;  %v4693_v50 = vmul.f32 0.5, %v4497_v44  ;;  %v11177_v26 = vmul.f32 %v4689_v11, %v13719_v63  ;;  %7079 = vmatpush1.bf16.msra.mxu1 %v7942_v31  ;;  %v13720_v19 = vld [vmem:[#allocation163_spill] sm:$0xff]  ;;  %v13722_v15 = vld [vmem:[#allocation121_spill] sm:$0xff]  ;;  %v13723_v32 = vld [vmem:[#allocation96_spill] sm:$0xff]  ;;  %v11194_v63 = vpop.f32.mrb[167].mxu1  ;;  %v11196_v31 = vpop.f32.mrb[167].mxu0 }
 0x55a   : > { %v3772_v59 = vmul.f32 0.044715, %v3576_v51  ;;  %7724 = vtanh.f32 %v4160_v3  ;;  %v4163_v2 = vmul.f32 0.7978846, %v3967_v40  ;;  %v4495_v42 = vadd.f32 1.0, %v13720_v19  ;;  %7064 = vmatprep.subr.bf16.mxu1 %v13400_v34  ;;  %v13725_v3 = vld [vmem:[#allocation144_spill] sm:$0xff] }
 0x55b   : > { %v4162_v23 = vmul.f32 0.7978846, %v3966_v30  ;;  %v13721_v41 = vpack.c.bf16 %v10868_v52, %v10859_v0  ;;  %v13724_v51 = vpack.c.bf16 %v13722_v15, %v13723_v32  ;;  %7726 = vtanh.f32 %v4161_v13  ;;  %v13726_v40 = vld [vmem:[#allocation167_spill] sm:$0xff]  ;;  %v13730_v52 = vld [vmem:[#allocation97_spill] sm:$0xff] }
 0x55c   : > { %v3968_v44 = vadd.f32 %v3772_v59, %v11136_v57  ;;  %v11191_v11 = vmul.f32 %v4693_v50, %v13725_v3  ;;  %v4499_v30 = vadd.f32 1.0, %v13726_v40  ;;  %v13727_v19 = vld [vmem:[#allocation75_spill] sm:$0xff]  ;;  %7728 = vtanh.f32 %v4163_v2  ;;  %v13733_v59 = vld [vmem:[#allocation177_spill] sm:$0xff]  ;;  %v13734_v50 = vld [vmem:[#allocation182_spill] sm:$0xff]  ;;  %v11206_v3 = vpop.f32.mrb[168].mxu1 }
 0x55d   : > { %5461 = vmatmul.mubr.bf16.gmra.mrb[208].mxu1 %v13721_v41  ;;  %5693 = vmatmul.mubr.bf16.gmra.mrb[208].mxu0 %v13724_v51  ;;  %v13729_v0 = vpack.c.bf16 %v13727_v19, %v13728_v53  ;;  %v13731_v41 = vld [vmem:[#allocation85_spill] sm:$0xff]  ;;  %v4691_v13 = vmul.f32 0.5, %v4495_v42  ;;  %v4502_v32 = vadd.f32 1.0, %v13733_v59  ;;  %v4506_v51 = vadd.f32 1.0, %v13734_v50  ;;  %v7943_v53 = vld [vmem:[#allocation16 + $0xa0] sm:$0xff]   ;;  %v13736_v42 = vld [vmem:[#allocation178_spill] sm:$0xff] }
 0x55e   : > { %v13732_v15 = vpack.c.bf16 %v13730_v52, %v13731_v41  ;;  %7730 = vtanh.f32 %v4162_v23  ;;  %v4164_v40 = vmul.f32 0.7978846, %v3968_v44  ;;  %v4695_v62 = vmul.f32 0.5, %v4499_v30  ;;  %7080 = vmatpush1.bf16.msra.mxu1 %v7943_v53  ;;  %v13735_v19 = vld [vmem:[#allocation140_spill] sm:$0xff]  ;;  %v13739_v50 = vld [vmem:[#allocation90_spill] sm:$0xff] }
 0x55f   : > { %5468 = vmatprep.mubr.bf16.mxu1 %v13729_v0  ;;  %v11211_v0 = vmul.f32 %v4691_v13, %v13735_v19  ;;  %v4698_v52 = vmul.f32 0.5, %v4502_v32  ;;  %v4702_v2 = vmul.f32 0.5, %v4506_v51  ;;  %v4504_v41 = vadd.f32 1.0, %v13736_v42  ;;  %7065 = vmatprep.subr.bf16.mxu1 %v13400_v34  ;;  %v13738_v23 = vld [vmem:[#allocation184_spill] sm:$0xff]  ;;  %v13742_v13 = vld [vmem:[#allocation161_spill] sm:$0xff] }
 0x560   : > { %5700 = vmatprep.mubr.bf16.mxu0 %v13732_v15  ;;  %7732 = vtanh.f32 %v4164_v40  ;;  %v13737_v15 = vld [vmem:[#allocation145_spill] sm:$0xff]  ;;  %v4508_v44 = vadd.f32 1.0, %v13738_v23  ;;  %v11221_v30 = vadd.f32 %v13739_v50, %v9708_v55  ;;  %v13741_v53 = vld [vmem:[#allocation156_spill] sm:$0xff]  ;;  %v13758_v57 = vpack.c.bf16 %v11074_v8, %v11042_v29 }
 0x561   : > { %v11216_v59 = vmul.f32 %v4695_v62, %v13737_v15  ;;  %v11224_v56 = vmul.f32 %v4698_v52, %v13741_v53  ;;  %v11227_v32 = vmul.f32 %v4702_v2, %v13742_v13  ;;  %v4700_v51 = vmul.f32 0.5, %v4504_v41  ;;  %v13743_v19 = vld [vmem:[#allocation89_spill] sm:$0xff]  ;;  %v11233_v40 = vpop.eup %7718  ;;  %v13746_v52 = vld [vmem:[#allocation122_spill] sm:$0xff] }
 0x562   : > { %13740 = vst [vmem:[#allocation147_spill] sm:$0xff] %v11221_v30  ;;  %v11231_v42 = vadd.f32 %v13743_v19, %v9710_v4  ;;  %13745 = vst [vmem:[#allocation149_spill] sm:$0xff] %v11233_v40  ;;  %v4704_v15 = vmul.f32 0.5, %v4508_v44  ;;  %v3381_v23 = vmul.f32 %v11221_v30, %v11221_v30  ;;  %v11241_v50 = vadd.f32 %v13746_v52, %v9714_v49  ;;  %v7944_v2 = vld [vmem:[#allocation16 + $0xa8] sm:$0xff]   ;;  %v11243_v41 = vpop.eup %7720 }
 0x563   : > { %v5067_v62 = vpack.c.bf16 %v11216_v59, %v11211_v0  ;;  %7081 = vmatpush1.bf16.msra.mxu1 %v7944_v2  ;;  %13748 = vst [vmem:[#allocation153_spill] sm:$0xff] %v11243_v41  ;;  %v5070_v53 = vpack.c.bf16 %v11227_v32, %v11224_v56  ;;  %v13749_v13 = vld [vmem:[#allocation157_spill] sm:$0xff]  ;;  %v13750_v59 = vld [vmem:[#allocation118_spill] sm:$0xff]  ;;  %v11255_v52 = vpop.eup %7722  ;;  %v13753_v2 = vpack.c.bf16 %v11027_v5, %v11022_v1 }
 0x564   : > { %13744 = vst [vmem:[#allocation151_spill] sm:$0xff] %v11231_v42  ;;  %13747 = vst [vmem:[#allocation123_spill] sm:$0xff] %v11241_v50  ;;  %v4896_v19 = vmul.f32 %v4700_v51, %v13749_v13  ;;  %v3383_v0 = vmul.f32 %v11231_v42, %v11231_v42  ;;  %v11252_v44 = vadd.f32 %v13750_v59, %v9716_v21  ;;  %7066 = vmatprep.subr.bf16.mxu1 %v13400_v34  ;;  %v13755_v32 = vld [vmem:[#allocation162_spill] sm:$0xff]  ;;  %v13756_v41 = vld [vmem:[#allocation173_spill] sm:$0xff]  ;;  %v11268_v40 = vpop.eup %7724 }
 0x565   : > { %13752 = vst [vmem:[#allocation128_spill] sm:$0xff] %v11255_v52  ;;  %5469 = vmatmul.mubr.bf16.gmra.mrb[212].mxu1 %v13753_v2  ;;  %v13754_v56 = vpack.c.bf16 %v11039_v10, %v11033_v7  ;;  %v4900_v51 = vmul.f32 %v4704_v15, %v13755_v32  ;;  %v3577_v13 = vmul.f32 %v3381_v23, %v11221_v30  ;;  %v4501_v12 = vadd.f32 1.0, %v13756_v41  ;;  %v13760_v10 = vld [vmem:[#allocation91_spill] sm:$0xff]  ;;  %v11284_v2 = vpop.eup %7726 }
 0x566   : > { %13751 = vst [vmem:[#allocation164_spill] sm:$0xff] %v11252_v44  ;;  %v3382_v59 = vmul.f32 %v11241_v50, %v11241_v50  ;;  %13757 = vst [vmem:[#allocation124_spill] sm:$0xff] %v11268_v40  ;;  %5476 = vmatprep.mubr.bf16.mxu1 %v13758_v57  ;;  %v13759_v1 = vpack.c.bf16 %v11096_v24, %v11083_v58  ;;  %v3579_v5 = vmul.f32 %v3383_v0, %v11231_v42  ;;  %v13762_v23 = vld [vmem:[#allocation179_spill] sm:$0xff]  ;;  %v13764_v58 = vld [vmem:[#allocation126_spill] sm:$0xff]  ;;  %v11291_v0 = vpop.eup %7728 }
 0x567   : > { %5701 = vmatmul.mubr.bf16.gmra.mrb[212].mxu0 %v13754_v56  ;;  %v3384_v7 = vmul.f32 %v11252_v44, %v11252_v44  ;;  %v11281_v15 = vadd.f32 %v13760_v10, %v9708_v55  ;;  %v4505_v41 = vadd.f32 1.0, %v13762_v23  ;;  %13763 = vst [vmem:[#allocation129_spill] sm:$0xff] %v11284_v2  ;;  %v5072_v56 = vpack.c.bf16 %v4900_v51, %v4896_v19  ;;  %v7945_v57 = vld [vmem:[#allocation16 + $0xb0] sm:$0xff]   ;;  %v13767_v23 = vld [vmem:[#allocation112_spill] sm:$0xff] }
 0x568   : > { %5708 = vmatprep.mubr.bf16.mxu0 %v13759_v1  ;;  %v3773_v29 = vmul.f32 0.044715, %v3577_v13  ;;  %v3578_v8 = vmul.f32 %v3382_v59, %v11241_v50  ;;  %v11289_v24 = vadd.f32 %v13764_v58, %v9710_v4  ;;  %7082 = vmatpush1.bf16.msra.mxu1 %v7945_v57  ;;  %13766 = vst [vmem:[#allocation106_spill] sm:$0xff] %v11291_v0  ;;  %v3775_v32 = vmul.f32 0.044715, %v3579_v5  ;;  %v11301_v51 = vpop.eup %7730  ;;  %v13770_v5 = vld [vmem:[#allocation119_spill] sm:$0xff] }
 0x569   : > { %13761 = vst [vmem:[#allocation165_spill] sm:$0xff] %v11281_v15  ;;  %v3580_v1 = vmul.f32 %v3384_v7, %v11252_v44  ;;  %v3385_v10 = vmul.f32 %v11281_v15, %v11281_v15  ;;  %v11298_v19 = vadd.f32 %v13767_v23, %v9714_v49  ;;  %7067 = vmatprep.subr.bf16.mxu1 %v13400_v34  ;;  %13769 = vst [vmem:[#allocation108_spill] sm:$0xff] %v11301_v51 }
 0x56a   : > { %13765 = vst [vmem:[#allocation142_spill] sm:$0xff] %v11289_v24  ;;  %v3969_v13 = vadd.f32 %v3773_v29, %v11221_v30  ;;  %v3774_v59 = vmul.f32 0.044715, %v3578_v8  ;;  %v3387_v58 = vmul.f32 %v11289_v24, %v11289_v24  ;;  %v11308_v7 = vadd.f32 %v13770_v5, %v9716_v21  ;;  %v11314_v39 = vpop.eup %7732  ;;  %v7946_v5 = vld [vmem:[#allocation16 + $0xb8] sm:$0xff]  }
 0x56b   : > { %13768 = vst [vmem:[#allocation102_spill] sm:$0xff] %v11298_v19  ;;  %v3971_v57 = vadd.f32 %v3775_v32, %v11231_v42  ;;  %v3776_v0 = vmul.f32 0.044715, %v3580_v1  ;;  %v3581_v23 = vmul.f32 %v3385_v10, %v11281_v15  ;;  %v3386_v2 = vmul.f32 %v11298_v19, %v11298_v19  ;;  %13772 = vst [vmem:[#allocation146_spill] sm:$0xff] %v11314_v39 }
 0x56c   : > { %13771 = vst [vmem:[#allocation104_spill] sm:$0xff] %v11308_v7  ;;  %v4165_v22 = vmul.f32 0.7978846, %v3969_v13  ;;  %v3970_v29 = vadd.f32 %v3774_v59, %v11241_v50  ;;  %v3583_v8 = vmul.f32 %v3387_v58, %v11289_v24  ;;  %v3388_v30 = vmul.f32 %v11308_v7, %v11308_v7  ;;  %7083 = vmatpush1.bf16.msra.mxu1 %v7946_v5 }
 0x56d   : > { %v4167_v20 = vmul.f32 0.7978846, %v3971_v57  ;;  %v3972_v32 = vadd.f32 %v3776_v0, %v11252_v44  ;;  %v3777_v1 = vmul.f32 0.044715, %v3581_v23  ;;  %v3582_v10 = vmul.f32 %v3386_v2, %v11298_v19  ;;  %7068 = vmatprep.subr.bf16.mxu1 %v13400_v34  ;;  %v11328_v2 = vpop.f32.mrb[168].mxu0 }
 0x56e   : > { %v13773_v13 = vpack.c.bf16 %v11191_v11, %v11177_v26  ;;  %7734 = vtanh.f32 %v4165_v22  ;;  %v4166_v59 = vmul.f32 0.7978846, %v3970_v29  ;;  %v3779_v58 = vmul.f32 0.044715, %v3583_v8  ;;  %v11333_v22 = vpop.f32.mrb[169].mxu0  ;;  %v7947_v29 = vld [vmem:[#allocation16 + $0xc0] sm:$0xff]  }
 0x56f   : > { %5709 = vmatmul.mubr.bf16.gmra.mrb[216].mxu0 %v5067_v62  ;;  %v3584_v42 = vmul.f32 %v3388_v30, %v11308_v7  ;;  %7736 = vtanh.f32 %v4167_v20  ;;  %v4168_v57 = vmul.f32 0.7978846, %v3972_v32  ;;  %v3973_v0 = vadd.f32 %v3777_v1, %v11281_v15  ;;  %v11331_v62 = vpop.f32.mrb[169].mxu1  ;;  %v13775_v1 = vld [vmem:[#allocation176_spill] sm:$0xff] }
 0x570   : > { %5477 = vmatmul.mubr.bf16.gmra.mrb[216].mxu1 %v13773_v13  ;;  %5716 = vmatprep.mubr.bf16.mxu0 %v5072_v56  ;;  %v3778_v23 = vmul.f32 0.044715, %v3582_v10  ;;  %7738 = vtanh.f32 %v4166_v59  ;;  %v3975_v5 = vadd.f32 %v3779_v58, %v11289_v24  ;;  %v4697_v11 = vmul.f32 0.5, %v4501_v12  ;;  %v11336_v56 = vpop.f32.mrb[170].mxu1  ;;  %v13776_v59 = vld [vmem:[#allocation158_spill] sm:$0xff]  ;;  %v7948_v15 = vld [vmem:[#allocation16 + $0xc8] sm:$0xff]  }
 0x571   : > { %5484 = vmatprep.mubr.bf16.mxu1 %v5070_v53  ;;  %v3780_v26 = vmul.f32 0.044715, %v3584_v42  ;;  %7084 = vmatpush1.bf16.msra.mxu1 %v7947_v29  ;;  %7740 = vtanh.f32 %v4168_v57  ;;  %v4169_v30 = vmul.f32 0.7978846, %v3973_v0  ;;  %v4701_v53 = vmul.f32 0.5, %v4505_v41  ;;  %v13774_v42 = vld [vmem:[#allocation152_spill] sm:$0xff] }
 0x572   : > { %v3974_v20 = vadd.f32 %v3778_v23, %v11298_v19  ;;  %7069 = vmatprep.subr.bf16.mxu1 %v13400_v34  ;;  %v4171_v8 = vmul.f32 0.7978846, %v3975_v5  ;;  %v4893_v12 = vmul.f32 %v4697_v11, %v13774_v42  ;;  %v4503_v10 = vadd.f32 1.0, %v13775_v1  ;;  %v13777_v57 = vld [vmem:[#allocation181_spill] sm:$0xff]  ;;  %v13781_v42 = vld [vmem:[#allocation194_spill] sm:$0xff] }
 0x573   : > { %v3976_v32 = vadd.f32 %v3780_v26, %v11308_v7  ;;  %7742 = vtanh.f32 %v4169_v30  ;;  %v4897_v58 = vmul.f32 %v4701_v53, %v13776_v59  ;;  %v4507_v0 = vadd.f32 1.0, %v13777_v57  ;;  %v13778_v29 = vld [vmem:[#allocation193_spill] sm:$0xff]  ;;  %v13779_v7 = vld [vmem:[#allocation198_spill] sm:$0xff] }
 0x574   : > { %v4170_v13 = vmul.f32 0.7978846, %v3974_v20  ;;  %7744 = vtanh.f32 %v4171_v8  ;;  %v4699_v41 = vmul.f32 0.5, %v4503_v10  ;;  %v4510_v24 = vadd.f32 1.0, %v13778_v29  ;;  %v13780_v30 = vld [vmem:[#allocation154_spill] sm:$0xff]  ;;  %v11349_v8 = vpop.f32.mrb[170].mxu0 }
 0x575   : > { %v4172_v23 = vmul.f32 0.7978846, %v3976_v32  ;;  %7085 = vmatpush1.bf16.msra.mxu1 %v7948_v15  ;;  %v5069_v5 = vpack.c.bf16 %v4897_v58, %v4893_v12  ;;  %v4703_v26 = vmul.f32 0.5, %v4507_v0  ;;  %v4514_v11 = vadd.f32 1.0, %v13779_v7  ;;  %v13782_v32 = vld [vmem:[#allocation159_spill] sm:$0xff]  ;;  %v13783_v15 = vld [vmem:[#allocation200_spill] sm:$0xff] }
 0x576   : > { %7746 = vtanh.f32 %v4170_v13  ;;  %7070 = vmatprep.subr.bf16.mxu1 %v13400_v34  ;;  %v4895_v20 = vmul.f32 %v4699_v41, %v13780_v30  ;;  %v4706_v53 = vmul.f32 0.5, %v4510_v24  ;;  %v4512_v1 = vadd.f32 1.0, %v13781_v42  ;;  %v13784_v12 = vld [vmem:[#allocation63_spill] sm:$0xff]  ;;  %v11357_v7 = vpop.f32.mrb[171].mxu1  ;;  %v11359_v57 = vpop.f32.mrb[171].mxu0  ;;  %v13789_v24 = vld [vmem:[#allocation169_spill] sm:$0xff] }
 0x577   : > { %7748 = vtanh.f32 %v4172_v23  ;;  %v4899_v10 = vmul.f32 %v4703_v26, %v13782_v32  ;;  %v4710_v59 = vmul.f32 0.5, %v4514_v11  ;;  %v4516_v13 = vadd.f32 1.0, %v13783_v15  ;;  %13786 = vst [vmem:[#allocation148_spill] sm:$0xff] %v11357_v7  ;;  %13787 = vst [vmem:[#allocation160_spill] sm:$0xff] %v11359_v57  ;;  %v13790_v29 = vld [vmem:[#allocation94_spill] sm:$0xff]  ;;  %v11372_v30 = vpop.f32.mrb[172].mxu1 }
 0x578   : > { %5485 = vmatmul.mubr.bf16.gmra.mrb[220].mxu1 %v5069_v5  ;;  %v11355_v58 = vadd.f32 %v13784_v12, %v9708_v55  ;;  %v11361_v0 = vpop.eup %7734  ;;  %v4902_v23 = vmul.f32 %v4706_v53, %v13789_v24  ;;  %v4708_v41 = vmul.f32 0.5, %v4512_v1  ;;  %v11366_v5 = vadd.f32 %v13790_v29, %v9710_v4  ;;  %v13792_v26 = vld [vmem:[#allocation98_spill] sm:$0xff]  ;;  %13794 = vst [vmem:[#allocation96_spill] sm:$0xff] %v11372_v30  ;;  %v13805_v30 = vld [vmem:[#allocation99_spill] sm:$0xff] }
 0x579   : > { %13788 = vst [vmem:[#allocation137_spill] sm:$0xff] %v11361_v0  ;;  %v11370_v11 = vadd.f32 %v13792_v26, %v9714_v49  ;;  %v7949_v42 = vld [vmem:[#allocation16 + $0xd0] sm:$0xff]   ;;  %v11374_v32 = vpop.eup %7736  ;;  %v5071_v15 = vpack.c.bf16 %v4899_v10, %v4895_v20  ;;  %v4712_v44 = vmul.f32 0.5, %v4516_v13  ;;  %v13799_v20 = vld [vmem:[#allocation95_spill] sm:$0xff] }
 0x57a   : > { %13785 = vst [vmem:[#allocation143_spill] sm:$0xff] %v11355_v58  ;;  %13791 = vst [vmem:[#allocation163_spill] sm:$0xff] %v11366_v5  ;;  %7086 = vmatpush1.bf16.msra.mxu1 %v7949_v42  ;;  %v13796_v12 = vld [vmem:[#allocation174_spill] sm:$0xff]  ;;  %v3389_v53 = vmul.f32 %v11355_v58, %v11355_v58  ;;  %v11380_v1 = vpop.eup %7738  ;;  %v3391_v26 = vmul.f32 %v11366_v5, %v11366_v5  ;;  %v11389_v10 = vadd.f32 %v13799_v20, %v9716_v21 }
 0x57b   : > { %13793 = vst [vmem:[#allocation121_spill] sm:$0xff] %v11370_v11  ;;  %13795 = vst [vmem:[#allocation144_spill] sm:$0xff] %v11374_v32  ;;  %v4906_v0 = vmul.f32 %v4710_v59, %v13796_v12  ;;  %7071 = vmatprep.subr.bf16.mxu1 %v13400_v34  ;;  %v13798_v24 = vld [vmem:[#allocation170_spill] sm:$0xff]  ;;  %v3390_v42 = vmul.f32 %v11370_v11, %v11370_v11  ;;  %v11391_v59 = vpop.eup %7740  ;;  %5717 = vmatmul.mubr.bf16.gmra.mrb[220].mxu0 %v5071_v15  ;;  %v13802_v12 = vld [vmem:[#allocation175_spill] sm:$0xff] }
 0x57c   : > { %13797 = vst [vmem:[#allocation167_spill] sm:$0xff] %v11380_v1  ;;  %v4904_v29 = vmul.f32 %v4708_v41, %v13798_v24  ;;  %13800 = vst [vmem:[#allocation75_spill] sm:$0xff] %v11389_v10  ;;  %v4908_v32 = vmul.f32 %v4712_v44, %v13802_v12  ;;  %v3585_v19 = vmul.f32 %v3389_v53, %v11355_v58  ;;  %v13803_v41 = vld [vmem:[#allocation83_spill] sm:$0xff] }
 0x57d   : > { %13801 = vst [vmem:[#allocation73_spill] sm:$0xff] %v11391_v59  ;;  %v5074_v13 = vpack.c.bf16 %v4906_v0, %v4902_v23  ;;  %v11397_v24 = vadd.f32 %v13803_v41, %v9708_v55  ;;  %v3587_v50 = vmul.f32 %v3391_v26, %v11366_v5  ;;  %v3586_v1 = vmul.f32 %v3390_v42, %v11370_v11  ;;  %v7950_v0 = vld [vmem:[#allocation16 + $0xd8] sm:$0xff]   ;;  %v11407_v44 = vpop.eup %7742 }
 0x57e   : > { %v3392_v20 = vmul.f32 %v11389_v10, %v11389_v10  ;;  %v11405_v59 = vadd.f32 %v13805_v30, %v9710_v4  ;;  %7087 = vmatpush1.bf16.msra.mxu1 %v7950_v0  ;;  %13807 = vst [vmem:[#allocation177_spill] sm:$0xff] %v11407_v44  ;;  %v5076_v23 = vpack.c.bf16 %v4908_v32, %v4904_v29  ;;  %v3781_v15 = vmul.f32 0.044715, %v3585_v19  ;;  %v13808_v26 = vld [vmem:[#allocation114_spill] sm:$0xff]  ;;  %v11416_v12 = vpop.eup %7744  ;;  %v13812_v44 = vld [vmem:[#allocation92_spill] sm:$0xff] }
 0x57f   : > { %13804 = vst [vmem:[#allocation97_spill] sm:$0xff] %v11397_v24  ;;  %5492 = vmatprep.mubr.bf16.mxu1 %v5074_v13  ;;  %v3393_v53 = vmul.f32 %v11397_v24, %v11397_v24  ;;  %v11413_v42 = vadd.f32 %v13808_v26, %v9714_v49  ;;  %7072 = vmatprep.subr.bf16.mxu1 %v13400_v34  ;;  %13810 = vst [vmem:[#allocation140_spill] sm:$0xff] %v11416_v12  ;;  %v3783_v30 = vmul.f32 0.044715, %v3587_v50 }
 0x580   : > { %13806 = vst [vmem:[#allocation85_spill] sm:$0xff] %v11405_v59  ;;  %v3782_v41 = vmul.f32 0.044715, %v3586_v1  ;;  %v3588_v0 = vmul.f32 %v3392_v20, %v11389_v10  ;;  %v3395_v13 = vmul.f32 %v11405_v59, %v11405_v59  ;;  %v11421_v32 = vpop.eup %7746  ;;  %5724 = vmatprep.mubr.bf16.mxu0 %v5076_v23  ;;  %v3977_v19 = vadd.f32 %v3781_v15, %v11355_v58 }
 0x581   : > { %13809 = vst [vmem:[#allocation182_spill] sm:$0xff] %v11413_v42  ;;  %13811 = vst [vmem:[#allocation178_spill] sm:$0xff] %v11421_v32  ;;  %v3589_v29 = vmul.f32 %v3393_v53, %v11397_v24  ;;  %v3394_v26 = vmul.f32 %v11413_v42, %v11413_v42  ;;  %v11429_v12 = vadd.f32 %v13812_v44, %v9716_v21  ;;  %v11431_v50 = vpop.eup %7748  ;;  %v7951_v32 = vld [vmem:[#allocation16 + $0xe0] sm:$0xff]  }
 0x582   : > { %13814 = vst [vmem:[#allocation184_spill] sm:$0xff] %v11431_v50  ;;  %v3979_v1 = vadd.f32 %v3783_v30, %v11366_v5  ;;  %v3978_v20 = vadd.f32 %v3782_v41, %v11370_v11  ;;  %v3784_v39 = vmul.f32 0.044715, %v3588_v0  ;;  %v3591_v23 = vmul.f32 %v3395_v13, %v11405_v59  ;;  %7088 = vmatpush1.bf16.msra.mxu1 %v7951_v32  ;;  %v7952_v11 = vld [vmem:[#allocation16 + $0xe8] sm:$0xff]  }
 0x583   : > { %13813 = vst [vmem:[#allocation145_spill] sm:$0xff] %v11429_v12  ;;  %v4173_v15 = vmul.f32 0.7978846, %v3977_v19  ;;  %v3785_v53 = vmul.f32 0.044715, %v3589_v29  ;;  %v3590_v58 = vmul.f32 %v3394_v26, %v11413_v42  ;;  %v3396_v40 = vmul.f32 %v11429_v12, %v11429_v12  ;;  %7073 = vmatprep.subr.bf16.mxu1 %v13400_v34  ;;  %v13815_v29 = vld [vmem:[#allocation189_spill] sm:$0xff] }
 0x584   : > { %v4175_v44 = vmul.f32 0.7978846, %v3979_v1  ;;  %v4174_v50 = vmul.f32 0.7978846, %v3978_v20  ;;  %v3980_v30 = vadd.f32 %v3784_v39, %v11389_v10  ;;  %v3787_v5 = vmul.f32 0.044715, %v3591_v23 }
 0x585   : > { %7750 = vtanh.f32 %v4173_v15  ;;  %v3981_v41 = vadd.f32 %v3785_v53, %v11397_v24  ;;  %v3786_v0 = vmul.f32 0.044715, %v3590_v58  ;;  %v3592_v13 = vmul.f32 %v3396_v40, %v11429_v12  ;;  %v13816_v58 = vld [vmem:[#allocation195_spill] sm:$0xff]  ;;  %v13830_v10 = vld [vmem:[#allocation172_spill] sm:$0xff] }
 0x586   : > { %7752 = vtanh.f32 %v4175_v44  ;;  %v4176_v32 = vmul.f32 0.7978846, %v3980_v30  ;;  %v3983_v19 = vadd.f32 %v3787_v5, %v11405_v59  ;;  %v4509_v26 = vadd.f32 1.0, %v13815_v29  ;;  %7089 = vmatpush1.bf16.msra.mxu1 %v7952_v11  ;;  %v13817_v44 = vld [vmem:[#allocation192_spill] sm:$0xff]  ;;  %v13819_v29 = vld [vmem:[#allocation197_spill] sm:$0xff] }
 0x587   : > { %7754 = vtanh.f32 %v4174_v50  ;;  %v4177_v1 = vmul.f32 0.7978846, %v3981_v41  ;;  %v3982_v20 = vadd.f32 %v3786_v0, %v11413_v42  ;;  %v3788_v39 = vmul.f32 0.044715, %v3592_v13  ;;  %7074 = vmatprep.subr.bf16.mxu1 %v13400_v34  ;;  %v13818_v50 = vld [vmem:[#allocation166_spill] sm:$0xff]  ;;  %v11452_v13 = vpop.f32.mrb[172].mxu0 }
 0x588   : > { %7756 = vtanh.f32 %v4176_v32  ;;  %v4179_v23 = vmul.f32 0.7978846, %v3983_v19  ;;  %v4513_v15 = vadd.f32 1.0, %v13816_v58  ;;  %v4705_v40 = vmul.f32 0.5, %v4509_v26  ;;  %13820 = vst [vmem:[#allocation90_spill] sm:$0xff] %v11452_v13  ;;  %v7953_v59 = vld [vmem:[#allocation16 + $0xf0] sm:$0xff]  }
 0x589   : > { %7758 = vtanh.f32 %v4177_v1  ;;  %v4178_v53 = vmul.f32 0.7978846, %v3982_v20  ;;  %v3984_v5 = vadd.f32 %v3788_v39, %v11429_v12  ;;  %v4511_v30 = vadd.f32 1.0, %v13817_v44  ;;  %v13821_v26 = vld [vmem:[#allocation208_spill] sm:$0xff]  ;;  %v11455_v20 = vpop.f32.mrb[173].mxu1  ;;  %v11457_v39 = vpop.f32.mrb[173].mxu0 }
 0x58a   : > { %7760 = vtanh.f32 %v4179_v23  ;;  %v4709_v11 = vmul.f32 0.5, %v4513_v15  ;;  %v4901_v41 = vmul.f32 %v4705_v40, %v13818_v50  ;;  %v4515_v0 = vadd.f32 1.0, %v13819_v29  ;;  %7090 = vmatpush1.bf16.msra.mxu1 %v7953_v59  ;;  %13822 = vst [vmem:[#allocation156_spill] sm:$0xff] %v11455_v20  ;;  %13823 = vst [vmem:[#allocation161_spill] sm:$0xff] %v11457_v39  ;;  %v13824_v23 = vld [vmem:[#allocation171_spill] sm:$0xff]  ;;  %v13825_v40 = vld [vmem:[#allocation213_spill] sm:$0xff] }
 0x58b   : > { %7762 = vtanh.f32 %v4178_v53  ;;  %v4180_v32 = vmul.f32 0.7978846, %v3984_v5  ;;  %v4707_v19 = vmul.f32 0.5, %v4511_v30  ;;  %v4518_v1 = vadd.f32 1.0, %v13821_v26  ;;  %7075 = vmatprep.subr.bf16.mxu1 %v13400_v34  ;;  %v13826_v50 = vld [vmem:[#allocation210_spill] sm:$0xff]  ;;  %v11463_v24 = vpop.f32.mrb[174].mxu1 }
 0x58c   : > { %v4905_v58 = vmul.f32 %v4709_v11, %v13824_v23  ;;  %v4711_v15 = vmul.f32 0.5, %v4515_v0  ;;  %v4522_v44 = vadd.f32 1.0, %v13825_v40  ;;  %v4520_v29 = vadd.f32 1.0, %v13826_v50  ;;  %13827 = vst [vmem:[#allocation89_spill] sm:$0xff] %v11463_v24  ;;  %v13828_v59 = vld [vmem:[#allocation168_spill] sm:$0xff]  ;;  %v13829_v30 = vld [vmem:[#allocation215_spill] sm:$0xff] }
 0x58d   : > { %7764 = vtanh.f32 %v4180_v32  ;;  %v4903_v53 = vmul.f32 %v4707_v19, %v13828_v59  ;;  %v4714_v5 = vmul.f32 0.5, %v4518_v1  ;;  %v4524_v26 = vadd.f32 1.0, %v13829_v30  ;;  %v7954_v20 = vld [vmem:[#allocation16 + $0xf8] sm:$0xff]   ;;  %v13832_v0 = vld [vmem:[#allocation185_spill] sm:$0xff] }
 0x58e   : > { %v5073_v12 = vpack.c.bf16 %v4905_v58, %v4901_v41  ;;  %v4907_v42 = vmul.f32 %v4711_v15, %v13830_v10  ;;  %v4718_v39 = vmul.f32 0.5, %v4522_v44  ;;  %v4716_v34 = vmul.f32 0.5, %v4520_v29  ;;  %7091 = vmatpush1.bf16.msra.mxu1 %v7954_v20  ;;  %v13833_v50 = vld [vmem:[#allocation135_spill] sm:$0xff]  ;;  %v13834_v19 = vld [vmem:[#allocation141_spill] sm:$0xff]  ;;  %v13836_v58 = vld [vmem:[#allocation190_spill] sm:$0xff] }
 0x58f   : > { %v11468_v11 = vpop.eup %7750  ;;  %v4910_v23 = vmul.f32 %v4714_v5, %v13832_v0  ;;  %v4720_v40 = vmul.f32 0.5, %v4524_v26  ;;  %v11473_v32 = vadd.f32 %v13833_v50, %v9708_v55  ;;  %v11477_v1 = vadd.f32 %v13834_v19, %v9710_v4  ;;  %v13837_v20 = vld [vmem:[#allocation186_spill] sm:$0xff]  ;;  %v13838_v29 = vld [vmem:[#allocation131_spill] sm:$0xff] }
 0x590   : > { %13831 = vst [vmem:[#allocation122_spill] sm:$0xff] %v11468_v11  ;;  %v11479_v41 = vpop.eup %7752  ;;  %5493 = vmatmul.mubr.bf16.gmra.mrb[224].mxu1 %v5073_v12  ;;  %v5075_v10 = vpack.c.bf16 %v4907_v42, %v4903_v53  ;;  %v4914_v15 = vmul.f32 %v4718_v39, %v13836_v58  ;;  %v4912_v44 = vmul.f32 %v4716_v34, %v13837_v20  ;;  %v13841_v30 = vld [vmem:[#allocation191_spill] sm:$0xff]  ;;  %v13842_v42 = vld [vmem:[#allocation110_spill] sm:$0xff]  ;;  %v11498_v39 = vpop.f32.mrb[174].mxu0  ;;  %v13847_v20 = vld [vmem:[#allocation136_spill] sm:$0xff] }
 0x591   : > { %13835 = vst [vmem:[#allocation157_spill] sm:$0xff] %v11479_v41  ;;  %v11485_v59 = vadd.f32 %v13838_v29, %v9714_v49  ;;  %v11487_v5 = vpop.eup %7754  ;;  %v4916_v26 = vmul.f32 %v4720_v40, %v13841_v30  ;;  %v3397_v0 = vmul.f32 %v11473_v32, %v11473_v32  ;;  %v3399_v50 = vmul.f32 %v11477_v1, %v11477_v1  ;;  %v13846_v40 = vld [vmem:[#allocation117_spill] sm:$0xff]  ;;  %v11512_v30 = vpop.f32.mrb[175].mxu1 }
 0x592   : > { %13840 = vst [vmem:[#allocation162_spill] sm:$0xff] %v11487_v5  ;;  %v11496_v12 = vadd.f32 %v13842_v42, %v9716_v21  ;;  %13844 = vst [vmem:[#allocation91_spill] sm:$0xff] %v11498_v39  ;;  %v11500_v53 = vpop.eup %7756  ;;  %5725 = vmatmul.mubr.bf16.gmra.mrb[224].mxu0 %v5075_v10  ;;  %v5078_v34 = vpack.c.bf16 %v4914_v15, %v4910_v23  ;;  %v11506_v58 = vadd.f32 %v13846_v40, %v9708_v55  ;;  %v11514_v42 = vpop.f32.mrb[175].mxu0 }
 0x593   : > { %13839 = vst [vmem:[#allocation118_spill] sm:$0xff] %v11485_v59  ;;  %13845 = vst [vmem:[#allocation179_spill] sm:$0xff] %v11500_v53  ;;  %v3398_v19 = vmul.f32 %v11485_v59, %v11485_v59  ;;  %v11510_v29 = vadd.f32 %v13847_v20, %v9710_v4  ;;  %v11516_v41 = vpop.eup %7758  ;;  %v5080_v11 = vpack.c.bf16 %v4916_v26, %v4912_v44  ;;  %v11522_v40 = vpop.f32.mrb[176].mxu1  ;;  %v13853_v26 = vld [vmem:[#allocation111_spill] sm:$0xff] }
 0x594   : > { %13843 = vst [vmem:[#allocation173_spill] sm:$0xff] %v11496_v12  ;;  %13848 = vst [vmem:[#allocation126_spill] sm:$0xff] %v11512_v30  ;;  %v3593_v23 = vmul.f32 %v3397_v0, %v11473_v32  ;;  %v3595_v10 = vmul.f32 %v3399_v50, %v11477_v1  ;;  %v3400_v15 = vmul.f32 %v11496_v12, %v11496_v12  ;;  %v11524_v53 = vpop.eup %7760  ;;  %5500 = vmatprep.mubr.bf16.mxu1 %v5078_v34  ;;  %v13856_v34 = vld [vmem:[#allocation133_spill] sm:$0xff] }
 0x595   : > { %13849 = vst [vmem:[#allocation112_spill] sm:$0xff] %v11514_v42  ;;  %13850 = vst [vmem:[#allocation119_spill] sm:$0xff] %v11516_v41  ;;  %v3594_v20 = vmul.f32 %v3398_v19, %v11485_v59  ;;  %v3401_v5 = vmul.f32 %v11506_v58, %v11506_v58  ;;  %v3403_v44 = vmul.f32 %v11510_v29, %v11510_v29  ;;  %v11535_v50 = vpop.eup %7762  ;;  %5732 = vmatprep.mubr.bf16.mxu0 %v5080_v11 }
 0x596   : > { %13851 = vst [vmem:[#allocation152_spill] sm:$0xff] %v11522_v40  ;;  %13852 = vst [vmem:[#allocation176_spill] sm:$0xff] %v11524_v53  ;;  %v11533_v0 = vadd.f32 %v13853_v26, %v9714_v49  ;;  %v3789_v41 = vmul.f32 0.044715, %v3593_v23  ;;  %v3791_v40 = vmul.f32 0.044715, %v3595_v10  ;;  %v3596_v53 = vmul.f32 %v3400_v15, %v11496_v12 }
 0x597   : > { %13855 = vst [vmem:[#allocation181_spill] sm:$0xff] %v11535_v50  ;;  %v11540_v19 = vadd.f32 %v13856_v34, %v9716_v21  ;;  %v3790_v42 = vmul.f32 0.044715, %v3594_v20  ;;  %v3597_v30 = vmul.f32 %v3401_v5, %v11506_v58  ;;  %v3599_v39 = vmul.f32 %v3403_v44, %v11510_v29  ;;  %v11546_v24 = vpop.eup %7764 }
 0x598   : > { %13854 = vst [vmem:[#allocation158_spill] sm:$0xff] %v11533_v0  ;;  %v3402_v26 = vmul.f32 %v11533_v0, %v11533_v0  ;;  %13858 = vst [vmem:[#allocation198_spill] sm:$0xff] %v11546_v24  ;;  %v3985_v11 = vadd.f32 %v3789_v41, %v11473_v32  ;;  %v3987_v23 = vadd.f32 %v3791_v40, %v11477_v1  ;;  %v3792_v10 = vmul.f32 0.044715, %v3596_v53 }
 0x599   : > { %13857 = vst [vmem:[#allocation193_spill] sm:$0xff] %v11540_v19  ;;  %v3404_v15 = vmul.f32 %v11540_v19, %v11540_v19  ;;  %v3986_v34 = vadd.f32 %v3790_v42, %v11485_v59  ;;  %v3793_v20 = vmul.f32 0.044715, %v3597_v30  ;;  %v3795_v50 = vmul.f32 0.044715, %v3599_v39  ;;  %v13859_v42 = vld [vmem:[#allocation204_spill] sm:$0xff] }
 0x59a   : > { %v3598_v5 = vmul.f32 %v3402_v26, %v11533_v0  ;;  %v4181_v44 = vmul.f32 0.7978846, %v3985_v11  ;;  %v4183_v13 = vmul.f32 0.7978846, %v3987_v23  ;;  %v3988_v51 = vadd.f32 %v3792_v10, %v11496_v12  ;;  %v13860_v10 = vld [vmem:[#allocation211_spill] sm:$0xff] }
 0x59b   : > { %v3600_v24 = vmul.f32 %v3404_v15, %v11540_v19  ;;  %v4182_v52 = vmul.f32 0.7978846, %v3986_v34  ;;  %v3989_v41 = vadd.f32 %v3793_v20, %v11506_v58  ;;  %v3991_v53 = vadd.f32 %v3795_v50, %v11510_v29  ;;  %v13861_v50 = vld [vmem:[#allocation207_spill] sm:$0xff] }
 0x59c   : > { %v3794_v40 = vmul.f32 0.044715, %v3598_v5  ;;  %7766 = vtanh.f32 %v4181_v44  ;;  %v4184_v57 = vmul.f32 0.7978846, %v3988_v51  ;;  %v4517_v30 = vadd.f32 1.0, %v13859_v42  ;;  %v13862_v44 = vld [vmem:[#allocation212_spill] sm:$0xff] }
 0x59d   : > { %v3796_v7 = vmul.f32 0.044715, %v3600_v24  ;;  %7768 = vtanh.f32 %v4183_v13  ;;  %v4185_v39 = vmul.f32 0.7978846, %v3989_v41  ;;  %v4187_v26 = vmul.f32 0.7978846, %v3991_v53 }
 0x59e   : > { %v3990_v11 = vadd.f32 %v3794_v40, %v11533_v0  ;;  %7770 = vtanh.f32 %v4182_v52  ;;  %v4521_v15 = vadd.f32 1.0, %v13860_v10  ;;  %v4713_v34 = vmul.f32 0.5, %v4517_v30  ;;  %v13863_v13 = vld [vmem:[#allocation180_spill] sm:$0xff]  ;;  %v13864_v52 = vld [vmem:[#allocation223_spill] sm:$0xff]  ;;  %v13866_v30 = vld [vmem:[#allocation229_spill] sm:$0xff] }
 0x59f   : > { %v3992_v23 = vadd.f32 %v3796_v7, %v11540_v19  ;;  %7772 = vtanh.f32 %v4184_v57  ;;  %v4519_v5 = vadd.f32 1.0, %v13861_v50  ;;  %v4523_v51 = vadd.f32 1.0, %v13862_v44  ;;  %v13865_v7 = vld [vmem:[#allocation187_spill] sm:$0xff]  ;;  %v11569_v50 = vpop.f32.mrb[176].mxu0 }
 0x5a0   : > { %v4186_v20 = vmul.f32 0.7978846, %v3990_v11  ;;  %7774 = vtanh.f32 %v4185_v39  ;;  %v4717_v42 = vmul.f32 0.5, %v4521_v15  ;;  %v4909_v41 = vmul.f32 %v4713_v34, %v13863_v13  ;;  %v13867_v11 = vld [vmem:[#allocation225_spill] sm:$0xff]  ;;  %v13868_v39 = vld [vmem:[#allocation183_spill] sm:$0xff]  ;;  %v13869_v15 = vld [vmem:[#allocation188_spill] sm:$0xff] }
 0x5a1   : > { %v4188_v24 = vmul.f32 0.7978846, %v3992_v23  ;;  %7776 = vtanh.f32 %v4187_v26  ;;  %v4715_v53 = vmul.f32 0.5, %v4519_v5  ;;  %v4719_v40 = vmul.f32 0.5, %v4523_v51  ;;  %v13870_v51 = vld [vmem:[#allocation230_spill] sm:$0xff] }
 0x5a2   : > { %v4526_v12 = vadd.f32 1.0, %v13864_v52  ;;  %7778 = vtanh.f32 %v4186_v20  ;;  %v4913_v10 = vmul.f32 %v4717_v42, %v13865_v7  ;;  %v4530_v57 = vadd.f32 1.0, %v13866_v30  ;;  %v11574_v20 = vpop.f32.mrb[177].mxu1  ;;  %v11576_v42 = vpop.f32.mrb[177].mxu0  ;;  %v13871_v30 = vld [vmem:[#allocation201_spill] sm:$0xff] }
 0x5a3   : > { %v4528_v19 = vadd.f32 1.0, %v13867_v11  ;;  %7780 = vtanh.f32 %v4188_v24  ;;  %v4911_v23 = vmul.f32 %v4715_v53, %v13868_v39  ;;  %v4915_v44 = vmul.f32 %v4719_v40, %v13869_v15 }
 0x5a4   : > { %v4722_v34 = vmul.f32 0.5, %v4526_v12  ;;  %v5077_v26 = vpack.c.bf16 %v4913_v10, %v4909_v41  ;;  %v4726_v5 = vmul.f32 0.5, %v4530_v57  ;;  %v4532_v13 = vadd.f32 1.0, %v13870_v51  ;;  %v11587_v12 = vpop.f32.mrb[178].mxu1  ;;  %v13873_v57 = vld [vmem:[#allocation202_spill] sm:$0xff] }
 0x5a5   : > { %v4724_v52 = vmul.f32 0.5, %v4528_v19  ;;  %v5079_v7 = vpack.c.bf16 %v4915_v44, %v4911_v23  ;;  %v11581_v24 = vadd.f32 %v10992_v6, %v9708_v55  ;;  %v11585_v53 = vadd.f32 %v10994_v37, %v9710_v4  ;;  %v13872_v19 = vld [vmem:[#allocation206_spill] sm:$0xff] }
 0x5a6   : > { %v4918_v11 = vmul.f32 %v4722_v34, %v13871_v30  ;;  %v7767_v41 = vpop.eup %7766  ;;  %5501 = vmatmul.mubr.bf16.gmra.mrb[228].mxu1 %v5077_v26  ;;  %v4922_v40 = vmul.f32 %v4726_v5, %v13872_v19  ;;  %v4728_v10 = vmul.f32 0.5, %v4532_v13  ;;  %v11593_v23 = vadd.f32 %v10998_v48, %v9714_v49  ;;  %v13877_v13 = vld [vmem:[#allocation209_spill] sm:$0xff] }
 0x5a7   : > { %v4920_v39 = vmul.f32 %v4724_v52, %v13873_v57  ;;  %v7769_v15 = vpop.eup %7768  ;;  %v4573_v6 = vadd.f32 1.0, %v7767_v41  ;;  %5733 = vmatmul.mubr.bf16.gmra.mrb[228].mxu0 %v5079_v7  ;;  %v3405_v37 = vmul.f32 %v11581_v24, %v11581_v24  ;;  %v3407_v44 = vmul.f32 %v11585_v53, %v11585_v53  ;;  %v11614_v57 = vpop.f32.mrb[178].mxu0 }
 0x5a8   : > { %13874 = vst [vmem:[#allocation154_spill] sm:$0xff] %v11593_v23  ;;  %v11601_v34 = vadd.f32 %v11000_v17, %v9716_v21  ;;  %v11603_v26 = vpop.eup %7770  ;;  %v4575_v5 = vadd.f32 1.0, %v7769_v15  ;;  %v5082_v51 = vpack.c.bf16 %v4922_v40, %v4918_v11  ;;  %v4924_v48 = vmul.f32 %v4728_v10, %v13877_v13 }
 0x5a9   : > { %13876 = vst [vmem:[#allocation159_spill] sm:$0xff] %v11603_v26  ;;  %v3406_v52 = vmul.f32 %v11593_v23, %v11593_v23  ;;  %v11608_v7 = vpop.eup %7772  ;;  %v4769_v30 = vmul.f32 0.5, %v4573_v6  ;;  %v3601_v41 = vmul.f32 %v3405_v37, %v11581_v24  ;;  %v3603_v19 = vmul.f32 %v3407_v44, %v11585_v53 }
 0x5aa   : > { %13875 = vst [vmem:[#allocation194_spill] sm:$0xff] %v11601_v34  ;;  %13878 = vst [vmem:[#allocation200_spill] sm:$0xff] %v11608_v7  ;;  %v3408_v17 = vmul.f32 %v11601_v34, %v11601_v34  ;;  %v7775_v0 = vpop.eup %7774  ;;  %v4771_v15 = vmul.f32 0.5, %v4575_v5  ;;  %5508 = vmatprep.mubr.bf16.mxu1 %v5082_v51  ;;  %v5084_v11 = vpack.c.bf16 %v4924_v48, %v4920_v39  ;;  %v11624_v7 = vpop.f32.mrb[179].mxu1 }
 0x5ab   : > { %v3602_v40 = vmul.f32 %v3406_v52, %v11593_v23  ;;  %v11619_v10 = vadd.f32 %v11005_v18, %v9708_v55  ;;  %v7777_v6 = vpop.eup %7776  ;;  %v11622_v37 = vmul.f32 %v4769_v30, %v11473_v32  ;;  %v4577_v44 = vadd.f32 1.0, %v7775_v0  ;;  %v11632_v48 = vpop.f32.mrb[179].mxu0 }
 0x5ac   : > { %v3797_v13 = vmul.f32 0.044715, %v3601_v41  ;;  %v3799_v59 = vmul.f32 0.044715, %v3603_v19  ;;  %v11626_v26 = vpop.eup %7778  ;;  %v11629_v5 = vmul.f32 %v4771_v15, %v11477_v1  ;;  %v4579_v39 = vadd.f32 1.0, %v7777_v6  ;;  %5740 = vmatprep.mubr.bf16.mxu0 %v5084_v11 }
 0x5ad   : > { %13879 = vst [vmem:[#allocation63_spill] sm:$0xff] %v11622_v37  ;;  %13880 = vst [vmem:[#allocation169_spill] sm:$0xff] %v11626_v26  ;;  %v3798_v51 = vmul.f32 0.044715, %v3602_v40  ;;  %v3604_v18 = vmul.f32 %v3408_v17, %v11601_v34  ;;  %v11634_v52 = vpop.eup %7780  ;;  %v4773_v32 = vmul.f32 0.5, %v4577_v44  ;;  %v3409_v41 = vmul.f32 %v11619_v10, %v11619_v10  ;;  %v13894_v26 = vld [vmem:[#allocation88_spill] sm:$0xff] }
 0x5ae   : > { %13881 = vst [vmem:[#allocation94_spill] sm:$0xff] %v11629_v5  ;;  %13882 = vst [vmem:[#allocation98_spill] sm:$0xff] %v11634_v52  ;;  %v3993_v0 = vadd.f32 %v3797_v13, %v11581_v24  ;;  %v3995_v30 = vadd.f32 %v3799_v59, %v11585_v53  ;;  %v4775_v19 = vmul.f32 0.5, %v4579_v39  ;;  %v11643_v11 = vadd.f32 %v11013_v27, %v9710_v4  ;;  %v13891_v52 = vld [vmem:[#allocation199_spill] sm:$0xff] }
 0x5af   : > { %v3994_v1 = vadd.f32 %v3798_v51, %v11593_v23  ;;  %v3800_v15 = vmul.f32 0.044715, %v3604_v18  ;;  %v11646_v17 = vmul.f32 %v4773_v32, %v11506_v58  ;;  %v3605_v44 = vmul.f32 %v3409_v41, %v11619_v10 }
 0x5b0   : > { %v4189_v40 = vmul.f32 0.7978846, %v3993_v0  ;;  %v4191_v6 = vmul.f32 0.7978846, %v3995_v30  ;;  %v11650_v59 = vmul.f32 %v4775_v19, %v11510_v29  ;;  %v3411_v51 = vmul.f32 %v11643_v11, %v11643_v11 }
 0x5b1   : > { %13883 = vst [vmem:[#allocation174_spill] sm:$0xff] %v11646_v17  ;;  %v4190_v13 = vmul.f32 0.7978846, %v3994_v1  ;;  %v3996_v39 = vadd.f32 %v3800_v15, %v11601_v34  ;;  %v3801_v18 = vmul.f32 0.044715, %v3605_v44  ;;  %v11659_v58 = vadd.f32 %v11017_v43, %v9714_v49  ;;  %v13885_v1 = vld [vmem:[#allocation219_spill] sm:$0xff] }
 0x5b2   : > { %13884 = vst [vmem:[#allocation170_spill] sm:$0xff] %v11650_v59  ;;  %7782 = vtanh.f32 %v4189_v40  ;;  %v3607_v0 = vmul.f32 %v3411_v51, %v11643_v11  ;;  %v11669_v19 = vadd.f32 %v11019_v9, %v9716_v21  ;;  %v4525_v15 = vadd.f32 1.0, %v13885_v1  ;;  %v13886_v40 = vld [vmem:[#allocation227_spill] sm:$0xff]  ;;  %v13887_v51 = vld [vmem:[#allocation222_spill] sm:$0xff]  ;;  %v13888_v9 = vld [vmem:[#allocation228_spill] sm:$0xff] }
 0x5b3   : > { %7784 = vtanh.f32 %v4191_v6  ;;  %v4192_v29 = vmul.f32 0.7978846, %v3996_v39  ;;  %v3997_v30 = vadd.f32 %v3801_v18, %v11619_v10  ;;  %v3410_v41 = vmul.f32 %v11659_v58, %v11659_v58 }
 0x5b4   : > { %7786 = vtanh.f32 %v4190_v13  ;;  %v3803_v43 = vmul.f32 0.044715, %v3607_v0  ;;  %v4529_v44 = vadd.f32 1.0, %v13886_v40  ;;  %v3412_v13 = vmul.f32 %v11669_v19, %v11669_v19 }
 0x5b5   : > { %7788 = vtanh.f32 %v4192_v29  ;;  %v4193_v6 = vmul.f32 0.7978846, %v3997_v30  ;;  %v3606_v39 = vmul.f32 %v3410_v41, %v11659_v58  ;;  %v4527_v18 = vadd.f32 1.0, %v13887_v51  ;;  %v13889_v30 = vld [vmem:[#allocation196_spill] sm:$0xff]  ;;  %v13890_v41 = vld [vmem:[#allocation203_spill] sm:$0xff] }
 0x5b6   : > { %v3999_v32 = vadd.f32 %v3803_v43, %v11643_v11  ;;  %v4721_v27 = vmul.f32 0.5, %v4525_v15  ;;  %v4725_v5 = vmul.f32 0.5, %v4529_v44  ;;  %v4531_v59 = vadd.f32 1.0, %v13888_v9  ;;  %v13892_v15 = vld [vmem:[#allocation100_spill] sm:$0xff] }
 0x5b7   : > { %7790 = vtanh.f32 %v4193_v6  ;;  %v3802_v29 = vmul.f32 0.044715, %v3606_v39  ;;  %v3608_v0 = vmul.f32 %v3412_v13, %v11669_v19  ;;  %v4723_v1 = vmul.f32 0.5, %v4527_v18  ;;  %v13893_v6 = vld [vmem:[#allocation205_spill] sm:$0xff] }
 0x5b8   : > { %v4195_v40 = vmul.f32 0.7978846, %v3999_v32  ;;  %v4917_v37 = vmul.f32 %v4721_v27, %v13889_v30  ;;  %v4921_v17 = vmul.f32 %v4725_v5, %v13890_v41  ;;  %v4727_v34 = vmul.f32 0.5, %v4531_v59  ;;  %v13895_v5 = vld [vmem:[#allocation103_spill] sm:$0xff] }
 0x5b9   : > { %v3998_v23 = vadd.f32 %v3802_v29, %v11659_v58  ;;  %v3804_v51 = vmul.f32 0.044715, %v3608_v0  ;;  %v4919_v43 = vmul.f32 %v4723_v1, %v13891_v52  ;;  %v4534_v44 = vadd.f32 1.0, %v13892_v15  ;;  %v13896_v1 = vld [vmem:[#allocation116_spill] sm:$0xff] }
 0x5ba   : > { %7792 = vtanh.f32 %v4195_v40  ;;  %v5081_v9 = vpack.c.bf16 %v4921_v17, %v4917_v37  ;;  %v4923_v39 = vmul.f32 %v4727_v34, %v13893_v6  ;;  %v4538_v13 = vadd.f32 1.0, %v13894_v26  ;;  %v13897_v26 = vld [vmem:[#allocation217_spill] sm:$0xff] }
 0x5bb   : > { %v4194_v32 = vmul.f32 0.7978846, %v3998_v23  ;;  %v4000_v27 = vadd.f32 %v3804_v51, %v11669_v19  ;;  %v4730_v30 = vmul.f32 0.5, %v4534_v44  ;;  %v4536_v59 = vadd.f32 1.0, %v13895_v5  ;;  %v13898_v44 = vld [vmem:[#allocation224_spill] sm:$0xff] }
 0x5bc   : > { %v7783_v18 = vpop.eup %7782  ;;  %5509 = vmatmul.mubr.bf16.gmra.mrb[232].mxu1 %v5081_v9  ;;  %v5083_v0 = vpack.c.bf16 %v4923_v39, %v4919_v43  ;;  %v4734_v52 = vmul.f32 0.5, %v4538_v13  ;;  %v4540_v15 = vadd.f32 1.0, %v13896_v1  ;;  %v11698_v43 = vadd.f32 %v11036_v36, %v9708_v55 }
 0x5bd   : > { %v7785_v41 = vpop.eup %7784  ;;  %v4581_v29 = vadd.f32 1.0, %v7783_v18  ;;  %7794 = vtanh.f32 %v4194_v32  ;;  %v4196_v34 = vmul.f32 0.7978846, %v4000_v27  ;;  %v4926_v17 = vmul.f32 %v4730_v30, %v13897_v26  ;;  %v13900_v27 = vld [vmem:[#allocation218_spill] sm:$0xff] }
 0x5be   : > { %v11690_v40 = vpop.eup %7786  ;;  %v4583_v37 = vadd.f32 1.0, %v7785_v41  ;;  %5741 = vmatmul.mubr.bf16.gmra.mrb[232].mxu0 %v5083_v0  ;;  %v4930_v6 = vmul.f32 %v4734_v52, %v13898_v44  ;;  %v4732_v5 = vmul.f32 0.5, %v4536_v59  ;;  %v4736_v18 = vmul.f32 0.5, %v4540_v15  ;;  %v13901_v41 = vld [vmem:[#allocation226_spill] sm:$0xff] }
 0x5bf   : > { %v11693_v23 = vpop.eup %7788  ;;  %v4777_v51 = vmul.f32 0.5, %v4581_v29  ;;  %7796 = vtanh.f32 %v4196_v34  ;;  %v11702_v39 = vadd.f32 %v11160_v16, %v9710_v4  ;;  %v3413_v36 = vmul.f32 %v11698_v43, %v11698_v43 }
 0x5c0   : > { %v4779_v9 = vmul.f32 0.5, %v4583_v37  ;;  %v5086_v32 = vpack.c.bf16 %v4930_v6, %v4926_v17  ;;  %v4928_v30 = vmul.f32 %v4732_v5, %v13900_v27  ;;  %v4932_v29 = vmul.f32 %v4736_v18, %v13901_v41 }
 0x5c1   : > { %v11705_v13 = vmul.f32 %v4777_v51, %v11581_v24  ;;  %v7791_v59 = vpop.eup %7790  ;;  %v3415_v52 = vmul.f32 %v11702_v39, %v11702_v39  ;;  %v11718_v16 = vadd.f32 %v11168_v47, %v9714_v49  ;;  %v11722_v15 = vadd.f32 %v11170_v45, %v9716_v21 }
 0x5c2   : > { %v11710_v0 = vmul.f32 %v4779_v9, %v11585_v53  ;;  %v4585_v24 = vadd.f32 1.0, %v7791_v59  ;;  %5516 = vmatprep.mubr.bf16.mxu1 %v5086_v32  ;;  %v5088_v1 = vpack.c.bf16 %v4932_v29, %v4928_v30  ;;  %v11726_v53 = vadd.f32 %v11174_v60, %v9708_v55 }
 0x5c3   : > { %13899 = vst [vmem:[#allocation95_spill] sm:$0xff] %v11705_v13  ;;  %v3609_v37 = vmul.f32 %v3413_v36, %v11698_v43  ;;  %v3611_v34 = vmul.f32 %v3415_v52, %v11702_v39  ;;  %v3414_v26 = vmul.f32 %v11718_v16, %v11718_v16  ;;  %v11734_v47 = vadd.f32 %v11180_v14, %v9710_v4  ;;  %v13962_v13 = vld [vmem:[#allocation167_spill] sm:$0xff] }
 0x5c4   : > { %13902 = vst [vmem:[#allocation175_spill] sm:$0xff] %v11710_v0  ;;  %v7793_v17 = vpop.eup %7792  ;;  %v4781_v51 = vmul.f32 0.5, %v4585_v24  ;;  %5748 = vmatprep.mubr.bf16.mxu0 %v5088_v1  ;;  %v3416_v45 = vmul.f32 %v11722_v15, %v11722_v15  ;;  %v3417_v60 = vmul.f32 %v11726_v53, %v11726_v53  ;;  %v11742_v44 = vadd.f32 %v11194_v63, %v9714_v49 }
 0x5c5   : > { %v4587_v6 = vadd.f32 1.0, %v7793_v17  ;;  %v3805_v5 = vmul.f32 0.044715, %v3609_v37  ;;  %v3807_v18 = vmul.f32 0.044715, %v3611_v34  ;;  %v3610_v9 = vmul.f32 %v3414_v26, %v11718_v16 }
 0x5c6   : > { %v11746_v14 = vmul.f32 %v4781_v51, %v11619_v10  ;;  %v3612_v32 = vmul.f32 %v3416_v45, %v11722_v15  ;;  %v3613_v27 = vmul.f32 %v3417_v60, %v11726_v53  ;;  %v3419_v30 = vmul.f32 %v11734_v47, %v11734_v47 }
 0x5c7   : > { %v11752_v41 = vpop.eup %7794  ;;  %v4783_v29 = vmul.f32 0.5, %v4587_v6  ;;  %v4001_v63 = vadd.f32 %v3805_v5, %v11698_v43  ;;  %v4003_v59 = vadd.f32 %v3807_v18, %v11702_v39  ;;  %v3806_v36 = vmul.f32 0.044715, %v3610_v9 }
 0x5c8   : > { %13903 = vst [vmem:[#allocation83_spill] sm:$0xff] %v11746_v14  ;;  %v3808_v10 = vmul.f32 0.044715, %v3612_v32  ;;  %v3809_v24 = vmul.f32 0.044715, %v3613_v27  ;;  %v3615_v1 = vmul.f32 %v3419_v30, %v11734_v47  ;;  %v3418_v5 = vmul.f32 %v11742_v44, %v11742_v44 }
 0x5c9   : > { %v11759_v37 = vpop.eup %7796  ;;  %v11762_v34 = vmul.f32 %v4783_v29, %v11643_v11  ;;  %v4197_v26 = vmul.f32 0.7978846, %v4001_v63  ;;  %v4199_v17 = vmul.f32 0.7978846, %v4003_v59  ;;  %v4002_v51 = vadd.f32 %v3806_v36, %v11718_v16  ;;  %v13905_v59 = vld [vmem:[#allocation59_spill] sm:$0xff] }
 0x5ca   : > { %v4004_v45 = vadd.f32 %v3808_v10, %v11722_v15  ;;  %v4005_v60 = vadd.f32 %v3809_v24, %v11726_v53  ;;  %v3811_v6 = vmul.f32 0.044715, %v3615_v1  ;;  %v11773_v11 = vadd.f32 %v11196_v31, %v9716_v21  ;;  %v13906_v24 = vld [vmem:[#allocation101_spill] sm:$0xff] }
 0x5cb   : > { %13904 = vst [vmem:[#allocation99_spill] sm:$0xff] %v11762_v34  ;;  %7798 = vtanh.f32 %v4197_v26  ;;  %v4198_v9 = vmul.f32 0.7978846, %v4002_v51  ;;  %v3614_v29 = vmul.f32 %v3418_v5, %v11742_v44  ;;  %v4533_v36 = vadd.f32 1.0, %v13905_v59  ;;  %v13907_v26 = vld [vmem:[#allocation61_spill] sm:$0xff]  ;;  %v13909_v59 = vld [vmem:[#allocation214_spill] sm:$0xff] }
 0x5cc   : > { %7800 = vtanh.f32 %v4199_v17  ;;  %v4200_v32 = vmul.f32 0.7978846, %v4004_v45  ;;  %v4201_v27 = vmul.f32 0.7978846, %v4005_v60  ;;  %v4007_v30 = vadd.f32 %v3811_v6, %v11734_v47  ;;  %v13908_v6 = vld [vmem:[#allocation105_spill] sm:$0xff] }
 0x5cd   : > { %7802 = vtanh.f32 %v4198_v9  ;;  %v3420_v63 = vmul.f32 %v11773_v11, %v11773_v11  ;;  %v4537_v1 = vadd.f32 1.0, %v13906_v24  ;;  %v4535_v31 = vadd.f32 1.0, %v13907_v26  ;;  %v13910_v24 = vld [vmem:[#allocation220_spill] sm:$0xff] }
 0x5ce   : > { %7804 = vtanh.f32 %v4200_v32  ;;  %v4203_v10 = vmul.f32 0.7978846, %v4007_v30  ;;  %v3810_v17 = vmul.f32 0.044715, %v3614_v29  ;;  %v4729_v45 = vmul.f32 0.5, %v4533_v36 }
 0x5cf   : > { %7806 = vtanh.f32 %v4201_v27  ;;  %v3616_v51 = vmul.f32 %v3420_v63, %v11773_v11  ;;  %v4733_v60 = vmul.f32 0.5, %v4537_v1  ;;  %v4539_v5 = vadd.f32 1.0, %v13908_v6  ;;  %v13911_v27 = vld [vmem:[#allocation216_spill] sm:$0xff] }
 0x5d0   : > { %7808 = vtanh.f32 %v4203_v10  ;;  %v4731_v9 = vmul.f32 0.5, %v4535_v31  ;;  %v4006_v18 = vadd.f32 %v3810_v17, %v11742_v44  ;;  %v4925_v32 = vmul.f32 %v4729_v45, %v13909_v59  ;;  %v13912_v17 = vld [vmem:[#allocation221_spill] sm:$0xff] }
 0x5d1   : > { %v3812_v52 = vmul.f32 0.044715, %v3616_v51  ;;  %v4542_v30 = vadd.f32 1.0, %v11091_v33  ;;  %v4929_v0 = vmul.f32 %v4733_v60, %v13910_v24  ;;  %v4735_v26 = vmul.f32 0.5, %v4539_v5 }
 0x5d2   : > { %v4927_v29 = vmul.f32 %v4731_v9, %v13911_v27  ;;  %v4546_v63 = vadd.f32 1.0, %v11129_v54  ;;  %v4202_v36 = vmul.f32 0.7978846, %v4006_v18  ;;  %v4544_v31 = vadd.f32 1.0, %v11105_v25 }
 0x5d3   : > { %v4008_v10 = vadd.f32 %v3812_v52, %v11773_v11  ;;  %v4738_v1 = vmul.f32 0.5, %v4542_v30  ;;  %v5085_v6 = vpack.c.bf16 %v4929_v0, %v4925_v32  ;;  %v4931_v51 = vmul.f32 %v4735_v26, %v13912_v17 }
 0x5d4   : > { %v4742_v34 = vmul.f32 0.5, %v4546_v63  ;;  %v4548_v45 = vadd.f32 1.0, %v11139_v46  ;;  %7810 = vtanh.f32 %v4202_v36  ;;  %v4740_v9 = vmul.f32 0.5, %v4544_v31 }
 0x5d5   : > { %v7799_v33 = vpop.eup %7798  ;;  %v4204_v60 = vmul.f32 0.7978846, %v4008_v10  ;;  %v4934_v5 = vmul.f32 %v4738_v1, %v10913_v35  ;;  %5517 = vmatmul.mubr.bf16.gmra.mrb[236].mxu1 %v5085_v6  ;;  %v5087_v18 = vpack.c.bf16 %v4931_v51, %v4927_v29  ;;  %v11801_v46 = vadd.f32 %v11206_v3, %v9708_v55 }
 0x5d6   : > { %v7801_v59 = vpop.eup %7800  ;;  %v4589_v54 = vadd.f32 1.0, %v7799_v33  ;;  %v4938_v52 = vmul.f32 %v4742_v34, %v10949_v28  ;;  %v4744_v30 = vmul.f32 0.5, %v4548_v45  ;;  %v4936_v32 = vmul.f32 %v4740_v9, %v10924_v61 }
 0x5d7   : > { %v11796_v25 = vpop.eup %7802  ;;  %v4591_v0 = vadd.f32 1.0, %v7801_v59  ;;  %7812 = vtanh.f32 %v4204_v60  ;;  %5749 = vmatmul.mubr.bf16.gmra.mrb[236].mxu0 %v5087_v18  ;;  %v11808_v28 = vadd.f32 %v11328_v2, %v9710_v4  ;;  %v3421_v61 = vmul.f32 %v11801_v46, %v11801_v46 }
 0x5d8   : > { %v11803_v24 = vpop.eup %7804  ;;  %v4785_v35 = vmul.f32 0.5, %v4589_v54  ;;  %v5090_v26 = vpack.c.bf16 %v4938_v52, %v4934_v5  ;;  %v4940_v27 = vmul.f32 %v4744_v30, %v10980_v38  ;;  %v11814_v3 = vadd.f32 %v11331_v62, %v9714_v49 }
 0x5d9   : > { %v7807_v34 = vpop.eup %7806  ;;  %v4787_v29 = vmul.f32 0.5, %v4591_v0  ;;  %v11818_v63 = vadd.f32 %v11333_v22, %v9716_v21  ;;  %v3423_v1 = vmul.f32 %v11808_v28, %v11808_v28  ;;  %v3617_v62 = vmul.f32 %v3421_v61, %v11801_v46 }
 0x5da   : > { %v7809_v36 = vpop.eup %7808  ;;  %v11821_v38 = vmul.f32 %v4785_v35, %v11698_v43  ;;  %v4593_v10 = vadd.f32 1.0, %v7807_v34  ;;  %5524 = vmatprep.mubr.bf16.mxu1 %v5090_v26  ;;  %v5092_v2 = vpack.c.bf16 %v4940_v27, %v4936_v32  ;;  %v3422_v22 = vmul.f32 %v11814_v3, %v11814_v3 }
 0x5db   : > { %v11826_v31 = vmul.f32 %v4787_v29, %v11702_v39  ;;  %v4595_v6 = vadd.f32 1.0, %v7809_v36  ;;  %v3619_v43 = vmul.f32 %v3423_v1, %v11808_v28  ;;  %v3424_v51 = vmul.f32 %v11818_v63, %v11818_v63  ;;  %v13917_v1 = vld [vmem:[#allocation148_spill] sm:$0xff] }
 0x5dc   : > { %13913 = vst [vmem:[#allocation114_spill] sm:$0xff] %v11821_v38  ;;  %v4789_v17 = vmul.f32 0.5, %v4593_v10  ;;  %5756 = vmatprep.mubr.bf16.mxu0 %v5092_v2  ;;  %v11836_v45 = vadd.f32 %v11336_v56, %v9708_v55  ;;  %v3813_v39 = vmul.f32 0.044715, %v3617_v62  ;;  %v3618_v60 = vmul.f32 %v3422_v22, %v11814_v3 }
 0x5dd   : > { %13914 = vst [vmem:[#allocation92_spill] sm:$0xff] %v11826_v31  ;;  %v4791_v33 = vmul.f32 0.5, %v4595_v6  ;;  %v11841_v5 = vadd.f32 %v11349_v8, %v9710_v4  ;;  %v3815_v59 = vmul.f32 0.044715, %v3619_v43  ;;  %v3620_v54 = vmul.f32 %v3424_v51, %v11818_v63 }
 0x5de   : > { %v11844_v9 = vmul.f32 %v4789_v17, %v11726_v53  ;;  %v3425_v18 = vmul.f32 %v11836_v45, %v11836_v45  ;;  %v11849_v52 = vpop.eup %7810  ;;  %v4009_v30 = vadd.f32 %v3813_v39, %v11801_v46  ;;  %v3814_v0 = vmul.f32 0.044715, %v3618_v60  ;;  %v13918_v17 = vld [vmem:[#allocation160_spill] sm:$0xff]  ;;  %v13929_v53 = vld [vmem:[#allocation139_spill] sm:$0xff] }
 0x5df   : > { %v11852_v56 = vmul.f32 %v4791_v33, %v11734_v47  ;;  %v3427_v8 = vmul.f32 %v11841_v5, %v11841_v5  ;;  %v4011_v32 = vadd.f32 %v3815_v59, %v11808_v28  ;;  %v3816_v35 = vmul.f32 0.044715, %v3620_v54  ;;  %v13919_v54 = vld [vmem:[#allocation150_spill] sm:$0xff]  ;;  %v13928_v47 = vld [vmem:[#allocation124_spill] sm:$0xff] }
 0x5e0   : > { %13915 = vst [vmem:[#allocation189_spill] sm:$0xff] %v11844_v9  ;;  %v3621_v26 = vmul.f32 %v3425_v18, %v11836_v45  ;;  %v4205_v34 = vmul.f32 0.7978846, %v4009_v30  ;;  %v4010_v29 = vadd.f32 %v3814_v0, %v11814_v3  ;;  %v11870_v6 = vadd.f32 %v13917_v1, %v9714_v49 }
 0x5e1   : > { %13916 = vst [vmem:[#allocation195_spill] sm:$0xff] %v11852_v56  ;;  %v11861_v27 = vpop.eup %7812  ;;  %v3623_v61 = vmul.f32 %v3427_v8, %v11841_v5  ;;  %v4207_v36 = vmul.f32 0.7978846, %v4011_v32  ;;  %v4012_v10 = vadd.f32 %v3816_v35, %v11818_v63  ;;  %v11874_v43 = vadd.f32 %v13918_v17, %v9716_v21  ;;  %v13920_v8 = vld [vmem:[#allocation125_spill] sm:$0xff] }
 0x5e2   : > { %v3817_v2 = vmul.f32 0.044715, %v3621_v26  ;;  %7814 = vtanh.f32 %v4205_v34  ;;  %v4206_v62 = vmul.f32 0.7978846, %v4010_v29  ;;  %v3426_v39 = vmul.f32 %v11870_v6, %v11870_v6  ;;  %v13921_v29 = vld [vmem:[#allocation155_spill] sm:$0xff] }
 0x5e3   : > { %v3819_v22 = vmul.f32 0.044715, %v3623_v61  ;;  %7816 = vtanh.f32 %v4207_v36  ;;  %v4208_v51 = vmul.f32 0.7978846, %v4012_v10  ;;  %v3428_v59 = vmul.f32 %v11874_v43, %v11874_v43 }
 0x5e4   : > { %v4013_v33 = vadd.f32 %v3817_v2, %v11836_v45  ;;  %7818 = vtanh.f32 %v4206_v62  ;;  %v4541_v18 = vadd.f32 1.0, %v13919_v54  ;;  %v3622_v0 = vmul.f32 %v3426_v39, %v11870_v6  ;;  %v13922_v2 = vld [vmem:[#allocation127_spill] sm:$0xff]  ;;  %v13924_v39 = vld [vmem:[#allocation134_spill] sm:$0xff] }
 0x5e5   : > { %v4015_v60 = vadd.f32 %v3819_v22, %v11841_v5  ;;  %7820 = vtanh.f32 %v4208_v51  ;;  %v4545_v32 = vadd.f32 1.0, %v13920_v8  ;;  %v3624_v26 = vmul.f32 %v3428_v59, %v11874_v43  ;;  %v13923_v22 = vld [vmem:[#allocation84_spill] sm:$0xff] }
 0x5e6   : > { %v4209_v30 = vmul.f32 0.7978846, %v4013_v33  ;;  %v4737_v34 = vmul.f32 0.5, %v4541_v18  ;;  %v4543_v61 = vadd.f32 1.0, %v13921_v29  ;;  %v3818_v36 = vmul.f32 0.044715, %v3622_v0 }
 0x5e7   : > { %v4211_v35 = vmul.f32 0.7978846, %v4015_v60  ;;  %v4741_v10 = vmul.f32 0.5, %v4545_v32  ;;  %v4547_v1 = vadd.f32 1.0, %v13922_v2  ;;  %v3820_v62 = vmul.f32 0.044715, %v3624_v26 }
 0x5e8   : > { %7822 = vtanh.f32 %v4209_v30  ;;  %v4933_v17 = vmul.f32 %v4737_v34, %v13923_v22  ;;  %v4739_v51 = vmul.f32 0.5, %v4543_v61  ;;  %v4014_v33 = vadd.f32 %v3818_v36, %v11870_v6  ;;  %v13925_v8 = vld [vmem:[#allocation128_spill] sm:$0xff]  ;;  %v13926_v29 = vld [vmem:[#allocation93_spill] sm:$0xff] }
 0x5e9   : > { %7824 = vtanh.f32 %v4211_v35  ;;  %v4937_v54 = vmul.f32 %v4741_v10, %v13924_v39  ;;  %v4743_v60 = vmul.f32 0.5, %v4547_v1  ;;  %v4550_v59 = vadd.f32 1.0, %v13925_v8  ;;  %v13927_v0 = vld [vmem:[#allocation108_spill] sm:$0xff]  ;;  %v13930_v10 = vld [vmem:[#allocation146_spill] sm:$0xff] }
 0x5ea   : > { %v4016_v18 = vadd.f32 %v3820_v62, %v11874_v43  ;;  %v4935_v30 = vmul.f32 %v4739_v51, %v13926_v29  ;;  %v4554_v32 = vadd.f32 1.0, %v13927_v0  ;;  %v4552_v2 = vadd.f32 1.0, %v13928_v47  ;;  %v13931_v51 = vld [vmem:[#allocation107_spill] sm:$0xff] }
 0x5eb   : > { %v4210_v35 = vmul.f32 0.7978846, %v4014_v33  ;;  %v5089_v26 = vpack.c.bf16 %v4937_v54, %v4933_v17  ;;  %v4939_v34 = vmul.f32 %v4743_v60, %v13929_v53  ;;  %v4746_v61 = vmul.f32 0.5, %v4550_v59  ;;  %v13932_v17 = vld [vmem:[#allocation130_spill] sm:$0xff]  ;;  %v13933_v59 = vld [vmem:[#allocation113_spill] sm:$0xff] }
 0x5ec   : > { %v7815_v22 = vpop.eup %7814  ;;  %v4212_v36 = vmul.f32 0.7978846, %v4016_v18  ;;  %v4750_v31 = vmul.f32 0.5, %v4554_v32  ;;  %v4556_v1 = vadd.f32 1.0, %v13930_v10  ;;  %v4748_v39 = vmul.f32 0.5, %v4552_v2  ;;  %v13934_v32 = vld [vmem:[#allocation96_spill] sm:$0xff] }
 0x5ed   : > { %v7817_v8 = vpop.eup %7816  ;;  %v4597_v56 = vadd.f32 1.0, %v7815_v22  ;;  %7826 = vtanh.f32 %v4210_v35  ;;  %5525 = vmatmul.mubr.bf16.gmra.mrb[240].mxu1 %v5089_v26  ;;  %v5091_v62 = vpack.c.bf16 %v4939_v34, %v4935_v30  ;;  %v4942_v29 = vmul.f32 %v4746_v61, %v13931_v51  ;;  %v13935_v30 = vld [vmem:[#allocation90_spill] sm:$0xff]  ;;  %v13936_v61 = vld [vmem:[#allocation132_spill] sm:$0xff] }
 0x5ee   : > { %v11899_v0 = vpop.eup %7818  ;;  %v4599_v47 = vadd.f32 1.0, %v7817_v8  ;;  %7828 = vtanh.f32 %v4212_v36  ;;  %v4946_v53 = vmul.f32 %v4750_v31, %v13932_v17  ;;  %v4752_v33 = vmul.f32 0.5, %v4556_v1  ;;  %v13937_v31 = vld [vmem:[#allocation156_spill] sm:$0xff]  ;;  %v13940_v8 = vld [vmem:[#allocation161_spill] sm:$0xff] }
 0x5ef   : > { %v11902_v54 = vpop.eup %7820  ;;  %v4793_v60 = vmul.f32 0.5, %v4597_v56  ;;  %5757 = vmatmul.mubr.bf16.gmra.mrb[240].mxu0 %v5091_v62  ;;  %v4944_v18 = vmul.f32 %v4748_v39, %v13933_v59  ;;  %v11907_v2 = vadd.f32 %v13934_v32, %v9708_v55  ;;  %v11911_v35 = vadd.f32 %v13935_v30, %v9710_v4 }
 0x5f0   : > { %v4795_v26 = vmul.f32 0.5, %v4599_v47  ;;  %v5094_v34 = vpack.c.bf16 %v4946_v53, %v4942_v29  ;;  %v4948_v22 = vmul.f32 %v4752_v33, %v13936_v61  ;;  %v11916_v36 = vadd.f32 %v13937_v31, %v9714_v49 }
 0x5f1   : > { %v11919_v10 = vmul.f32 %v4793_v60, %v11801_v46  ;;  %v3429_v1 = vmul.f32 %v11907_v2, %v11907_v2  ;;  %v3431_v39 = vmul.f32 %v11911_v35, %v11911_v35  ;;  %v11927_v62 = vadd.f32 %v13940_v8, %v9716_v21 }
 0x5f2   : > { %13938 = vst [vmem:[#allocation192_spill] sm:$0xff] %v11916_v36  ;;  %v7823_v56 = vpop.eup %7822  ;;  %v11930_v29 = vmul.f32 %v4795_v26, %v11808_v28  ;;  %5532 = vmatprep.mubr.bf16.mxu1 %v5094_v34  ;;  %v5096_v17 = vpack.c.bf16 %v4948_v22, %v4944_v18  ;;  %v3430_v46 = vmul.f32 %v11916_v36, %v11916_v36  ;;  %v13943_v28 = vld [vmem:[#allocation89_spill] sm:$0xff]  ;;  %v13944_v18 = vld [vmem:[#allocation91_spill] sm:$0xff]  ;;  %v4558_v14 = vadd.f32 1.0, %v13962_v13 }
 0x5f3   : > { %13939 = vst [vmem:[#allocation166_spill] sm:$0xff] %v11919_v10  ;;  %13941 = vst [vmem:[#allocation197_spill] sm:$0xff] %v11927_v62  ;;  %v7825_v51 = vpop.eup %7824  ;;  %v4601_v47 = vadd.f32 1.0, %v7823_v56  ;;  %v3625_v33 = vmul.f32 %v3429_v1, %v11907_v2  ;;  %v3627_v60 = vmul.f32 %v3431_v39, %v11911_v35  ;;  %v3432_v59 = vmul.f32 %v11927_v62, %v11927_v62 }
 0x5f4   : > { %13942 = vst [vmem:[#allocation208_spill] sm:$0xff] %v11930_v29  ;;  %v4603_v53 = vadd.f32 1.0, %v7825_v51  ;;  %5764 = vmatprep.mubr.bf16.mxu0 %v5096_v17  ;;  %v3626_v30 = vmul.f32 %v3430_v46, %v11916_v36  ;;  %v11941_v26 = vadd.f32 %v13943_v28, %v9708_v55  ;;  %v11945_v34 = vadd.f32 %v13944_v18, %v9710_v4 }
 0x5f5   : > { %v4797_v32 = vmul.f32 0.5, %v4601_v47  ;;  %v3821_v22 = vmul.f32 0.044715, %v3625_v33  ;;  %v3823_v31 = vmul.f32 0.044715, %v3627_v60  ;;  %v3628_v56 = vmul.f32 %v3432_v59, %v11927_v62  ;;  %v11962_v60 = vpop.f32.mrb[180].mxu1 }
 0x5f6   : > { %v4799_v61 = vmul.f32 0.5, %v4603_v53  ;;  %v3822_v39 = vmul.f32 0.044715, %v3626_v30  ;;  %v3433_v8 = vmul.f32 %v11941_v26, %v11941_v26  ;;  %v3435_v51 = vmul.f32 %v11945_v34, %v11945_v34  ;;  %13947 = vst [vmem:[#allocation210_spill] sm:$0xff] %v11962_v60  ;;  %v11973_v18 = vpop.f32.mrb[181].mxu1 }
 0x5f7   : > { %v11949_v1 = vmul.f32 %v4797_v32, %v11836_v45  ;;  %v11955_v47 = vpop.eup %7826  ;;  %v4017_v46 = vadd.f32 %v3821_v22, %v11907_v2  ;;  %v4019_v53 = vadd.f32 %v3823_v31, %v11911_v35  ;;  %v3824_v33 = vmul.f32 0.044715, %v3628_v56  ;;  %v11964_v45 = vpop.f32.mrb[180].mxu0  ;;  %13949 = vst [vmem:[#allocation215_spill] sm:$0xff] %v11973_v18  ;;  %v13954_v18 = vld [vmem:[#allocation112_spill] sm:$0xff] }
 0x5f8   : > { %v11958_v17 = vmul.f32 %v4799_v61, %v11841_v5  ;;  %13948 = vst [vmem:[#allocation168_spill] sm:$0xff] %v11964_v45  ;;  %v11966_v59 = vpop.eup %7828  ;;  %v4018_v30 = vadd.f32 %v3822_v39, %v11916_v36  ;;  %v3629_v28 = vmul.f32 %v3433_v8, %v11941_v26  ;;  %v3631_v5 = vmul.f32 %v3435_v51, %v11945_v34  ;;  %v11975_v61 = vpop.f32.mrb[181].mxu0  ;;  %v13953_v51 = vld [vmem:[#allocation126_spill] sm:$0xff] }
 0x5f9   : > { %13945 = vst [vmem:[#allocation171_spill] sm:$0xff] %v11949_v1  ;;  %13950 = vst [vmem:[#allocation172_spill] sm:$0xff] %v11975_v61  ;;  %v4213_v31 = vmul.f32 0.7978846, %v4017_v46  ;;  %v4215_v56 = vmul.f32 0.7978846, %v4019_v53  ;;  %v4020_v38 = vadd.f32 %v3824_v33, %v11927_v62  ;;  %v11986_v1 = vadd.f32 %v13953_v51, %v9714_v49 }
 0x5fa   : > { %13946 = vst [vmem:[#allocation213_spill] sm:$0xff] %v11958_v17  ;;  %v11980_v9 = vpop.f32.mrb[182].mxu1  ;;  %v11982_v32 = vpop.f32.mrb[182].mxu0  ;;  %v4214_v39 = vmul.f32 0.7978846, %v4018_v30  ;;  %v11990_v22 = vadd.f32 %v13954_v18, %v9716_v21  ;;  %v13955_v46 = vld [vmem:[#allocation149_spill] sm:$0xff] }
 0x5fb   : > { %13951 = vst [vmem:[#allocation185_spill] sm:$0xff] %v11980_v9  ;;  %13952 = vst [vmem:[#allocation135_spill] sm:$0xff] %v11982_v32  ;;  %v3825_v10 = vmul.f32 0.044715, %v3629_v28  ;;  %v3827_v8 = vmul.f32 0.044715, %v3631_v5  ;;  %7830 = vtanh.f32 %v4213_v31  ;;  %v3434_v5 = vmul.f32 %v11986_v1, %v11986_v1 }
 0x5fc   : > { %v4216_v61 = vmul.f32 0.7978846, %v4020_v38  ;;  %v4549_v53 = vadd.f32 1.0, %v13955_v46  ;;  %v11993_v33 = vpop.f32.mrb[183].mxu1  ;;  %v11995_v29 = vpop.f32.mrb[183].mxu0  ;;  %7832 = vtanh.f32 %v4215_v56  ;;  %v3436_v38 = vmul.f32 %v11990_v22, %v11990_v22  ;;  %v13958_v18 = vld [vmem:[#allocation129_spill] sm:$0xff] }
 0x5fd   : > { %13956 = vst [vmem:[#allocation141_spill] sm:$0xff] %v11993_v33  ;;  %13957 = vst [vmem:[#allocation190_spill] sm:$0xff] %v11995_v29  ;;  %v4021_v30 = vadd.f32 %v3825_v10, %v11941_v26  ;;  %v4023_v28 = vadd.f32 %v3827_v8, %v11945_v34  ;;  %7834 = vtanh.f32 %v4214_v39  ;;  %v4553_v31 = vadd.f32 1.0, %v13958_v18  ;;  %v13959_v33 = vld [vmem:[#allocation138_spill] sm:$0xff]  ;;  %v13960_v32 = vld [vmem:[#allocation153_spill] sm:$0xff]  ;;  %v12016_v36 = vpop.f32.mrb[184].mxu1 }
 0x5fe   : > { %v4745_v51 = vmul.f32 0.5, %v4549_v53  ;;  %7836 = vtanh.f32 %v4216_v61  ;;  %v3630_v29 = vmul.f32 %v3434_v5, %v11986_v1  ;;  %v3632_v56 = vmul.f32 %v3436_v38, %v11990_v22  ;;  %v13961_v45 = vld [vmem:[#allocation106_spill] sm:$0xff]  ;;  %v13963_v61 = vld [vmem:[#allocation109_spill] sm:$0xff]  ;;  %13967 = vst [vmem:[#allocation186_spill] sm:$0xff] %v12016_v36  ;;  %v12018_v13 = vpop.f32.mrb[184].mxu0  ;;  %v14011_v36 = vld [vmem:[#allocation151_spill] sm:$0xff] }
 0x5ff   : > { %v4217_v46 = vmul.f32 0.7978846, %v4021_v30  ;;  %v4219_v17 = vmul.f32 0.7978846, %v4023_v28  ;;  %v4749_v10 = vmul.f32 0.5, %v4553_v31  ;;  %v4551_v9 = vadd.f32 1.0, %v13960_v32 }
 0x600   : > { %v4941_v8 = vmul.f32 %v4745_v51, %v13959_v33  ;;  %v3826_v39 = vmul.f32 0.044715, %v3630_v29  ;;  %v4555_v60 = vadd.f32 1.0, %v13961_v45  ;;  %v3828_v53 = vmul.f32 0.044715, %v3632_v56  ;;  %v13964_v38 = vld [vmem:[#allocation178_spill] sm:$0xff] }
 0x601   : > { %7838 = vtanh.f32 %v4217_v46  ;;  %v4945_v30 = vmul.f32 %v4749_v10, %v13963_v61  ;;  %v4747_v28 = vmul.f32 0.5, %v4551_v9  ;;  %v4562_v31 = vadd.f32 1.0, %v13964_v38  ;;  %v13965_v51 = vld [vmem:[#allocation120_spill] sm:$0xff]  ;;  %v13966_v46 = vld [vmem:[#allocation73_spill] sm:$0xff]  ;;  %13968 = vst [vmem:[#allocation131_spill] sm:$0xff] %v12018_v13  ;;  %v13969_v56 = vld [vmem:[#allocation115_spill] sm:$0xff] }
 0x602   : > { %7840 = vtanh.f32 %v4219_v17  ;;  %v4022_v5 = vadd.f32 %v3826_v39, %v11986_v1  ;;  %v4751_v18 = vmul.f32 0.5, %v4555_v60  ;;  %v4754_v62 = vmul.f32 0.5, %v4558_v14  ;;  %v13970_v39 = vld [vmem:[#allocation123_spill] sm:$0xff]  ;;  %v12022_v61 = vpop.f32.mrb[185].mxu1  ;;  %v12024_v14 = vpop.f32.mrb[185].mxu0 }
 0x603   : > { %v4024_v33 = vadd.f32 %v3828_v53, %v11990_v22  ;;  %v5093_v32 = vpack.c.bf16 %v4945_v30, %v4941_v8  ;;  %v4943_v29 = vmul.f32 %v4747_v28, %v13965_v51  ;;  %v4560_v45 = vadd.f32 1.0, %v13966_v46  ;;  %13971 = vst [vmem:[#allocation191_spill] sm:$0xff] %v12022_v61  ;;  %13972 = vst [vmem:[#allocation110_spill] sm:$0xff] %v12024_v14  ;;  %v13973_v30 = vld [vmem:[#allocation184_spill] sm:$0xff] }
 0x604   : > { %v4218_v17 = vmul.f32 0.7978846, %v4022_v5  ;;  %v4947_v9 = vmul.f32 %v4751_v18, %v13969_v56  ;;  %v4758_v10 = vmul.f32 0.5, %v4562_v31  ;;  %v4950_v60 = vmul.f32 %v4754_v62, %v13970_v39  ;;  %v13974_v51 = vld [vmem:[#allocation152_spill] sm:$0xff]  ;;  %v12031_v5 = vpop.f32.mrb[186].mxu1  ;;  %v12033_v18 = vpop.f32.mrb[186].mxu0 }
 0x605   : > { %v7831_v53 = vpop.eup %7830  ;;  %v4220_v8 = vmul.f32 0.7978846, %v4024_v33  ;;  %5533 = vmatmul.mubr.bf16.gmra.mrb[244].mxu1 %v5093_v32  ;;  %v4564_v28 = vadd.f32 1.0, %v13973_v30  ;;  %v4756_v38 = vmul.f32 0.5, %v4560_v45  ;;  %v12029_v46 = vadd.f32 %v13974_v51, %v9708_v55  ;;  %13975 = vst [vmem:[#allocation117_spill] sm:$0xff] %v12031_v5  ;;  %13976 = vst [vmem:[#allocation136_spill] sm:$0xff] %v12033_v18 }
 0x606   : > { %v7833_v31 = vpop.eup %7832  ;;  %v4605_v62 = vadd.f32 1.0, %v7831_v53  ;;  %7842 = vtanh.f32 %v4218_v17  ;;  %v5095_v56 = vpack.c.bf16 %v4947_v9, %v4943_v29  ;;  %v13977_v39 = vld [vmem:[#allocation102_spill] sm:$0xff]  ;;  %v12036_v61 = vpop.f32.mrb[187].mxu1  ;;  %v13980_v51 = vld [vmem:[#allocation164_spill] sm:$0xff]  ;;  %v12049_v17 = vadd.f32 %v11569_v50, %v9710_v4 }
 0x607   : > { %v4954_v14 = vmul.f32 %v4758_v10, %v13977_v39  ;;  %13978 = vst [vmem:[#allocation111_spill] sm:$0xff] %v12036_v61  ;;  %v12038_v33 = vpop.f32.mrb[187].mxu0  ;;  %v12040_v32 = vpop.eup %7834  ;;  %v4607_v45 = vadd.f32 1.0, %v7833_v31  ;;  %7844 = vtanh.f32 %v4220_v8  ;;  %v4760_v30 = vmul.f32 0.5, %v4564_v28  ;;  %v13981_v10 = vld [vmem:[#allocation104_spill] sm:$0xff]  ;;  %v14010_v61 = vld [vmem:[#allocation181_spill] sm:$0xff] }
 0x608   : > { %13979 = vst [vmem:[#allocation133_spill] sm:$0xff] %v12038_v33  ;;  %v4952_v13 = vmul.f32 %v4756_v38, %v13980_v51  ;;  %v12043_v5 = vpop.eup %7836  ;;  %v4801_v18 = vmul.f32 0.5, %v4605_v62  ;;  %5765 = vmatmul.mubr.bf16.gmra.mrb[244].mxu0 %v5095_v56  ;;  %v3437_v29 = vmul.f32 %v12029_v46, %v12029_v46  ;;  %v12054_v8 = vadd.f32 %v11574_v20, %v9714_v49 }
 0x609   : > { %v5098_v53 = vpack.c.bf16 %v4954_v14, %v4950_v60  ;;  %v4803_v9 = vmul.f32 0.5, %v4607_v45  ;;  %v4956_v39 = vmul.f32 %v4760_v30, %v13981_v10  ;;  %v12058_v28 = vadd.f32 %v11576_v42, %v9716_v21  ;;  %v12077_v45 = vpop.f32.mrb[188].mxu0 }
 0x60a   : > { %v12061_v60 = vmul.f32 %v4801_v18, %v11907_v2  ;;  %v3633_v14 = vmul.f32 %v3437_v29, %v12029_v46  ;;  %v3439_v50 = vmul.f32 %v12049_v17, %v12049_v17  ;;  %v12068_v31 = vadd.f32 %v11587_v12, %v9708_v55  ;;  %v12075_v18 = vpop.f32.mrb[188].mxu1  ;;  %13986 = vst [vmem:[#allocation180_spill] sm:$0xff] %v12077_v45 }
 0x60b   : > { %13982 = vst [vmem:[#allocation204_spill] sm:$0xff] %v12058_v28  ;;  %v7839_v38 = vpop.eup %7838  ;;  %5540 = vmatprep.mubr.bf16.mxu1 %v5098_v53  ;;  %v12071_v62 = vmul.f32 %v4803_v9, %v11911_v35  ;;  %v5100_v56 = vpack.c.bf16 %v4956_v39, %v4952_v13  ;;  %v3438_v2 = vmul.f32 %v12054_v8, %v12054_v8  ;;  %13985 = vst [vmem:[#allocation212_spill] sm:$0xff] %v12075_v18  ;;  %v12082_v29 = vpop.f32.mrb[189].mxu1 }
 0x60c   : > { %13983 = vst [vmem:[#allocation211_spill] sm:$0xff] %v12061_v60  ;;  %v7841_v20 = vpop.eup %7840  ;;  %v4609_v42 = vadd.f32 1.0, %v7839_v38  ;;  %v3829_v51 = vmul.f32 0.044715, %v3633_v14  ;;  %v3635_v53 = vmul.f32 %v3439_v50, %v12049_v17  ;;  %v3440_v12 = vmul.f32 %v12058_v28, %v12058_v28  ;;  %13987 = vst [vmem:[#allocation223_spill] sm:$0xff] %v12082_v29  ;;  %v12084_v35 = vpop.f32.mrb[189].mxu0 }
 0x60d   : > { %13984 = vst [vmem:[#allocation207_spill] sm:$0xff] %v12071_v62  ;;  %v4611_v30 = vadd.f32 1.0, %v7841_v20  ;;  %13988 = vst [vmem:[#allocation187_spill] sm:$0xff] %v12084_v35  ;;  %5772 = vmatprep.mubr.bf16.mxu0 %v5100_v56  ;;  %v3634_v13 = vmul.f32 %v3438_v2, %v12054_v8  ;;  %v3441_v10 = vmul.f32 %v12068_v31, %v12068_v31  ;;  %v12093_v38 = vpop.f32.mrb[190].mxu1  ;;  %v12095_v14 = vpop.f32.mrb[190].mxu0 }
 0x60e   : > { %v4805_v9 = vmul.f32 0.5, %v4609_v42  ;;  %v12091_v39 = vadd.f32 %v11614_v57, %v9710_v4  ;;  %13989 = vst [vmem:[#allocation229_spill] sm:$0xff] %v12093_v38  ;;  %13990 = vst [vmem:[#allocation225_spill] sm:$0xff] %v12095_v14  ;;  %v4025_v20 = vadd.f32 %v3829_v51, %v12029_v46  ;;  %v3831_v29 = vmul.f32 0.044715, %v3635_v53  ;;  %v12099_v56 = vpop.f32.mrb[191].mxu1 }
 0x60f   : > { %v4807_v50 = vmul.f32 0.5, %v4611_v30  ;;  %v3636_v42 = vmul.f32 %v3440_v12, %v12058_v28  ;;  %13991 = vst [vmem:[#allocation183_spill] sm:$0xff] %v12099_v56  ;;  %v12101_v2 = vpop.f32.mrb[191].mxu0  ;;  %v3830_v45 = vmul.f32 0.044715, %v3634_v13  ;;  %v3637_v57 = vmul.f32 %v3441_v10, %v12068_v31 }
 0x610   : > { %13992 = vst [vmem:[#allocation188_spill] sm:$0xff] %v12101_v2  ;;  %v12104_v35 = vmul.f32 %v4805_v9, %v11941_v26  ;;  %v3443_v38 = vmul.f32 %v12091_v39, %v12091_v39  ;;  %v12109_v14 = vpop.eup %7842  ;;  %v4221_v51 = vmul.f32 0.7978846, %v4025_v20  ;;  %v4027_v53 = vadd.f32 %v3831_v29, %v12049_v17  ;;  %v12129_v26 = vpop.f32.mrb[192].mxu1 }
 0x611   : > { %v12112_v30 = vmul.f32 %v4807_v50, %v11945_v34  ;;  %v3832_v12 = vmul.f32 0.044715, %v3636_v42  ;;  %v12115_v56 = vpop.eup %7844  ;;  %v4026_v9 = vadd.f32 %v3830_v45, %v12054_v8  ;;  %v3833_v13 = vmul.f32 0.044715, %v3637_v57  ;;  %13995 = vst [vmem:[#allocation206_spill] sm:$0xff] %v12129_v26  ;;  %v12131_v45 = vpop.f32.mrb[192].mxu0 }
 0x612   : > { %13993 = vst [vmem:[#allocation230_spill] sm:$0xff] %v12104_v35  ;;  %v3639_v10 = vmul.f32 %v3443_v38, %v12091_v39  ;;  %7846 = vtanh.f32 %v4221_v51  ;;  %v4223_v34 = vmul.f32 0.7978846, %v4027_v53  ;;  %v12127_v18 = vadd.f32 %v11624_v7, %v9714_v49  ;;  %13996 = vst [vmem:[#allocation202_spill] sm:$0xff] %v12131_v45  ;;  %v13997_v51 = vld [vmem:[#allocation137_spill] sm:$0xff]  ;;  %v14008_v35 = vld [vmem:[#allocation162_spill] sm:$0xff] }
 0x613   : > { %13994 = vst [vmem:[#allocation201_spill] sm:$0xff] %v12112_v30  ;;  %v4028_v50 = vadd.f32 %v3832_v12, %v12058_v28  ;;  %v4222_v20 = vmul.f32 0.7978846, %v4026_v9  ;;  %v4029_v29 = vadd.f32 %v3833_v13, %v12068_v31  ;;  %v12135_v57 = vadd.f32 %v11632_v48, %v9716_v21  ;;  %v12138_v12 = vpop.f32.mrb[193].mxu1  ;;  %v12140_v9 = vpop.f32.mrb[193].mxu0  ;;  %v14007_v30 = vld [vmem:[#allocation140_spill] sm:$0xff] }
 0x614   : > { %v3835_v42 = vmul.f32 0.044715, %v3639_v10  ;;  %7848 = vtanh.f32 %v4223_v34  ;;  %v4557_v53 = vadd.f32 1.0, %v13997_v51  ;;  %13998 = vst [vmem:[#allocation209_spill] sm:$0xff] %v12138_v12  ;;  %13999 = vst [vmem:[#allocation219_spill] sm:$0xff] %v12140_v9  ;;  %v3442_v10 = vmul.f32 %v12127_v18, %v12127_v18  ;;  %v12145_v2 = vpop.f32.mrb[194].mxu1 }
 0x615   : > { %v4224_v38 = vmul.f32 0.7978846, %v4028_v50  ;;  %7850 = vtanh.f32 %v4222_v20  ;;  %v4225_v13 = vmul.f32 0.7978846, %v4029_v29  ;;  %14000 = vst [vmem:[#allocation227_spill] sm:$0xff] %v12145_v2  ;;  %v12147_v34 = vpop.f32.mrb[194].mxu0  ;;  %v3444_v48 = vmul.f32 %v12135_v57, %v12135_v57 }
 0x616   : > { %v4031_v7 = vadd.f32 %v3835_v42, %v12091_v39  ;;  %14001 = vst [vmem:[#allocation222_spill] sm:$0xff] %v12147_v34  ;;  %v14002_v50 = vld [vmem:[#allocation177_spill] sm:$0xff]  ;;  %v4753_v12 = vmul.f32 0.5, %v4557_v53  ;;  %v12152_v45 = vpop.f32.mrb[195].mxu1  ;;  %v12154_v20 = vpop.f32.mrb[195].mxu0  ;;  %v3638_v42 = vmul.f32 %v3442_v10, %v12127_v18  ;;  %v14005_v9 = vld [vmem:[#allocation144_spill] sm:$0xff] }
 0x617   : > { %7852 = vtanh.f32 %v4224_v38  ;;  %v4561_v51 = vadd.f32 1.0, %v14002_v50  ;;  %14003 = vst [vmem:[#allocation228_spill] sm:$0xff] %v12152_v45  ;;  %14004 = vst [vmem:[#allocation196_spill] sm:$0xff] %v12154_v20  ;;  %v4559_v26 = vadd.f32 1.0, %v14005_v9  ;;  %v3640_v2 = vmul.f32 %v3444_v48, %v12135_v57  ;;  %v14006_v38 = vld [vmem:[#allocation147_spill] sm:$0xff]  ;;  %v14009_v20 = vld [vmem:[#allocation165_spill] sm:$0xff] }
 0x618   : > { %7854 = vtanh.f32 %v4225_v13  ;;  %v4227_v29 = vmul.f32 0.7978846, %v4031_v7  ;;  %v4949_v62 = vmul.f32 %v4753_v12, %v14006_v38  ;;  %v4563_v60 = vadd.f32 1.0, %v14007_v30  ;;  %v14012_v21 = vld [vmem:[#allocation179_spill] sm:$0xff]  ;;  %v12167_v38 = vpop.f32.mrb[196].mxu1  ;;  %v12169_v30 = vpop.f32.mrb[196].mxu0 }
 0x619   : > { %v4757_v34 = vmul.f32 0.5, %v4561_v51  ;;  %v3834_v50 = vmul.f32 0.044715, %v3638_v42  ;;  %v4755_v53 = vmul.f32 0.5, %v4559_v26  ;;  %v4566_v45 = vadd.f32 1.0, %v14008_v35  ;;  %14013 = vst [vmem:[#allocation203_spill] sm:$0xff] %v12167_v38 }
 0x61a   : > { %7856 = vtanh.f32 %v4227_v29  ;;  %v3836_v33 = vmul.f32 0.044715, %v3640_v2  ;;  %v4759_v7 = vmul.f32 0.5, %v4563_v60  ;;  %v4570_v10 = vadd.f32 1.0, %v14010_v61  ;;  %14014 = vst [vmem:[#allocation199_spill] sm:$0xff] %v12169_v30  ;;  %v14015_v29 = vld [vmem:[#allocation142_spill] sm:$0xff] }
 0x61b   : > { %v4953_v13 = vmul.f32 %v4757_v34, %v14009_v20  ;;  %v4030_v9 = vadd.f32 %v3834_v50, %v12127_v18  ;;  %v4951_v48 = vmul.f32 %v4755_v53, %v14011_v36  ;;  %v4762_v51 = vmul.f32 0.5, %v4566_v45  ;;  %v12173_v20 = vpop.f32.mrb[197].mxu1  ;;  %v12175_v61 = vpop.f32.mrb[197].mxu0  ;;  %v14018_v45 = vld [vmem:[#allocation121_spill] sm:$0xff] }
 0x61c   : > { %v4568_v12 = vadd.f32 1.0, %v14012_v21  ;;  %v7847_v26 = vpop.eup %7846  ;;  %v4032_v35 = vadd.f32 %v3836_v33, %v12135_v57  ;;  %v4955_v34 = vmul.f32 %v4759_v7, %v14015_v29  ;;  %v4766_v60 = vmul.f32 0.5, %v4570_v10  ;;  %14016 = vst [vmem:[#allocation100_spill] sm:$0xff] %v12173_v20  ;;  %14017 = vst [vmem:[#allocation205_spill] sm:$0xff] %v12175_v61  ;;  %v14019_v21 = vld [vmem:[#allocation198_spill] sm:$0xff]  ;;  %v3001_v38 = vpop.f32.mrb[198].mxu1 }
 0x61d   : > { %v5097_v2 = vpack.c.bf16 %v4953_v13, %v4949_v62  ;;  %v4613_v42 = vadd.f32 1.0, %v7847_v26  ;;  %v4226_v36 = vmul.f32 0.7978846, %v4030_v9  ;;  %v4958_v50 = vmul.f32 %v4762_v51, %v14018_v45  ;;  %v3282_v28 = vpop.f32.mrb[198].mxu0  ;;  %v14020_v62 = vld [vmem:[#allocation182_spill] sm:$0xff]  ;;  %v3002_v10 = vpop.f32.mrb[199].mxu1 }
 0x61e   : > { %v4572_v53 = vadd.f32 1.0, %v14019_v21  ;;  %v7849_v30 = vpop.eup %7848  ;;  %v4228_v49 = vmul.f32 0.7978846, %v4032_v35  ;;  %v5099_v33 = vpack.c.bf16 %v4955_v34, %v4951_v48  ;;  %v4962_v13 = vmul.f32 %v4766_v60, %v14020_v62  ;;  %v3283_v29 = vpop.f32.mrb[199].mxu0  ;;  %v14021_v38 = vld [vmem:[#allocation75_spill] sm:$0xff]  ;;  %v14023_v45 = vld [vmem:[#allocation145_spill] sm:$0xff] }
 0x61f   : > { %5541 = vmatmul.mubr.bf16.gmra.mrb[248].mxu1 %v5097_v2  ;;  %v4764_v7 = vmul.f32 0.5, %v4568_v12  ;;  %v12180_v20 = vpop.eup %7850  ;;  %v4809_v61 = vmul.f32 0.5, %v4613_v42  ;;  %v4615_v26 = vadd.f32 1.0, %v7849_v30  ;;  %7858 = vtanh.f32 %v4226_v36  ;;  %v14022_v2 = vld [vmem:[#allocation122_spill] sm:$0xff]  ;;  %v14024_v42 = vld [vmem:[#allocation119_spill] sm:$0xff]  ;;  %v14025_v62 = vld [vmem:[#allocation157_spill] sm:$0xff] }
 0x620   : > { %v4768_v9 = vmul.f32 0.5, %v4572_v53  ;;  %7860 = vtanh.f32 %v4228_v49  ;;  %5773 = vmatmul.mubr.bf16.gmra.mrb[248].mxu0 %v5099_v33  ;;  %v5102_v28 = vpack.c.bf16 %v4962_v13, %v4958_v50  ;;  %v4565_v48 = vadd.f32 1.0, %v14022_v2  ;;  %v14026_v33 = vld [vmem:[#allocation176_spill] sm:$0xff] }
 0x621   : > { %v12182_v51 = vpop.eup %7852  ;;  %v4960_v35 = vmul.f32 %v4764_v7, %v14021_v38  ;;  %v12187_v12 = vmul.f32 %v4809_v61, %v12029_v46  ;;  %v4811_v60 = vmul.f32 0.5, %v4615_v26  ;;  %v4569_v30 = vadd.f32 1.0, %v14024_v42  ;;  %v14027_v46 = vld [vmem:[#allocation159_spill] sm:$0xff]  ;;  %v12197_v26 = vpop.f32.mrb[200].mxu1 }
 0x622   : > { %v7855_v34 = vpop.eup %7854  ;;  %v4964_v21 = vmul.f32 %v4768_v9, %v14023_v45  ;;  %5548 = vmatprep.mubr.bf16.mxu1 %v5102_v28  ;;  %v4761_v53 = vmul.f32 0.5, %v4565_v48  ;;  %v4567_v49 = vadd.f32 1.0, %v14025_v62  ;;  %v4571_v50 = vadd.f32 1.0, %v14026_v33  ;;  %v12199_v9 = vpop.f32.mrb[200].mxu0  ;;  %v14029_v28 = vld [vmem:[#allocation143_spill] sm:$0xff]  ;;  %v14030_v62 = vld [vmem:[#allocation97_spill] sm:$0xff] }
 0x623   : > { %v4617_v36 = vadd.f32 1.0, %v7855_v34  ;;  %v12194_v7 = vmul.f32 %v4811_v60, %v12049_v17  ;;  %v4765_v29 = vmul.f32 0.5, %v4569_v30  ;;  %v4574_v61 = vadd.f32 1.0, %v14027_v46  ;;  %14028 = vst [vmem:[#allocation88_spill] sm:$0xff] %v12199_v9  ;;  %v5448_v45 = vpop.f32.mrb[201].mxu1  ;;  %v5680_v42 = vpop.f32.mrb[201].mxu0 }
 0x624   : > { %v7857_v13 = vpop.eup %7856  ;;  %v5104_v10 = vpack.c.bf16 %v4964_v21, %v4960_v35  ;;  %v4957_v48 = vmul.f32 %v4761_v53, %v14029_v28  ;;  %v4763_v34 = vmul.f32 0.5, %v4567_v49  ;;  %v4767_v17 = vmul.f32 0.5, %v4571_v50  ;;  %v14031_v60 = vld [vmem:[#allocation169_spill] sm:$0xff]  ;;  %v12204_v30 = vpop.f32.mrb[202].mxu1  ;;  %v14035_v49 = vld [vmem:[#allocation200_spill] sm:$0xff] }
 0x625   : > { %v4813_v38 = vmul.f32 0.5, %v4617_v36  ;;  %v4619_v2 = vadd.f32 1.0, %v7857_v13  ;;  %v4961_v33 = vmul.f32 %v4765_v29, %v14030_v62  ;;  %v4578_v35 = vadd.f32 1.0, %v14031_v60  ;;  %14032 = vst [vmem:[#allocation103_spill] sm:$0xff] %v12204_v30  ;;  %v12206_v46 = vpop.f32.mrb[202].mxu0  ;;  %v14034_v13 = vld [vmem:[#allocation163_spill] sm:$0xff] }
 0x626   : > { %5780 = vmatprep.mubr.bf16.mxu0 %v5104_v10  ;;  %v4770_v21 = vmul.f32 0.5, %v4574_v61  ;;  %14033 = vst [vmem:[#allocation116_spill] sm:$0xff] %v12206_v46  ;;  %v4959_v53 = vmul.f32 %v4763_v34, %v14034_v13  ;;  %v4576_v28 = vadd.f32 1.0, %v14035_v49  ;;  %v5451_v45 = vpop.f32.mrb[203].mxu1  ;;  %v5683_v10 = vpop.f32.mrb[203].mxu0  ;;  %v14036_v29 = vld [vmem:[#allocation85_spill] sm:$0xff] }
 0x627   : > { %v12209_v9 = vmul.f32 %v4813_v38, %v12068_v31  ;;  %v4815_v36 = vmul.f32 0.5, %v4619_v2  ;;  %v5101_v42 = vpack.c.bf16 %v4961_v33, %v4957_v48  ;;  %v4963_v50 = vmul.f32 %v4767_v17, %v14036_v29  ;;  %v14037_v60 = vld [vmem:[#allocation118_spill] sm:$0xff] }
 0x628   : > { %v4774_v62 = vmul.f32 0.5, %v4578_v35  ;;  %v4966_v61 = vmul.f32 %v4770_v21, %v14037_v60  ;;  %v14038_v31 = vld [vmem:[#allocation98_spill] sm:$0xff]  ;;  %v4772_v2 = vmul.f32 0.5, %v4576_v28  ;;  %v4582_v33 = vadd.f32 1.0, %v11690_v40  ;;  %v12235_v40 = vpop.f32.mrb[204].mxu0 }
 0x629   : > { %v12218_v46 = vmul.f32 %v4815_v36, %v12091_v39  ;;  %v4580_v38 = vadd.f32 1.0, %v14038_v31  ;;  %v12221_v34 = vpop.eup %7858  ;;  %5549 = vmatmul.mubr.bf16.gmra.mrb[252].mxu1 %v5101_v42  ;;  %v5103_v13 = vpack.c.bf16 %v4963_v50, %v4959_v53  ;;  %v14039_v49 = vld [vmem:[#allocation158_spill] sm:$0xff]  ;;  %v4586_v17 = vadd.f32 1.0, %v11752_v41  ;;  %v14040_v36 = vld [vmem:[#allocation173_spill] sm:$0xff]  ;;  %v12233_v50 = vpop.f32.mrb[204].mxu1 }
 0x62a   : > { %v4970_v48 = vmul.f32 %v4774_v62, %v14039_v49  ;;  %v12226_v35 = vpop.eup %7860  ;;  %v4968_v45 = vmul.f32 %v4772_v2, %v14040_v36  ;;  %v4584_v28 = vadd.f32 1.0, %v11693_v23  ;;  %v4778_v42 = vmul.f32 0.5, %v4582_v33  ;;  %v14041_v41 = vld [vmem:[#allocation193_spill] sm:$0xff]  ;;  %v5456_v2 = vpop.f32.mrb[205].mxu1  ;;  %v14042_v23 = vld [vmem:[#allocation154_spill] sm:$0xff] }
 0x62b   : > { %v4776_v39 = vmul.f32 0.5, %v4580_v38  ;;  %5781 = vmatmul.mubr.bf16.gmra.mrb[252].mxu0 %v5103_v13  ;;  %v4782_v53 = vmul.f32 0.5, %v4586_v17  ;;  %v4588_v29 = vadd.f32 1.0, %v11759_v37  ;;  %v4590_v31 = vadd.f32 1.0, %v11796_v25  ;;  %v5688_v49 = vpop.f32.mrb[205].mxu0  ;;  %v12243_v33 = vpop.f32.mrb[206].mxu1 }
 0x62c   : > { %v5106_v10 = vpack.c.bf16 %v4970_v48, %v4966_v61  ;;  %v4780_v60 = vmul.f32 0.5, %v4584_v28  ;;  %v4594_v38 = vadd.f32 1.0, %v11849_v52  ;;  %v4974_v61 = vmul.f32 %v4778_v42, %v14042_v23  ;;  %v12245_v17 = vpop.f32.mrb[206].mxu0  ;;  %v14043_v36 = vld [vmem:[#allocation194_spill] sm:$0xff]  ;;  %v5459_v52 = vpop.f32.mrb[207].mxu1 }
 0x62d   : > { %v4972_v62 = vmul.f32 %v4776_v39, %v14041_v41  ;;  %v4978_v13 = vmul.f32 %v4782_v53, %v11659_v58  ;;  %v4784_v48 = vmul.f32 0.5, %v4588_v29  ;;  %v4592_v37 = vadd.f32 1.0, %v11803_v24  ;;  %v5691_v2 = vpop.f32.mrb[207].mxu0 }
 0x62e   : > { %5556 = vmatprep.mubr.bf16.mxu1 %v5106_v10  ;;  %v4976_v28 = vmul.f32 %v4780_v60, %v14043_v36  ;;  %v4786_v25 = vmul.f32 0.5, %v4590_v31  ;;  %v4790_v41 = vmul.f32 0.5, %v4594_v38  ;;  %v4596_v42 = vadd.f32 1.0, %v11861_v27  ;;  %v14045_v60 = vld [vmem:[#allocation63_spill] sm:$0xff] }
 0x62f   : > { %v5108_v39 = vpack.c.bf16 %v4972_v62, %v4968_v45  ;;  %v5110_v49 = vpack.c.bf16 %v4978_v13, %v4974_v61  ;;  %v4980_v10 = vmul.f32 %v4784_v48, %v11669_v19  ;;  %v4788_v58 = vmul.f32 0.5, %v4592_v37  ;;  %v14044_v62 = vld [vmem:[#allocation174_spill] sm:$0xff] }
 0x630   : > { %v4982_v24 = vmul.f32 %v4786_v25, %v11718_v16  ;;  %v4986_v53 = vmul.f32 %v4790_v41, %v11742_v44  ;;  %v4598_v29 = vadd.f32 1.0, %v11899_v0  ;;  %v4602_v45 = vadd.f32 1.0, %v11955_v47  ;;  %v14047_v48 = vld [vmem:[#allocation170_spill] sm:$0xff] }
 0x631   : > { %5788 = vmatprep.mubr.bf16.mxu0 %v5108_v39  ;;  %v14046_v31 = vpack.c.bf16 %v14044_v62, %v14045_v60  ;;  %v5112_v38 = vpack.c.bf16 %v4980_v10, %v4976_v28  ;;  %v4792_v23 = vmul.f32 0.5, %v4596_v42  ;;  %v4984_v19 = vmul.f32 %v4788_v58, %v11722_v15  ;;  %v14048_v0 = vld [vmem:[#allocation94_spill] sm:$0xff]  ;;  %v12266_v15 = vpop.f32.mrb[208].mxu1 }
 0x632   : > { %v4600_v27 = vadd.f32 1.0, %v11902_v54  ;;  %v5114_v61 = vpack.c.bf16 %v4986_v53, %v4982_v24  ;;  %v4794_v13 = vmul.f32 0.5, %v4598_v29  ;;  %v4798_v16 = vmul.f32 0.5, %v4602_v45  ;;  %14050 = vst [vmem:[#allocation217_spill] sm:$0xff] %v12266_v15  ;;  %v12268_v54 = vpop.f32.mrb[208].mxu0  ;;  %v14054_v45 = vld [vmem:[#allocation192_spill] sm:$0xff] }
 0x633   : > { %5557 = vmatmul.mubr.bf16.gmra.mrb[0].mxu1 %v14046_v31  ;;  %v4604_v44 = vadd.f32 1.0, %v11966_v59  ;;  %v14049_v37 = vpack.c.bf16 %v14047_v48, %v14048_v0  ;;  %v4988_v47 = vmul.f32 %v4792_v23, %v11773_v11  ;;  %v4606_v36 = vadd.f32 1.0, %v12040_v32  ;;  %14051 = vst [vmem:[#allocation224_spill] sm:$0xff] %v12268_v54  ;;  %v5464_v11 = vpop.f32.mrb[209].mxu1  ;;  %v5696_v2 = vpop.f32.mrb[209].mxu0  ;;  %v14055_v23 = vld [vmem:[#allocation197_spill] sm:$0xff] }
 0x634   : > { %5564 = vmatprep.mubr.bf16.mxu1 %v5110_v49  ;;  %v4796_v39 = vmul.f32 0.5, %v4600_v27  ;;  %v4610_v28 = vadd.f32 1.0, %v12109_v14  ;;  %v12271_v25 = vmul.f32 %v4794_v13, %v11814_v3  ;;  %v12274_v59 = vmul.f32 %v4798_v16, %v11870_v6  ;;  %v12280_v42 = vpop.f32.mrb[210].mxu1  ;;  %v12282_v58 = vpop.f32.mrb[210].mxu0  ;;  %v14056_v27 = vld [vmem:[#allocation83_spill] sm:$0xff] }
 0x635   : > { %5789 = vmatmul.mubr.bf16.gmra.mrb[0].mxu0 %v14049_v37  ;;  %v4800_v41 = vmul.f32 0.5, %v4604_v44  ;;  %v4608_v52 = vadd.f32 1.0, %v12043_v5  ;;  %v5116_v49 = vpack.c.bf16 %v4988_v47, %v4984_v19  ;;  %v4802_v14 = vmul.f32 0.5, %v4606_v36  ;;  %14052 = vst [vmem:[#allocation218_spill] sm:$0xff] %v12280_v42  ;;  %14053 = vst [vmem:[#allocation226_spill] sm:$0xff] %v12282_v58  ;;  %v5467_v53 = vpop.f32.mrb[211].mxu1 }
 0x636   : > { %5796 = vmatprep.mubr.bf16.mxu0 %v5112_v38  ;;  %v12278_v32 = vmul.f32 %v4796_v39, %v11818_v63  ;;  %v4806_v10 = vmul.f32 0.5, %v4610_v28  ;;  %v5118_v3 = vpack.c.bf16 %v12274_v59, %v12271_v25  ;;  %v4612_v5 = vadd.f32 1.0, %v12115_v56  ;;  %v5699_v29 = vpop.f32.mrb[211].mxu0  ;;  %v14057_v13 = vld [vmem:[#allocation95_spill] sm:$0xff]  ;;  %v14059_v37 = vld [vmem:[#allocation210_spill] sm:$0xff] }
 0x637   : > { %v12287_v6 = vmul.f32 %v4800_v41, %v11874_v43  ;;  %v4804_v24 = vmul.f32 0.5, %v4608_v52  ;;  %v12291_v63 = vmul.f32 %v4802_v14, %v14054_v45  ;;  %v4614_v60 = vadd.f32 1.0, %v12180_v20  ;;  %v14061_v36 = vld [vmem:[#allocation99_spill] sm:$0xff] }
 0x638   : > { %v12294_v62 = vmul.f32 %v4806_v10, %v11986_v1  ;;  %v4618_v31 = vadd.f32 1.0, %v12221_v34  ;;  %v4808_v43 = vmul.f32 0.5, %v4612_v5  ;;  %v4616_v56 = vadd.f32 1.0, %v12182_v51  ;;  %v14060_v51 = vld [vmem:[#allocation168_spill] sm:$0xff]  ;;  %v14062_v28 = vld [vmem:[#allocation175_spill] sm:$0xff]  ;;  %v12334_v14 = vpop.f32.mrb[212].mxu1 }
 0x639   : > { %v5120_v38 = vpack.c.bf16 %v12287_v6, %v12278_v32  ;;  %v12301_v19 = vmul.f32 %v4804_v24, %v14055_v23  ;;  %v14058_v16 = vpack.c.bf16 %v14056_v27, %v14057_v13  ;;  %v4810_v44 = vmul.f32 0.5, %v4614_v60  ;;  %v14065_v11 = vld [vmem:[#allocation215_spill] sm:$0xff]  ;;  %14066 = vst [vmem:[#allocation59_spill] sm:$0xff] %v12334_v14  ;;  %v14068_v24 = vld [vmem:[#allocation204_spill] sm:$0xff]  ;;  %v5472_v29 = vpop.f32.mrb[213].mxu1 }
 0x63a   : > { %v5122_v1 = vpack.c.bf16 %v12294_v62, %v12291_v63  ;;  %v4814_v20 = vmul.f32 0.5, %v4618_v31  ;;  %v4620_v34 = vadd.f32 1.0, %v12226_v35  ;;  %v12311_v48 = vmul.f32 %v4808_v43, %v11990_v22  ;;  %v12336_v10 = vpop.f32.mrb[212].mxu0  ;;  %v14069_v43 = vld [vmem:[#allocation87_spill] sm:$0xff]  ;;  %v14070_v23 = vld [vmem:[#allocation172_spill] sm:$0xff]  ;;  %v12358_v27 = vpop.f32.mrb[214].mxu1 }
 0x63b   : > { %5565 = vmatmul.mubr.bf16.gmra.mrb[4].mxu1 %v14058_v16  ;;  %v4812_v0 = vmul.f32 0.5, %v4616_v56  ;;  %v12315_v47 = vadd.f32 %v14059_v37, %v9708_v55  ;;  %v12319_v39 = vadd.f32 %v14060_v51, %v9710_v4  ;;  %v14063_v41 = vpack.c.bf16 %v14061_v36, %v14062_v28  ;;  %14067 = vst [vmem:[#allocation101_spill] sm:$0xff] %v12336_v10  ;;  %v5704_v45 = vpop.f32.mrb[213].mxu0  ;;  %v5475_v37 = vpop.f32.mrb[215].mxu1  ;;  %v14097_v62 = vld [vmem:[#allocation117_spill] sm:$0xff] }
 0x63c   : > { %5572 = vmatprep.mubr.bf16.mxu1 %v5114_v61  ;;  %v12325_v52 = vmul.f32 %v4810_v44, %v12054_v8  ;;  %v12328_v35 = vmul.f32 %v4814_v20, %v12127_v18  ;;  %v4816_v22 = vmul.f32 0.5, %v4620_v34  ;;  %v14064_v61 = vld [vmem:[#allocation86_spill] sm:$0xff]  ;;  %v5124_v5 = vpack.c.bf16 %v12311_v48, %v12301_v19  ;;  %14071 = vst [vmem:[#allocation61_spill] sm:$0xff] %v12358_v27  ;;  %v12360_v13 = vpop.f32.mrb[214].mxu0  ;;  %v14073_v20 = vld [vmem:[#allocation185_spill] sm:$0xff]  ;;  %v14099_v19 = vld [vmem:[#allocation136_spill] sm:$0xff] }
 0x63d   : > { %5797 = vmatmul.mubr.bf16.gmra.mrb[4].mxu0 %v14063_v41  ;;  %v12332_v2 = vadd.f32 %v14065_v11, %v14064_v61  ;;  %v12341_v53 = vmul.f32 %v4812_v0, %v14068_v24  ;;  %v3445_v8 = vmul.f32 %v12315_v47, %v12315_v47  ;;  %v3447_v18 = vmul.f32 %v12319_v39, %v12319_v39  ;;  %v5707_v51 = vpop.f32.mrb[215].mxu0  ;;  %v14076_v45 = vld [vmem:[#allocation189_spill] sm:$0xff] }
 0x63e   : > { %5804 = vmatprep.mubr.bf16.mxu0 %v5116_v49  ;;  %v12350_v31 = vmul.f32 %v4816_v22, %v12135_v57  ;;  %v12356_v56 = vadd.f32 %v14070_v23, %v14069_v43  ;;  %14072 = vst [vmem:[#allocation105_spill] sm:$0xff] %v12360_v13  ;;  %v12366_v34 = vadd.f32 %v14073_v20, %v9708_v55  ;;  %v14074_v57 = vld [vmem:[#allocation135_spill] sm:$0xff]  ;;  %v14075_v22 = vld [vmem:[#allocation141_spill] sm:$0xff]  ;;  %v14077_v23 = vld [vmem:[#allocation114_spill] sm:$0xff] }
 0x63f   : > { %v3446_v49 = vmul.f32 %v12332_v2, %v12332_v2  ;;  %v3641_v16 = vmul.f32 %v3445_v8, %v12315_v47  ;;  %v3643_v44 = vmul.f32 %v3447_v18, %v12319_v39  ;;  %v12370_v0 = vadd.f32 %v14074_v57, %v9710_v4  ;;  %v14079_v51 = vld [vmem:[#allocation190_spill] sm:$0xff] }
 0x640   : > { %v3448_v41 = vmul.f32 %v12356_v56, %v12356_v56  ;;  %v12379_v11 = vadd.f32 %v14075_v22, %v14064_v61  ;;  %v3449_v18 = vmul.f32 %v12366_v34, %v12366_v34  ;;  %v14078_v20 = vpack.c.bf16 %v14076_v45, %v14077_v23  ;;  %v14081_v23 = vld [vmem:[#allocation92_spill] sm:$0xff] }
 0x641   : > { %v3642_v28 = vmul.f32 %v3446_v49, %v12332_v2  ;;  %v3837_v24 = vmul.f32 0.044715, %v3641_v16  ;;  %v3839_v8 = vmul.f32 0.044715, %v3643_v44  ;;  %v3451_v29 = vmul.f32 %v12370_v0, %v12370_v0 }
 0x642   : > { %v3644_v57 = vmul.f32 %v3448_v41, %v12356_v56  ;;  %v3450_v37 = vmul.f32 %v12379_v11, %v12379_v11  ;;  %v12393_v16 = vadd.f32 %v14079_v51, %v14069_v43  ;;  %v3645_v45 = vmul.f32 %v3449_v18, %v12366_v34  ;;  %v14080_v41 = vld [vmem:[#allocation195_spill] sm:$0xff] }
 0x643   : > { %5573 = vmatmul.mubr.bf16.gmra.mrb[8].mxu1 %v14078_v20  ;;  %v3838_v49 = vmul.f32 0.044715, %v3642_v28  ;;  %v4033_v44 = vadd.f32 %v3837_v24, %v12315_v47  ;;  %v4035_v22 = vadd.f32 %v3839_v8, %v12319_v39  ;;  %v3647_v28 = vmul.f32 %v3451_v29, %v12370_v0  ;;  %v12409_v59 = vpop.f32.mrb[216].mxu1  ;;  %v14085_v29 = vld [vmem:[#allocation186_spill] sm:$0xff] }
 0x644   : > { %5580 = vmatprep.mubr.bf16.mxu1 %v5118_v3  ;;  %v14082_v20 = vpack.c.bf16 %v14080_v41, %v14081_v23  ;;  %v3840_v51 = vmul.f32 0.044715, %v3644_v57  ;;  %v3646_v30 = vmul.f32 %v3450_v37, %v12379_v11  ;;  %v3452_v25 = vmul.f32 %v12393_v16, %v12393_v16  ;;  %14083 = vst [vmem:[#allocation214_spill] sm:$0xff] %v12409_v59  ;;  %v12411_v3 = vpop.f32.mrb[216].mxu0  ;;  %v5480_v6 = vpop.f32.mrb[217].mxu1 }
 0x645   : > { %v4034_v21 = vadd.f32 %v3838_v49, %v12332_v2  ;;  %14084 = vst [vmem:[#allocation220_spill] sm:$0xff] %v12411_v3  ;;  %v4229_v24 = vmul.f32 0.7978846, %v4033_v44  ;;  %v4231_v8 = vmul.f32 0.7978846, %v4035_v22  ;;  %v12418_v49 = vadd.f32 %v14085_v29, %v9708_v55  ;;  %v14088_v29 = vld [vmem:[#allocation171_spill] sm:$0xff] }
 0x646   : > { %5805 = vmatmul.mubr.bf16.gmra.mrb[8].mxu0 %v14082_v20  ;;  %v3841_v18 = vmul.f32 0.044715, %v3645_v45  ;;  %v4036_v37 = vadd.f32 %v3840_v51, %v12356_v56  ;;  %v3843_v41 = vmul.f32 0.044715, %v3647_v28  ;;  %v3842_v23 = vmul.f32 0.044715, %v3646_v30 }
 0x647   : > { %5812 = vmatprep.mubr.bf16.mxu0 %v5120_v38  ;;  %v4230_v57 = vmul.f32 0.7978846, %v4034_v21  ;;  %7862 = vtanh.f32 %v4229_v24  ;;  %v3648_v36 = vmul.f32 %v3452_v25, %v12393_v16  ;;  %v3453_v32 = vmul.f32 %v12418_v49, %v12418_v49  ;;  %v5712_v38 = vpop.f32.mrb[217].mxu0  ;;  %v12427_v45 = vpop.f32.mrb[218].mxu1  ;;  %v14089_v6 = vld [vmem:[#allocation166_spill] sm:$0xff] }
 0x648   : > { %v4037_v20 = vadd.f32 %v3841_v18, %v12366_v34  ;;  %7864 = vtanh.f32 %v4231_v8  ;;  %v4232_v44 = vmul.f32 0.7978846, %v4036_v37  ;;  %v4039_v22 = vadd.f32 %v3843_v41, %v12370_v0  ;;  %14086 = vst [vmem:[#allocation216_spill] sm:$0xff] %v12427_v45  ;;  %v12429_v28 = vpop.f32.mrb[218].mxu0  ;;  %v5483_v24 = vpop.f32.mrb[219].mxu1  ;;  %v14091_v41 = vld [vmem:[#allocation131_spill] sm:$0xff] }
 0x649   : > { %v4038_v21 = vadd.f32 %v3842_v23, %v12379_v11  ;;  %14087 = vst [vmem:[#allocation221_spill] sm:$0xff] %v12429_v28  ;;  %7866 = vtanh.f32 %v4230_v57  ;;  %v3844_v51 = vmul.f32 0.044715, %v3648_v36  ;;  %v3649_v25 = vmul.f32 %v3453_v32, %v12418_v49  ;;  %v5715_v18 = vpop.f32.mrb[219].mxu0  ;;  %v14093_v24 = vld [vmem:[#allocation213_spill] sm:$0xff] }
 0x64a   : > { %v4233_v30 = vmul.f32 0.7978846, %v4037_v20  ;;  %v14090_v38 = vpack.c.bf16 %v14088_v29, %v14089_v6  ;;  %7868 = vtanh.f32 %v4232_v44  ;;  %v4235_v8 = vmul.f32 0.7978846, %v4039_v22  ;;  %v14092_v20 = vld [vmem:[#allocation191_spill] sm:$0xff]  ;;  %v14094_v44 = vld [vmem:[#allocation208_spill] sm:$0xff] }
 0x64b   : > { %v4234_v37 = vmul.f32 0.7978846, %v4038_v21  ;;  %v12437_v23 = vadd.f32 %v14091_v41, %v9710_v4  ;;  %v4040_v36 = vadd.f32 %v3844_v51, %v12393_v16  ;;  %v3845_v57 = vmul.f32 0.044715, %v3649_v25  ;;  %v14096_v18 = vld [vmem:[#allocation110_spill] sm:$0xff]  ;;  %v12466_v29 = vpop.f32.mrb[220].mxu1 }
 0x64c   : > { %5581 = vmatmul.mubr.bf16.gmra.mrb[12].mxu1 %v14090_v38  ;;  %7870 = vtanh.f32 %v4233_v30  ;;  %v12445_v32 = vadd.f32 %v14092_v20, %v14064_v61  ;;  %v14095_v22 = vpack.c.bf16 %v14093_v24, %v14094_v44  ;;  %v12454_v63 = vadd.f32 %v14096_v18, %v14069_v43  ;;  %14098 = vst [vmem:[#allocation148_spill] sm:$0xff] %v12466_v29 }
 0x64d   : > { %5588 = vmatprep.mubr.bf16.mxu1 %v5122_v1  ;;  %7872 = vtanh.f32 %v4235_v8  ;;  %v3455_v21 = vmul.f32 %v12437_v23, %v12437_v23  ;;  %v12458_v1 = vadd.f32 %v14097_v62, %v9708_v55  ;;  %v4236_v30 = vmul.f32 0.7978846, %v4040_v36  ;;  %v14100_v36 = vld [vmem:[#allocation111_spill] sm:$0xff] }
 0x64e   : > { %5813 = vmatmul.mubr.bf16.gmra.mrb[12].mxu0 %v14095_v22  ;;  %7874 = vtanh.f32 %v4234_v37  ;;  %v4041_v51 = vadd.f32 %v3845_v57, %v12418_v49  ;;  %v3454_v25 = vmul.f32 %v12445_v32, %v12445_v32  ;;  %v3456_v38 = vmul.f32 %v12454_v63, %v12454_v63 }
 0x64f   : > { %5820 = vmatprep.mubr.bf16.mxu0 %v5124_v5  ;;  %v3651_v6 = vmul.f32 %v3455_v21, %v12437_v23  ;;  %v3457_v8 = vmul.f32 %v12458_v1, %v12458_v1  ;;  %v12475_v48 = vadd.f32 %v14099_v19, %v9710_v4  ;;  %v5488_v5 = vpop.f32.mrb[221].mxu1  ;;  %7876 = vtanh.f32 %v4236_v30 }
 0x650   : > { %v4237_v37 = vmul.f32 0.7978846, %v4041_v51  ;;  %v3650_v41 = vmul.f32 %v3454_v25, %v12445_v32  ;;  %v12480_v57 = vadd.f32 %v14100_v36, %v14064_v61  ;;  %v12482_v20 = vpop.f32.mrb[222].mxu1  ;;  %v3652_v44 = vmul.f32 %v3456_v38, %v12454_v63  ;;  %v14102_v25 = vld [vmem:[#allocation133_spill] sm:$0xff]  ;;  %v12494_v5 = vpop.f32.mrb[220].mxu0  ;;  %v14104_v38 = vld [vmem:[#allocation230_spill] sm:$0xff] }
 0x651   : > { %14101 = vst [vmem:[#allocation160_spill] sm:$0xff] %v12482_v20  ;;  %v3847_v24 = vmul.f32 0.044715, %v3651_v6  ;;  %v3653_v22 = vmul.f32 %v3457_v8, %v12458_v1  ;;  %v3459_v21 = vmul.f32 %v12475_v48, %v12475_v48  ;;  %v5491_v18 = vpop.f32.mrb[223].mxu1  ;;  %v7863_v62 = vpop.eup %7862  ;;  %v12492_v19 = vadd.f32 %v14102_v25, %v14069_v43  ;;  %14103 = vst [vmem:[#allocation150_spill] sm:$0xff] %v12494_v5  ;;  %v14105_v36 = vld [vmem:[#allocation211_spill] sm:$0xff] }
 0x652   : > { %7878 = vtanh.f32 %v4237_v37  ;;  %v3846_v30 = vmul.f32 0.044715, %v3650_v41  ;;  %v3458_v51 = vmul.f32 %v12480_v57, %v12480_v57  ;;  %v7865_v6 = vpop.eup %7864  ;;  %v14106_v8 = vpack.c.bf16 %v14104_v38, %v14105_v36  ;;  %v5720_v41 = vpop.f32.mrb[221].mxu0 }
 0x653   : > { %v4621_v60 = vadd.f32 1.0, %v7863_v62  ;;  %v4043_v18 = vadd.f32 %v3847_v24, %v12437_v23  ;;  %v3848_v20 = vmul.f32 0.044715, %v3652_v44  ;;  %v3849_v37 = vmul.f32 0.044715, %v3653_v22  ;;  %v12500_v29 = vpop.eup %7866  ;;  %v12508_v36 = vpop.f32.mrb[222].mxu0 }
 0x654   : > { %5589 = vmatmul.mubr.bf16.gmra.mrb[16].mxu1 %v14106_v8  ;;  %v14107_v28 = vpack.c.bf16 %v12328_v35, %v12325_v52  ;;  %v4623_v25 = vadd.f32 1.0, %v7865_v6  ;;  %v4042_v5 = vadd.f32 %v3846_v30, %v12445_v32  ;;  %v3655_v3 = vmul.f32 %v3459_v21, %v12475_v48  ;;  %14108 = vst [vmem:[#allocation125_spill] sm:$0xff] %v12508_v36  ;;  %v12510_v62 = vpop.eup %7868  ;;  %v14109_v24 = vld [vmem:[#allocation201_spill] sm:$0xff]  ;;  %v14110_v44 = vld [vmem:[#allocation207_spill] sm:$0xff] }
 0x655   : > { %v3654_v38 = vmul.f32 %v3458_v51, %v12480_v57  ;;  %v14111_v22 = vpack.c.bf16 %v14109_v24, %v14110_v44  ;;  %v4817_v8 = vmul.f32 0.5, %v4621_v60  ;;  %v4239_v41 = vmul.f32 0.7978846, %v4043_v18 }
 0x656   : > { %5596 = vmatprep.mubr.bf16.mxu1 %v14107_v28  ;;  %v4044_v52 = vadd.f32 %v3848_v20, %v12454_v63  ;;  %v4045_v35 = vadd.f32 %v3849_v37, %v12458_v1  ;;  %v5723_v28 = vpop.f32.mrb[223].mxu0  ;;  %v7871_v30 = vpop.eup %7870  ;;  %v14112_v21 = vpack.c.bf16 %v12350_v31, %v12341_v53  ;;  %v4819_v51 = vmul.f32 0.5, %v4623_v25 }
 0x657   : > { %5821 = vmatmul.mubr.bf16.gmra.mrb[16].mxu0 %v14111_v22  ;;  %v4238_v6 = vmul.f32 0.7978846, %v4042_v5  ;;  %v3851_v36 = vmul.f32 0.044715, %v3655_v3  ;;  %v3460_v45 = vmul.f32 %v12492_v19, %v12492_v19  ;;  %v7873_v24 = vpop.eup %7872  ;;  %v12523_v60 = vmul.f32 %v4817_v8, %v12315_v47  ;;  %v14113_v8 = vld [vmem:[#allocation212_spill] sm:$0xff] }
 0x658   : > { %5828 = vmatprep.mubr.bf16.mxu0 %v14112_v21  ;;  %v4625_v18 = vadd.f32 1.0, %v7871_v30  ;;  %7880 = vtanh.f32 %v4239_v41  ;;  %v12525_v20 = vpop.eup %7874  ;;  %v12528_v37 = vmul.f32 %v4819_v51, %v12319_v39  ;;  %v4627_v44 = vadd.f32 1.0, %v7873_v24 }
 0x659   : > { %v4240_v53 = vmul.f32 0.7978846, %v4044_v52  ;;  %v4241_v31 = vmul.f32 0.7978846, %v4045_v35  ;;  %7882 = vtanh.f32 %v4238_v6  ;;  %v4047_v3 = vadd.f32 %v3851_v36, %v12475_v48  ;;  %v12531_v22 = vpop.eup %7876  ;;  %v14115_v36 = vld [vmem:[#allocation180_spill] sm:$0xff] }
 0x65a   : > { %v4821_v25 = vmul.f32 0.5, %v4625_v18  ;;  %v3850_v5 = vmul.f32 0.044715, %v3654_v38  ;;  %v4823_v28 = vmul.f32 0.5, %v4627_v44  ;;  %v3656_v47 = vmul.f32 %v3460_v45, %v12492_v19 }
 0x65b   : > { %7884 = vtanh.f32 %v4241_v31  ;;  %v12536_v41 = vadd.f32 %v14113_v8, %v9708_v55  ;;  %v14114_v39 = vpack.c.bf16 %v12209_v9, %v12187_v12  ;;  %v4243_v35 = vmul.f32 0.7978846, %v4047_v3  ;;  %v14116_v12 = vld [vmem:[#allocation223_spill] sm:$0xff]  ;;  %v14121_v8 = vld [vmem:[#allocation229_spill] sm:$0xff] }
 0x65c   : > { %v12542_v52 = vmul.f32 %v4821_v25, %v12366_v34  ;;  %v4046_v38 = vadd.f32 %v3850_v5, %v12480_v57  ;;  %v12547_v30 = vadd.f32 %v14115_v36, %v9710_v4  ;;  %v7879_v21 = vpop.eup %7878  ;;  %v12550_v45 = vmul.f32 %v4823_v28, %v12370_v0 }
 0x65d   : > { %5597 = vmatmul.mubr.bf16.gmra.mrb[20].mxu1 %v14114_v39  ;;  %v3852_v51 = vmul.f32 0.044715, %v3656_v47  ;;  %v3461_v6 = vmul.f32 %v12536_v41, %v12536_v41  ;;  %v12556_v9 = vadd.f32 %v14116_v12, %v14064_v61  ;;  %v14118_v34 = vpack.c.bf16 %v12218_v46, %v12194_v7  ;;  %v14119_v46 = vld [vmem:[#allocation187_spill] sm:$0xff] }
 0x65e   : > { %v4629_v18 = vadd.f32 1.0, %v7879_v21  ;;  %7886 = vtanh.f32 %v4243_v35  ;;  %v3463_v25 = vmul.f32 %v12547_v30, %v12547_v30  ;;  %v12573_v3 = vadd.f32 %v14119_v46, %v14069_v43 }
 0x65f   : > { %14117 = vst [vmem:[#allocation155_spill] sm:$0xff] %v12556_v9  ;;  %5829 = vmatmul.mubr.bf16.gmra.mrb[20].mxu0 %v14118_v34  ;;  %v4048_v44 = vadd.f32 %v3852_v51, %v12492_v19  ;;  %v3657_v31 = vmul.f32 %v3461_v6, %v12536_v41  ;;  %7888 = vtanh.f32 %v4240_v53  ;;  %v3462_v7 = vmul.f32 %v12556_v9, %v12556_v9  ;;  %v14122_v51 = vld [vmem:[#allocation225_spill] sm:$0xff] }
 0x660   : > { %14120 = vst [vmem:[#allocation127_spill] sm:$0xff] %v12573_v3  ;;  %v4242_v5 = vmul.f32 0.7978846, %v4046_v38  ;;  %v3659_v47 = vmul.f32 %v3463_v25, %v12547_v30  ;;  %v12578_v39 = vadd.f32 %v14121_v8, %v9708_v55  ;;  %v4825_v36 = vmul.f32 0.5, %v4629_v18 }
 0x661   : > { %v3853_v28 = vmul.f32 0.044715, %v3657_v31  ;;  %v3658_v21 = vmul.f32 %v3462_v7, %v12556_v9  ;;  %v3464_v53 = vmul.f32 %v12573_v3, %v12573_v3  ;;  %v12585_v6 = vadd.f32 %v14122_v51, %v9710_v4 }
 0x662   : > { %v7881_v35 = vpop.eup %7880  ;;  %v4244_v38 = vmul.f32 0.7978846, %v4048_v44  ;;  %v3855_v31 = vmul.f32 0.044715, %v3659_v47  ;;  %v3465_v18 = vmul.f32 %v12578_v39, %v12578_v39  ;;  %7890 = vtanh.f32 %v4242_v5  ;;  %v14123_v44 = vld [vmem:[#allocation183_spill] sm:$0xff] }
 0x663   : > { %v4631_v12 = vadd.f32 1.0, %v7881_v35  ;;  %v4049_v34 = vadd.f32 %v3853_v28, %v12536_v41  ;;  %v12588_v25 = vpop.eup %7882  ;;  %v3854_v46 = vmul.f32 0.044715, %v3658_v21  ;;  %v3660_v8 = vmul.f32 %v3464_v53, %v12573_v3  ;;  %v12602_v59 = vpop.f32.mrb[224].mxu1 }
 0x664   : > { %v3467_v7 = vmul.f32 %v12585_v6, %v12585_v6  ;;  %v4051_v35 = vadd.f32 %v3855_v31, %v12547_v30  ;;  %v12598_v28 = vadd.f32 %v14123_v44, %v14064_v61  ;;  %v3661_v53 = vmul.f32 %v3465_v18, %v12578_v39  ;;  %14125 = vst [vmem:[#allocation134_spill] sm:$0xff] %v12602_v59  ;;  %v5496_v31 = vpop.f32.mrb[225].mxu1 }
 0x665   : > { %v7885_v0 = vpop.eup %7884  ;;  %v4245_v51 = vmul.f32 0.7978846, %v4049_v34  ;;  %v4827_v47 = vmul.f32 0.5, %v4631_v12  ;;  %v4050_v21 = vadd.f32 %v3854_v46, %v12556_v9  ;;  %v12605_v13 = vmul.f32 %v4825_v36, %v12418_v49  ;;  %v12612_v36 = vpop.f32.mrb[226].mxu1  ;;  %v14131_v31 = vld [vmem:[#allocation188_spill] sm:$0xff] }
 0x666   : > { %14124 = vst [vmem:[#allocation84_spill] sm:$0xff] %v12598_v28  ;;  %v4633_v24 = vadd.f32 1.0, %v7885_v0  ;;  %v4247_v5 = vmul.f32 0.7978846, %v4051_v35  ;;  %v3663_v34 = vmul.f32 %v3467_v7, %v12585_v6  ;;  %v3856_v44 = vmul.f32 0.044715, %v3660_v8 }
 0x667   : > { %14126 = vst [vmem:[#allocation128_spill] sm:$0xff] %v12605_v13  ;;  %7892 = vtanh.f32 %v4245_v51  ;;  %v3857_v12 = vmul.f32 0.044715, %v3661_v53  ;;  %v12608_v0 = vpop.f32.mrb[224].mxu0  ;;  %v3466_v59 = vmul.f32 %v12598_v28, %v12598_v28  ;;  %14128 = vst [vmem:[#allocation108_spill] sm:$0xff] %v12612_v36  ;;  %v12617_v7 = vmul.f32 %v4827_v47, %v12437_v23  ;;  %v5499_v35 = vpop.f32.mrb[227].mxu1 }
 0x668   : > { %v7887_v10 = vpop.eup %7886  ;;  %v4829_v27 = vmul.f32 0.5, %v4633_v24  ;;  %7894 = vtanh.f32 %v4244_v38  ;;  %14127 = vst [vmem:[#allocation93_spill] sm:$0xff] %v12608_v0  ;;  %v3859_v18 = vmul.f32 0.044715, %v3663_v34  ;;  %v5728_v49 = vpop.f32.mrb[225].mxu0 }
 0x669   : > { %v4635_v46 = vadd.f32 1.0, %v7887_v10  ;;  %7896 = vtanh.f32 %v4247_v5  ;;  %v12614_v51 = vpop.eup %7888  ;;  %14129 = vst [vmem:[#allocation124_spill] sm:$0xff] %v12617_v7  ;;  %v4246_v38 = vmul.f32 0.7978846, %v4050_v21  ;;  %v4053_v8 = vadd.f32 %v3857_v12, %v12578_v39  ;;  %v12623_v10 = vpop.f32.mrb[226].mxu0  ;;  %v14133_v21 = vld [vmem:[#allocation206_spill] sm:$0xff] }
 0x66a   : > { %v12620_v24 = vmul.f32 %v4829_v27, %v12458_v1  ;;  %14130 = vst [vmem:[#allocation139_spill] sm:$0xff] %v12623_v10  ;;  %v4055_v5 = vadd.f32 %v3859_v18, %v12585_v6  ;;  %v3662_v34 = vmul.f32 %v3466_v59, %v12598_v28  ;;  %v12629_v49 = vadd.f32 %v14131_v31, %v14069_v43  ;;  %v5731_v23 = vpop.f32.mrb[227].mxu0 }
 0x66b   : > { %v4831_v53 = vmul.f32 0.5, %v4635_v46  ;;  %v4052_v1 = vadd.f32 %v3856_v44, %v12573_v3  ;;  %v4249_v47 = vmul.f32 0.7978846, %v4053_v8  ;;  %v12636_v12 = vadd.f32 %v14133_v21, %v9708_v55  ;;  %v14135_v23 = vld [vmem:[#allocation202_spill] sm:$0xff]  ;;  %v14136_v8 = vld [vmem:[#allocation209_spill] sm:$0xff] }
 0x66c   : > { %14132 = vst [vmem:[#allocation146_spill] sm:$0xff] %v12629_v49  ;;  %v4251_v18 = vmul.f32 0.7978846, %v4055_v5  ;;  %v3858_v59 = vmul.f32 0.044715, %v3662_v34  ;;  %v3468_v35 = vmul.f32 %v12629_v49, %v12629_v49  ;;  %v12647_v44 = vadd.f32 %v14135_v23, %v9710_v4  ;;  %v12653_v27 = vpop.eup %7890 }
 0x66d   : > { %v12639_v46 = vmul.f32 %v4831_v53, %v12475_v48  ;;  %7898 = vtanh.f32 %v4249_v47  ;;  %v3469_v31 = vmul.f32 %v12636_v12, %v12636_v12  ;;  %v12651_v21 = vadd.f32 %v14136_v8, %v14064_v61  ;;  %v14137_v8 = vld [vmem:[#allocation219_spill] sm:$0xff] }
 0x66e   : > { %7900 = vtanh.f32 %v4251_v18  ;;  %v4054_v53 = vadd.f32 %v3858_v59, %v12598_v28  ;;  %v3664_v5 = vmul.f32 %v3468_v35, %v12629_v49  ;;  %v3471_v47 = vmul.f32 %v12647_v44, %v12647_v44  ;;  %v14139_v59 = vld [vmem:[#allocation227_spill] sm:$0xff] }
 0x66f   : > { %14134 = vst [vmem:[#allocation107_spill] sm:$0xff] %v12639_v46  ;;  %v3665_v34 = vmul.f32 %v3469_v31, %v12636_v12  ;;  %v3470_v23 = vmul.f32 %v12651_v21, %v12651_v21  ;;  %v12666_v10 = vadd.f32 %v14137_v8, %v14069_v43  ;;  %v4248_v36 = vmul.f32 0.7978846, %v4052_v1  ;;  %v14140_v46 = vld [vmem:[#allocation222_spill] sm:$0xff] }
 0x670   : > { %v4250_v48 = vmul.f32 0.7978846, %v4054_v53  ;;  %v3860_v18 = vmul.f32 0.044715, %v3664_v5  ;;  %v12670_v14 = vadd.f32 %v14139_v59, %v9708_v55  ;;  %v3667_v7 = vmul.f32 %v3471_v47, %v12647_v44 }
 0x671   : > { %14138 = vst [vmem:[#allocation130_spill] sm:$0xff] %v12666_v10  ;;  %v7893_v0 = vpop.eup %7892  ;;  %v3861_v58 = vmul.f32 0.044715, %v3665_v34  ;;  %v12677_v3 = vadd.f32 %v14140_v46, %v9710_v4  ;;  %v3666_v1 = vmul.f32 %v3470_v23, %v12651_v21  ;;  %v3472_v53 = vmul.f32 %v12666_v10, %v12666_v10 }
 0x672   : > { %v12672_v35 = vpop.eup %7894  ;;  %v4637_v31 = vadd.f32 1.0, %v7893_v0  ;;  %v4056_v42 = vadd.f32 %v3860_v18, %v12629_v49  ;;  %v3473_v5 = vmul.f32 %v12670_v14, %v12670_v14  ;;  %v3863_v47 = vmul.f32 0.044715, %v3667_v7 }
 0x673   : > { %v7897_v8 = vpop.eup %7896  ;;  %v4057_v34 = vadd.f32 %v3861_v58, %v12636_v12  ;;  %7902 = vtanh.f32 %v4246_v38  ;;  %v3668_v46 = vmul.f32 %v3472_v53, %v12666_v10  ;;  %v3862_v9 = vmul.f32 0.044715, %v3666_v1 }
 0x674   : > { %v4833_v59 = vmul.f32 0.5, %v4637_v31  ;;  %v4639_v0 = vadd.f32 1.0, %v7897_v8  ;;  %v4252_v54 = vmul.f32 0.7978846, %v4056_v42  ;;  %v3669_v28 = vmul.f32 %v3473_v5, %v12670_v14 }
 0x675   : > { %7904 = vtanh.f32 %v4248_v36  ;;  %v4253_v18 = vmul.f32 0.7978846, %v4057_v34  ;;  %v4059_v23 = vadd.f32 %v3863_v47, %v12647_v44  ;;  %v3475_v42 = vmul.f32 %v12677_v3, %v12677_v3  ;;  %v14146_v47 = vld [vmem:[#allocation196_spill] sm:$0xff] }
 0x676   : > { %v4835_v49 = vmul.f32 0.5, %v4639_v0  ;;  %7906 = vtanh.f32 %v4250_v48  ;;  %v3865_v15 = vmul.f32 0.044715, %v3669_v28  ;;  %v12690_v31 = vmul.f32 %v4833_v59, %v12536_v41  ;;  %v14142_v28 = vld [vmem:[#allocation228_spill] sm:$0xff] }
 0x677   : > { %v7899_v13 = vpop.eup %7898  ;;  %7908 = vtanh.f32 %v4253_v18  ;;  %v4255_v58 = vmul.f32 0.7978846, %v4059_v23  ;;  %v3864_v36 = vmul.f32 0.044715, %v3668_v46  ;;  %v3671_v48 = vmul.f32 %v3475_v42, %v12677_v3  ;;  %v14151_v42 = vld [vmem:[#allocation199_spill] sm:$0xff] }
 0x678   : > { %14141 = vst [vmem:[#allocation113_spill] sm:$0xff] %v12690_v31  ;;  %v7901_v7 = vpop.eup %7900  ;;  %v4641_v38 = vadd.f32 1.0, %v7899_v13  ;;  %7910 = vtanh.f32 %v4252_v54  ;;  %v4061_v8 = vadd.f32 %v3865_v15, %v12670_v14  ;;  %v12698_v1 = vadd.f32 %v14142_v28, %v14064_v61 }
 0x679   : > { %v4643_v53 = vadd.f32 1.0, %v7901_v7  ;;  %7912 = vtanh.f32 %v4255_v58  ;;  %v12701_v41 = vmul.f32 %v4835_v49, %v12547_v30  ;;  %v4058_v59 = vadd.f32 %v3862_v9, %v12651_v21  ;;  %v12704_v13 = vpop.f32.mrb[228].mxu1  ;;  %v14149_v49 = vld [vmem:[#allocation203_spill] sm:$0xff] }
 0x67a   : > { %14143 = vst [vmem:[#allocation96_spill] sm:$0xff] %v12698_v1  ;;  %v4837_v5 = vmul.f32 0.5, %v4641_v38  ;;  %v4257_v0 = vmul.f32 0.7978846, %v4061_v8  ;;  %14145 = vst [vmem:[#allocation132_spill] sm:$0xff] %v12704_v13  ;;  %v3474_v15 = vmul.f32 %v12698_v1, %v12698_v1  ;;  %v12710_v46 = vadd.f32 %v14146_v47, %v14069_v43  ;;  %v12712_v18 = vpop.f32.mrb[228].mxu0 }
 0x67b   : > { %14144 = vst [vmem:[#allocation90_spill] sm:$0xff] %v12701_v41  ;;  %v4839_v54 = vmul.f32 0.5, %v4643_v53  ;;  %v3867_v34 = vmul.f32 0.044715, %v3671_v48  ;;  %14147 = vst [vmem:[#allocation156_spill] sm:$0xff] %v12712_v18  ;;  %v5504_v23 = vpop.f32.mrb[229].mxu1  ;;  %v4060_v9 = vadd.f32 %v3864_v36, %v12666_v10  ;;  %v12720_v58 = vadd.f32 %v14149_v49, %v9708_v55 }
 0x67c   : > { %v12715_v30 = vmul.f32 %v4837_v5, %v12578_v39  ;;  %v12724_v7 = vadd.f32 %v14151_v42, %v9710_v4  ;;  %v5736_v38 = vpop.f32.mrb[229].mxu0  ;;  %v12726_v8 = vpop.f32.mrb[230].mxu1  ;;  %7914 = vtanh.f32 %v4257_v0  ;;  %v3670_v48 = vmul.f32 %v3474_v15, %v12698_v1  ;;  %v14155_v49 = vld [vmem:[#allocation100_spill] sm:$0xff] }
 0x67d   : > { %14150 = vst [vmem:[#allocation89_spill] sm:$0xff] %v12720_v58  ;;  %14152 = vst [vmem:[#allocation91_spill] sm:$0xff] %v12726_v8  ;;  %v12729_v53 = vmul.f32 %v4839_v54, %v12585_v6  ;;  %v4063_v39 = vadd.f32 %v3867_v34, %v12677_v3  ;;  %v12733_v36 = vpop.f32.mrb[230].mxu0  ;;  %v5507_v28 = vpop.f32.mrb[231].mxu1  ;;  %v3476_v5 = vmul.f32 %v12710_v46, %v12710_v46  ;;  %v4256_v13 = vmul.f32 0.7978846, %v4060_v9 }
 0x67e   : > { %14148 = vst [vmem:[#allocation161_spill] sm:$0xff] %v12715_v30  ;;  %14154 = vst [vmem:[#allocation112_spill] sm:$0xff] %v12733_v36  ;;  %v12735_v55 = vpop.eup %7902  ;;  %v3477_v6 = vmul.f32 %v12720_v58, %v12720_v58  ;;  %v3479_v0 = vmul.f32 %v12724_v7, %v12724_v7  ;;  %v5739_v54 = vpop.f32.mrb[231].mxu0  ;;  %v3866_v23 = vmul.f32 0.044715, %v3670_v48  ;;  %v12751_v42 = vadd.f32 %v14155_v49, %v14064_v61 }
 0x67f   : > { %14153 = vst [vmem:[#allocation126_spill] sm:$0xff] %v12729_v53  ;;  %v12745_v34 = vpop.eup %7904  ;;  %v4259_v47 = vmul.f32 0.7978846, %v4063_v39  ;;  %v4254_v28 = vmul.f32 0.7978846, %v4058_v59  ;;  %v3672_v4 = vmul.f32 %v3476_v5, %v12710_v46  ;;  %v14156_v54 = vld [vmem:[#allocation205_spill] sm:$0xff] }
 0x680   : > { %v12753_v38 = vpop.eup %7906  ;;  %v3673_v36 = vmul.f32 %v3477_v6, %v12720_v58  ;;  %v12759_v18 = vadd.f32 %v14156_v54, %v14069_v43  ;;  %v4062_v39 = vadd.f32 %v3866_v23, %v12698_v1  ;;  %v3478_v61 = vmul.f32 %v12751_v42, %v12751_v42 }
 0x681   : > { %v7909_v8 = vpop.eup %7908  ;;  %7916 = vtanh.f32 %v4259_v47  ;;  %v3868_v59 = vmul.f32 0.044715, %v3672_v4  ;;  %v3675_v43 = vmul.f32 %v3479_v0, %v12724_v7  ;;  %v4622_v47 = vadd.f32 1.0, %v12500_v29 }
 0x682   : > { %v12764_v48 = vpop.eup %7910  ;;  %v4645_v49 = vadd.f32 1.0, %v7909_v8  ;;  %v3869_v15 = vmul.f32 0.044715, %v3673_v36  ;;  %v3480_v5 = vmul.f32 %v12759_v18, %v12759_v18  ;;  %v4258_v41 = vmul.f32 0.7978846, %v4062_v39 }
 0x683   : > { %v7913_v6 = vpop.eup %7912  ;;  %v3674_v9 = vmul.f32 %v3478_v61, %v12751_v42  ;;  %v4064_v54 = vadd.f32 %v3868_v59, %v12710_v46  ;;  %v4626_v8 = vadd.f32 1.0, %v12525_v20  ;;  %7918 = vtanh.f32 %v4254_v28 }
 0x684   : > { %v4647_v23 = vadd.f32 1.0, %v7913_v6  ;;  %v4065_v53 = vadd.f32 %v3869_v15, %v12720_v58  ;;  %v4841_v4 = vmul.f32 0.5, %v4645_v49  ;;  %v3676_v10 = vmul.f32 %v3480_v5, %v12759_v18  ;;  %v12776_v58 = vld [vmem:[#allocation17] ss:$0 sm:$0xff] }
 0x685   : > { %v3870_v36 = vmul.f32 0.044715, %v3674_v9  ;;  %7920 = vtanh.f32 %v4256_v13  ;;  %v4260_v39 = vmul.f32 0.7978846, %v4064_v54  ;;  %v4818_v6 = vmul.f32 0.5, %v4622_v47 }
 0x686   : > { %v4843_v1 = vmul.f32 0.5, %v4647_v23  ;;  %v7915_v0 = vpop.eup %7914  ;;  %v4261_v31 = vmul.f32 0.7978846, %v4065_v53  ;;  %v3872_v29 = vmul.f32 0.044715, %v3676_v10  ;;  %7922 = vtanh.f32 %v4258_v41 }
 0x687   : > { %v4066_v61 = vadd.f32 %v3870_v36, %v12751_v42  ;;  %v4649_v30 = vadd.f32 1.0, %v7915_v0  ;;  %v3871_v59 = vmul.f32 0.044715, %v3675_v43  ;;  %v4822_v15 = vmul.f32 0.5, %v4626_v8 }
 0x688   : > { %v12779_v20 = vmul.f32 %v4841_v4, %v12636_v12  ;;  %v12782_v28 = vmul.f32 %v4843_v1, %v12647_v44  ;;  %7924 = vtanh.f32 %v4260_v39  ;;  %v5014_v53 = vmul.f32 %v4818_v6, %v12332_v2  ;;  %v14160_v39 = vld [vmem:[#allocation29_spill] sm:$0xff] }
 0x689   : > { %v4262_v13 = vmul.f32 0.7978846, %v4066_v61  ;;  %v4845_v49 = vmul.f32 0.5, %v4649_v30  ;;  %v5018_v10 = vmul.f32 %v4822_v15, %v12379_v11  ;;  %v4624_v5 = vadd.f32 1.0, %v12510_v62  ;;  %v14157_v11 = vld [vmem:[#allocation88_spill] sm:$0xff]  ;;  %v14158_v62 = vld [vmem:[#allocation103_spill] sm:$0xff] }
 0x68a   : > { %7926 = vtanh.f32 %v4261_v31  ;;  %v4068_v43 = vadd.f32 %v3872_v29, %v12759_v18  ;;  %v4628_v9 = vadd.f32 1.0, %v12531_v22  ;;  %v5447_v12 = vadd.f32 %v12776_v58, %v12197_v26  ;;  %v14161_v61 = vld [vmem:[#allocation116_spill] sm:$0xff] }
 0x68b   : > { %v7917_v41 = vpop.eup %7916  ;;  %v12792_v44 = vmul.f32 %v4845_v49, %v12670_v14  ;;  %v5130_v30 = vpack.c.bf16 %v5018_v10, %v5014_v53  ;;  %v4820_v47 = vmul.f32 0.5, %v4624_v5  ;;  %7928 = vtanh.f32 %v4262_v13 }
 0x68c   : > { %v4651_v1 = vadd.f32 1.0, %v7917_v41  ;;  %v4824_v2 = vmul.f32 0.5, %v4628_v9  ;;  %v5679_v23 = vadd.f32 %v14157_v11, %v5447_v12  ;;  %v5450_v31 = vadd.f32 %v12776_v58, %v14158_v62 }
 0x68d   : > { %v5141_v54 = vpack.c.bf16 %v12792_v44, %v12779_v20  ;;  %5604 = vmatprep.mubr.bf16.mxu1 %v5130_v30  ;;  %v5016_v26 = vmul.f32 %v4820_v47, %v12356_v56  ;;  %v4630_v14 = vadd.f32 1.0, %v12588_v25  ;;  %v12801_v8 = vpop.eup %7918  ;;  %v14159_v36 = vpack.c.bf16 %v12542_v52, %v12523_v60  ;;  %v14162_v52 = vld [vmem:[#allocation30_spill] sm:$0xff] }
 0x68e   : > { %v4847_v22 = vmul.f32 0.5, %v4651_v1  ;;  %v5020_v4 = vmul.f32 %v4824_v2, %v12393_v16  ;;  %v5876_v0 = vadd.f32 %v5679_v23, %v14160_v39  ;;  %v5682_v29 = vadd.f32 %v14161_v61, %v5450_v31  ;;  %v14217_v44 = vld [vmem:[#allocation42_spill] sm:$0xff] }
 0x68f   : > { %5605 = vmatmul.mubr.bf16.gmra.mrb[24].mxu1 %v14159_v36  ;;  %v4634_v6 = vadd.f32 1.0, %v12653_v27  ;;  %v12810_v15 = vpop.eup %7920  ;;  %v4826_v25 = vmul.f32 0.5, %v4630_v14  ;;  %v4632_v13 = vadd.f32 1.0, %v12614_v51  ;;  %v4636_v16 = vadd.f32 1.0, %v12672_v35  ;;  %v12817_v49 = vpop.f32.mrb[232].mxu1 }
 0x690   : > { %v12813_v56 = vmul.f32 %v4847_v22, %v12677_v3  ;;  %v5132_v60 = vpack.c.bf16 %v5020_v4, %v5016_v26  ;;  %v5877_v53 = vadd.f32 %v5682_v29, %v14162_v52  ;;  %v5455_v5 = vadd.f32 %v12776_v58, %v12233_v50  ;;  %v5512_v27 = vpop.f32.mrb[233].mxu1  ;;  %v7923_v41 = vpop.eup %7922 }
 0x691   : > { %v4830_v10 = vmul.f32 0.5, %v4634_v6  ;;  %v5022_v9 = vmul.f32 %v4826_v25, %v12445_v32  ;;  %v4828_v12 = vmul.f32 0.5, %v4632_v13  ;;  %v4832_v51 = vmul.f32 0.5, %v4636_v16  ;;  %v12825_v1 = vpop.f32.mrb[232].mxu0  ;;  %v12827_v35 = vpop.f32.mrb[234].mxu1 }
 0x692   : > { %v5143_v3 = vpack.c.bf16 %v12813_v56, %v12782_v28  ;;  %v12829_v30 = vpop.eup %7924  ;;  %5836 = vmatprep.mubr.bf16.mxu0 %v5132_v60  ;;  %v6748_v47 = vpack.c.bf16 %v5877_v53, %v5876_v0  ;;  %v5687_v2 = vadd.f32 %v12235_v40, %v5455_v5  ;;  %v5458_v11 = vadd.f32 %v12776_v58, %v12243_v33  ;;  %v5744_v23 = vpop.f32.mrb[233].mxu0  ;;  %v14165_v0 = vld [vmem:[#allocation32_spill] sm:$0xff] }
 0x693   : > { %v5026_v50 = vmul.f32 %v4830_v10, %v12480_v57  ;;  %v5515_v32 = vpop.f32.mrb[235].mxu1  ;;  %v4067_v62 = vadd.f32 %v3871_v59, %v12724_v7  ;;  %v14163_v31 = vpack.c.bf16 %v12550_v45, %v12528_v37  ;;  %v5024_v22 = vmul.f32 %v4828_v12, %v12454_v63  ;;  %v12842_v57 = vpop.f32.mrb[234].mxu0  ;;  %v14169_v10 = vld [vmem:[#allocation155_spill] sm:$0xff]  ;;  %v14172_v12 = vld [vmem:[#allocation218_spill] sm:$0xff] }
 0x694   : > { %v5028_v26 = vmul.f32 %v4832_v51, %v12492_v19  ;;  %v4638_v14 = vadd.f32 1.0, %v12735_v55  ;;  %v7927_v40 = vpop.eup %7926  ;;  %v4264_v4 = vmul.f32 0.7978846, %v4068_v43  ;;  %6749 = vst [vmem:[%s12846_s25] sm:$0xff] %v6748_v47   ;;  %v5690_v59 = vadd.f32 %v12245_v17, %v5458_v11  ;;  %v5747_v37 = vpop.f32.mrb[235].mxu0  ;;  %v14164_v55 = vld [vmem:[#allocation31_spill] sm:$0xff]  ;;  %v14166_v17 = vld [vmem:[#allocation128_spill] sm:$0xff] }
 0x695   : > { %5837 = vmatmul.mubr.bf16.gmra.mrb[24].mxu0 %v14163_v31  ;;  %v5134_v33 = vpack.c.bf16 %v5026_v50, %v5022_v9  ;;  %v4642_v63 = vadd.f32 1.0, %v12753_v38  ;;  %v7929_v19 = vpop.eup %7928  ;;  %v5878_v39 = vadd.f32 %v5687_v2, %v14164_v55  ;;  %v4640_v43 = vadd.f32 1.0, %v12745_v34  ;;  %v14168_v38 = vld [vmem:[#allocation217_spill] sm:$0xff]  ;;  %v14170_v34 = vld [vmem:[#allocation84_spill] sm:$0xff]  ;;  %v14174_v2 = vld [vmem:[#allocation146_spill] sm:$0xff] }
 0x696   : > { %v5136_v45 = vpack.c.bf16 %v5028_v26, %v5024_v22  ;;  %v4834_v36 = vmul.f32 0.5, %v4638_v14  ;;  %v5879_v61 = vadd.f32 %v5690_v59, %v14165_v0  ;;  %v4644_v29 = vadd.f32 1.0, %v12764_v48  ;;  %v14171_v9 = vld [vmem:[#allocation224_spill] sm:$0xff]  ;;  %v14175_v32 = vld [vmem:[#allocation107_spill] sm:$0xff]  ;;  %v14178_v26 = vld [vmem:[#allocation33_spill] sm:$0xff] }
 0x697   : > { %5612 = vmatprep.mubr.bf16.mxu1 %v5134_v33  ;;  %v4263_v6 = vmul.f32 0.7978846, %v4067_v62  ;;  %v14167_v25 = vpack.c.bf16 %v12620_v24, %v14166_v17  ;;  %v4838_v13 = vmul.f32 0.5, %v4642_v63  ;;  %v5463_v16 = vadd.f32 %v12776_v58, %v14168_v38  ;;  %v14173_v24 = vld [vmem:[#allocation127_spill] sm:$0xff]  ;;  %v14176_v62 = vld [vmem:[#allocation124_spill] sm:$0xff]  ;;  %v14181_v55 = vld [vmem:[#allocation34_spill] sm:$0xff] }
 0x698   : > { %5844 = vmatprep.mubr.bf16.mxu0 %v5136_v45  ;;  %7930 = vtanh.f32 %v4264_v4  ;;  %v6753_v60 = vpack.c.bf16 %v5879_v61, %v5878_v39  ;;  %v4836_v52 = vmul.f32 0.5, %v4640_v43  ;;  %v4840_v53 = vmul.f32 0.5, %v4644_v29  ;;  %v14179_v4 = vld [vmem:[#allocation226_spill] sm:$0xff]  ;;  %v14182_v0 = vld [vmem:[#allocation61_spill] sm:$0xff] }
 0x699   : > { %5613 = vmatmul.mubr.bf16.gmra.mrb[28].mxu1 %v14167_v25  ;;  %v5030_v5 = vmul.f32 %v4834_v36, %v14169_v10  ;;  %v5034_v27 = vmul.f32 %v4838_v13, %v14170_v34  ;;  %v5695_v48 = vadd.f32 %v14171_v9, %v5463_v16  ;;  %v5466_v51 = vadd.f32 %v12776_v58, %v14172_v12  ;;  %v14184_v38 = vld [vmem:[#allocation161_spill] sm:$0xff]  ;;  %v14189_v9 = vld [vmem:[#allocation214_spill] sm:$0xff]  ;;  %v14190_v12 = vld [vmem:[#allocation35_spill] sm:$0xff] }
 0x69a   : > { %v4653_v47 = vadd.f32 1.0, %v7927_v40  ;;  %6888 = vst [vmem:[%s12846_s25 + $0x8] sm:$0xff] %v6753_v60   ;;  %v5032_v50 = vmul.f32 %v4836_v52, %v14173_v24  ;;  %v5036_v11 = vmul.f32 %v4840_v53, %v14174_v2  ;;  %v4646_v23 = vadd.f32 1.0, %v12801_v8  ;;  %v14180_v40 = vld [vmem:[#allocation59_spill] sm:$0xff]  ;;  %v14187_v52 = vld [vmem:[#allocation96_spill] sm:$0xff]  ;;  %v14188_v10 = vld [vmem:[#allocation105_spill] sm:$0xff] }
 0x69b   : > { %v14177_v31 = vpack.c.bf16 %v14175_v32, %v14176_v62  ;;  %v5138_v22 = vpack.c.bf16 %v5034_v27, %v5030_v5  ;;  %v5880_v14 = vadd.f32 %v5695_v48, %v14178_v26  ;;  %v5698_v33 = vadd.f32 %v14179_v4, %v5466_v51  ;;  %v14191_v51 = vld [vmem:[#allocation36_spill] sm:$0xff]  ;;  %v14193_v32 = vld [vmem:[#allocation130_spill] sm:$0xff] }
 0x69c   : > { %v4650_v59 = vadd.f32 1.0, %v7923_v41  ;;  %v5140_v37 = vpack.c.bf16 %v5036_v11, %v5032_v50  ;;  %v4842_v45 = vmul.f32 0.5, %v4646_v23  ;;  %v5471_v63 = vadd.f32 %v12776_v58, %v14180_v40  ;;  %v14183_v41 = vld [vmem:[#allocation101_spill] sm:$0xff]  ;;  %v14192_v50 = vld [vmem:[#allocation216_spill] sm:$0xff]  ;;  %v14195_v26 = vld [vmem:[#allocation126_spill] sm:$0xff] }
 0x69d   : > { %5845 = vmatmul.mubr.bf16.gmra.mrb[28].mxu0 %v14177_v31  ;;  %v4654_v36 = vadd.f32 1.0, %v7929_v19  ;;  %5620 = vmatprep.mubr.bf16.mxu1 %v5138_v22  ;;  %v5881_v39 = vadd.f32 %v5698_v33, %v14181_v55  ;;  %v5474_v61 = vadd.f32 %v12776_v58, %v14182_v0  ;;  %v4648_v43 = vadd.f32 1.0, %v12810_v15  ;;  %v14185_v19 = vld [vmem:[#allocation113_spill] sm:$0xff]  ;;  %v14194_v31 = vld [vmem:[#allocation220_spill] sm:$0xff]  ;;  %v14203_v0 = vld [vmem:[#allocation150_spill] sm:$0xff] }
 0x69e   : > { %v4846_v8 = vmul.f32 0.5, %v4650_v59  ;;  %5852 = vmatprep.mubr.bf16.mxu0 %v5140_v37  ;;  %v5038_v29 = vmul.f32 %v4842_v45, %v12651_v21  ;;  %v5703_v17 = vadd.f32 %v14183_v41, %v5471_v63  ;;  %v4652_v13 = vadd.f32 1.0, %v12829_v30  ;;  %v14198_v59 = vld [vmem:[#allocation221_spill] sm:$0xff]  ;;  %v14199_v45 = vld [vmem:[#allocation148_spill] sm:$0xff] }
 0x69f   : > { %v4850_v25 = vmul.f32 0.5, %v4654_v36  ;;  %v14186_v16 = vpack.c.bf16 %v14184_v38, %v14185_v19  ;;  %v6758_v60 = vpack.c.bf16 %v5881_v39, %v5880_v14  ;;  %v5706_v5 = vadd.f32 %v14188_v10, %v5474_v61  ;;  %v14196_v14 = vld [vmem:[#allocation90_spill] sm:$0xff]  ;;  %v14201_v55 = vld [vmem:[#allocation160_spill] sm:$0xff]  ;;  %v14207_v38 = vld [vmem:[#allocation125_spill] sm:$0xff] }
 0x6a0   : > { %v5042_v53 = vmul.f32 %v4846_v8, %v14187_v52  ;;  %v4844_v34 = vmul.f32 0.5, %v4648_v43  ;;  %v4848_v27 = vmul.f32 0.5, %v4652_v13  ;;  %v5479_v21 = vadd.f32 %v12776_v58, %v14189_v9  ;;  %v14202_v39 = vld [vmem:[#allocation38_spill] sm:$0xff]  ;;  %v14205_v41 = vld [vmem:[#allocation108_spill] sm:$0xff]  ;;  %v14209_v52 = vld [vmem:[#allocation91_spill] sm:$0xff] }
 0x6a1   : > { %5621 = vmatmul.mubr.bf16.gmra.mrb[32].mxu1 %v14186_v16  ;;  %v5046_v15 = vmul.f32 %v4850_v25, %v12751_v42  ;;  %6889 = vst [vmem:[%s12846_s25 + $0x10] sm:$0xff] %v6758_v60   ;;  %v5882_v30 = vadd.f32 %v5703_v17, %v14190_v12  ;;  %v5883_v24 = vadd.f32 %v5706_v5, %v14191_v51  ;;  %v4849_v23 = vmul.f32 0.5, %v4653_v47  ;;  %v14204_v43 = vld [vmem:[#allocation134_spill] sm:$0xff]  ;;  %v14206_v25 = vld [vmem:[#allocation89_spill] sm:$0xff]  ;;  %v14208_v16 = vld [vmem:[#allocation132_spill] sm:$0xff] }
 0x6a2   : > { %v5142_v48 = vpack.c.bf16 %v5042_v53, %v5038_v29  ;;  %v5482_v2 = vadd.f32 %v12776_v58, %v14192_v50  ;;  %v7931_v11 = vpop.eup %7930  ;;  %v12897_v62 = vmul.f32 %v4844_v34, %v14193_v32  ;;  %v12900_v42 = vmul.f32 %v4848_v27, %v12710_v46  ;;  %v14200_v46 = vld [vmem:[#allocation37_spill] sm:$0xff]  ;;  %v14211_v27 = vld [vmem:[#allocation139_spill] sm:$0xff]  ;;  %v14213_v12 = vld [vmem:[#allocation40_spill] sm:$0xff] }
 0x6a3   : > { %v5711_v22 = vadd.f32 %v14194_v31, %v5479_v21  ;;  %7932 = vtanh.f32 %v4263_v6  ;;  %v14197_v4 = vpack.c.bf16 %v14195_v26, %v14196_v14  ;;  %v6763_v33 = vpack.c.bf16 %v5883_v24, %v5882_v30  ;;  %v14210_v34 = vld [vmem:[#allocation93_spill] sm:$0xff]  ;;  %v14212_v21 = vld [vmem:[#allocation39_spill] sm:$0xff]  ;;  %v14214_v51 = vld [vmem:[#allocation156_spill] sm:$0xff] }
 0x6a4   : > { %5628 = vmatprep.mubr.bf16.mxu1 %v5142_v48  ;;  %v5714_v37 = vadd.f32 %v14198_v59, %v5482_v2  ;;  %v5487_v47 = vadd.f32 %v12776_v58, %v14199_v45  ;;  %v5146_v40 = vpack.c.bf16 %v5046_v15, %v5046_v15  ;;  %v5144_v63 = vpack.c.bf16 %v12900_v42, %v12897_v62  ;;  %v14215_v50 = vld [vmem:[#allocation112_spill] sm:$0xff]  ;;  %v14218_v31 = vld [vmem:[#allocation43_spill] sm:$0xff] }
 0x6a5   : > { %5853 = vmatmul.mubr.bf16.gmra.mrb[32].mxu0 %v14197_v4  ;;  %v5884_v36 = vadd.f32 %v5711_v22, %v14200_v46  ;;  %v5490_v6 = vadd.f32 %v12776_v58, %v14201_v55  ;;  %6890 = vst [vmem:[%s12846_s25 + $0x18] sm:$0xff] %v6763_v33   ;;  %v5495_v29 = vadd.f32 %v12776_v58, %v14204_v43  ;;  %v4656_v5 = vadd.f32 1.0, %v7931_v11  ;;  %v14219_v26 = vld [vmem:[#allocation44_spill] sm:$0xff] }
 0x6a6   : > { %v5885_v8 = vadd.f32 %v5714_v37, %v14202_v39  ;;  %v5719_v61 = vadd.f32 %v14203_v0, %v5487_v47  ;;  %v5498_v17 = vadd.f32 %v12776_v58, %v14205_v41  ;;  %v5045_v13 = vmul.f32 %v4849_v23, %v14206_v25  ;;  %v14216_v23 = vld [vmem:[#allocation41_spill] sm:$0xff]  ;;  %v14222_v25 = vld [vmem:[#allocation47_spill] sm:$0xff] }
 0x6a7   : > { %v5722_v19 = vadd.f32 %v14207_v38, %v5490_v6  ;;  %v5503_v60 = vadd.f32 %v12776_v58, %v14208_v16  ;;  %v5506_v53 = vadd.f32 %v12776_v58, %v14209_v52  ;;  %v5727_v15 = vadd.f32 %v14210_v34, %v5495_v29 }
 0x6a8   : > { %v6768_v10 = vpack.c.bf16 %v5885_v8, %v5884_v36  ;;  %v5730_v9 = vadd.f32 %v14211_v27, %v5498_v17  ;;  %v5886_v48 = vadd.f32 %v5719_v61, %v14212_v21  ;;  %v5511_v11 = vadd.f32 %v12776_v58, %v12817_v49  ;;  %v5518_v62 = vpop.f32.mrb[236].mxu1  ;;  %v14220_v8 = vld [vmem:[#allocation45_spill] sm:$0xff]  ;;  %v14221_v61 = vld [vmem:[#allocation46_spill] sm:$0xff] }
 0x6a9   : > { %5629 = vmatmul.mubr.bf16.gmra.mrb[36].mxu1 %v5141_v54  ;;  %v5887_v30 = vadd.f32 %v5722_v19, %v14213_v12  ;;  %v5735_v24 = vadd.f32 %v14214_v51, %v5503_v60  ;;  %v5738_v2 = vadd.f32 %v14215_v50, %v5506_v53  ;;  %v5888_v20 = vadd.f32 %v5727_v15, %v14216_v23  ;;  %v5520_v33 = vpop.f32.mrb[237].mxu1  ;;  %v14223_v19 = vld [vmem:[#allocation48_spill] sm:$0xff] }
 0x6aa   : > { %5636 = vmatprep.mubr.bf16.mxu1 %v5146_v40  ;;  %6891 = vst [vmem:[%s12846_s25 + $0x20] sm:$0xff] %v6768_v10   ;;  %v5889_v54 = vadd.f32 %v5730_v9, %v14217_v44  ;;  %v5514_v32 = vadd.f32 %v12776_v58, %v12827_v35  ;;  %v5519_v4 = vadd.f32 %v12776_v58, %v5518_v62  ;;  %v5750_v49 = vpop.f32.mrb[236].mxu0  ;;  %v5521_v47 = vpop.f32.mrb[238].mxu1  ;;  %v4852_v43 = vmul.f32 0.5, %v4656_v5 }
 0x6ab   : > { %v6773_v42 = vpack.c.bf16 %v5887_v30, %v5886_v48  ;;  %v5890_v22 = vadd.f32 %v5735_v24, %v14218_v31  ;;  %v5891_v14 = vadd.f32 %v5738_v2, %v14219_v26  ;;  %v5743_v37 = vadd.f32 %v12825_v1, %v5511_v11  ;;  %v5752_v46 = vpop.f32.mrb[237].mxu0  ;;  %v5523_v55 = vpop.f32.mrb[239].mxu1 }
 0x6ac   : > { %v6778_v59 = vpack.c.bf16 %v5889_v54, %v5888_v20  ;;  %v5746_v45 = vadd.f32 %v12842_v57, %v5514_v32  ;;  %v5751_v40 = vadd.f32 %v5750_v49, %v5519_v4  ;;  %v5522_v36 = vadd.f32 %v12776_v58, %v5521_v47  ;;  %v5753_v57 = vpop.f32.mrb[238].mxu0  ;;  %v14226_v4 = vld [vmem:[#allocation51_spill] sm:$0xff] }
 0x6ad   : > { %6892 = vst [vmem:[%s12846_s25 + $0x28] sm:$0xff] %v6773_v42   ;;  %v6783_v35 = vpack.c.bf16 %v5891_v14, %v5890_v22  ;;  %v7933_v6 = vpop.eup %7932  ;;  %v5145_v39 = vpack.c.bf16 %v5045_v13, %v5045_v13  ;;  %v5892_v0 = vadd.f32 %v5743_v37, %v14220_v8  ;;  %v5755_v41 = vpop.f32.mrb[239].mxu0  ;;  %v5048_v13 = vmul.f32 %v4852_v43, %v12759_v18  ;;  %v14229_v43 = vld [vmem:[#allocation54_spill] sm:$0xff] }
 0x6ae   : > { %6893 = vst [vmem:[%s12846_s25 + $0x30] sm:$0xff] %v6778_v59   ;;  %v5893_v1 = vadd.f32 %v5746_v45, %v14221_v61  ;;  %v5754_v29 = vadd.f32 %v5753_v57, %v5522_v36  ;;  %v5894_v38 = vadd.f32 %v5751_v40, %v14222_v25  ;;  %v4655_v60 = vadd.f32 1.0, %v7933_v6  ;;  %v14227_v59 = vld [vmem:[#allocation52_spill] sm:$0xff] }
 0x6af   : > { %6894 = vst [vmem:[%s12846_s25 + $0x38] sm:$0xff] %v6783_v35   ;;  %v5148_v10 = vpack.c.bf16 %v5048_v13, %v5048_v13 }
 0x6b0   : > { %v6788_v17 = vpack.c.bf16 %v5893_v1, %v5892_v0  ;;  %v5895_v16 = vadd.f32 %v5754_v29, %v14223_v19  ;;  %v4851_v53 = vmul.f32 0.5, %v4655_v60  ;;  %v14228_v1 = vld [vmem:[#allocation53_spill] sm:$0xff] }
 0x6b1   : > { %5637 = vmatmul.mubr.bf16.gmra.mrb[40].mxu1 %v5145_v39 }
 0x6b2   : > { %5860 = vmatprep.mubr.bf16.mxu1 %v5144_v63  ;;  %6895 = vst [vmem:[%s12846_s25 + $0x40] sm:$0xff] %v6788_v17   ;;  %v6793_v52 = vpack.c.bf16 %v5895_v16, %v5894_v38  ;;  %v5047_v5 = vmul.f32 %v4851_v53, %v12724_v7  ;;  %v14225_v7 = vld [vmem:[#allocation50_spill] sm:$0xff] }
 0x6b4   : > { %6896 = vst [vmem:[%s12846_s25 + $0x48] sm:$0xff] %v6793_v52   ;;  %v5147_v63 = vpack.c.bf16 %v5047_v5, %v5047_v5 }
 0x6b9   : > { %5861 = vmatmul.mubr.bf16.vlgmr.msra.gmra.mrb[44].mxu1 %v5143_v3  ;;  %v14224_v3 = vld [vmem:[#allocation49_spill] sm:$0xff] }
 0x6ba   : > { %5868 = vmatprep.mubr.bf16.mxu1 %v5148_v10 }
 0x6c0   : > { %v5526_v34 = vpop.f32.mrb[240].mxu1 }
 0x6c1   : > { %5869 = vmatmul.mubr.bf16.gmra.mrb[48].mxu1 %v5147_v63  ;;  %v5527_v15 = vadd.f32 %v12776_v58, %v5526_v34  ;;  %v5528_v27 = vpop.f32.mrb[241].mxu1  ;;  %v14230_v34 = vld [vmem:[#allocation55_spill] sm:$0xff] }
 0x6c2   : > { %v5758_v9 = vpop.f32.mrb[240].mxu0  ;;  %v5529_v18 = vpop.f32.mrb[242].mxu1  ;;  %v14231_v27 = vld [vmem:[#allocation56_spill] sm:$0xff] }
 0x6c3   : > { %v5759_v21 = vadd.f32 %v5758_v9, %v5527_v15  ;;  %v5760_v48 = vpop.f32.mrb[241].mxu0  ;;  %v5530_v12 = vadd.f32 %v12776_v58, %v5529_v18  ;;  %v5531_v30 = vpop.f32.mrb[243].mxu1 }
 0x6c4   : > { %v5761_v51 = vpop.f32.mrb[242].mxu0 }
 0x6c5   : > { %v5762_v28 = vadd.f32 %v5761_v51, %v5530_v12  ;;  %v5763_v56 = vpop.f32.mrb[243].mxu0  ;;  %v5896_v24 = vadd.f32 %v5759_v21, %v14224_v3 }
 0x6c7   : > { %v5897_v50 = vadd.f32 %v5762_v28, %v14225_v7 }
 0x6c9   : > { %v6798_v2 = vpack.c.bf16 %v5897_v50, %v5896_v24 }
 0x6cb   : > { %6897 = vst [vmem:[%s12846_s25 + $0x50] sm:$0xff] %v6798_v2  }
 0x6d8   : > { %v5534_v23 = vpop.f32.mrb[244].mxu1 }
 0x6d9   : > { %v5535_v20 = vadd.f32 %v12776_v58, %v5534_v23  ;;  %v5536_v44 = vpop.f32.mrb[245].mxu1  ;;  %v14232_v23 = vld [vmem:[#allocation57_spill] sm:$0xff] }
 0x6da   : > { %v5537_v54 = vpop.f32.mrb[246].mxu1  ;;  %v14233_v44 = vld [vmem:[#allocation58_spill] sm:$0xff] }
 0x6db   : > { %v5766_v11 = vpop.f32.mrb[244].mxu0  ;;  %v5538_v32 = vadd.f32 %v12776_v58, %v5537_v54  ;;  %v5539_v62 = vpop.f32.mrb[247].mxu1 }
 0x6dc   : > { %v5767_v42 = vadd.f32 %v5766_v11, %v5535_v20  ;;  %v5768_v31 = vpop.f32.mrb[245].mxu0 }
 0x6dd   : > { %v5769_v22 = vpop.f32.mrb[246].mxu0 }
 0x6de   : > { %v5770_v26 = vadd.f32 %v5769_v22, %v5538_v32  ;;  %v5771_v14 = vpop.f32.mrb[247].mxu0  ;;  %v5898_v33 = vadd.f32 %v5767_v42, %v14226_v4 }
 0x6e0   : > { %v5899_v37 = vadd.f32 %v5770_v26, %v14227_v59 }
 0x6e2   : > { %v6803_v45 = vpack.c.bf16 %v5899_v37, %v5898_v33 }
 0x6e4   : > { %6898 = vst [vmem:[%s12846_s25 + $0x58] sm:$0xff] %v6803_v45  }
 0x6f2   : > { %v5542_v49 = vpop.f32.mrb[248].mxu1 }
 0x6f3   : > { %v5543_v47 = vadd.f32 %v12776_v58, %v5542_v49  ;;  %v5544_v35 = vpop.f32.mrb[249].mxu1  ;;  %v5774_v40 = vpop.f32.mrb[248].mxu0  ;;  %v14234_v49 = vld [vmem:[#allocation60_spill] sm:$0xff] }
 0x6f4   : > { %v5545_v46 = vpop.f32.mrb[250].mxu1  ;;  %v5776_v55 = vpop.f32.mrb[249].mxu0  ;;  %v14235_v35 = vld [vmem:[#allocation62_spill] sm:$0xff] }
 0x6f5   : > { %v5775_v36 = vadd.f32 %v5774_v40, %v5543_v47  ;;  %v5546_v6 = vadd.f32 %v12776_v58, %v5545_v46  ;;  %v5547_v39 = vpop.f32.mrb[251].mxu1  ;;  %v5777_v8 = vpop.f32.mrb[250].mxu0 }
 0x6f6   : > { %v5779_v61 = vpop.f32.mrb[251].mxu0 }
 0x6f7   : > { %v5778_v0 = vadd.f32 %v5777_v8, %v5546_v6  ;;  %v5900_v57 = vadd.f32 %v5775_v36, %v14228_v1 }
 0x6f9   : > { %v5901_v29 = vadd.f32 %v5778_v0, %v14229_v43 }
 0x6fb   : > { %v6808_v41 = vpack.c.bf16 %v5901_v29, %v5900_v57 }
 0x6fc   : > { %v5550_v17 = vpop.f32.mrb[252].mxu1 }
 0x6fd   : > { %6899 = vst [vmem:[%s12846_s25 + $0x60] sm:$0xff] %v6808_v41   ;;  %v5551_v25 = vadd.f32 %v12776_v58, %v5550_v17  ;;  %v5552_v38 = vpop.f32.mrb[253].mxu1  ;;  %v14236_v17 = vld [vmem:[#allocation64_spill] sm:$0xff] }
 0x6fe   : > { %v5782_v19 = vpop.f32.mrb[252].mxu0  ;;  %v5553_v16 = vpop.f32.mrb[254].mxu1  ;;  %v14237_v38 = vld [vmem:[#allocation65_spill] sm:$0xff] }
 0x6ff   : > { %v5783_v60 = vadd.f32 %v5782_v19, %v5551_v25  ;;  %v5784_v13 = vpop.f32.mrb[253].mxu0  ;;  %v5554_v52 = vadd.f32 %v12776_v58, %v5553_v16  ;;  %v5555_v53 = vpop.f32.mrb[255].mxu1 }
 0x700   : > { %v5785_v10 = vpop.f32.mrb[254].mxu0 }
 0x701   : > { %v5786_v5 = vadd.f32 %v5785_v10, %v5554_v52  ;;  %v5787_v63 = vpop.f32.mrb[255].mxu0  ;;  %v5902_v15 = vadd.f32 %v5783_v60, %v14230_v34 }
 0x703   : > { %v5903_v9 = vadd.f32 %v5786_v5, %v14231_v27 }
 0x705   : > { %v6813_v21 = vpack.c.bf16 %v5903_v9, %v5902_v15 }
 0x706   : > { %v5558_v18 = vpop.f32.mrb[0].mxu1 }
 0x707   : > { %v5559_v48 = vadd.f32 %v12776_v58, %v5558_v18  ;;  %v5560_v12 = vpop.f32.mrb[1].mxu1  ;;  %6900 = vst [vmem:[%s12846_s25 + $0x68] sm:$0xff] %v6813_v21   ;;  %v14238_v21 = vld [vmem:[#allocation66_spill] sm:$0xff] }
 0x708   : > { %v5790_v30 = vpop.f32.mrb[0].mxu0  ;;  %v5561_v51 = vpop.f32.mrb[2].mxu1  ;;  %v14239_v12 = vld [vmem:[#allocation67_spill] sm:$0xff] }
 0x709   : > { %v5791_v28 = vadd.f32 %v5790_v30, %v5559_v48  ;;  %v5792_v56 = vpop.f32.mrb[1].mxu0  ;;  %v5562_v3 = vadd.f32 %v12776_v58, %v5561_v51  ;;  %v5563_v24 = vpop.f32.mrb[3].mxu1 }
 0x70a   : > { %v5793_v7 = vpop.f32.mrb[2].mxu0 }
 0x70b   : > { %v5794_v50 = vadd.f32 %v5793_v7, %v5562_v3  ;;  %v5795_v2 = vpop.f32.mrb[3].mxu0  ;;  %v5904_v20 = vadd.f32 %v5791_v28, %v14232_v23 }
 0x70d   : > { %v5905_v54 = vadd.f32 %v5794_v50, %v14233_v44 }
 0x70e   : > { %v5566_v11 = vpop.f32.mrb[4].mxu1 }
 0x70f   : > { %v6818_v32 = vpack.c.bf16 %v5905_v54, %v5904_v20  ;;  %v5567_v62 = vadd.f32 %v12776_v58, %v5566_v11  ;;  %v5568_v42 = vpop.f32.mrb[5].mxu1 }
 0x710   : > { %v5798_v31 = vpop.f32.mrb[4].mxu0  ;;  %v5569_v22 = vpop.f32.mrb[6].mxu1  ;;  %v14241_v42 = vld [vmem:[#allocation69_spill] sm:$0xff] }
 0x711   : > { %6901 = vst [vmem:[%s12846_s25 + $0x70] sm:$0xff] %v6818_v32   ;;  %v5799_v26 = vadd.f32 %v5798_v31, %v5567_v62  ;;  %v5800_v14 = vpop.f32.mrb[5].mxu0  ;;  %v5570_v4 = vadd.f32 %v12776_v58, %v5569_v22  ;;  %v5571_v33 = vpop.f32.mrb[7].mxu1  ;;  %v14240_v32 = vld [vmem:[#allocation68_spill] sm:$0xff] }
 0x712   : > { %v5801_v59 = vpop.f32.mrb[6].mxu0 }
 0x713   : > { %v5802_v37 = vadd.f32 %v5801_v59, %v5570_v4  ;;  %v5803_v45 = vpop.f32.mrb[7].mxu0  ;;  %v5906_v47 = vadd.f32 %v5799_v26, %v14234_v49 }
 0x715   : > { %v5907_v40 = vadd.f32 %v5802_v37, %v14235_v35 }
 0x716   : > { %v5574_v46 = vpop.f32.mrb[8].mxu1 }
 0x717   : > { %v6823_v36 = vpack.c.bf16 %v5907_v40, %v5906_v47  ;;  %v5575_v55 = vadd.f32 %v12776_v58, %v5574_v46  ;;  %v5576_v6 = vpop.f32.mrb[9].mxu1 }
 0x718   : > { %v5577_v8 = vpop.f32.mrb[10].mxu1  ;;  %v14243_v6 = vld [vmem:[#allocation71_spill] sm:$0xff] }
 0x719   : > { %v5806_v39 = vpop.f32.mrb[8].mxu0  ;;  %6902 = vst [vmem:[%s12846_s25 + $0x78] sm:$0xff] %v6823_v36   ;;  %v5578_v1 = vadd.f32 %v12776_v58, %v5577_v8  ;;  %v5579_v57 = vpop.f32.mrb[11].mxu1  ;;  %v14242_v36 = vld [vmem:[#allocation70_spill] sm:$0xff] }
 0x71a   : > { %v5807_v0 = vadd.f32 %v5806_v39, %v5575_v55  ;;  %v5808_v61 = vpop.f32.mrb[9].mxu0 }
 0x71b   : > { %v5809_v43 = vpop.f32.mrb[10].mxu0 }
 0x71c   : > { %v5810_v29 = vadd.f32 %v5809_v43, %v5578_v1  ;;  %v5811_v41 = vpop.f32.mrb[11].mxu0  ;;  %v5908_v25 = vadd.f32 %v5807_v0, %v14236_v17 }
 0x71e   : > { %v5909_v19 = vadd.f32 %v5810_v29, %v14237_v38 }
 0x71f   : > { %v5582_v16 = vpop.f32.mrb[12].mxu1 }
 0x720   : > { %v6828_v60 = vpack.c.bf16 %v5909_v19, %v5908_v25  ;;  %v5583_v13 = vadd.f32 %v12776_v58, %v5582_v16  ;;  %v5584_v52 = vpop.f32.mrb[13].mxu1 }
 0x721   : > { %v5814_v53 = vpop.f32.mrb[12].mxu0  ;;  %v5585_v10 = vpop.f32.mrb[14].mxu1 }
 0x722   : > { %6903 = vst [vmem:[%s12846_s25 + $0x80] sm:$0xff] %v6828_v60   ;;  %v5815_v5 = vadd.f32 %v5814_v53, %v5583_v13  ;;  %v5816_v63 = vpop.f32.mrb[13].mxu0  ;;  %v5586_v34 = vadd.f32 %v12776_v58, %v5585_v10  ;;  %v5587_v15 = vpop.f32.mrb[15].mxu1  ;;  %v14244_v13 = vld [vmem:[#allocation72_spill] sm:$0xff]  ;;  %v14245_v53 = vld [vmem:[#allocation74_spill] sm:$0xff] }
 0x723   : > { %v5817_v27 = vpop.f32.mrb[14].mxu0 }
 0x724   : > { %v5818_v9 = vadd.f32 %v5817_v27, %v5586_v34  ;;  %v5819_v18 = vpop.f32.mrb[15].mxu0  ;;  %v5910_v48 = vadd.f32 %v5815_v5, %v14238_v21 }
 0x726   : > { %v5911_v30 = vadd.f32 %v5818_v9, %v14239_v12 }
 0x727   : > { %v5590_v51 = vpop.f32.mrb[16].mxu1 }
 0x728   : > { %v6833_v28 = vpack.c.bf16 %v5911_v30, %v5910_v48  ;;  %v5591_v56 = vadd.f32 %v12776_v58, %v5590_v51  ;;  %v5592_v3 = vpop.f32.mrb[17].mxu1 }
 0x729   : > { %v5593_v7 = vpop.f32.mrb[18].mxu1 }
 0x72a   : > { %v5822_v24 = vpop.f32.mrb[16].mxu0  ;;  %6904 = vst [vmem:[%s12846_s25 + $0x88] sm:$0xff] %v6833_v28   ;;  %v5594_v23 = vadd.f32 %v12776_v58, %v5593_v7  ;;  %v5595_v20 = vpop.f32.mrb[19].mxu1 }
 0x72b   : > { %v5823_v50 = vadd.f32 %v5822_v24, %v5591_v56  ;;  %v5824_v2 = vpop.f32.mrb[17].mxu0  ;;  %v14246_v56 = vld [vmem:[#allocation76_spill] sm:$0xff]  ;;  %v14247_v24 = vld [vmem:[#allocation77_spill] sm:$0xff] }
 0x72c   : > { %v5825_v44 = vpop.f32.mrb[18].mxu0 }
 0x72d   : > { %v5826_v54 = vadd.f32 %v5825_v44, %v5594_v23  ;;  %v5827_v11 = vpop.f32.mrb[19].mxu0  ;;  %v5912_v62 = vadd.f32 %v5823_v50, %v14240_v32 }
 0x72f   : > { %v5913_v31 = vadd.f32 %v5826_v54, %v14241_v42 }
 0x730   : > { %v5598_v22 = vpop.f32.mrb[20].mxu1 }
 0x731   : > { %v6838_v26 = vpack.c.bf16 %v5913_v31, %v5912_v62  ;;  %v5599_v14 = vadd.f32 %v12776_v58, %v5598_v22  ;;  %v5600_v4 = vpop.f32.mrb[21].mxu1 }
 0x732   : > { %v5830_v33 = vpop.f32.mrb[20].mxu0  ;;  %v5601_v59 = vpop.f32.mrb[22].mxu1 }
 0x733   : > { %6905 = vst [vmem:[%s12846_s25 + $0x90] sm:$0xff] %v6838_v26   ;;  %v5831_v37 = vadd.f32 %v5830_v33, %v5599_v14  ;;  %v5832_v45 = vpop.f32.mrb[21].mxu0  ;;  %v5602_v49 = vadd.f32 %v12776_v58, %v5601_v59  ;;  %v5603_v47 = vpop.f32.mrb[23].mxu1  ;;  %v14248_v14 = vld [vmem:[#allocation78_spill] sm:$0xff]  ;;  %v14249_v33 = vld [vmem:[#allocation79_spill] sm:$0xff] }
 0x734   : > { %v5833_v35 = vpop.f32.mrb[22].mxu0 }
 0x735   : > { %v5834_v40 = vadd.f32 %v5833_v35, %v5602_v49  ;;  %v5835_v46 = vpop.f32.mrb[23].mxu0  ;;  %v5914_v55 = vadd.f32 %v5831_v37, %v14242_v36 }
 0x737   : > { %v5915_v39 = vadd.f32 %v5834_v40, %v14243_v6 }
 0x739   : > { %v6843_v8 = vpack.c.bf16 %v5915_v39, %v5914_v55 }
 0x73b   : > { %6906 = vst [vmem:[%s12846_s25 + $0x98] sm:$0xff] %v6843_v8  }
 0x762   : > { %v5606_v0 = vpop.f32.mrb[24].mxu1 }
 0x763   : > { %v5608_v61 = vpop.f32.mrb[25].mxu1  ;;  %v5607_v1 = vadd.f32 %v12776_v58, %v5606_v0 }
 0x764   : > { %v5609_v57 = vpop.f32.mrb[26].mxu1 }
 0x765   : > { %v5611_v43 = vpop.f32.mrb[27].mxu1  ;;  %v5610_v29 = vadd.f32 %v12776_v58, %v5609_v57 }
 0x766   : > { %v14250_v43 = vld [vmem:[#allocation80_spill] sm:$0xff] }
 0x768   : > { %v5838_v41 = vpop.f32.mrb[24].mxu0 }
 0x769   : > { %v5839_v17 = vadd.f32 %v5838_v41, %v5607_v1  ;;  %v5840_v25 = vpop.f32.mrb[25].mxu0  ;;  %v14251_v41 = vld [vmem:[#allocation81_spill] sm:$0xff] }
 0x76a   : > { %v5841_v38 = vpop.f32.mrb[26].mxu0 }
 0x76b   : > { %v5842_v19 = vadd.f32 %v5841_v38, %v5610_v29  ;;  %v5843_v16 = vpop.f32.mrb[27].mxu0  ;;  %v5916_v52 = vadd.f32 %v5839_v17, %v14244_v13 }
 0x76c   : > { %v5614_v60 = vpop.f32.mrb[28].mxu1 }
 0x76d   : > { %v5917_v10 = vadd.f32 %v5842_v19, %v14245_v53  ;;  %v5615_v5 = vadd.f32 %v12776_v58, %v5614_v60  ;;  %v5616_v63 = vpop.f32.mrb[29].mxu1 }
 0x76e   : > { %v5617_v34 = vpop.f32.mrb[30].mxu1 }
 0x76f   : > { %v6848_v15 = vpack.c.bf16 %v5917_v10, %v5916_v52  ;;  %v5618_v27 = vadd.f32 %v12776_v58, %v5617_v34  ;;  %v5619_v9 = vpop.f32.mrb[31].mxu1  ;;  %v14252_v52 = vld [vmem:[#allocation82_spill] sm:$0xff] }
 0x770   : > { %v5846_v18 = vpop.f32.mrb[28].mxu0 }
 0x771   : > { %6907 = vst [vmem:[%s12846_s25 + $0xa0] sm:$0xff] %v6848_v15   ;;  %v5847_v21 = vadd.f32 %v5846_v18, %v5615_v5  ;;  %v5848_v48 = vpop.f32.mrb[29].mxu0 }
 0x772   : > { %v5849_v12 = vpop.f32.mrb[30].mxu0 }
 0x773   : > { %v5850_v30 = vadd.f32 %v5849_v12, %v5618_v27  ;;  %v5851_v51 = vpop.f32.mrb[31].mxu0  ;;  %v5918_v3 = vadd.f32 %v5847_v21, %v14246_v56 }
 0x774   : > { %v5622_v28 = vpop.f32.mrb[32].mxu1 }
 0x775   : > { %v5919_v7 = vadd.f32 %v5850_v30, %v14247_v24  ;;  %v5623_v50 = vadd.f32 %v12776_v58, %v5622_v28  ;;  %v5624_v2 = vpop.f32.mrb[33].mxu1 }
 0x776   : > { %v5625_v23 = vpop.f32.mrb[34].mxu1 }
 0x777   : > { %v6853_v20 = vpack.c.bf16 %v5919_v7, %v5918_v3  ;;  %v5626_v44 = vadd.f32 %v12776_v58, %v5625_v23  ;;  %v5627_v54 = vpop.f32.mrb[35].mxu1 }
 0x778   : > { %v5854_v11 = vpop.f32.mrb[32].mxu0 }
 0x779   : > { %6908 = vst [vmem:[%s12846_s25 + $0xa8] sm:$0xff] %v6853_v20   ;;  %v5855_v32 = vadd.f32 %v5854_v11, %v5623_v50  ;;  %v5856_v62 = vpop.f32.mrb[33].mxu0 }
 0x77a   : > { %v5857_v42 = vpop.f32.mrb[34].mxu0 }
 0x77b   : > { %v5858_v31 = vadd.f32 %v5857_v42, %v5626_v44  ;;  %v5859_v22 = vpop.f32.mrb[35].mxu0  ;;  %v5920_v4 = vadd.f32 %v5855_v32, %v14248_v14 }
 0x77c   : > { %v5630_v26 = vpop.f32.mrb[36].mxu1 }
 0x77d   : > { %v5921_v59 = vadd.f32 %v5858_v31, %v14249_v33  ;;  %v5632_v37 = vpop.f32.mrb[37].mxu1  ;;  %v5631_v55 = vadd.f32 %v12776_v58, %v5630_v26 }
 0x77e   : > { %v5633_v45 = vpop.f32.mrb[38].mxu1 }
 0x77f   : > { %v6858_v49 = vpack.c.bf16 %v5921_v59, %v5920_v4  ;;  %v5635_v47 = vpop.f32.mrb[39].mxu1  ;;  %v5634_v39 = vadd.f32 %v12776_v58, %v5633_v45 }
 0x781   : > { %6909 = vst [vmem:[%s12846_s25 + $0xb0] sm:$0xff] %v6858_v49  }
 0x784   : > { %v5638_v35 = vpop.f32.mrb[40].mxu1 }
 0x785   : > { %v5640_v40 = vpop.f32.mrb[41].mxu1  ;;  %v5639_v25 = vadd.f32 %v12776_v58, %v5638_v35 }
 0x786   : > { %v5641_v46 = vpop.f32.mrb[42].mxu1 }
 0x787   : > { %v5642_v36 = vpop.f32.mrb[43].mxu1 }
 0x78c   : > { %v5862_v6 = vpop.f32.mrb[44].mxu1 }
 0x78d   : > { %v5863_v8 = vadd.f32 %v5862_v6, %v5631_v55  ;;  %v5864_v0 = vpop.f32.mrb[45].mxu1 }
 0x78e   : > { %v5865_v61 = vpop.f32.mrb[46].mxu1 }
 0x78f   : > { %v5866_v1 = vadd.f32 %v5865_v61, %v5634_v39  ;;  %v5867_v57 = vpop.f32.mrb[47].mxu1  ;;  %v5922_v29 = vadd.f32 %v5863_v8, %v14250_v43 }
 0x791   : > { %v5923_v17 = vadd.f32 %v5866_v1, %v14251_v41 }
 0x793   : > { %v6863_v38 = vpack.c.bf16 %v5923_v17, %v5922_v29 }
 0x794   : > { %v5870_v19 = vpop.f32.mrb[48].mxu1 }
 0x795   : > { %6910 = vst [vmem:[%s12846_s25 + $0xb8] sm:$0xff] %v6863_v38   ;;  %v5871_v16 = vadd.f32 %v5870_v19, %v5639_v25  ;;  %v5872_v60 = vpop.f32.mrb[49].mxu1 }
 0x796   : > { %v5873_v13 = vpop.f32.mrb[50].mxu1 }
 0x797   : > { %v5924_v53 = vadd.f32 %v5871_v16, %v14252_v52  ;;  %v5874_v10 = vpop.f32.mrb[51].mxu1 }
 0x799   : > { %v6647_v5 = vpack.c.bf16 %v5924_v53, %v5924_v53 }
 0x79b   : > { %6170 = vst [vmem:[%s12846_s25 + $0xc0] sm:$0xf] %v6647_v5 }
 0x79c   : > { %8252 = shalt.err (!%p8249_p13)
}
 0x79d   : > { %s8253_s26 = scalar_lea.hbm %s13040_s29, 3136  ;;  %s8257_s10 = scalar_lea.hbm %s14253_s20, 6272 }
 0x79e   : > { %p8254_p2 = scmp.ne.s32.totalorder %s13040_s29, %s8253_s26  ;;  %p8258_p3 = scmp.lt.u32.totalorder %s13040_s29, %s14253_s20 }
 0x79f   : > { %p8259_p6 = scmp.lt.u32.totalorder %s8257_s10, %s8253_s26  ;;  %p8261_p5 = scmp.lt.u32.totalorder %s8253_s26, %s13040_s29 }
 0x7a0   : > { %p8255_p1 = pnand %p8254_p2, %p14254_p9 }
 0x7a1   : > { %p8260_p10 = por %p8259_p6, %p8258_p3 }
 0x7a2   : > { %p8256_p7 = pneg %p8255_p1 }
 0x7a3   : > { %p8262_p4 = por %p8261_p5, %p8260_p10 }
 0x7a5   : > { %p8263_p8 = pnand %p8262_p4, %p8256_p7 }
 0x7a7   : > { %8266 = shalt.err (!%p8263_p8)
}
 0x7a8   : > { %s8351_s25 = smov 64   ;;  %s8352_s22 = smov 4  }
 0x7a9   : > { %7133 = dma.vmem_to_hbm [thread:$0]  (%p14254_p9), %s13042_s2, 3136, %s13040_s29, %s6172_s19, %s8351_s25, %s8351_s25, %s8352_s22  }
 0x7aa PF: > { %s6200_s3 = sand.u32 1, %s8317_s13   ;;  %p14255_p11 = scmp.ne.s32.totalorder %s13353_s18, 0 }
 0x7ab   : > { %p14256_p0 = scmp.ge.s32.totalorder %s8329_s16, 2  ;;  %s6201_s4 = scalar_lea.sflag [#allocation4], %s6200_s3 }
 0x7ad   : > { %p7168_p12 = pnand %p14256_p0, %p14255_p11 }
 0x7af   : > { %8312 = dma.done.wait (!%p7168_p12), %s6201_s4, 3136  }
 0x7b0   : > { %8314 = vsyncadd (!%p7168_p12), %s6201_s4, 4294964160  ;;  %p30_p13 = scmp.ge.s32.totalorder %s8636_s21, 4   ;;  %s14257_s13 = smov %s8321_s14 }
 0x7b1   : > { %s14258_s14 = smov %s8325_s15  ;;  %s14259_s15 = smov %s8648_s28 }
 0x7b2   : > { %s14260_s16 = smov %s8636_s21  ;;  %32 = sbr.rel (!%p30_p13) target bundleno = 19 (0x13), region = 150 }
 0x7b9   :  { %6206 = vsyncpa [#allocation3], 1 }
 0x7ba   :  { %6208 = vsyncpa [#allocation3 + $0x1], 1 }
 0x7bb   :  { %6209 = vsyncpa [#allocation6], 1 }
 0x7bc   :  { %6211 = vsyncpa [#allocation6 + $0x1], 1 }
 0x7bd   :  { %6212 = vsyncpa [#allocation9], 1 }
 0x7be   :  { %6213 = vsyncpa [#allocation12], 1 }
 0x7bf   :  { %6214 = vsyncpa [#allocation15], 1 }
 0x7c0   :  { %6215 = vsyncpa [#allocation18], 1 }
 0x7c1   :  { %6216 = vsyncpa [#allocation4], 1 }
 0x7c2   :  { %6218 = vsyncpa [#allocation4 + $0x1], 1 }

</bundles_post_ra>
